<compile_context>
chip_gen: v6e
topology: v6e:2x2x1
jax: 0.10.0
libtpu: 0.0.40
codegen_flags: <defaults>
</compile_context>

<pallas_src>
import functools  # noqa: F401  (kept for parity with typical kernel scaffolding)

import jax
import jax.numpy as jnp
from jax.experimental import pallas as pl
from jax.experimental.pallas import tpu as pltpu

_BN_EPS = 1e-5


# ------------------------------ fused Pallas kernel -------------------------------

def _ib_stage(v, w1_ref, dw_ref, w2_ref, b1_ref, b2_ref, b3_ref, hp_ref, residual):
    """One inverted-bottleneck stage on an in-register activation v of shape (1,H,W,cin)."""
    _, H, W, cin = v.shape
    cmid = w1_ref.shape[1]
    cout = w2_ref.shape[1]

    # ---- 1x1 expand: matmul over channels (MXU, bf16 inputs, f32 accumulate) ----
    h = jnp.dot(v.reshape(H * W, cin).astype(jnp.bfloat16), w1_ref[...],
                preferred_element_type=jnp.float32)
    h = jnp.clip(h + b1_ref[0, :], 0.0, 6.0)                      # folded BN + ReLU6

    # ---- 3x3 depthwise, stride 1, pad 1 ----
    # Interior of the pre-zeroed halo buffer is overwritten, then 9 taps accumulated.
    hp_ref[:, 1:H + 1, 1:W + 1, :cmid] = h.reshape(1, H, W, cmid)
    dw = dw_ref[...]                                              # (9, cmid), loaded once
    acc = dw[0] * hp_ref[:, 0:H, 0:W, :cmid]
    for k in range(1, 9):
        dy, dx = k // 3, k % 3
        acc = acc + dw[k] * hp_ref[:, dy:dy + H, dx:dx + W, :cmid]
    acc = jnp.clip(acc + b2_ref[0, :], 0.0, 6.0)                  # folded BN + ReLU6

    # ---- 1x1 project (MXU) + folded BN bias ----
    out = jnp.dot(acc.reshape(H * W, cmid).astype(jnp.bfloat16), w2_ref[...],
                  preferred_element_type=jnp.float32)
    out = (out + b3_ref[0, :]).reshape(1, H, W, cout)
    if residual:
        out = out + v
    return out


def _feblock_kernel(*args):
    x_ref = args[0]
    wrefs = args[1:25]                       # 4 stages x (w1, dw, w2, b1, b2, b3)
    o_ref, stage_ref, hp_ref = args[25:28]

    _, H, W, in_planes = stage_ref.shape
    G = in_planes // 8
    cm = hp_ref.shape[3]

    # Zero only the 1-element halo of the depthwise pad buffer.  Every stage rewrites
    # the interior before reading it, and the halo is never written, so this is the
    # only zero-fill needed per grid step (safe under parallel/megacore execution).
    hp_ref[:, 0:1, :, :] = jnp.zeros((1, 1, W + 2, cm), jnp.float32)
    hp_ref[:, H + 1:H + 2, :, :] = jnp.zeros((1, 1, W + 2, cm), jnp.float32)
    hp_ref[:, :, 0:1, :] = jnp.zeros((1, H + 2, 1, cm), jnp.float32)
    hp_ref[:, :, W + 1:W + 2, :] = jnp.zeros((1, H + 2, 1, cm), jnp.float32)

    # Staging buffer = current activation state over the original in_planes channels.
    stage_ref[...] = x_ref[...]

    # Stage k reads the channel tail [c0:in_planes] (= cat of the untouched group G_k
    # and the previous stage's output) and writes its result back over that tail.
    offsets = (7 * G, 6 * G, 4 * G)
    for s in range(3):
        w1, dw, w2, b1, b2, b3 = wrefs[6 * s:6 * s + 6]
        c0 = offsets[s]
        v = stage_ref[:, :, :, c0:in_planes]
        y = _ib_stage(v, w1, dw, w2, b1, b2, b3, hp_ref, residual=True)
        stage_ref[:, :, :, c0:in_planes] = y

    # Final IBPool stage over all in_planes channels, no residual.
    w1, dw, w2, b1, b2, b3 = wrefs[18:24]
    y = _ib_stage(stage_ref[...], w1, dw, w2, b1, b2, b3, hp_ref, residual=False)
    o_ref[...] = y.astype(o_ref.dtype)


# ----------------------------------- wrapper ---------------------------------------

def feblock4n2s_forward(x_nchw, params):
    x = jnp.transpose(x_nchw, (0, 2, 3, 1))            # NCHW -> NHWC
    B, H, W, C = x.shape
    stages = (params["resibssl_1"], params["resibssl_2"],
              params["resibssl_3"], params["ibpool"])
    flat = []
    for p in stages:
        flat += [p["w1"], p["dw"], p["w2"], p["b1"], p["b2"], p["b3"]]
    cmid_max = max(p["dw"].shape[1] for p in stages)
    out_c = stages[-1]["w2"].shape[1]

    def whole(shape):
        n = len(shape)
        return pl.BlockSpec(shape, lambda b, n=n: (0,) * n)   # constant index -> no re-DMA

    grid_spec = pltpu.PrefetchScalarGridSpec(
        num_scalar_prefetch=0,
        grid=(B,),
        in_specs=[pl.BlockSpec((1, H, W, C), lambda b: (b, 0, 0, 0))]
                 + [whole(a.shape) for a in flat],
        out_specs=pl.BlockSpec((1, H, W, out_c), lambda b: (b, 0, 0, 0)),
        scratch_shapes=[pltpu.VMEM((1, H, W, C), jnp.float32),               # staging
                        pltpu.VMEM((1, H + 2, W + 2, cmid_max), jnp.float32)],  # dw pad
    )
    y = pl.pallas_call(
        _feblock_kernel,
        out_shape=jax.ShapeDtypeStruct((B, H, W, out_c), jnp.float32),
        grid_spec=grid_spec,
        compiler_params=pltpu.CompilerParams(dimension_semantics=("parallel",)),
    )(x, *flat)
    return jnp.transpose(y, (0, 3, 1, 2))               # NHWC -> NCHW


# --------------------------------- parameters ---------------------------------------

def make_ib_params(key, in_c, out_c, expansion):
    mid = in_c * expansion
    k1, k2, k3 = jax.random.split(key, 3)
    w1 = jax.random.normal(k1, (in_c, mid), jnp.float32) * (2.0 / in_c) ** 0.5
    dw = jax.random.normal(k2, (9, mid), jnp.float32) * (2.0 / 9.0) ** 0.5
    w2 = jax.random.normal(k3, (mid, out_c), jnp.float32) * (2.0 / mid) ** 0.5
    # BatchNorm (eval mode, default init: gamma=1, beta=0, mean=0, var=1) folds to a
    # per-channel scale s and bias 0; the scale is folded into the conv weights here.
    s = jnp.float32(1.0) / jnp.sqrt(jnp.float32(1.0 + _BN_EPS))
    return dict(
        w1=(w1 * s).astype(jnp.bfloat16),               # MXU-ready bf16
        dw=(dw * s).astype(jnp.float32),                # VPU f32 (v5e has no bf16 VPU)
        w2=(w2 * s).astype(jnp.bfloat16),
        b1=jnp.zeros((1, mid), jnp.float32),
        b2=jnp.zeros((1, mid), jnp.float32),
        b3=jnp.zeros((1, out_c), jnp.float32),
    )


def make_feblock_params(key, in_planes, out_planes, expansion):
    G = in_planes // 8
    k1, k2, k3, k4 = jax.random.split(key, 4)
    return dict(
        G=G,
        resibssl_1=make_ib_params(k1, G, G, expansion),
        resibssl_2=make_ib_params(k2, 2 * G, 2 * G, expansion),
        resibssl_3=make_ib_params(k3, 4 * G, 4 * G, expansion),
        ibpool=make_ib_params(k4, in_planes, out_planes, expansion),
    )


# ------------------------------ pure-JAX reference ----------------------------------

def _ib_ref(x, p, residual):
    B, H, W, cin = x.shape
    cmid = p["dw"].shape[1]
    h = jnp.dot(x.reshape(-1, cin).astype(jnp.bfloat16), p["w1"],
                preferred_element_type=jnp.float32)
    h = jnp.clip(h + p["b1"][0], 0.0, 6.0).reshape(B, H, W, cmid)
    hp = jnp.pad(h, ((0, 0), (1, 1), (1, 1), (0, 0)))
    acc = jnp.zeros_like(h)
    for k in range(9):
        dy, dx = k // 3, k % 3
        acc = acc + p["dw"][k] * hp[:, dy:dy + H, dx:dx + W, :]
    a = jnp.clip(acc + p["b2"][0], 0.0, 6.0)
    out = jnp.dot(a.reshape(B * H * W, cmid).astype(jnp.bfloat16), p["w2"],
                  preferred_element_type=jnp.float32)
    out = (out + p["b3"][0]).reshape(B, H, W, -1)
    return out + x if residual else out


def feblock4n2s_ref(x_nchw, params):
    x = jnp.transpose(x_nchw, (0, 2, 3, 1))
    G = params["G"]
    G1, G2 = x[..., :4 * G], x[..., 4 * G:6 * G]
    G3, G4 = x[..., 6 * G:7 * G], x[..., 7 * G:]
    y = _ib_ref(G4, params["resibssl_1"], True)
    y = jnp.concatenate([G3, y], axis=-1)
    y = _ib_ref(y, params["resibssl_2"], True)
    y = jnp.concatenate([G2, y], axis=-1)
    y = _ib_ref(y, params["resibssl_3"], True)
    y = jnp.concatenate([G1, y], axis=-1)
    y = _ib_ref(y, params["ibpool"], False)
    return jnp.transpose(y, (0, 3, 1, 2))


# ------------------------------------- main ------------------------------------------

if __name__ == "__main__":
    in_planes, out_planes, expansion = 16, 32, 6
    B, H, W = 2, 16, 16

    key = jax.random.PRNGKey(0)
    kx, kp = jax.random.split(key)
    x = jax.random.normal(kx, (B, in_planes, H, W), jnp.float32)   # NCHW like PyTorch
    params = make_feblock_params(kp, in_planes, out_planes, expansion)

    y = jax.block_until_ready(feblock4n2s_forward(x, params))
    assert y.shape == (B, out_planes, H, W), y.shape

    y_ref = feblock4n2s_ref(x, params)
    max_err = float(jnp.max(jnp.abs(y - y_ref)))
    assert jnp.allclose(y, y_ref, rtol=2e-3, atol=2e-3), max_err

    print("KERNEL_OK")
</pallas_src>

<mosaic_0001>
module attributes {stable_mosaic.version = 11 : i64} {
  func.func @_feblock_kernel(%arg0: i32, %arg1: memref<1x16x16x16xf32, #tpu.memory_space<vmem>>, %arg2: memref<2x12xbf16, #tpu.memory_space<vmem>>, %arg3: memref<9x12xf32, #tpu.memory_space<vmem>>, %arg4: memref<12x2xbf16, #tpu.memory_space<vmem>>, %arg5: memref<1x12xf32, #tpu.memory_space<vmem>>, %arg6: memref<1x12xf32, #tpu.memory_space<vmem>>, %arg7: memref<1x2xf32, #tpu.memory_space<vmem>>, %arg8: memref<4x24xbf16, #tpu.memory_space<vmem>>, %arg9: memref<9x24xf32, #tpu.memory_space<vmem>>, %arg10: memref<24x4xbf16, #tpu.memory_space<vmem>>, %arg11: memref<1x24xf32, #tpu.memory_space<vmem>>, %arg12: memref<1x24xf32, #tpu.memory_space<vmem>>, %arg13: memref<1x4xf32, #tpu.memory_space<vmem>>, %arg14: memref<8x48xbf16, #tpu.memory_space<vmem>>, %arg15: memref<9x48xf32, #tpu.memory_space<vmem>>, %arg16: memref<48x8xbf16, #tpu.memory_space<vmem>>, %arg17: memref<1x48xf32, #tpu.memory_space<vmem>>, %arg18: memref<1x48xf32, #tpu.memory_space<vmem>>, %arg19: memref<1x8xf32, #tpu.memory_space<vmem>>, %arg20: memref<16x96xbf16, #tpu.memory_space<vmem>>, %arg21: memref<9x96xf32, #tpu.memory_space<vmem>>, %arg22: memref<96x32xbf16, #tpu.memory_space<vmem>>, %arg23: memref<1x96xf32, #tpu.memory_space<vmem>>, %arg24: memref<1x96xf32, #tpu.memory_space<vmem>>, %arg25: memref<1x32xf32, #tpu.memory_space<vmem>>, %arg26: memref<1x16x16x32xf32, #tpu.memory_space<vmem>>, %arg27: memref<1x16x16x16xf32, #tpu.memory_space<vmem>>, %arg28: memref<1x18x18x96xf32, #tpu.memory_space<vmem>>) attributes {dimension_semantics = [#tpu.dimension_semantics<parallel>], iteration_bounds = array<i64: 2>, scalar_prefetch = 0 : i64, scratch_operands = 2 : i64, tpu.core_type = #tpu.core_type<tc>, window_params = [{transform_indices = @transform_0, window_bounds = array<i64: 1, 16, 16, 16>}, {pipeline_mode = #tpu.pipeline_mode<synchronous>, transform_indices = @transform_1, window_bounds = array<i64: 2, 12>}, {pipeline_mode = #tpu.pipeline_mode<synchronous>, transform_indices = @transform_2, window_bounds = array<i64: 9, 12>}, {pipeline_mode = #tpu.pipeline_mode<synchronous>, transform_indices = @transform_3, window_bounds = array<i64: 12, 2>}, {pipeline_mode = #tpu.pipeline_mode<synchronous>, transform_indices = @transform_4, window_bounds = array<i64: 1, 12>}, {pipeline_mode = #tpu.pipeline_mode<synchronous>, transform_indices = @transform_5, window_bounds = array<i64: 1, 12>}, {pipeline_mode = #tpu.pipeline_mode<synchronous>, transform_indices = @transform_6, window_bounds = array<i64: 1, 2>}, {pipeline_mode = #tpu.pipeline_mode<synchronous>, transform_indices = @transform_7, window_bounds = array<i64: 4, 24>}, {pipeline_mode = #tpu.pipeline_mode<synchronous>, transform_indices = @transform_8, window_bounds = array<i64: 9, 24>}, {pipeline_mode = #tpu.pipeline_mode<synchronous>, transform_indices = @transform_9, window_bounds = array<i64: 24, 4>}, {pipeline_mode = #tpu.pipeline_mode<synchronous>, transform_indices = @transform_10, window_bounds = array<i64: 1, 24>}, {pipeline_mode = #tpu.pipeline_mode<synchronous>, transform_indices = @transform_11, window_bounds = array<i64: 1, 24>}, {pipeline_mode = #tpu.pipeline_mode<synchronous>, transform_indices = @transform_12, window_bounds = array<i64: 1, 4>}, {pipeline_mode = #tpu.pipeline_mode<synchronous>, transform_indices = @transform_13, window_bounds = array<i64: 8, 48>}, {pipeline_mode = #tpu.pipeline_mode<synchronous>, transform_indices = @transform_14, window_bounds = array<i64: 9, 48>}, {pipeline_mode = #tpu.pipeline_mode<synchronous>, transform_indices = @transform_15, window_bounds = array<i64: 48, 8>}, {pipeline_mode = #tpu.pipeline_mode<synchronous>, transform_indices = @transform_16, window_bounds = array<i64: 1, 48>}, {pipeline_mode = #tpu.pipeline_mode<synchronous>, transform_indices = @transform_17, window_bounds = array<i64: 1, 48>}, {pipeline_mode = #tpu.pipeline_mode<synchronous>, transform_indices = @transform_18, window_bounds = array<i64: 1, 8>}, {pipeline_mode = #tpu.pipeline_mode<synchronous>, transform_indices = @transform_19, window_bounds = array<i64: 16, 96>}, {pipeline_mode = #tpu.pipeline_mode<synchronous>, transform_indices = @transform_20, window_bounds = array<i64: 9, 96>}, {pipeline_mode = #tpu.pipeline_mode<synchronous>, transform_indices = @transform_21, window_bounds = array<i64: 96, 32>}, {pipeline_mode = #tpu.pipeline_mode<synchronous>, transform_indices = @transform_22, window_bounds = array<i64: 1, 96>}, {pipeline_mode = #tpu.pipeline_mode<synchronous>, transform_indices = @transform_23, window_bounds = array<i64: 1, 96>}, {pipeline_mode = #tpu.pipeline_mode<synchronous>, transform_indices = @transform_24, window_bounds = array<i64: 1, 32>}, {transform_indices = @transform_25, window_bounds = array<i64: 1, 16, 16, 32>}]} {
    %cst = arith.constant 0.000000e+00 : f32
    %0 = vector.broadcast %cst : f32 to vector<1x1x18x96xf32>
    %c0 = arith.constant 0 : index
    %c0_0 = arith.constant 0 : index
    %c0_1 = arith.constant 0 : index
    %c0_2 = arith.constant 0 : index
    %1 = vector.load %arg28[%c0, %c0_0, %c0_1, %c0_2] : memref<1x18x18x96xf32, #tpu.memory_space<vmem>>, vector<1x1x18x96xf32>
    tpu.vector_store %arg28[%c0, %c0_0, %c0_1, %c0_2], %0 {strides = array<i32>} : memref<1x18x18x96xf32, #tpu.memory_space<vmem>>, vector<1x1x18x96xf32>,
    %cst_3 = arith.constant 0.000000e+00 : f32
    %2 = vector.broadcast %cst_3 : f32 to vector<1x1x18x96xf32>
    %c0_4 = arith.constant 0 : index
    %c17 = arith.constant 17 : index
    %c0_5 = arith.constant 0 : index
    %c0_6 = arith.constant 0 : index
    %3 = vector.load %arg28[%c0_4, %c17, %c0_5, %c0_6] : memref<1x18x18x96xf32, #tpu.memory_space<vmem>>, vector<1x1x18x96xf32>
    tpu.vector_store %arg28[%c0_4, %c17, %c0_5, %c0_6], %2 {strides = array<i32>} : memref<1x18x18x96xf32, #tpu.memory_space<vmem>>, vector<1x1x18x96xf32>,
    %cst_7 = arith.constant 0.000000e+00 : f32
    %4 = vector.broadcast %cst_7 : f32 to vector<1x18x1x96xf32>
    %c0_8 = arith.constant 0 : index
    %c0_9 = arith.constant 0 : index
    %c0_10 = arith.constant 0 : index
    %c0_11 = arith.constant 0 : index
    %5 = vector.load %arg28[%c0_8, %c0_9, %c0_10, %c0_11] : memref<1x18x18x96xf32, #tpu.memory_space<vmem>>, vector<1x18x1x96xf32>
    tpu.vector_store %arg28[%c0_8, %c0_9, %c0_10, %c0_11], %4 {strides = array<i32>} : memref<1x18x18x96xf32, #tpu.memory_space<vmem>>, vector<1x18x1x96xf32>,
    %cst_12 = arith.constant 0.000000e+00 : f32
    %6 = vector.broadcast %cst_12 : f32 to vector<1x18x1x96xf32>
    %c0_13 = arith.constant 0 : index
    %c0_14 = arith.constant 0 : index
    %c17_15 = arith.constant 17 : index
    %c0_16 = arith.constant 0 : index
    %7 = vector.load %arg28[%c0_13, %c0_14, %c17_15, %c0_16] : memref<1x18x18x96xf32, #tpu.memory_space<vmem>>, vector<1x18x1x96xf32>
    tpu.vector_store %arg28[%c0_13, %c0_14, %c17_15, %c0_16], %6 {strides = array<i32>} : memref<1x18x18x96xf32, #tpu.memory_space<vmem>>, vector<1x18x1x96xf32>,
    %c0_17 = arith.constant 0 : index
    %c0_18 = arith.constant 0 : index
    %c0_19 = arith.constant 0 : index
    %c0_20 = arith.constant 0 : index
    %8 = vector.load %arg1[%c0_17, %c0_18, %c0_19, %c0_20] : memref<1x16x16x16xf32, #tpu.memory_space<vmem>>, vector<1x16x16x16xf32>
    %c0_21 = arith.constant 0 : index
    %c0_22 = arith.constant 0 : index
    %c0_23 = arith.constant 0 : index
    %c0_24 = arith.constant 0 : index
    %9 = vector.load %arg27[%c0_21, %c0_22, %c0_23, %c0_24] : memref<1x16x16x16xf32, #tpu.memory_space<vmem>>, vector<1x16x16x16xf32>
    tpu.vector_store %arg27[%c0_21, %c0_22, %c0_23, %c0_24], %8 {strides = array<i32>} : memref<1x16x16x16xf32, #tpu.memory_space<vmem>>, vector<1x16x16x16xf32>,
    %c0_25 = arith.constant 0 : index
    %c0_26 = arith.constant 0 : index
    %c0_27 = arith.constant 0 : index
    %c14 = arith.constant 14 : index
    %10 = vector.load %arg27[%c0_25, %c0_26, %c0_27, %c14] : memref<1x16x16x16xf32, #tpu.memory_space<vmem>>, vector<1x16x16x2xf32>
    %11 = vector.shape_cast %10 : vector<1x16x16x2xf32> to vector<256x2xf32>
    %12 = arith.truncf %11 : vector<256x2xf32> to vector<256x2xbf16>
    %c0_28 = arith.constant 0 : index
    %c0_29 = arith.constant 0 : index
    %13 = vector.load %arg2[%c0_28, %c0_29] : memref<2x12xbf16, #tpu.memory_space<vmem>>, vector<2x12xbf16>
    %cst_30 = arith.constant dense<0.000000e+00> : vector<256x12xf32>
    %14 = tpu.matmul %12, %13, %cst_30 {dimension_numbers = #tpu.dot_dimension_numbers<[1], [0], [0], [1], [0, 0, 1, 1], [], []>} : vector<256x2xbf16>, vector<2x12xbf16>, vector<256x12xf32> -> vector<256x12xf32>
    %c0_31 = arith.constant 0 : index
    %c0_32 = arith.constant 0 : index
    %15 = vector.load %arg5[%c0_31, %c0_32] : memref<1x12xf32, #tpu.memory_space<vmem>>, vector<1x12xf32>
    %16 = vector.shape_cast %15 : vector<1x12xf32> to vector<12xf32>
    %17 = vector.shape_cast %16 : vector<12xf32> to vector<1x12xf32>
    %18 = vector.broadcast %17 : vector<1x12xf32> to vector<256x12xf32>
    %19 = arith.addf %14, %18 : vector<256x12xf32>
    %cst_33 = arith.constant 0.000000e+00 : f32
    %cst_34 = arith.constant 6.000000e+00 : f32
    %20 = vector.broadcast %cst_33 : f32 to vector<256x12xf32>
    %21 = arith.maximumf %20, %19 : vector<256x12xf32>
    %22 = vector.broadcast %cst_34 : f32 to vector<256x12xf32>
    %23 = arith.minimumf %22, %21 : vector<256x12xf32>
    %24 = vector.shape_cast %23 : vector<256x12xf32> to vector<1x16x16x12xf32>
    %c0_35 = arith.constant 0 : index
    %c1 = arith.constant 1 : index
    %c1_36 = arith.constant 1 : index
    %c0_37 = arith.constant 0 : index
    %25 = vector.load %arg28[%c0_35, %c1, %c1_36, %c0_37] : memref<1x18x18x96xf32, #tpu.memory_space<vmem>>, vector<1x16x16x12xf32>
    tpu.vector_store %arg28[%c0_35, %c1, %c1_36, %c0_37], %24 {strides = array<i32>} : memref<1x18x18x96xf32, #tpu.memory_space<vmem>>, vector<1x16x16x12xf32>,
    %c0_38 = arith.constant 0 : index
    %c0_39 = arith.constant 0 : index
    %26 = vector.load %arg3[%c0_38, %c0_39] : memref<9x12xf32, #tpu.memory_space<vmem>>, vector<9x12xf32>
    %27 = vector.extract_strided_slice %26 {offsets = [0, 0], sizes = [1, 12], strides = [1, 1]} : vector<9x12xf32> to vector<1x12xf32>
    %28 = vector.shape_cast %27 : vector<1x12xf32> to vector<12xf32>
    %c0_40 = arith.constant 0 : index
    %c0_41 = arith.constant 0 : index
    %c0_42 = arith.constant 0 : index
    %c0_43 = arith.constant 0 : index
    %29 = vector.load %arg28[%c0_40, %c0_41, %c0_42, %c0_43] : memref<1x18x18x96xf32, #tpu.memory_space<vmem>>, vector<1x16x16x12xf32>
    %30 = vector.shape_cast %28 : vector<12xf32> to vector<1x1x1x12xf32>
    %31 = vector.broadcast %30 : vector<1x1x1x12xf32> to vector<1x16x16x12xf32>
    %32 = arith.mulf %31, %29 : vector<1x16x16x12xf32>
    %33 = vector.extract_strided_slice %26 {offsets = [1, 0], sizes = [1, 12], strides = [1, 1]} : vector<9x12xf32> to vector<1x12xf32>
    %34 = vector.shape_cast %33 : vector<1x12xf32> to vector<12xf32>
    %c0_44 = arith.constant 0 : index
    %c0_45 = arith.constant 0 : index
    %c1_46 = arith.constant 1 : index
    %c0_47 = arith.constant 0 : index
    %35 = vector.load %arg28[%c0_44, %c0_45, %c1_46, %c0_47] : memref<1x18x18x96xf32, #tpu.memory_space<vmem>>, vector<1x16x16x12xf32>
    %36 = vector.shape_cast %34 : vector<12xf32> to vector<1x1x1x12xf32>
    %37 = vector.broadcast %36 : vector<1x1x1x12xf32> to vector<1x16x16x12xf32>
    %38 = arith.mulf %37, %35 : vector<1x16x16x12xf32>
    %39 = arith.addf %32, %38 : vector<1x16x16x12xf32>
    %40 = vector.extract_strided_slice %26 {offsets = [2, 0], sizes = [1, 12], strides = [1, 1]} : vector<9x12xf32> to vector<1x12xf32>
    %41 = vector.shape_cast %40 : vector<1x12xf32> to vector<12xf32>
    %c0_48 = arith.constant 0 : index
    %c0_49 = arith.constant 0 : index
    %c2 = arith.constant 2 : index
    %c0_50 = arith.constant 0 : index
    %42 = vector.load %arg28[%c0_48, %c0_49, %c2, %c0_50] : memref<1x18x18x96xf32, #tpu.memory_space<vmem>>, vector<1x16x16x12xf32>
    %43 = vector.shape_cast %41 : vector<12xf32> to vector<1x1x1x12xf32>
    %44 = vector.broadcast %43 : vector<1x1x1x12xf32> to vector<1x16x16x12xf32>
    %45 = arith.mulf %44, %42 : vector<1x16x16x12xf32>
    %46 = arith.addf %39, %45 : vector<1x16x16x12xf32>
    %47 = vector.extract_strided_slice %26 {offsets = [3, 0], sizes = [1, 12], strides = [1, 1]} : vector<9x12xf32> to vector<1x12xf32>
    %48 = vector.shape_cast %47 : vector<1x12xf32> to vector<12xf32>
    %c0_51 = arith.constant 0 : index
    %c1_52 = arith.constant 1 : index
    %c0_53 = arith.constant 0 : index
    %c0_54 = arith.constant 0 : index
    %49 = vector.load %arg28[%c0_51, %c1_52, %c0_53, %c0_54] : memref<1x18x18x96xf32, #tpu.memory_space<vmem>>, vector<1x16x16x12xf32>
    %50 = vector.shape_cast %48 : vector<12xf32> to vector<1x1x1x12xf32>
    %51 = vector.broadcast %50 : vector<1x1x1x12xf32> to vector<1x16x16x12xf32>
    %52 = arith.mulf %51, %49 : vector<1x16x16x12xf32>
    %53 = arith.addf %46, %52 : vector<1x16x16x12xf32>
    %54 = vector.extract_strided_slice %26 {offsets = [4, 0], sizes = [1, 12], strides = [1, 1]} : vector<9x12xf32> to vector<1x12xf32>
    %55 = vector.shape_cast %54 : vector<1x12xf32> to vector<12xf32>
    %c0_55 = arith.constant 0 : index
    %c1_56 = arith.constant 1 : index
    %c1_57 = arith.constant 1 : index
    %c0_58 = arith.constant 0 : index
    %56 = vector.load %arg28[%c0_55, %c1_56, %c1_57, %c0_58] : memref<1x18x18x96xf32, #tpu.memory_space<vmem>>, vector<1x16x16x12xf32>
    %57 = vector.shape_cast %55 : vector<12xf32> to vector<1x1x1x12xf32>
    %58 = vector.broadcast %57 : vector<1x1x1x12xf32> to vector<1x16x16x12xf32>
    %59 = arith.mulf %58, %56 : vector<1x16x16x12xf32>
    %60 = arith.addf %53, %59 : vector<1x16x16x12xf32>
    %61 = vector.extract_strided_slice %26 {offsets = [5, 0], sizes = [1, 12], strides = [1, 1]} : vector<9x12xf32> to vector<1x12xf32>
    %62 = vector.shape_cast %61 : vector<1x12xf32> to vector<12xf32>
    %c0_59 = arith.constant 0 : index
    %c1_60 = arith.constant 1 : index
    %c2_61 = arith.constant 2 : index
    %c0_62 = arith.constant 0 : index
    %63 = vector.load %arg28[%c0_59, %c1_60, %c2_61, %c0_62] : memref<1x18x18x96xf32, #tpu.memory_space<vmem>>, vector<1x16x16x12xf32>
    %64 = vector.shape_cast %62 : vector<12xf32> to vector<1x1x1x12xf32>
    %65 = vector.broadcast %64 : vector<1x1x1x12xf32> to vector<1x16x16x12xf32>
    %66 = arith.mulf %65, %63 : vector<1x16x16x12xf32>
    %67 = arith.addf %60, %66 : vector<1x16x16x12xf32>
    %68 = vector.extract_strided_slice %26 {offsets = [6, 0], sizes = [1, 12], strides = [1, 1]} : vector<9x12xf32> to vector<1x12xf32>
    %69 = vector.shape_cast %68 : vector<1x12xf32> to vector<12xf32>
    %c0_63 = arith.constant 0 : index
    %c2_64 = arith.constant 2 : index
    %c0_65 = arith.constant 0 : index
    %c0_66 = arith.constant 0 : index
    %70 = vector.load %arg28[%c0_63, %c2_64, %c0_65, %c0_66] : memref<1x18x18x96xf32, #tpu.memory_space<vmem>>, vector<1x16x16x12xf32>
    %71 = vector.shape_cast %69 : vector<12xf32> to vector<1x1x1x12xf32>
    %72 = vector.broadcast %71 : vector<1x1x1x12xf32> to vector<1x16x16x12xf32>
    %73 = arith.mulf %72, %70 : vector<1x16x16x12xf32>
    %74 = arith.addf %67, %73 : vector<1x16x16x12xf32>
    %75 = vector.extract_strided_slice %26 {offsets = [7, 0], sizes = [1, 12], strides = [1, 1]} : vector<9x12xf32> to vector<1x12xf32>
    %76 = vector.shape_cast %75 : vector<1x12xf32> to vector<12xf32>
    %c0_67 = arith.constant 0 : index
    %c2_68 = arith.constant 2 : index
    %c1_69 = arith.constant 1 : index
    %c0_70 = arith.constant 0 : index
    %77 = vector.load %arg28[%c0_67, %c2_68, %c1_69, %c0_70] : memref<1x18x18x96xf32, #tpu.memory_space<vmem>>, vector<1x16x16x12xf32>
    %78 = vector.shape_cast %76 : vector<12xf32> to vector<1x1x1x12xf32>
    %79 = vector.broadcast %78 : vector<1x1x1x12xf32> to vector<1x16x16x12xf32>
    %80 = arith.mulf %79, %77 : vector<1x16x16x12xf32>
    %81 = arith.addf %74, %80 : vector<1x16x16x12xf32>
    %82 = vector.extract_strided_slice %26 {offsets = [8, 0], sizes = [1, 12], strides = [1, 1]} : vector<9x12xf32> to vector<1x12xf32>
    %83 = vector.shape_cast %82 : vector<1x12xf32> to vector<12xf32>
    %c0_71 = arith.constant 0 : index
    %c2_72 = arith.constant 2 : index
    %c2_73 = arith.constant 2 : index
    %c0_74 = arith.constant 0 : index
    %84 = vector.load %arg28[%c0_71, %c2_72, %c2_73, %c0_74] : memref<1x18x18x96xf32, #tpu.memory_space<vmem>>, vector<1x16x16x12xf32>
    %85 = vector.shape_cast %83 : vector<12xf32> to vector<1x1x1x12xf32>
    %86 = vector.broadcast %85 : vector<1x1x1x12xf32> to vector<1x16x16x12xf32>
    %87 = arith.mulf %86, %84 : vector<1x16x16x12xf32>
    %88 = arith.addf %81, %87 : vector<1x16x16x12xf32>
    %c0_75 = arith.constant 0 : index
    %c0_76 = arith.constant 0 : index
    %89 = vector.load %arg6[%c0_75, %c0_76] : memref<1x12xf32, #tpu.memory_space<vmem>>, vector<1x12xf32>
    %90 = vector.shape_cast %89 : vector<1x12xf32> to vector<12xf32>
    %91 = vector.shape_cast %90 : vector<12xf32> to vector<1x1x1x12xf32>
    %92 = vector.broadcast %91 : vector<1x1x1x12xf32> to vector<1x16x16x12xf32>
    %93 = arith.addf %88, %92 : vector<1x16x16x12xf32>
    %cst_77 = arith.constant 0.000000e+00 : f32
    %cst_78 = arith.constant 6.000000e+00 : f32
    %94 = vector.broadcast %cst_77 : f32 to vector<1x16x16x12xf32>
    %95 = arith.maximumf %94, %93 : vector<1x16x16x12xf32>
    %96 = vector.broadcast %cst_78 : f32 to vector<1x16x16x12xf32>
    %97 = arith.minimumf %96, %95 : vector<1x16x16x12xf32>
    %98 = vector.shape_cast %97 : vector<1x16x16x12xf32> to vector<256x12xf32>
    %99 = arith.truncf %98 : vector<256x12xf32> to vector<256x12xbf16>
    %c0_79 = arith.constant 0 : index
    %c0_80 = arith.constant 0 : index
    %100 = vector.load %arg4[%c0_79, %c0_80] : memref<12x2xbf16, #tpu.memory_space<vmem>>, vector<12x2xbf16>
    %cst_81 = arith.constant dense<0.000000e+00> : vector<256x2xf32>
    %101 = tpu.matmul %99, %100, %cst_81 {dimension_numbers = #tpu.dot_dimension_numbers<[1], [0], [0], [1], [0, 0, 1, 1], [], []>} : vector<256x12xbf16>, vector<12x2xbf16>, vector<256x2xf32> -> vector<256x2xf32>
    %c0_82 = arith.constant 0 : index
    %c0_83 = arith.constant 0 : index
    %102 = vector.load %arg7[%c0_82, %c0_83] : memref<1x2xf32, #tpu.memory_space<vmem>>, vector<1x2xf32>
    %103 = vector.shape_cast %102 : vector<1x2xf32> to vector<2xf32>
    %104 = vector.shape_cast %103 : vector<2xf32> to vector<1x2xf32>
    %105 = vector.broadcast %104 : vector<1x2xf32> to vector<256x2xf32>
    %106 = arith.addf %101, %105 : vector<256x2xf32>
    %107 = vector.shape_cast %106 : vector<256x2xf32> to vector<1x16x16x2xf32>
    %108 = arith.addf %107, %10 : vector<1x16x16x2xf32>
    %c0_84 = arith.constant 0 : index
    %c0_85 = arith.constant 0 : index
    %c0_86 = arith.constant 0 : index
    %c14_87 = arith.constant 14 : index
    %109 = vector.load %arg27[%c0_84, %c0_85, %c0_86, %c14_87] : memref<1x16x16x16xf32, #tpu.memory_space<vmem>>, vector<1x16x16x2xf32>
    tpu.vector_store %arg27[%c0_84, %c0_85, %c0_86, %c14_87], %108 {strides = array<i32>} : memref<1x16x16x16xf32, #tpu.memory_space<vmem>>, vector<1x16x16x2xf32>,
    %c0_88 = arith.constant 0 : index
    %c0_89 = arith.constant 0 : index
    %c0_90 = arith.constant 0 : index
    %c12 = arith.constant 12 : index
    %110 = vector.load %arg27[%c0_88, %c0_89, %c0_90, %c12] : memref<1x16x16x16xf32, #tpu.memory_space<vmem>>, vector<1x16x16x4xf32>
    %111 = vector.shape_cast %110 : vector<1x16x16x4xf32> to vector<256x4xf32>
    %112 = arith.truncf %111 : vector<256x4xf32> to vector<256x4xbf16>
    %c0_91 = arith.constant 0 : index
    %c0_92 = arith.constant 0 : index
    %113 = vector.load %arg8[%c0_91, %c0_92] : memref<4x24xbf16, #tpu.memory_space<vmem>>, vector<4x24xbf16>
    %cst_93 = arith.constant dense<0.000000e+00> : vector<256x24xf32>
    %114 = tpu.matmul %112, %113, %cst_93 {dimension_numbers = #tpu.dot_dimension_numbers<[1], [0], [0], [1], [0, 0, 1, 1], [], []>} : vector<256x4xbf16>, vector<4x24xbf16>, vector<256x24xf32> -> vector<256x24xf32>
    %c0_94 = arith.constant 0 : index
    %c0_95 = arith.constant 0 : index
    %115 = vector.load %arg11[%c0_94, %c0_95] : memref<1x24xf32, #tpu.memory_space<vmem>>, vector<1x24xf32>
    %116 = vector.shape_cast %115 : vector<1x24xf32> to vector<24xf32>
    %117 = vector.shape_cast %116 : vector<24xf32> to vector<1x24xf32>
    %118 = vector.broadcast %117 : vector<1x24xf32> to vector<256x24xf32>
    %119 = arith.addf %114, %118 : vector<256x24xf32>
    %cst_96 = arith.constant 0.000000e+00 : f32
    %cst_97 = arith.constant 6.000000e+00 : f32
    %120 = vector.broadcast %cst_96 : f32 to vector<256x24xf32>
    %121 = arith.maximumf %120, %119 : vector<256x24xf32>
    %122 = vector.broadcast %cst_97 : f32 to vector<256x24xf32>
    %123 = arith.minimumf %122, %121 : vector<256x24xf32>
    %124 = vector.shape_cast %123 : vector<256x24xf32> to vector<1x16x16x24xf32>
    %c0_98 = arith.constant 0 : index
    %c1_99 = arith.constant 1 : index
    %c1_100 = arith.constant 1 : index
    %c0_101 = arith.constant 0 : index
    %125 = vector.load %arg28[%c0_98, %c1_99, %c1_100, %c0_101] : memref<1x18x18x96xf32, #tpu.memory_space<vmem>>, vector<1x16x16x24xf32>
    tpu.vector_store %arg28[%c0_98, %c1_99, %c1_100, %c0_101], %124 {strides = array<i32>} : memref<1x18x18x96xf32, #tpu.memory_space<vmem>>, vector<1x16x16x24xf32>,
    %c0_102 = arith.constant 0 : index
    %c0_103 = arith.constant 0 : index
    %126 = vector.load %arg9[%c0_102, %c0_103] : memref<9x24xf32, #tpu.memory_space<vmem>>, vector<9x24xf32>
    %127 = vector.extract_strided_slice %126 {offsets = [0, 0], sizes = [1, 24], strides = [1, 1]} : vector<9x24xf32> to vector<1x24xf32>
    %128 = vector.shape_cast %127 : vector<1x24xf32> to vector<24xf32>
    %c0_104 = arith.constant 0 : index
    %c0_105 = arith.constant 0 : index
    %c0_106 = arith.constant 0 : index
    %c0_107 = arith.constant 0 : index
    %129 = vector.load %arg28[%c0_104, %c0_105, %c0_106, %c0_107] : memref<1x18x18x96xf32, #tpu.memory_space<vmem>>, vector<1x16x16x24xf32>
    %130 = vector.shape_cast %128 : vector<24xf32> to vector<1x1x1x24xf32>
    %131 = vector.broadcast %130 : vector<1x1x1x24xf32> to vector<1x16x16x24xf32>
    %132 = arith.mulf %131, %129 : vector<1x16x16x24xf32>
    %133 = vector.extract_strided_slice %126 {offsets = [1, 0], sizes = [1, 24], strides = [1, 1]} : vector<9x24xf32> to vector<1x24xf32>
    %134 = vector.shape_cast %133 : vector<1x24xf32> to vector<24xf32>
    %c0_108 = arith.constant 0 : index
    %c0_109 = arith.constant 0 : index
    %c1_110 = arith.constant 1 : index
    %c0_111 = arith.constant 0 : index
    %135 = vector.load %arg28[%c0_108, %c0_109, %c1_110, %c0_111] : memref<1x18x18x96xf32, #tpu.memory_space<vmem>>, vector<1x16x16x24xf32>
    %136 = vector.shape_cast %134 : vector<24xf32> to vector<1x1x1x24xf32>
    %137 = vector.broadcast %136 : vector<1x1x1x24xf32> to vector<1x16x16x24xf32>
    %138 = arith.mulf %137, %135 : vector<1x16x16x24xf32>
    %139 = arith.addf %132, %138 : vector<1x16x16x24xf32>
    %140 = vector.extract_strided_slice %126 {offsets = [2, 0], sizes = [1, 24], strides = [1, 1]} : vector<9x24xf32> to vector<1x24xf32>
    %141 = vector.shape_cast %140 : vector<1x24xf32> to vector<24xf32>
    %c0_112 = arith.constant 0 : index
    %c0_113 = arith.constant 0 : index
    %c2_114 = arith.constant 2 : index
    %c0_115 = arith.constant 0 : index
    %142 = vector.load %arg28[%c0_112, %c0_113, %c2_114, %c0_115] : memref<1x18x18x96xf32, #tpu.memory_space<vmem>>, vector<1x16x16x24xf32>
    %143 = vector.shape_cast %141 : vector<24xf32> to vector<1x1x1x24xf32>
    %144 = vector.broadcast %143 : vector<1x1x1x24xf32> to vector<1x16x16x24xf32>
    %145 = arith.mulf %144, %142 : vector<1x16x16x24xf32>
    %146 = arith.addf %139, %145 : vector<1x16x16x24xf32>
    %147 = vector.extract_strided_slice %126 {offsets = [3, 0], sizes = [1, 24], strides = [1, 1]} : vector<9x24xf32> to vector<1x24xf32>
    %148 = vector.shape_cast %147 : vector<1x24xf32> to vector<24xf32>
    %c0_116 = arith.constant 0 : index
    %c1_117 = arith.constant 1 : index
    %c0_118 = arith.constant 0 : index
    %c0_119 = arith.constant 0 : index
    %149 = vector.load %arg28[%c0_116, %c1_117, %c0_118, %c0_119] : memref<1x18x18x96xf32, #tpu.memory_space<vmem>>, vector<1x16x16x24xf32>
    %150 = vector.shape_cast %148 : vector<24xf32> to vector<1x1x1x24xf32>
    %151 = vector.broadcast %150 : vector<1x1x1x24xf32> to vector<1x16x16x24xf32>
    %152 = arith.mulf %151, %149 : vector<1x16x16x24xf32>
    %153 = arith.addf %146, %152 : vector<1x16x16x24xf32>
    %154 = vector.extract_strided_slice %126 {offsets = [4, 0], sizes = [1, 24], strides = [1, 1]} : vector<9x24xf32> to vector<1x24xf32>
    %155 = vector.shape_cast %154 : vector<1x24xf32> to vector<24xf32>
    %c0_120 = arith.constant 0 : index
    %c1_121 = arith.constant 1 : index
    %c1_122 = arith.constant 1 : index
    %c0_123 = arith.constant 0 : index
    %156 = vector.load %arg28[%c0_120, %c1_121, %c1_122, %c0_123] : memref<1x18x18x96xf32, #tpu.memory_space<vmem>>, vector<1x16x16x24xf32>
    %157 = vector.shape_cast %155 : vector<24xf32> to vector<1x1x1x24xf32>
    %158 = vector.broadcast %157 : vector<1x1x1x24xf32> to vector<1x16x16x24xf32>
    %159 = arith.mulf %158, %156 : vector<1x16x16x24xf32>
    %160 = arith.addf %153, %159 : vector<1x16x16x24xf32>
    %161 = vector.extract_strided_slice %126 {offsets = [5, 0], sizes = [1, 24], strides = [1, 1]} : vector<9x24xf32> to vector<1x24xf32>
    %162 = vector.shape_cast %161 : vector<1x24xf32> to vector<24xf32>
    %c0_124 = arith.constant 0 : index
    %c1_125 = arith.constant 1 : index
    %c2_126 = arith.constant 2 : index
    %c0_127 = arith.constant 0 : index
    %163 = vector.load %arg28[%c0_124, %c1_125, %c2_126, %c0_127] : memref<1x18x18x96xf32, #tpu.memory_space<vmem>>, vector<1x16x16x24xf32>
    %164 = vector.shape_cast %162 : vector<24xf32> to vector<1x1x1x24xf32>
    %165 = vector.broadcast %164 : vector<1x1x1x24xf32> to vector<1x16x16x24xf32>
    %166 = arith.mulf %165, %163 : vector<1x16x16x24xf32>
    %167 = arith.addf %160, %166 : vector<1x16x16x24xf32>
    %168 = vector.extract_strided_slice %126 {offsets = [6, 0], sizes = [1, 24], strides = [1, 1]} : vector<9x24xf32> to vector<1x24xf32>
    %169 = vector.shape_cast %168 : vector<1x24xf32> to vector<24xf32>
    %c0_128 = arith.constant 0 : index
    %c2_129 = arith.constant 2 : index
    %c0_130 = arith.constant 0 : index
    %c0_131 = arith.constant 0 : index
    %170 = vector.load %arg28[%c0_128, %c2_129, %c0_130, %c0_131] : memref<1x18x18x96xf32, #tpu.memory_space<vmem>>, vector<1x16x16x24xf32>
    %171 = vector.shape_cast %169 : vector<24xf32> to vector<1x1x1x24xf32>
    %172 = vector.broadcast %171 : vector<1x1x1x24xf32> to vector<1x16x16x24xf32>
    %173 = arith.mulf %172, %170 : vector<1x16x16x24xf32>
    %174 = arith.addf %167, %173 : vector<1x16x16x24xf32>
    %175 = vector.extract_strided_slice %126 {offsets = [7, 0], sizes = [1, 24], strides = [1, 1]} : vector<9x24xf32> to vector<1x24xf32>
    %176 = vector.shape_cast %175 : vector<1x24xf32> to vector<24xf32>
    %c0_132 = arith.constant 0 : index
    %c2_133 = arith.constant 2 : index
    %c1_134 = arith.constant 1 : index
    %c0_135 = arith.constant 0 : index
    %177 = vector.load %arg28[%c0_132, %c2_133, %c1_134, %c0_135] : memref<1x18x18x96xf32, #tpu.memory_space<vmem>>, vector<1x16x16x24xf32>
    %178 = vector.shape_cast %176 : vector<24xf32> to vector<1x1x1x24xf32>
    %179 = vector.broadcast %178 : vector<1x1x1x24xf32> to vector<1x16x16x24xf32>
    %180 = arith.mulf %179, %177 : vector<1x16x16x24xf32>
    %181 = arith.addf %174, %180 : vector<1x16x16x24xf32>
    %182 = vector.extract_strided_slice %126 {offsets = [8, 0], sizes = [1, 24], strides = [1, 1]} : vector<9x24xf32> to vector<1x24xf32>
    %183 = vector.shape_cast %182 : vector<1x24xf32> to vector<24xf32>
    %c0_136 = arith.constant 0 : index
    %c2_137 = arith.constant 2 : index
    %c2_138 = arith.constant 2 : index
    %c0_139 = arith.constant 0 : index
    %184 = vector.load %arg28[%c0_136, %c2_137, %c2_138, %c0_139] : memref<1x18x18x96xf32, #tpu.memory_space<vmem>>, vector<1x16x16x24xf32>
    %185 = vector.shape_cast %183 : vector<24xf32> to vector<1x1x1x24xf32>
    %186 = vector.broadcast %185 : vector<1x1x1x24xf32> to vector<1x16x16x24xf32>
    %187 = arith.mulf %186, %184 : vector<1x16x16x24xf32>
    %188 = arith.addf %181, %187 : vector<1x16x16x24xf32>
    %c0_140 = arith.constant 0 : index
    %c0_141 = arith.constant 0 : index
    %189 = vector.load %arg12[%c0_140, %c0_141] : memref<1x24xf32, #tpu.memory_space<vmem>>, vector<1x24xf32>
    %190 = vector.shape_cast %189 : vector<1x24xf32> to vector<24xf32>
    %191 = vector.shape_cast %190 : vector<24xf32> to vector<1x1x1x24xf32>
    %192 = vector.broadcast %191 : vector<1x1x1x24xf32> to vector<1x16x16x24xf32>
    %193 = arith.addf %188, %192 : vector<1x16x16x24xf32>
    %cst_142 = arith.constant 0.000000e+00 : f32
    %cst_143 = arith.constant 6.000000e+00 : f32
    %194 = vector.broadcast %cst_142 : f32 to vector<1x16x16x24xf32>
    %195 = arith.maximumf %194, %193 : vector<1x16x16x24xf32>
    %196 = vector.broadcast %cst_143 : f32 to vector<1x16x16x24xf32>
    %197 = arith.minimumf %196, %195 : vector<1x16x16x24xf32>
    %198 = vector.shape_cast %197 : vector<1x16x16x24xf32> to vector<256x24xf32>
    %199 = arith.truncf %198 : vector<256x24xf32> to vector<256x24xbf16>
    %c0_144 = arith.constant 0 : index
    %c0_145 = arith.constant 0 : index
    %200 = vector.load %arg10[%c0_144, %c0_145] : memref<24x4xbf16, #tpu.memory_space<vmem>>, vector<24x4xbf16>
    %cst_146 = arith.constant dense<0.000000e+00> : vector<256x4xf32>
    %201 = tpu.matmul %199, %200, %cst_146 {dimension_numbers = #tpu.dot_dimension_numbers<[1], [0], [0], [1], [0, 0, 1, 1], [], []>} : vector<256x24xbf16>, vector<24x4xbf16>, vector<256x4xf32> -> vector<256x4xf32>
    %c0_147 = arith.constant 0 : index
    %c0_148 = arith.constant 0 : index
    %202 = vector.load %arg13[%c0_147, %c0_148] : memref<1x4xf32, #tpu.memory_space<vmem>>, vector<1x4xf32>
    %203 = vector.shape_cast %202 : vector<1x4xf32> to vector<4xf32>
    %204 = vector.shape_cast %203 : vector<4xf32> to vector<1x4xf32>
    %205 = vector.broadcast %204 : vector<1x4xf32> to vector<256x4xf32>
    %206 = arith.addf %201, %205 : vector<256x4xf32>
    %207 = vector.shape_cast %206 : vector<256x4xf32> to vector<1x16x16x4xf32>
    %208 = arith.addf %207, %110 : vector<1x16x16x4xf32>
    %c0_149 = arith.constant 0 : index
    %c0_150 = arith.constant 0 : index
    %c0_151 = arith.constant 0 : index
    %c12_152 = arith.constant 12 : index
    %209 = vector.load %arg27[%c0_149, %c0_150, %c0_151, %c12_152] : memref<1x16x16x16xf32, #tpu.memory_space<vmem>>, vector<1x16x16x4xf32>
    tpu.vector_store %arg27[%c0_149, %c0_150, %c0_151, %c12_152], %208 {strides = array<i32>} : memref<1x16x16x16xf32, #tpu.memory_space<vmem>>, vector<1x16x16x4xf32>,
    %c0_153 = arith.constant 0 : index
    %c0_154 = arith.constant 0 : index
    %c0_155 = arith.constant 0 : index
    %c8 = arith.constant 8 : index
    %210 = vector.load %arg27[%c0_153, %c0_154, %c0_155, %c8] : memref<1x16x16x16xf32, #tpu.memory_space<vmem>>, vector<1x16x16x8xf32>
    %211 = vector.shape_cast %210 : vector<1x16x16x8xf32> to vector<256x8xf32>
    %212 = arith.truncf %211 : vector<256x8xf32> to vector<256x8xbf16>
    %c0_156 = arith.constant 0 : index
    %c0_157 = arith.constant 0 : index
    %213 = vector.load %arg14[%c0_156, %c0_157] : memref<8x48xbf16, #tpu.memory_space<vmem>>, vector<8x48xbf16>
    %cst_158 = arith.constant dense<0.000000e+00> : vector<256x48xf32>
    %214 = tpu.matmul %212, %213, %cst_158 {dimension_numbers = #tpu.dot_dimension_numbers<[1], [0], [0], [1], [0, 0, 1, 1], [], []>} : vector<256x8xbf16>, vector<8x48xbf16>, vector<256x48xf32> -> vector<256x48xf32>
    %c0_159 = arith.constant 0 : index
    %c0_160 = arith.constant 0 : index
    %215 = vector.load %arg17[%c0_159, %c0_160] : memref<1x48xf32, #tpu.memory_space<vmem>>, vector<1x48xf32>
    %216 = vector.shape_cast %215 : vector<1x48xf32> to vector<48xf32>
    %217 = vector.shape_cast %216 : vector<48xf32> to vector<1x48xf32>
    %218 = vector.broadcast %217 : vector<1x48xf32> to vector<256x48xf32>
    %219 = arith.addf %214, %218 : vector<256x48xf32>
    %cst_161 = arith.constant 0.000000e+00 : f32
    %cst_162 = arith.constant 6.000000e+00 : f32
    %220 = vector.broadcast %cst_161 : f32 to vector<256x48xf32>
    %221 = arith.maximumf %220, %219 : vector<256x48xf32>
    %222 = vector.broadcast %cst_162 : f32 to vector<256x48xf32>
    %223 = arith.minimumf %222, %221 : vector<256x48xf32>
    %224 = vector.shape_cast %223 : vector<256x48xf32> to vector<1x16x16x48xf32>
    %c0_163 = arith.constant 0 : index
    %c1_164 = arith.constant 1 : index
    %c1_165 = arith.constant 1 : index
    %c0_166 = arith.constant 0 : index
    %225 = vector.load %arg28[%c0_163, %c1_164, %c1_165, %c0_166] : memref<1x18x18x96xf32, #tpu.memory_space<vmem>>, vector<1x16x16x48xf32>
    tpu.vector_store %arg28[%c0_163, %c1_164, %c1_165, %c0_166], %224 {strides = array<i32>} : memref<1x18x18x96xf32, #tpu.memory_space<vmem>>, vector<1x16x16x48xf32>,
    %c0_167 = arith.constant 0 : index
    %c0_168 = arith.constant 0 : index
    %226 = vector.load %arg15[%c0_167, %c0_168] : memref<9x48xf32, #tpu.memory_space<vmem>>, vector<9x48xf32>
    %227 = vector.extract_strided_slice %226 {offsets = [0, 0], sizes = [1, 48], strides = [1, 1]} : vector<9x48xf32> to vector<1x48xf32>
    %228 = vector.shape_cast %227 : vector<1x48xf32> to vector<48xf32>
    %c0_169 = arith.constant 0 : index
    %c0_170 = arith.constant 0 : index
    %c0_171 = arith.constant 0 : index
    %c0_172 = arith.constant 0 : index
    %229 = vector.load %arg28[%c0_169, %c0_170, %c0_171, %c0_172] : memref<1x18x18x96xf32, #tpu.memory_space<vmem>>, vector<1x16x16x48xf32>
    %230 = vector.shape_cast %228 : vector<48xf32> to vector<1x1x1x48xf32>
    %231 = vector.broadcast %230 : vector<1x1x1x48xf32> to vector<1x16x16x48xf32>
    %232 = arith.mulf %231, %229 : vector<1x16x16x48xf32>
    %233 = vector.extract_strided_slice %226 {offsets = [1, 0], sizes = [1, 48], strides = [1, 1]} : vector<9x48xf32> to vector<1x48xf32>
    %234 = vector.shape_cast %233 : vector<1x48xf32> to vector<48xf32>
    %c0_173 = arith.constant 0 : index
    %c0_174 = arith.constant 0 : index
    %c1_175 = arith.constant 1 : index
    %c0_176 = arith.constant 0 : index
    %235 = vector.load %arg28[%c0_173, %c0_174, %c1_175, %c0_176] : memref<1x18x18x96xf32, #tpu.memory_space<vmem>>, vector<1x16x16x48xf32>
    %236 = vector.shape_cast %234 : vector<48xf32> to vector<1x1x1x48xf32>
    %237 = vector.broadcast %236 : vector<1x1x1x48xf32> to vector<1x16x16x48xf32>
    %238 = arith.mulf %237, %235 : vector<1x16x16x48xf32>
    %239 = arith.addf %232, %238 : vector<1x16x16x48xf32>
    %240 = vector.extract_strided_slice %226 {offsets = [2, 0], sizes = [1, 48], strides = [1, 1]} : vector<9x48xf32> to vector<1x48xf32>
    %241 = vector.shape_cast %240 : vector<1x48xf32> to vector<48xf32>
    %c0_177 = arith.constant 0 : index
    %c0_178 = arith.constant 0 : index
    %c2_179 = arith.constant 2 : index
    %c0_180 = arith.constant 0 : index
    %242 = vector.load %arg28[%c0_177, %c0_178, %c2_179, %c0_180] : memref<1x18x18x96xf32, #tpu.memory_space<vmem>>, vector<1x16x16x48xf32>
    %243 = vector.shape_cast %241 : vector<48xf32> to vector<1x1x1x48xf32>
    %244 = vector.broadcast %243 : vector<1x1x1x48xf32> to vector<1x16x16x48xf32>
    %245 = arith.mulf %244, %242 : vector<1x16x16x48xf32>
    %246 = arith.addf %239, %245 : vector<1x16x16x48xf32>
    %247 = vector.extract_strided_slice %226 {offsets = [3, 0], sizes = [1, 48], strides = [1, 1]} : vector<9x48xf32> to vector<1x48xf32>
    %248 = vector.shape_cast %247 : vector<1x48xf32> to vector<48xf32>
    %c0_181 = arith.constant 0 : index
    %c1_182 = arith.constant 1 : index
    %c0_183 = arith.constant 0 : index
    %c0_184 = arith.constant 0 : index
    %249 = vector.load %arg28[%c0_181, %c1_182, %c0_183, %c0_184] : memref<1x18x18x96xf32, #tpu.memory_space<vmem>>, vector<1x16x16x48xf32>
    %250 = vector.shape_cast %248 : vector<48xf32> to vector<1x1x1x48xf32>
    %251 = vector.broadcast %250 : vector<1x1x1x48xf32> to vector<1x16x16x48xf32>
    %252 = arith.mulf %251, %249 : vector<1x16x16x48xf32>
    %253 = arith.addf %246, %252 : vector<1x16x16x48xf32>
    %254 = vector.extract_strided_slice %226 {offsets = [4, 0], sizes = [1, 48], strides = [1, 1]} : vector<9x48xf32> to vector<1x48xf32>
    %255 = vector.shape_cast %254 : vector<1x48xf32> to vector<48xf32>
    %c0_185 = arith.constant 0 : index
    %c1_186 = arith.constant 1 : index
    %c1_187 = arith.constant 1 : index
    %c0_188 = arith.constant 0 : index
    %256 = vector.load %arg28[%c0_185, %c1_186, %c1_187, %c0_188] : memref<1x18x18x96xf32, #tpu.memory_space<vmem>>, vector<1x16x16x48xf32>
    %257 = vector.shape_cast %255 : vector<48xf32> to vector<1x1x1x48xf32>
    %258 = vector.broadcast %257 : vector<1x1x1x48xf32> to vector<1x16x16x48xf32>
    %259 = arith.mulf %258, %256 : vector<1x16x16x48xf32>
    %260 = arith.addf %253, %259 : vector<1x16x16x48xf32>
    %261 = vector.extract_strided_slice %226 {offsets = [5, 0], sizes = [1, 48], strides = [1, 1]} : vector<9x48xf32> to vector<1x48xf32>
    %262 = vector.shape_cast %261 : vector<1x48xf32> to vector<48xf32>
    %c0_189 = arith.constant 0 : index
    %c1_190 = arith.constant 1 : index
    %c2_191 = arith.constant 2 : index
    %c0_192 = arith.constant 0 : index
    %263 = vector.load %arg28[%c0_189, %c1_190, %c2_191, %c0_192] : memref<1x18x18x96xf32, #tpu.memory_space<vmem>>, vector<1x16x16x48xf32>
    %264 = vector.shape_cast %262 : vector<48xf32> to vector<1x1x1x48xf32>
    %265 = vector.broadcast %264 : vector<1x1x1x48xf32> to vector<1x16x16x48xf32>
    %266 = arith.mulf %265, %263 : vector<1x16x16x48xf32>
    %267 = arith.addf %260, %266 : vector<1x16x16x48xf32>
    %268 = vector.extract_strided_slice %226 {offsets = [6, 0], sizes = [1, 48], strides = [1, 1]} : vector<9x48xf32> to vector<1x48xf32>
    %269 = vector.shape_cast %268 : vector<1x48xf32> to vector<48xf32>
    %c0_193 = arith.constant 0 : index
    %c2_194 = arith.constant 2 : index
    %c0_195 = arith.constant 0 : index
    %c0_196 = arith.constant 0 : index
    %270 = vector.load %arg28[%c0_193, %c2_194, %c0_195, %c0_196] : memref<1x18x18x96xf32, #tpu.memory_space<vmem>>, vector<1x16x16x48xf32>
    %271 = vector.shape_cast %269 : vector<48xf32> to vector<1x1x1x48xf32>
    %272 = vector.broadcast %271 : vector<1x1x1x48xf32> to vector<1x16x16x48xf32>
    %273 = arith.mulf %272, %270 : vector<1x16x16x48xf32>
    %274 = arith.addf %267, %273 : vector<1x16x16x48xf32>
    %275 = vector.extract_strided_slice %226 {offsets = [7, 0], sizes = [1, 48], strides = [1, 1]} : vector<9x48xf32> to vector<1x48xf32>
    %276 = vector.shape_cast %275 : vector<1x48xf32> to vector<48xf32>
    %c0_197 = arith.constant 0 : index
    %c2_198 = arith.constant 2 : index
    %c1_199 = arith.constant 1 : index
    %c0_200 = arith.constant 0 : index
    %277 = vector.load %arg28[%c0_197, %c2_198, %c1_199, %c0_200] : memref<1x18x18x96xf32, #tpu.memory_space<vmem>>, vector<1x16x16x48xf32>
    %278 = vector.shape_cast %276 : vector<48xf32> to vector<1x1x1x48xf32>
    %279 = vector.broadcast %278 : vector<1x1x1x48xf32> to vector<1x16x16x48xf32>
    %280 = arith.mulf %279, %277 : vector<1x16x16x48xf32>
    %281 = arith.addf %274, %280 : vector<1x16x16x48xf32>
    %282 = vector.extract_strided_slice %226 {offsets = [8, 0], sizes = [1, 48], strides = [1, 1]} : vector<9x48xf32> to vector<1x48xf32>
    %283 = vector.shape_cast %282 : vector<1x48xf32> to vector<48xf32>
    %c0_201 = arith.constant 0 : index
    %c2_202 = arith.constant 2 : index
    %c2_203 = arith.constant 2 : index
    %c0_204 = arith.constant 0 : index
    %284 = vector.load %arg28[%c0_201, %c2_202, %c2_203, %c0_204] : memref<1x18x18x96xf32, #tpu.memory_space<vmem>>, vector<1x16x16x48xf32>
    %285 = vector.shape_cast %283 : vector<48xf32> to vector<1x1x1x48xf32>
    %286 = vector.broadcast %285 : vector<1x1x1x48xf32> to vector<1x16x16x48xf32>
    %287 = arith.mulf %286, %284 : vector<1x16x16x48xf32>
    %288 = arith.addf %281, %287 : vector<1x16x16x48xf32>
    %c0_205 = arith.constant 0 : index
    %c0_206 = arith.constant 0 : index
    %289 = vector.load %arg18[%c0_205, %c0_206] : memref<1x48xf32, #tpu.memory_space<vmem>>, vector<1x48xf32>
    %290 = vector.shape_cast %289 : vector<1x48xf32> to vector<48xf32>
    %291 = vector.shape_cast %290 : vector<48xf32> to vector<1x1x1x48xf32>
    %292 = vector.broadcast %291 : vector<1x1x1x48xf32> to vector<1x16x16x48xf32>
    %293 = arith.addf %288, %292 : vector<1x16x16x48xf32>
    %cst_207 = arith.constant 0.000000e+00 : f32
    %cst_208 = arith.constant 6.000000e+00 : f32
    %294 = vector.broadcast %cst_207 : f32 to vector<1x16x16x48xf32>
    %295 = arith.maximumf %294, %293 : vector<1x16x16x48xf32>
    %296 = vector.broadcast %cst_208 : f32 to vector<1x16x16x48xf32>
    %297 = arith.minimumf %296, %295 : vector<1x16x16x48xf32>
    %298 = vector.shape_cast %297 : vector<1x16x16x48xf32> to vector<256x48xf32>
    %299 = arith.truncf %298 : vector<256x48xf32> to vector<256x48xbf16>
    %c0_209 = arith.constant 0 : index
    %c0_210 = arith.constant 0 : index
    %300 = vector.load %arg16[%c0_209, %c0_210] : memref<48x8xbf16, #tpu.memory_space<vmem>>, vector<48x8xbf16>
    %cst_211 = arith.constant dense<0.000000e+00> : vector<256x8xf32>
    %301 = tpu.matmul %299, %300, %cst_211 {dimension_numbers = #tpu.dot_dimension_numbers<[1], [0], [0], [1], [0, 0, 1, 1], [], []>} : vector<256x48xbf16>, vector<48x8xbf16>, vector<256x8xf32> -> vector<256x8xf32>
    %c0_212 = arith.constant 0 : index
    %c0_213 = arith.constant 0 : index
    %302 = vector.load %arg19[%c0_212, %c0_213] : memref<1x8xf32, #tpu.memory_space<vmem>>, vector<1x8xf32>
    %303 = vector.shape_cast %302 : vector<1x8xf32> to vector<8xf32>
    %304 = vector.shape_cast %303 : vector<8xf32> to vector<1x8xf32>
    %305 = vector.broadcast %304 : vector<1x8xf32> to vector<256x8xf32>
    %306 = arith.addf %301, %305 : vector<256x8xf32>
    %307 = vector.shape_cast %306 : vector<256x8xf32> to vector<1x16x16x8xf32>
    %308 = arith.addf %307, %210 : vector<1x16x16x8xf32>
    %c0_214 = arith.constant 0 : index
    %c0_215 = arith.constant 0 : index
    %c0_216 = arith.constant 0 : index
    %c8_217 = arith.constant 8 : index
    %309 = vector.load %arg27[%c0_214, %c0_215, %c0_216, %c8_217] : memref<1x16x16x16xf32, #tpu.memory_space<vmem>>, vector<1x16x16x8xf32>
    tpu.vector_store %arg27[%c0_214, %c0_215, %c0_216, %c8_217], %308 {strides = array<i32>} : memref<1x16x16x16xf32, #tpu.memory_space<vmem>>, vector<1x16x16x8xf32>,
    %c0_218 = arith.constant 0 : index
    %c0_219 = arith.constant 0 : index
    %c0_220 = arith.constant 0 : index
    %c0_221 = arith.constant 0 : index
    %310 = vector.load %arg27[%c0_218, %c0_219, %c0_220, %c0_221] : memref<1x16x16x16xf32, #tpu.memory_space<vmem>>, vector<1x16x16x16xf32>
    %311 = vector.shape_cast %310 : vector<1x16x16x16xf32> to vector<256x16xf32>
    %312 = arith.truncf %311 : vector<256x16xf32> to vector<256x16xbf16>
    %c0_222 = arith.constant 0 : index
    %c0_223 = arith.constant 0 : index
    %313 = vector.load %arg20[%c0_222, %c0_223] : memref<16x96xbf16, #tpu.memory_space<vmem>>, vector<16x96xbf16>
    %cst_224 = arith.constant dense<0.000000e+00> : vector<256x96xf32>
    %314 = tpu.matmul %312, %313, %cst_224 {dimension_numbers = #tpu.dot_dimension_numbers<[1], [0], [0], [1], [0, 0, 1, 1], [], []>} : vector<256x16xbf16>, vector<16x96xbf16>, vector<256x96xf32> -> vector<256x96xf32>
    %c0_225 = arith.constant 0 : index
    %c0_226 = arith.constant 0 : index
    %315 = vector.load %arg23[%c0_225, %c0_226] : memref<1x96xf32, #tpu.memory_space<vmem>>, vector<1x96xf32>
    %316 = vector.shape_cast %315 : vector<1x96xf32> to vector<96xf32>
    %317 = vector.shape_cast %316 : vector<96xf32> to vector<1x96xf32>
    %318 = vector.broadcast %317 : vector<1x96xf32> to vector<256x96xf32>
    %319 = arith.addf %314, %318 : vector<256x96xf32>
    %cst_227 = arith.constant 0.000000e+00 : f32
    %cst_228 = arith.constant 6.000000e+00 : f32
    %320 = vector.broadcast %cst_227 : f32 to vector<256x96xf32>
    %321 = arith.maximumf %320, %319 : vector<256x96xf32>
    %322 = vector.broadcast %cst_228 : f32 to vector<256x96xf32>
    %323 = arith.minimumf %322, %321 : vector<256x96xf32>
    %324 = vector.shape_cast %323 : vector<256x96xf32> to vector<1x16x16x96xf32>
    %c0_229 = arith.constant 0 : index
    %c1_230 = arith.constant 1 : index
    %c1_231 = arith.constant 1 : index
    %c0_232 = arith.constant 0 : index
    %325 = vector.load %arg28[%c0_229, %c1_230, %c1_231, %c0_232] : memref<1x18x18x96xf32, #tpu.memory_space<vmem>>, vector<1x16x16x96xf32>
    tpu.vector_store %arg28[%c0_229, %c1_230, %c1_231, %c0_232], %324 {strides = array<i32>} : memref<1x18x18x96xf32, #tpu.memory_space<vmem>>, vector<1x16x16x96xf32>,
    %c0_233 = arith.constant 0 : index
    %c0_234 = arith.constant 0 : index
    %326 = vector.load %arg21[%c0_233, %c0_234] : memref<9x96xf32, #tpu.memory_space<vmem>>, vector<9x96xf32>
    %327 = vector.extract_strided_slice %326 {offsets = [0, 0], sizes = [1, 96], strides = [1, 1]} : vector<9x96xf32> to vector<1x96xf32>
    %328 = vector.shape_cast %327 : vector<1x96xf32> to vector<96xf32>
    %c0_235 = arith.constant 0 : index
    %c0_236 = arith.constant 0 : index
    %c0_237 = arith.constant 0 : index
    %c0_238 = arith.constant 0 : index
    %329 = vector.load %arg28[%c0_235, %c0_236, %c0_237, %c0_238] : memref<1x18x18x96xf32, #tpu.memory_space<vmem>>, vector<1x16x16x96xf32>
    %330 = vector.shape_cast %328 : vector<96xf32> to vector<1x1x1x96xf32>
    %331 = vector.broadcast %330 : vector<1x1x1x96xf32> to vector<1x16x16x96xf32>
    %332 = arith.mulf %331, %329 : vector<1x16x16x96xf32>
    %333 = vector.extract_strided_slice %326 {offsets = [1, 0], sizes = [1, 96], strides = [1, 1]} : vector<9x96xf32> to vector<1x96xf32>
    %334 = vector.shape_cast %333 : vector<1x96xf32> to vector<96xf32>
    %c0_239 = arith.constant 0 : index
    %c0_240 = arith.constant 0 : index
    %c1_241 = arith.constant 1 : index
    %c0_242 = arith.constant 0 : index
    %335 = vector.load %arg28[%c0_239, %c0_240, %c1_241, %c0_242] : memref<1x18x18x96xf32, #tpu.memory_space<vmem>>, vector<1x16x16x96xf32>
    %336 = vector.shape_cast %334 : vector<96xf32> to vector<1x1x1x96xf32>
    %337 = vector.broadcast %336 : vector<1x1x1x96xf32> to vector<1x16x16x96xf32>
    %338 = arith.mulf %337, %335 : vector<1x16x16x96xf32>
    %339 = arith.addf %332, %338 : vector<1x16x16x96xf32>
    %340 = vector.extract_strided_slice %326 {offsets = [2, 0], sizes = [1, 96], strides = [1, 1]} : vector<9x96xf32> to vector<1x96xf32>
    %341 = vector.shape_cast %340 : vector<1x96xf32> to vector<96xf32>
    %c0_243 = arith.constant 0 : index
    %c0_244 = arith.constant 0 : index
    %c2_245 = arith.constant 2 : index
    %c0_246 = arith.constant 0 : index
    %342 = vector.load %arg28[%c0_243, %c0_244, %c2_245, %c0_246] : memref<1x18x18x96xf32, #tpu.memory_space<vmem>>, vector<1x16x16x96xf32>
    %343 = vector.shape_cast %341 : vector<96xf32> to vector<1x1x1x96xf32>
    %344 = vector.broadcast %343 : vector<1x1x1x96xf32> to vector<1x16x16x96xf32>
    %345 = arith.mulf %344, %342 : vector<1x16x16x96xf32>
    %346 = arith.addf %339, %345 : vector<1x16x16x96xf32>
    %347 = vector.extract_strided_slice %326 {offsets = [3, 0], sizes = [1, 96], strides = [1, 1]} : vector<9x96xf32> to vector<1x96xf32>
    %348 = vector.shape_cast %347 : vector<1x96xf32> to vector<96xf32>
    %c0_247 = arith.constant 0 : index
    %c1_248 = arith.constant 1 : index
    %c0_249 = arith.constant 0 : index
    %c0_250 = arith.constant 0 : index
    %349 = vector.load %arg28[%c0_247, %c1_248, %c0_249, %c0_250] : memref<1x18x18x96xf32, #tpu.memory_space<vmem>>, vector<1x16x16x96xf32>
    %350 = vector.shape_cast %348 : vector<96xf32> to vector<1x1x1x96xf32>
    %351 = vector.broadcast %350 : vector<1x1x1x96xf32> to vector<1x16x16x96xf32>
    %352 = arith.mulf %351, %349 : vector<1x16x16x96xf32>
    %353 = arith.addf %346, %352 : vector<1x16x16x96xf32>
    %354 = vector.extract_strided_slice %326 {offsets = [4, 0], sizes = [1, 96], strides = [1, 1]} : vector<9x96xf32> to vector<1x96xf32>
    %355 = vector.shape_cast %354 : vector<1x96xf32> to vector<96xf32>
    %c0_251 = arith.constant 0 : index
    %c1_252 = arith.constant 1 : index
    %c1_253 = arith.constant 1 : index
    %c0_254 = arith.constant 0 : index
    %356 = vector.load %arg28[%c0_251, %c1_252, %c1_253, %c0_254] : memref<1x18x18x96xf32, #tpu.memory_space<vmem>>, vector<1x16x16x96xf32>
    %357 = vector.shape_cast %355 : vector<96xf32> to vector<1x1x1x96xf32>
    %358 = vector.broadcast %357 : vector<1x1x1x96xf32> to vector<1x16x16x96xf32>
    %359 = arith.mulf %358, %356 : vector<1x16x16x96xf32>
    %360 = arith.addf %353, %359 : vector<1x16x16x96xf32>
    %361 = vector.extract_strided_slice %326 {offsets = [5, 0], sizes = [1, 96], strides = [1, 1]} : vector<9x96xf32> to vector<1x96xf32>
    %362 = vector.shape_cast %361 : vector<1x96xf32> to vector<96xf32>
    %c0_255 = arith.constant 0 : index
    %c1_256 = arith.constant 1 : index
    %c2_257 = arith.constant 2 : index
    %c0_258 = arith.constant 0 : index
    %363 = vector.load %arg28[%c0_255, %c1_256, %c2_257, %c0_258] : memref<1x18x18x96xf32, #tpu.memory_space<vmem>>, vector<1x16x16x96xf32>
    %364 = vector.shape_cast %362 : vector<96xf32> to vector<1x1x1x96xf32>
    %365 = vector.broadcast %364 : vector<1x1x1x96xf32> to vector<1x16x16x96xf32>
    %366 = arith.mulf %365, %363 : vector<1x16x16x96xf32>
    %367 = arith.addf %360, %366 : vector<1x16x16x96xf32>
    %368 = vector.extract_strided_slice %326 {offsets = [6, 0], sizes = [1, 96], strides = [1, 1]} : vector<9x96xf32> to vector<1x96xf32>
    %369 = vector.shape_cast %368 : vector<1x96xf32> to vector<96xf32>
    %c0_259 = arith.constant 0 : index
    %c2_260 = arith.constant 2 : index
    %c0_261 = arith.constant 0 : index
    %c0_262 = arith.constant 0 : index
    %370 = vector.load %arg28[%c0_259, %c2_260, %c0_261, %c0_262] : memref<1x18x18x96xf32, #tpu.memory_space<vmem>>, vector<1x16x16x96xf32>
    %371 = vector.shape_cast %369 : vector<96xf32> to vector<1x1x1x96xf32>
    %372 = vector.broadcast %371 : vector<1x1x1x96xf32> to vector<1x16x16x96xf32>
    %373 = arith.mulf %372, %370 : vector<1x16x16x96xf32>
    %374 = arith.addf %367, %373 : vector<1x16x16x96xf32>
    %375 = vector.extract_strided_slice %326 {offsets = [7, 0], sizes = [1, 96], strides = [1, 1]} : vector<9x96xf32> to vector<1x96xf32>
    %376 = vector.shape_cast %375 : vector<1x96xf32> to vector<96xf32>
    %c0_263 = arith.constant 0 : index
    %c2_264 = arith.constant 2 : index
    %c1_265 = arith.constant 1 : index
    %c0_266 = arith.constant 0 : index
    %377 = vector.load %arg28[%c0_263, %c2_264, %c1_265, %c0_266] : memref<1x18x18x96xf32, #tpu.memory_space<vmem>>, vector<1x16x16x96xf32>
    %378 = vector.shape_cast %376 : vector<96xf32> to vector<1x1x1x96xf32>
    %379 = vector.broadcast %378 : vector<1x1x1x96xf32> to vector<1x16x16x96xf32>
    %380 = arith.mulf %379, %377 : vector<1x16x16x96xf32>
    %381 = arith.addf %374, %380 : vector<1x16x16x96xf32>
    %382 = vector.extract_strided_slice %326 {offsets = [8, 0], sizes = [1, 96], strides = [1, 1]} : vector<9x96xf32> to vector<1x96xf32>
    %383 = vector.shape_cast %382 : vector<1x96xf32> to vector<96xf32>
    %c0_267 = arith.constant 0 : index
    %c2_268 = arith.constant 2 : index
    %c2_269 = arith.constant 2 : index
    %c0_270 = arith.constant 0 : index
    %384 = vector.load %arg28[%c0_267, %c2_268, %c2_269, %c0_270] : memref<1x18x18x96xf32, #tpu.memory_space<vmem>>, vector<1x16x16x96xf32>
    %385 = vector.shape_cast %383 : vector<96xf32> to vector<1x1x1x96xf32>
    %386 = vector.broadcast %385 : vector<1x1x1x96xf32> to vector<1x16x16x96xf32>
    %387 = arith.mulf %386, %384 : vector<1x16x16x96xf32>
    %388 = arith.addf %381, %387 : vector<1x16x16x96xf32>
    %c0_271 = arith.constant 0 : index
    %c0_272 = arith.constant 0 : index
    %389 = vector.load %arg24[%c0_271, %c0_272] : memref<1x96xf32, #tpu.memory_space<vmem>>, vector<1x96xf32>
    %390 = vector.shape_cast %389 : vector<1x96xf32> to vector<96xf32>
    %391 = vector.shape_cast %390 : vector<96xf32> to vector<1x1x1x96xf32>
    %392 = vector.broadcast %391 : vector<1x1x1x96xf32> to vector<1x16x16x96xf32>
    %393 = arith.addf %388, %392 : vector<1x16x16x96xf32>
    %cst_273 = arith.constant 0.000000e+00 : f32
    %cst_274 = arith.constant 6.000000e+00 : f32
    %394 = vector.broadcast %cst_273 : f32 to vector<1x16x16x96xf32>
    %395 = arith.maximumf %394, %393 : vector<1x16x16x96xf32>
    %396 = vector.broadcast %cst_274 : f32 to vector<1x16x16x96xf32>
    %397 = arith.minimumf %396, %395 : vector<1x16x16x96xf32>
    %398 = vector.shape_cast %397 : vector<1x16x16x96xf32> to vector<256x96xf32>
    %399 = arith.truncf %398 : vector<256x96xf32> to vector<256x96xbf16>
    %c0_275 = arith.constant 0 : index
    %c0_276 = arith.constant 0 : index
    %400 = vector.load %arg22[%c0_275, %c0_276] : memref<96x32xbf16, #tpu.memory_space<vmem>>, vector<96x32xbf16>
    %cst_277 = arith.constant dense<0.000000e+00> : vector<256x32xf32>
    %401 = tpu.matmul %399, %400, %cst_277 {dimension_numbers = #tpu.dot_dimension_numbers<[1], [0], [0], [1], [0, 0, 1, 1], [], []>} : vector<256x96xbf16>, vector<96x32xbf16>, vector<256x32xf32> -> vector<256x32xf32>
    %c0_278 = arith.constant 0 : index
    %c0_279 = arith.constant 0 : index
    %402 = vector.load %arg25[%c0_278, %c0_279] : memref<1x32xf32, #tpu.memory_space<vmem>>, vector<1x32xf32>
    %403 = vector.shape_cast %402 : vector<1x32xf32> to vector<32xf32>
    %404 = vector.shape_cast %403 : vector<32xf32> to vector<1x32xf32>
    %405 = vector.broadcast %404 : vector<1x32xf32> to vector<256x32xf32>
    %406 = arith.addf %401, %405 : vector<256x32xf32>
    %407 = vector.shape_cast %406 : vector<256x32xf32> to vector<1x16x16x32xf32>
    %c0_280 = arith.constant 0 : index
    %c0_281 = arith.constant 0 : index
    %c0_282 = arith.constant 0 : index
    %c0_283 = arith.constant 0 : index
    %408 = vector.load %arg26[%c0_280, %c0_281, %c0_282, %c0_283] : memref<1x16x16x32xf32, #tpu.memory_space<vmem>>, vector<1x16x16x32xf32>
    tpu.vector_store %arg26[%c0_280, %c0_281, %c0_282, %c0_283], %407 {strides = array<i32>} : memref<1x16x16x32xf32, #tpu.memory_space<vmem>>, vector<1x16x16x32xf32>,
    return
  }
  func.func @transform_0(%arg0: i32) -> (i32, i32, i32, i32) {
    %c0_i32 = arith.constant 0 : i32
    %c0_i32_0 = arith.constant 0 : i32
    %c0_i32_1 = arith.constant 0 : i32
    %c0_i32_2 = arith.constant 0 : i32
    return %arg0, %c0_i32, %c0_i32_0, %c0_i32_1 : i32, i32, i32, i32
  }
  func.func @transform_1(%arg0: i32) -> (i32, i32) {
    %c0_i32 = arith.constant 0 : i32
    %c0_i32_0 = arith.constant 0 : i32
    %c0_i32_1 = arith.constant 0 : i32
    return %c0_i32, %c0_i32_0 : i32, i32
  }
  func.func @transform_2(%arg0: i32) -> (i32, i32) {
    %c0_i32 = arith.constant 0 : i32
    %c0_i32_0 = arith.constant 0 : i32
    %c0_i32_1 = arith.constant 0 : i32
    return %c0_i32, %c0_i32_0 : i32, i32
  }
  func.func @transform_3(%arg0: i32) -> (i32, i32) {
    %c0_i32 = arith.constant 0 : i32
    %c0_i32_0 = arith.constant 0 : i32
    %c0_i32_1 = arith.constant 0 : i32
    return %c0_i32, %c0_i32_0 : i32, i32
  }
  func.func @transform_4(%arg0: i32) -> (i32, i32) {
    %c0_i32 = arith.constant 0 : i32
    %c0_i32_0 = arith.constant 0 : i32
    %c0_i32_1 = arith.constant 0 : i32
    return %c0_i32, %c0_i32_0 : i32, i32
  }
  func.func @transform_5(%arg0: i32) -> (i32, i32) {
    %c0_i32 = arith.constant 0 : i32
    %c0_i32_0 = arith.constant 0 : i32
    %c0_i32_1 = arith.constant 0 : i32
    return %c0_i32, %c0_i32_0 : i32, i32
  }
  func.func @transform_6(%arg0: i32) -> (i32, i32) {
    %c0_i32 = arith.constant 0 : i32
    %c0_i32_0 = arith.constant 0 : i32
    %c0_i32_1 = arith.constant 0 : i32
    return %c0_i32, %c0_i32_0 : i32, i32
  }
  func.func @transform_7(%arg0: i32) -> (i32, i32) {
    %c0_i32 = arith.constant 0 : i32
    %c0_i32_0 = arith.constant 0 : i32
    %c0_i32_1 = arith.constant 0 : i32
    return %c0_i32, %c0_i32_0 : i32, i32
  }
  func.func @transform_8(%arg0: i32) -> (i32, i32) {
    %c0_i32 = arith.constant 0 : i32
    %c0_i32_0 = arith.constant 0 : i32
    %c0_i32_1 = arith.constant 0 : i32
    return %c0_i32, %c0_i32_0 : i32, i32
  }
  func.func @transform_9(%arg0: i32) -> (i32, i32) {
    %c0_i32 = arith.constant 0 : i32
    %c0_i32_0 = arith.constant 0 : i32
    %c0_i32_1 = arith.constant 0 : i32
    return %c0_i32, %c0_i32_0 : i32, i32
  }
  func.func @transform_10(%arg0: i32) -> (i32, i32) {
    %c0_i32 = arith.constant 0 : i32
    %c0_i32_0 = arith.constant 0 : i32
    %c0_i32_1 = arith.constant 0 : i32
    return %c0_i32, %c0_i32_0 : i32, i32
  }
  func.func @transform_11(%arg0: i32) -> (i32, i32) {
    %c0_i32 = arith.constant 0 : i32
    %c0_i32_0 = arith.constant 0 : i32
    %c0_i32_1 = arith.constant 0 : i32
    return %c0_i32, %c0_i32_0 : i32, i32
  }
  func.func @transform_12(%arg0: i32) -> (i32, i32) {
    %c0_i32 = arith.constant 0 : i32
    %c0_i32_0 = arith.constant 0 : i32
    %c0_i32_1 = arith.constant 0 : i32
    return %c0_i32, %c0_i32_0 : i32, i32
  }
  func.func @transform_13(%arg0: i32) -> (i32, i32) {
    %c0_i32 = arith.constant 0 : i32
    %c0_i32_0 = arith.constant 0 : i32
    %c0_i32_1 = arith.constant 0 : i32
    return %c0_i32, %c0_i32_0 : i32, i32
  }
  func.func @transform_14(%arg0: i32) -> (i32, i32) {
    %c0_i32 = arith.constant 0 : i32
    %c0_i32_0 = arith.constant 0 : i32
    %c0_i32_1 = arith.constant 0 : i32
    return %c0_i32, %c0_i32_0 : i32, i32
  }
  func.func @transform_15(%arg0: i32) -> (i32, i32) {
    %c0_i32 = arith.constant 0 : i32
    %c0_i32_0 = arith.constant 0 : i32
    %c0_i32_1 = arith.constant 0 : i32
    return %c0_i32, %c0_i32_0 : i32, i32
  }
  func.func @transform_16(%arg0: i32) -> (i32, i32) {
    %c0_i32 = arith.constant 0 : i32
    %c0_i32_0 = arith.constant 0 : i32
    %c0_i32_1 = arith.constant 0 : i32
    return %c0_i32, %c0_i32_0 : i32, i32
  }
  func.func @transform_17(%arg0: i32) -> (i32, i32) {
    %c0_i32 = arith.constant 0 : i32
    %c0_i32_0 = arith.constant 0 : i32
    %c0_i32_1 = arith.constant 0 : i32
    return %c0_i32, %c0_i32_0 : i32, i32
  }
  func.func @transform_18(%arg0: i32) -> (i32, i32) {
    %c0_i32 = arith.constant 0 : i32
    %c0_i32_0 = arith.constant 0 : i32
    %c0_i32_1 = arith.constant 0 : i32
    return %c0_i32, %c0_i32_0 : i32, i32
  }
  func.func @transform_19(%arg0: i32) -> (i32, i32) {
    %c0_i32 = arith.constant 0 : i32
    %c0_i32_0 = arith.constant 0 : i32
    %c0_i32_1 = arith.constant 0 : i32
    return %c0_i32, %c0_i32_0 : i32, i32
  }
  func.func @transform_20(%arg0: i32) -> (i32, i32) {
    %c0_i32 = arith.constant 0 : i32
    %c0_i32_0 = arith.constant 0 : i32
    %c0_i32_1 = arith.constant 0 : i32
    return %c0_i32, %c0_i32_0 : i32, i32
  }
  func.func @transform_21(%arg0: i32) -> (i32, i32) {
    %c0_i32 = arith.constant 0 : i32
    %c0_i32_0 = arith.constant 0 : i32
    %c0_i32_1 = arith.constant 0 : i32
    return %c0_i32, %c0_i32_0 : i32, i32
  }
  func.func @transform_22(%arg0: i32) -> (i32, i32) {
    %c0_i32 = arith.constant 0 : i32
    %c0_i32_0 = arith.constant 0 : i32
    %c0_i32_1 = arith.constant 0 : i32
    return %c0_i32, %c0_i32_0 : i32, i32
  }
  func.func @transform_23(%arg0: i32) -> (i32, i32) {
    %c0_i32 = arith.constant 0 : i32
    %c0_i32_0 = arith.constant 0 : i32
    %c0_i32_1 = arith.constant 0 : i32
    return %c0_i32, %c0_i32_0 : i32, i32
  }
  func.func @transform_24(%arg0: i32) -> (i32, i32) {
    %c0_i32 = arith.constant 0 : i32
    %c0_i32_0 = arith.constant 0 : i32
    %c0_i32_1 = arith.constant 0 : i32
    return %c0_i32, %c0_i32_0 : i32, i32
  }
  func.func @transform_25(%arg0: i32) -> (i32, i32, i32, i32) {
    %c0_i32 = arith.constant 0 : i32
    %c0_i32_0 = arith.constant 0 : i32
    %c0_i32_1 = arith.constant 0 : i32
    %c0_i32_2 = arith.constant 0 : i32
    return %arg0, %c0_i32, %c0_i32_0, %c0_i32_1 : i32, i32, i32, i32
  }
}

</mosaic_0001>

<bundles_post_ra>
// kernel: tpu_custom_call.1
= control target key start
LH: loop header
LB: loop body
LE: loop exit
PB: predicated region body
PF: predicated region fallthrough
CT: control target
= control target key end

     0   :  { %s13950_s0 = inlined_call_operand.hbm [shape: f32[2,16,16,16], index: 0, kind: input, shape index: {}]   ;;  %s13951_s1 = inlined_call_operand.vmem [shape: bf16[2,12], index: 1, kind: input, shape index: {}]   ;;  %s13952_s2 = inlined_call_operand.vmem [shape: f32[9,12], index: 2, kind: input, shape index: {}]   ;;  %s13953_s3 = inlined_call_operand.vmem [shape: bf16[12,2], index: 3, kind: input, shape index: {}]   ;;  %s13954_s4 = inlined_call_operand.vmem [shape: f32[1,12], index: 4, kind: input, shape index: {}]   ;;  %s13955_s5 = inlined_call_operand.vmem [shape: f32[1,12], index: 5, kind: input, shape index: {}]   ;;  %s13956_s6 = inlined_call_operand.vmem [shape: f32[1,2], index: 6, kind: input, shape index: {}]   ;;  %s13957_s7 = inlined_call_operand.vmem [shape: bf16[4,24], index: 7, kind: input, shape index: {}]   ;;  %s13958_s8 = inlined_call_operand.vmem [shape: f32[9,24], index: 8, kind: input, shape index: {}]   ;;  %s13959_s9 = inlined_call_operand.vmem [shape: bf16[24,4], index: 9, kind: input, shape index: {}]   ;;  %s13960_s10 = inlined_call_operand.vmem [shape: f32[1,24], index: 10, kind: input, shape index: {}]   ;;  %s13961_s11 = inlined_call_operand.vmem [shape: f32[1,24], index: 11, kind: input, shape index: {}]   ;;  %s13962_s12 = inlined_call_operand.vmem [shape: f32[1,4], index: 12, kind: input, shape index: {}]   ;;  %s13963_s13 = inlined_call_operand.vmem [shape: bf16[8,48], index: 13, kind: input, shape index: {}]   ;;  %s13964_s14 = inlined_call_operand.vmem [shape: f32[9,48], index: 14, kind: input, shape index: {}]   ;;  %s13965_s15 = inlined_call_operand.vmem [shape: bf16[48,8], index: 15, kind: input, shape index: {}]   ;;  %s13966_s16 = inlined_call_operand.vmem [shape: f32[1,48], index: 16, kind: input, shape index: {}]   ;;  %s13967_s17 = inlined_call_operand.vmem [shape: f32[1,48], index: 17, kind: input, shape index: {}]   ;;  %s13968_s18 = inlined_call_operand.vmem [shape: f32[1,8], index: 18, kind: input, shape index: {}]   ;;  %s13969_s19 = inlined_call_operand.vmem [shape: bf16[16,96], index: 19, kind: input, shape index: {}]   ;;  %s13970_s20 = inlined_call_operand.vmem [shape: f32[9,96], index: 20, kind: input, shape index: {}]   ;;  %s13971_s21 = inlined_call_operand.vmem [shape: bf16[96,32], index: 21, kind: input, shape index: {}]   ;;  %s13972_s22 = inlined_call_operand.vmem [shape: f32[1,96], index: 22, kind: input, shape index: {}]   ;;  %s13973_s23 = inlined_call_operand.vmem [shape: f32[1,96], index: 23, kind: input, shape index: {}]   ;;  %s13974_s24 = inlined_call_operand.vmem [shape: f32[1,32], index: 24, kind: input, shape index: {}]   ;;  %s13975_s25 = inlined_call_operand.hbm [shape: f32[2,16,16,32], index: 25, kind: output, shape index: {}]  }
   0x1   :  { %13996 = sst [smem:[#allocation17_spill]] %s13950_s0 }
   0x2   :  { %13997 = sst [smem:[#allocation18_spill]] %s13951_s1 }
   0x3   :  { %13998 = sst [smem:[#allocation19_spill]] %s13952_s2 }
   0x4   :  { %13999 = sst [smem:[#allocation20_spill]] %s13953_s3 }
   0x5   :  { %14000 = sst [smem:[#allocation21_spill]] %s13954_s4 }
   0x6   :  { %14001 = sst [smem:[#allocation22_spill]] %s13955_s5 }
   0x7   :  { %14002 = sst [smem:[#allocation23_spill]] %s13956_s6 }
   0x8   :  { %14003 = sst [smem:[#allocation24_spill]] %s13957_s7 }
   0x9   :  { %14004 = sst [smem:[#allocation25_spill]] %s13958_s8 }
   0xa   :  { %14005 = sst [smem:[#allocation26_spill]] %s13959_s9 }
   0xb   :  { %14006 = sst [smem:[#allocation27_spill]] %s13960_s10 }
   0xc   :  { %14007 = sst [smem:[#allocation28_spill]] %s13961_s11 }
   0xd   :  { %14008 = sst [smem:[#allocation29_spill]] %s13974_s24 }
   0xe   :  { %14009 = sst [smem:[#allocation30_spill]] %s13975_s25 }
   0xf   :  { %30 = vsyncpa [#allocation5], 0 }
  0x10   :  { %32 = vsyncpa [#allocation5 + $0x1], 0 }
  0x11   :  { %33 = vsyncpa [#allocation6], 0 }
  0x12   :  { %35 = vsyncpa [#allocation6 + $0x1], 0  ;;  %s9437_s29 = smov 0   ;;  %s9439_s2 = smov 0  }
  0x13   :  { %s9441_s6 = smov 0   ;;  %s9443_s30 = smov 0  }
  0x14 LB: > { %14010 = sst [smem:[#allocation10_spill]] %s9281_s29  ;;  %s9458_s7 = sadd.s32 4294967295, %s9293_s30   ;;  %s9293_s30 = sphi %s9443_s30, %s14048_s30   ;;  %s9289_s6 = sphi %s9441_s6, %s14050_s6   ;;  %s9285_s2 = sphi %s9439_s2, %s14052_s2   ;;  %s9281_s29 = sphi %s9437_s29, %s14051_s29  }
  0x15   : > { %14011 = sst [smem:[#allocation11_spill]] %s9289_s6  ;;  %s8511_s3 = sadd.s32 4294967294, %s9293_s30  }
  0x16   : > { %14012 = sst [smem:[#allocation12_spill]] %s9458_s7  ;;  %s9462_s26 = sadd.s32 1, %s9293_s30  }
  0x17   : > { %14013 = sst [smem:[#allocation13_spill]] %s9462_s26  ;;  %s48_s1 = sadd.s32 1, %s9289_s6 }
  0x18   : > { %s45_s8 = ssub.s32 %s9293_s30, %s9462_s26  ;;  %p55_p0 = scmp.ne.s32.totalorder %s9289_s6, %s9285_s2 }
  0x19   : > { %p46_p1 = scmp.eq.s32.totalorder %s45_s8, 0  ;;  %p56_p2 = scmp.eq.s32.totalorder %s9293_s30, 0 }
  0x1a   : > { %p61_p3 = scmp.ne.s32.totalorder %s9285_s2, %s9281_s29  ;;  %p62_p4 = scmp.eq.s32.totalorder %s9458_s7, 0 }
  0x1b   : > { %s9474_s27 = scalar_select %p46_p1, %s9289_s6, %s48_s1  }
  0x1c   : > { %p9476_p5 = por %p56_p2, %p55_p0  ;;  %p9480_p6 = por %p62_p4, %p61_p3 }
  0x1d   : > { %14014 = sst [smem:[#allocation14_spill]] %s9474_s27  ;;  %p589_p7 = scmp.eq.s32.totalorder %s9458_s7, 1 }
  0x1e   : > { %s14016_s28 = scalar_select %p9480_p6, 1, 0 }
  0x1f   : > { %p595_p8 = scmp.eq.s32.totalorder %s8511_s3, 1  ;;  %p9133_p10 = scmp.lt.s32.totalorder %s9293_s30, 2 }
  0x20   : > { %p9487_p11 = por %p589_p7, %p55_p0  ;;  %s687_s0 = sand.u32 1, %s9289_s6  }
  0x21   : > { %p9491_p12 = por %p595_p8, %p61_p3  ;;  %s8682_s1 = sshll.u32 %s9293_s30, 12 }
  0x22   : > { %s14017_s9 = scalar_select %p9487_p11, 1, 0 }
  0x23   : > { %s14019_s5 = scalar_select %p9491_p12, 1, 0 }
  0x24   : > { %14018 = sst [smem:[#allocation15_spill]] %s14017_s9  ;;  %s8514_s8 = sshll.u32 %s687_s0, 8 }
  0x25   : > { %14020 = sst [smem:[#allocation16_spill]] %s14019_s5  ;;  %s691_s3 = scalar_lea.vmem [#allocation4], %s8514_s8 }
  0x26   : > { %s14021_s29 = sld [smem:[#allocation17_spill]]  ;;  %s698_s7 = sshll.u32 %s691_s3, 4  ;;  %s9508_s7 = int_to_ptr.vmem [resolvable:$true] %s698_s7 }
  0x27   : > { %p9504_p13 = pnand %p9133_p10, %p9476_p5  ;;  %s9510_s6 = scalar_lea.sflag [#allocation5], %s687_s0 }
  0x29   : > { %p9203_p1 = pneg %p9504_p13 }
  0x2c   : > { %s14022_s25 = smov %s14021_s29  ;;  %s9500_s24 = scalar_lea.hbm %s14021_s29, %s8682_s1 }
  0x2d   : > { %s9201_s5 = scalar_lea.hbm %s9500_s24, 4096  ;;  %s9206_s27 = scalar_lea.hbm %s14022_s25, 8192 }
  0x2e   : > { %p9202_p0 = scmp.ne.s32.totalorder %s9500_s24, %s9201_s5  ;;  %p9207_p4 = scmp.lt.s32.totalorder %s9500_s24, %s14022_s25 }
  0x2f   : > { %p9208_p5 = scmp.lt.s32.totalorder %s9206_s27, %s9201_s5 }
  0x30   : > { %p9204_p2 = pnand %p9203_p1, %p9202_p0 }
  0x31   : > { %p9209_p7 = por %p9208_p5, %p9207_p4 }
  0x32   : > { %p9205_p3 = pneg %p9204_p2 }
  0x34   : > { %p9210_p8 = pnand %p9209_p7, %p9205_p3 }
  0x36   : > { %9213 = shalt.err (!%p9210_p8)
}
  0x37   : > { %s9214_s0 = scalar_lea.vmem %s9508_s7, 4096  ;;  %s9295_s8 = smov [#allocation4]  }
  0x38   : > { %p9215_p10 = scmp.ne.s32.totalorder %s9508_s7, %s9214_s0  ;;  %s9219_s3 = sshll.u32 %s9295_s8, 4  ;;  %s9220_s3 = int_to_ptr.vmem [resolvable:$false] %s9219_s3 }
  0x39   : > { %s9221_s29 = scalar_lea.vmem %s9220_s3, 8192  ;;  %p9222_p2 = scmp.lt.s32.totalorder %s9508_s7, %s9220_s3 }
  0x3a   : > { %p9217_p9 = pnand %p9215_p10, %p9203_p1  ;;  %p9223_p12 = scmp.lt.s32.totalorder %s9221_s29, %s9214_s0 }
  0x3c   : > { %p9218_p0 = pneg %p9217_p9  ;;  %p9224_p11 = por %p9223_p12, %p9222_p2 }
  0x3e   : > { %p9225_p6 = pnand %p9224_p11, %p9218_p0 }
  0x40   : > { %9228 = shalt.err (!%p9225_p6)
}
  0x41   : > { %s9296_s5 = smov 128   ;;  %s9297_s26 = smov 8  }
  0x42   : > { %9128 = dma.hbm_to_vmem [thread:$0]  (!%p9504_p13), %s9500_s24, 4096, %s9508_s7, %s9510_s6, %s9296_s5, %s9296_s5, %s9297_s26  }
  0x43   : > { %p8517_p9 = scmp.ge.s32.totalorder %s9293_s30, 1  ;;  %p706_p1 = scmp.lt.s32.totalorder %s9293_s30, 3 }
  0x45   : > { %p707_p3 = pnand %p8517_p9, %p706_p1 }
  0x46   : > { %s9534_s27 = sand.u32 (!%p707_p3), 1, %s9285_s2   ;;  %p14024_p6 = scmp.ne.s32.totalorder (!%p707_p3), %s14016_s28, 0 }
  0x47   : > { %710 = sbr.rel (%p707_p3) target bundleno = 2864 (0xb30), region = 120  ;;  %s8518_s4 = sshll.u32 (!%p707_p3), %s9534_s27, 8 }
  0x48   : > { %s713_s1 = scalar_lea.sflag (!%p707_p3), [#allocation5], %s9534_s27  ;;  %s9540_s0 = scalar_lea.vmem (!%p707_p3), [#allocation4], %s8518_s4 }
  0x4c   : > { %9272 = dma.done.wait (%p14024_p6), %s713_s1, 4096  }
  0x4d   : > { %9274 = vsyncadd (%p14024_p6), %s713_s1, 4294963200  ;;  %vm862_vm0 = vcmask 130048   ;;  %v830_v0 = vld [vmem:[%s9540_s0] sm:$0xff]  ;;  %v831_v1 = vld [vmem:[%s9540_s0 + $0x8] sm:$0xff]  ;;  %s9298_s24 = smov 114   ;;  %vm1048_vm1 = vcmask 1040384  }
  0x4e   : > { %v832_v2 = vld [vmem:[%s9540_s0 + $0x10] sm:$0xff]  ;;  %863 = vst.msk [vmem:[#allocation2] sm:$0xff] %vm862_vm0, %v830_v0  ;;  %864 = vst.msk [vmem:[#allocation2 + $0x8] sm:$0xff] %vm862_vm0, %v831_v1  ;;  %v833_v3 = vld [vmem:[%s9540_s0 + $0x18] sm:$0xff]  ;;  %s14025_s28 = sld [smem:[#allocation18_spill]]  ;;  %vm999_vm2 = vcmask 15360  }
  0x4f   : > { %865 = vst.msk [vmem:[#allocation2 + $0x10] sm:$0xff] %vm862_vm0, %v832_v2  ;;  %v834_v4 = vld [vmem:[%s9540_s0 + $0x20] sm:$0xff]  ;;  %v835_v5 = vld [vmem:[%s9540_s0 + $0x28] sm:$0xff]  ;;  %866 = vst.msk [vmem:[#allocation2 + $0x18] sm:$0xff] %vm862_vm0, %v833_v3  ;;  %vm784_vm3 = vcmask 785408   ;;  %vm793_vm4 = vcmask 778240  }
  0x50   : > { %867 = vst.msk [vmem:[#allocation2 + $0x20] sm:$0xff] %vm862_vm0, %v834_v4  ;;  %868 = vst.msk [vmem:[#allocation2 + $0x28] sm:$0xff] %vm862_vm0, %v835_v5  ;;  %v836_v6 = vld [vmem:[%s9540_s0 + $0x30] sm:$0xff]  ;;  %v837_v7 = vld [vmem:[%s9540_s0 + $0x38] sm:$0xff]  ;;  %vm787_vm5 = vcmask 779264   ;;  %s14026_s3 = sld [smem:[#allocation20_spill]] }
  0x51   : > { %v838_v8 = vld [vmem:[%s9540_s0 + $0x40] sm:$0xff]  ;;  %869 = vst.msk [vmem:[#allocation2 + $0x30] sm:$0xff] %vm862_vm0, %v836_v6  ;;  %870 = vst.msk [vmem:[#allocation2 + $0x38] sm:$0xff] %vm862_vm0, %v837_v7  ;;  %v839_v9 = vld [vmem:[%s9540_s0 + $0x48] sm:$0xff]  ;;  %vm2363_vm6 = vcmask 1045504   ;;  %s14027_s26 = sld [smem:[#allocation19_spill]] }
  0x52   : > { %871 = vst.msk [vmem:[#allocation2 + $0x40] sm:$0xff] %vm862_vm0, %v838_v8  ;;  %v840_v10 = vld [vmem:[%s9540_s0 + $0x50] sm:$0xff]  ;;  %v841_v11 = vld [vmem:[%s9540_s0 + $0x58] sm:$0xff]  ;;  %872 = vst.msk [vmem:[#allocation2 + $0x48] sm:$0xff] %vm862_vm0, %v839_v9  ;;  %vm1278_vm7 = vcmask 97280   ;;  %s14029_s8 = sld [smem:[#allocation22_spill]] }
  0x53   : > { %873 = vst.msk [vmem:[#allocation2 + $0x50] sm:$0xff] %vm862_vm0, %v840_v10  ;;  %874 = vst.msk [vmem:[#allocation2 + $0x58] sm:$0xff] %vm862_vm0, %v841_v11  ;;  %v842_v12 = vld [vmem:[%s9540_s0 + $0x60] sm:$0xff]  ;;  %v843_v13 = vld [vmem:[%s9540_s0 + $0x68] sm:$0xff]  ;;  %s14030_s6 = sld [smem:[#allocation23_spill]]  ;;  %s9300_s7 = smov 14  }
  0x54   : > { %v844_v14 = vld [vmem:[%s9540_s0 + $0x70] sm:$0xff]  ;;  %875 = vst.msk [vmem:[#allocation2 + $0x60] sm:$0xff] %vm862_vm0, %v842_v12  ;;  %876 = vst.msk [vmem:[#allocation2 + $0x68] sm:$0xff] %vm862_vm0, %v843_v13  ;;  %v845_v15 = vld [vmem:[%s9540_s0 + $0x78] sm:$0xff]  ;;  %vm2816_vm8 = vcmask 130160   ;;  %vm3002_vm9 = vcmask 1041408  }
  0x55   : > { %877 = vst.msk [vmem:[#allocation2 + $0x70] sm:$0xff] %vm862_vm0, %v844_v14  ;;  %v846_v16 = vld [vmem:[%s9540_s0 + $0x80] sm:$0xff]  ;;  %v847_v17 = vld [vmem:[%s9540_s0 + $0x88] sm:$0xff]  ;;  %878 = vst.msk [vmem:[#allocation2 + $0x78] sm:$0xff] %vm862_vm0, %v845_v15  ;;  %s9301_s29 = smov 116   ;;  %vm2953_vm10 = vcmask 31744  }
  0x56   : > { %879 = vst.msk [vmem:[#allocation2 + $0x80] sm:$0xff] %vm862_vm0, %v846_v16  ;;  %880 = vst.msk [vmem:[#allocation2 + $0x88] sm:$0xff] %vm862_vm0, %v847_v17  ;;  %v848_v18 = vld [vmem:[%s9540_s0 + $0x90] sm:$0xff]  ;;  %v849_v19 = vld [vmem:[%s9540_s0 + $0x98] sm:$0xff]  ;;  %vm4320_vm11 = vcmask 1043456   ;;  %s14033_s10 = sld [smem:[#allocation27_spill]] }
  0x57   : > { %v850_v20 = vld [vmem:[%s9540_s0 + $0xa0] sm:$0xff]  ;;  %881 = vst.msk [vmem:[#allocation2 + $0x90] sm:$0xff] %vm862_vm0, %v848_v18  ;;  %882 = vst.msk [vmem:[#allocation2 + $0x98] sm:$0xff] %vm862_vm0, %v849_v19  ;;  %v851_v21 = vld [vmem:[%s9540_s0 + $0xa8] sm:$0xff]  ;;  %vm3231_vm12 = vcmask 195584   ;;  %s14036_s11 = sld [smem:[#allocation28_spill]] }
  0x58   : > { %883 = vst.msk [vmem:[#allocation2 + $0xa0] sm:$0xff] %vm862_vm0, %v850_v20  ;;  %v852_v22 = vld [vmem:[%s9540_s0 + $0xb0] sm:$0xff]  ;;  %v853_v23 = vld [vmem:[%s9540_s0 + $0xb8] sm:$0xff]  ;;  %v9595_v26 = vld [vmem:[#allocation2 + $0x10] sm:$0xff]  ;;  %vm4773_vm13 = vcmask 130144   ;;  %vm4910_vm14 = vcmask 64512  }
  0x59   : > { %v9591_v24 = vld [vmem:[#allocation2] sm:$0xff]  ;;  %v9593_v25 = vld [vmem:[#allocation2 + $0x8] sm:$0xff]  ;;  %884 = vst.msk [vmem:[#allocation2 + $0xa8] sm:$0xff] %vm862_vm0, %v851_v21  ;;  %885 = vst.msk [vmem:[#allocation2 + $0xb0] sm:$0xff] %vm862_vm0, %v852_v22  ;;  %vm5187_vm15 = vcmask 392192  }
  0x5a   : > { %886 = vst.msk [vmem:[#allocation2 + $0xb8] sm:$0xff] %vm862_vm0, %v853_v23  ;;  %v927_v27 = vpack.c.bf16 %v9593_v25, %v9591_v24  ;;  %v9602_v28 = vld [vmem:[#allocation2 + $0x18] sm:$0xff]  ;;  %v9604_v29 = vld [vmem:[#allocation2 + $0x20] sm:$0xff]  ;;  %v9606_v30 = vld [vmem:[#allocation2 + $0x28] sm:$0xff] }
  0x5b   : > { %v929_v31 = vpack.c.bf16 %v9606_v30, %v9604_v29  ;;  %v9610_v32 = vld [vmem:[#allocation2 + $0x30] sm:$0xff]  ;;  %v9612_v33 = vld [vmem:[#allocation2 + $0x38] sm:$0xff]  ;;  %v928_v34 = vpack.c.bf16 %v9602_v28, %v9595_v26  ;;  %v9620_v36 = vld [vmem:[#allocation2 + $0x40] sm:$0xff] }
  0x5c   : > { %967 = vrot.lane.b32.xlu0 %v927_v27, %s9298_s24  ;;  %v930_v35 = vpack.c.bf16 %v9612_v33, %v9610_v32  ;;  %v9622_v37 = vld [vmem:[#allocation2 + $0x48] sm:$0xff]  ;;  %v9624_v38 = vld [vmem:[#allocation2 + $0x50] sm:$0xff]  ;;  %v9626_v39 = vld [vmem:[#allocation2 + $0x58] sm:$0xff] }
  0x5d   : > { %971 = vrot.lane.b32.xlu1 %v929_v31, %s9298_s24  ;;  %v9628_v40 = vld [vmem:[#allocation2 + $0x60] sm:$0xff]  ;;  %v931_v41 = vpack.c.bf16 %v9622_v37, %v9620_v36  ;;  %v9633_v42 = vld [vmem:[#allocation2 + $0x68] sm:$0xff]  ;;  %v9635_v43 = vld [vmem:[#allocation2 + $0x70] sm:$0xff]  ;;  %v932_v45 = vpack.c.bf16 %v9626_v39, %v9624_v38 }
  0x5e   : > { %v9637_v44 = vld [vmem:[#allocation2 + $0x78] sm:$0xff]  ;;  %v854_v46 = vld [vmem:[%s9540_s0 + $0xc0] sm:$0xff]  ;;  %v856_v48 = vld [vmem:[%s9540_s0 + $0xd0] sm:$0xff]  ;;  %v933_v57 = vpack.c.bf16 %v9633_v42, %v9628_v40 }
  0x5f   : > { %v855_v47 = vld [vmem:[%s9540_s0 + $0xc8] sm:$0xff]  ;;  %887 = vst.msk [vmem:[#allocation2 + $0xc0] sm:$0xff] %vm862_vm0, %v854_v46  ;;  %v857_v49 = vld [vmem:[%s9540_s0 + $0xd8] sm:$0xff]  ;;  %889 = vst.msk [vmem:[#allocation2 + $0xd0] sm:$0xff] %vm862_vm0, %v856_v48  ;;  %v934_v61 = vpack.c.bf16 %v9637_v44, %v9635_v43 }
  0x60   : > { %969 = vrot.lane.b32.xlu0 %v928_v34, %s9298_s24  ;;  %888 = vst.msk [vmem:[#allocation2 + $0xc8] sm:$0xff] %vm862_vm0, %v855_v47  ;;  %v858_v50 = vld [vmem:[%s9540_s0 + $0xe0] sm:$0xff]  ;;  %v859_v51 = vld [vmem:[%s9540_s0 + $0xe8] sm:$0xff]  ;;  %v9651_v52 = vld [vmem:[#allocation2 + $0x80] sm:$0xff]  ;;  %v9299_v34 = vmov 0.0  }
  0x61   : > { %973 = vrot.lane.b32.xlu1 %v930_v35, %s9298_s24  ;;  %v9653_v53 = vld [vmem:[#allocation2 + $0x88] sm:$0xff]  ;;  %890 = vst.msk [vmem:[#allocation2 + $0xd8] sm:$0xff] %vm862_vm0, %v857_v49  ;;  %891 = vst.msk [vmem:[#allocation2 + $0xe0] sm:$0xff] %vm862_vm0, %v858_v50  ;;  %v860_v54 = vld [vmem:[%s9540_s0 + $0xf0] sm:$0xff] }
  0x62   : > { %892 = vst.msk [vmem:[#allocation2 + $0xe8] sm:$0xff] %vm862_vm0, %v859_v51  ;;  %v861_v55 = vld [vmem:[%s9540_s0 + $0xf8] sm:$0xff]  ;;  %v943_v56 = vld [vmem:[%s14025_s28] sm:$0x1]  ;;  %v913_v58 = vld [vmem:[#allocation2 + $0x90] sm:$0xff]  ;;  %v935_v62 = vpack.c.bf16 %v9653_v53, %v9651_v52  ;;  %s14032_s0 = sld [smem:[#allocation26_spill]] }
  0x63   : > { %v914_v59 = vld [vmem:[#allocation2 + $0x98] sm:$0xff]  ;;  %893 = vst.msk [vmem:[#allocation2 + $0xf0] sm:$0xff] %vm862_vm0, %v860_v54  ;;  %894 = vst.msk [vmem:[#allocation2 + $0xf8] sm:$0xff] %vm862_vm0, %v861_v55  ;;  %9116 = vmatprep.subr.msk.bf16.mxu0 %vm1048_vm1, %v943_v56  ;;  %v1050_v60 = vsel %vm1048_vm1, %v943_v56, 0  ;;  %v915_v0 = vld [vmem:[#allocation2 + $0xa0] sm:$0xff]  ;;  %s9302_s28 = smov 12  }
  0x64   : > { %975 = vrot.lane.b32.xlu0 %v931_v41, %s9298_s24  ;;  %8829 = vmatpush3.bf16.msra.mxu0 %v1050_v60  ;;  %v936_v63 = vpack.c.bf16 %v914_v59, %v913_v58  ;;  %v916_v1 = vld [vmem:[#allocation2 + $0xa8] sm:$0xff]  ;;  %v917_v2 = vld [vmem:[#allocation2 + $0xb0] sm:$0xff]  ;;  %v918_v3 = vld [vmem:[#allocation2 + $0xb8] sm:$0xff]  ;;  %785 = vst.msk [vmem:[#allocation3] sm:$0xff] %vm784_vm3, %v9299_v34  ;;  %vm6737_vm1 = vcmask 130112  }
  0x65   : > { %977 = vrot.lane.b32.xlu1 %v932_v45, %s9298_s24  ;;  %v937_v6 = vpack.c.bf16 %v916_v1, %v915_v0  ;;  %v938_v9 = vpack.c.bf16 %v918_v3, %v917_v2  ;;  %786 = vst.msk [vmem:[#allocation3 + $0x8] sm:$0xff] %vm784_vm3, %v9299_v34  ;;  %790 = vst.msk [vmem:[#allocation3 + $0x198] sm:$0xff] %vm784_vm3, %v9299_v34  ;;  %v9177_v35 = vld [vmem:[%s14026_s3] sm:$0x3f]   ;;  %s14031_s3 = sld [smem:[#allocation24_spill]] }
  0x66   : > { %v919_v4 = vld [vmem:[#allocation2 + $0xc0] sm:$0xff]  ;;  %v921_v7 = vld [vmem:[#allocation2 + $0xd0] sm:$0xff]  ;;  %791 = vst.msk [vmem:[#allocation3 + $0x1a0] sm:$0xff] %vm784_vm3, %v9299_v34  ;;  %9117 = vmatprep.subr.msk.bf16.mxu1 %vm2363_vm6, %v9177_v35 }
  0x67   : > { %v920_v5 = vld [vmem:[#allocation2 + $0xc8] sm:$0xff]  ;;  %794 = vst.msk [vmem:[#allocation3] sm:$0x1] %vm793_vm4, %v9299_v34  ;;  %795 = vst.msk [vmem:[#allocation3 + $0x18] sm:$0x1] %vm793_vm4, %v9299_v34 }
  0x68   : > { %979 = vrot.lane.b32.xlu0 %v933_v57, %s9298_s24  ;;  %v922_v8 = vld [vmem:[#allocation2 + $0xd8] sm:$0xff]  ;;  %v939_v10 = vpack.c.bf16 %v920_v5, %v919_v4  ;;  %v923_v12 = vld [vmem:[#allocation2 + $0xe0] sm:$0xff]  ;;  %796 = vst.msk [vmem:[#allocation3 + $0x30] sm:$0x1] %vm793_vm4, %v9299_v34  ;;  %813 = vst.msk [vmem:[#allocation3 + $0x29] sm:$0x1] %vm793_vm4, %v9299_v34 }
  0x69   : > { %981 = vrot.lane.b32.xlu1 %v934_v61, %s9298_s24  ;;  %v940_v11 = vpack.c.bf16 %v922_v8, %v921_v7  ;;  %v924_v13 = vld [vmem:[#allocation2 + $0xe8] sm:$0xff]  ;;  %814 = vst.msk [vmem:[#allocation3 + $0x41] sm:$0x1] %vm793_vm4, %v9299_v34  ;;  %797 = vst.msk [vmem:[#allocation3 + $0x48] sm:$0x1] %vm793_vm4, %v9299_v34 }
  0x6a   : > { %v925_v14 = vld [vmem:[#allocation2 + $0xf0] sm:$0xff]  ;;  %v926_v15 = vld [vmem:[#allocation2 + $0xf8] sm:$0xff]  ;;  %v941_v16 = vpack.c.bf16 %v924_v13, %v923_v12  ;;  %798 = vst.msk [vmem:[#allocation3 + $0x60] sm:$0x1] %vm793_vm4, %v9299_v34  ;;  %799 = vst.msk [vmem:[#allocation3 + $0x78] sm:$0x1] %vm793_vm4, %v9299_v34 }
  0x6b   : > { %v942_v17 = vpack.c.bf16 %v926_v15, %v925_v14  ;;  %800 = vst.msk [vmem:[#allocation3 + $0x90] sm:$0x1] %vm793_vm4, %v9299_v34  ;;  %801 = vst.msk [vmem:[#allocation3 + $0xa8] sm:$0x1] %vm793_vm4, %v9299_v34 }
  0x6c   : > { %983 = vrot.lane.b32.xlu0 %v935_v62, %s9298_s24  ;;  %802 = vst.msk [vmem:[#allocation3 + $0xc0] sm:$0x1] %vm793_vm4, %v9299_v34  ;;  %803 = vst.msk [vmem:[#allocation3 + $0xd8] sm:$0x1] %vm793_vm4, %v9299_v34  ;;  %v1381_v49 = vld [vmem:[#allocation3 + $0x1] sm:$0xff] }
  0x6d   : > { %985 = vrot.lane.b32.xlu1 %v936_v63, %s9298_s24  ;;  %804 = vst.msk [vmem:[#allocation3 + $0xf0] sm:$0x1] %vm793_vm4, %v9299_v34  ;;  %805 = vst.msk [vmem:[#allocation3 + $0x108] sm:$0x1] %vm793_vm4, %v9299_v34 }
  0x6e   : > { %806 = vst.msk [vmem:[#allocation3 + $0x120] sm:$0x1] %vm793_vm4, %v9299_v34  ;;  %807 = vst.msk [vmem:[#allocation3 + $0x138] sm:$0x1] %vm793_vm4, %v9299_v34  ;;  %v1313_v46 = vld [vmem:[#allocation3] sm:$0xff] }
  0x6f   : > { %808 = vst.msk [vmem:[#allocation3 + $0x150] sm:$0x1] %vm793_vm4, %v9299_v34  ;;  %809 = vst.msk [vmem:[#allocation3 + $0x168] sm:$0x1] %vm793_vm4, %v9299_v34 }
  0x70   : > { %987 = vrot.lane.b32.xlu0 %v937_v6, %s9298_s24  ;;  %810 = vst.msk [vmem:[#allocation3 + $0x180] sm:$0x1] %vm793_vm4, %v9299_v34  ;;  %815 = vst.msk [vmem:[#allocation3 + $0x59] sm:$0x1] %vm793_vm4, %v9299_v34 }
  0x71   : > { %989 = vrot.lane.b32.xlu1 %v938_v9, %s9298_s24  ;;  %816 = vst.msk [vmem:[#allocation3 + $0x71] sm:$0x1] %vm793_vm4, %v9299_v34  ;;  %817 = vst.msk [vmem:[#allocation3 + $0x89] sm:$0x1] %vm793_vm4, %v9299_v34 }
  0x72   : > { %818 = vst.msk [vmem:[#allocation3 + $0xa1] sm:$0x1] %vm793_vm4, %v9299_v34  ;;  %819 = vst.msk [vmem:[#allocation3 + $0xb9] sm:$0x1] %vm793_vm4, %v9299_v34 }
  0x73   : > { %820 = vst.msk [vmem:[#allocation3 + $0xd1] sm:$0x1] %vm793_vm4, %v9299_v34  ;;  %821 = vst.msk [vmem:[#allocation3 + $0xe9] sm:$0x1] %vm793_vm4, %v9299_v34 }
  0x74   : > { %991 = vrot.lane.b32.xlu0 %v939_v10, %s9298_s24  ;;  %822 = vst.msk [vmem:[#allocation3 + $0x101] sm:$0x1] %vm793_vm4, %v9299_v34  ;;  %823 = vst.msk [vmem:[#allocation3 + $0x119] sm:$0x1] %vm793_vm4, %v9299_v34 }
  0x75   : > { %993 = vrot.lane.b32.xlu1 %v940_v11, %s9298_s24  ;;  %824 = vst.msk [vmem:[#allocation3 + $0x131] sm:$0x1] %vm793_vm4, %v9299_v34  ;;  %825 = vst.msk [vmem:[#allocation3 + $0x149] sm:$0x1] %vm793_vm4, %v9299_v34 }
  0x76   : > { %826 = vst.msk [vmem:[#allocation3 + $0x161] sm:$0x1] %vm793_vm4, %v9299_v34  ;;  %827 = vst.msk [vmem:[#allocation3 + $0x179] sm:$0x1] %vm793_vm4, %v9299_v34 }
  0x77   : > { %828 = vst.msk [vmem:[#allocation3 + $0x191] sm:$0x1] %vm793_vm4, %v9299_v34  ;;  %811 = vst.msk [vmem:[#allocation3 + $0x198] sm:$0x1] %vm793_vm4, %v9299_v34 }
  0x78   : > { %995 = vrot.lane.b32.xlu0 %v941_v16, %s9298_s24  ;;  %788 = vst.msk [vmem:[#allocation3 + $0x10] sm:$0x3] %vm787_vm5, %v9299_v34  ;;  %792 = vst.msk [vmem:[#allocation3 + $0x1a8] sm:$0x3] %vm787_vm5, %v9299_v34 }
  0x79   : > { %997 = vrot.lane.b32.xlu1 %v942_v17, %s9298_s24  ;;  %812 = vst.msk [vmem:[#allocation3 + $0x11] sm:$0x1] %vm793_vm4, %v9299_v34  ;;  %829 = vst.msk [vmem:[#allocation3 + $0x1a9] sm:$0x1] %vm793_vm4, %v9299_v34 }
  0x7c   : > { %2560 = vrot.lane.b32.xlu0 %v9591_v24, %s9298_s24 }
  0x7d   : > { %2562 = vrot.lane.b32.xlu1 %v9593_v25, %s9298_s24 }
  0x7f   : > { %v1382_v54 = vld [vmem:[#allocation3 + $0x9] sm:$0xff] }
  0x80   : > { %2564 = vrot.lane.b32.xlu0 %v9595_v26, %s9298_s24 }
  0x81   : > { %2566 = vrot.lane.b32.xlu1 %v9602_v28, %s9298_s24 }
  0x84   : > { %2568 = vrot.lane.b32.xlu0 %v9604_v29, %s9298_s24 }
  0x85   : > { %2570 = vrot.lane.b32.xlu1 %v9606_v30, %s9298_s24 }
  0x88   : > { %2572 = vrot.lane.b32.xlu0 %v9610_v32, %s9298_s24 }
  0x89   : > { %2574 = vrot.lane.b32.xlu1 %v9612_v33, %s9298_s24 }
  0x8c   : > { %2576 = vrot.lane.b32.xlu0 %v9620_v36, %s9298_s24  ;;  %v2365_v36 = vsel %vm2363_vm6, %v9177_v35, 0 }
  0x8d   : > { %2578 = vrot.lane.b32.xlu1 %v9622_v37, %s9298_s24  ;;  %8863 = vmatpush3.bf16.msra.mxu1 %v2365_v36  ;;  %v1345_v37 = vlaneseq }
  0x90   : > { %2580 = vrot.lane.b32.xlu0 %v9624_v38, %s9298_s24  ;;  %v1346_v38 = vshrl.u32 %v1345_v37, 7 }
  0x91   : > { %2582 = vrot.lane.b32.xlu1 %v9626_v39, %s9298_s24 }
  0x92   : > { %v9794_v39 = vsub.s32 0, %v1346_v38  ;;  %v9801_v41 = vsub.s32 1, %v1346_v38  ;;  %v9817_v50 = vsub.s32 2, %v1346_v38  ;;  %v9831_v6 = vsub.s32 6, %v1346_v38 }
  0x93   : > { %v9835_v9 = vsub.s32 4, %v1346_v38  ;;  %v9837_v10 = vsub.s32 7, %v1346_v38 }
  0x94   : > { %2584 = vrot.lane.b32.xlu0 %v9628_v40, %s9298_s24  ;;  %v9799_v40 = vld [vmem:[%s14027_s26] sm:$0xff] }
  0x95   : > { %2586 = vrot.lane.b32.xlu1 %v9633_v42, %s9298_s24  ;;  %v9815_v47 = vrot.slane %v9799_v40, %v9801_v41 }
  0x97   : > { %v1417_v60 = vmul.f32 %v9815_v47, %v1381_v49  ;;  %v1418_v63 = vmul.f32 %v9815_v47, %v1382_v54 }
  0x98   : > { %2588 = vrot.lane.b32.xlu0 %v9635_v43, %s9298_s24 }
  0x99   : > { %2590 = vrot.lane.b32.xlu1 %v9637_v44, %s9298_s24  ;;  %v9810_v44 = vrot.slane %v9799_v40, %v9794_v39 }
  0x9b   : > { %v1349_v56 = vmul.f32 %v9810_v44, %v1313_v46 }
  0x9c   : > { %2592 = vrot.lane.b32.xlu0 %v9651_v52, %s9298_s24 }
  0x9d   : > { %2594 = vrot.lane.b32.xlu1 %v9653_v53, %s9298_s24  ;;  %v1314_v53 = vld [vmem:[#allocation3 + $0x8] sm:$0xff] }
  0x9e   : > { %v1350_v62 = vmul.f32 %v9810_v44, %v1314_v53 }
  0xa0   : > { %2596 = vrot.lane.b32.xlu0 %v913_v58, %s9298_s24  ;;  %v1450_v16 = vadd.f32 %v1418_v63, %v1350_v62 }
  0xa1   : > { %2598 = vrot.lane.b32.xlu1 %v914_v59, %s9298_s24 }
  0xa4   : > { %2600 = vrot.lane.b32.xlu0 %v915_v0, %s9298_s24  ;;  %v9827_v0 = vrot.slane %v9799_v40, %v9817_v50 }
  0xa5   : > { %2602 = vrot.lane.b32.xlu1 %v916_v1, %s9298_s24 }
  0xa8   : > { %2604 = vrot.lane.b32.xlu0 %v917_v2, %s9298_s24 }
  0xa9   : > { %2606 = vrot.lane.b32.xlu1 %v918_v3, %s9298_s24 }
  0xac   : > { %2608 = vrot.lane.b32.xlu0 %v919_v4, %s9298_s24  ;;  %v1481_v4 = vld [vmem:[#allocation3 + $0x2] sm:$0xff] }
  0xad   : > { %2610 = vrot.lane.b32.xlu1 %v920_v5, %s9298_s24  ;;  %v1482_v5 = vld [vmem:[#allocation3 + $0xa] sm:$0xff]  ;;  %v1517_v17 = vmul.f32 %v9827_v0, %v1481_v4 }
  0xb0   : > { %2612 = vrot.lane.b32.xlu0 %v921_v7, %s9298_s24 }
  0xb1   : > { %2614 = vrot.lane.b32.xlu1 %v922_v8, %s9298_s24  ;;  %v9833_v8 = vsub.s32 3, %v1346_v38 }
  0xb4   : > { %2616 = vrot.lane.b32.xlu0 %v923_v12, %s9298_s24 }
  0xb5   : > { %2618 = vrot.lane.b32.xlu1 %v924_v13, %s9298_s24 }
  0xb8   : > { %2620 = vrot.lane.b32.xlu0 %v925_v14, %s9298_s24  ;;  %v1449_v14 = vadd.f32 %v1417_v60, %v1349_v56 }
  0xb9   : > { %2622 = vrot.lane.b32.xlu1 %v926_v15, %s9298_s24  ;;  %s14028_s24 = sld [smem:[#allocation21_spill]] }
  0xbf   : > { %v9806_v42 = vld [vmem:[%s14028_s24] ss:$0 sm:$0xff]  ;;  %s14037_s24 = sld [smem:[#allocation29_spill]] }
  0xce   : > { %v968_v18 = vpop.permute.xlu0 %967 }
  0xcf   : > { %8830 = vmatprep.mubr.msk.bf16.mxu0 %vm999_vm2, %v968_v18  ;;  %v972_v19 = vpop.permute.xlu1 %971  ;;  %v1518_v18 = vmul.f32 %v9827_v0, %v1482_v5 }
  0xd2   : > { %v970_v20 = vpop.permute.xlu0 %969 }
  0xd3   : > { %8831 = vmatmul.mubr.msk.bf16.vlgmr.msra.gmra.mxu0 %vm999_vm2, %v970_v20  ;;  %v974_v21 = vpop.permute.xlu1 %973 }
  0xd4   : > { %8834 = vmatprep.mubr.msk.bf16.mxu0 %vm999_vm2, %v972_v19  ;;  %v9843_v19 = vsub.s32 5, %v1346_v38 }
  0xd6   : > { %v976_v22 = vpop.permute.xlu0 %975  ;;  %v9867_v34 = vrot.slane %v9799_v40, %v9843_v19 }
  0xd7   : > { %v978_v23 = vpop.permute.xlu1 %977 }
  0xda   : > { %v980_v24 = vpop.permute.xlu0 %979 }
  0xdb   : > { %8835 = vmatmul.mubr.msk.bf16.gmra.mxu0 %vm999_vm2, %v974_v21  ;;  %v982_v25 = vpop.permute.xlu1 %981 }
  0xdc   : > { %8838 = vmatprep.mubr.msk.bf16.mxu0 %vm999_vm2, %v976_v22 }
  0xde   : > { %v984_v26 = vpop.permute.xlu0 %983 }
  0xdf   : > { %v986_v27 = vpop.permute.xlu1 %985 }
  0xe2   : > { %v988_v28 = vpop.permute.xlu0 %987 }
  0xe3   : > { %8839 = vmatmul.mubr.msk.bf16.gmra.mxu0 %vm999_vm2, %v978_v23  ;;  %v990_v29 = vpop.permute.xlu1 %989  ;;  %v9849_v23 = vrot.slane %v9799_v40, %v9831_v6 }
  0xe4   : > { %8842 = vmatprep.mubr.msk.bf16.mxu0 %vm999_vm2, %v980_v24 }
  0xe6   : > { %v992_v30 = vpop.permute.xlu0 %991 }
  0xe7   : > { %v994_v31 = vpop.permute.xlu1 %993 }
  0xea   : > { %v996_v32 = vpop.permute.xlu0 %995 }
  0xeb   : > { %8843 = vmatmul.mubr.msk.bf16.gmra.mxu0 %vm999_vm2, %v982_v25  ;;  %v998_v33 = vpop.permute.xlu1 %997  ;;  %v9853_v25 = vrot.slane %v9799_v40, %v9833_v8 }
  0xec   : > { %8846 = vmatprep.mubr.msk.bf16.mxu0 %vm999_vm2, %v984_v26  ;;  %v9857_v26 = vrot.slane %v9799_v40, %v9835_v9 }
  0xf3   : > { %8847 = vmatmul.mubr.msk.bf16.gmra.mxu0 %vm999_vm2, %v986_v27  ;;  %v9861_v27 = vrot.slane %v9799_v40, %v9837_v10 }
  0xf4   : > { %8850 = vmatprep.mubr.msk.bf16.mxu0 %vm999_vm2, %v988_v28 }
  0xfb   : > { %8851 = vmatmul.mubr.msk.bf16.gmra.mxu0 %vm999_vm2, %v990_v29 }
  0xfc   : > { %8854 = vmatprep.mubr.msk.bf16.mxu0 %vm999_vm2, %v992_v30 }
 0x103   : > { %8855 = vmatmul.mubr.msk.bf16.gmra.mxu0 %vm999_vm2, %v994_v31 }
 0x104   : > { %8858 = vmatprep.mubr.msk.bf16.mxu0 %vm999_vm2, %v996_v32  ;;  %v1549_v32 = vadd.f32 %v1517_v17, %v1449_v14 }
 0x10b   : > { %8859 = vmatmul.mubr.msk.bf16.gmra.mxu0 %vm999_vm2, %v998_v33  ;;  %v1550_v33 = vadd.f32 %v1518_v18, %v1450_v16 }
 0x193   : > { %v8832_v43 = vpop.f32.mrf.mxu0 }
 0x194   : > { %v1095_v45 = vadd.f32 %v8832_v43, %v9806_v42 }
 0x195   : > { %v1086_v48 = vpop.f32.mrf.mxu0 }
 0x196   : > { %v1215_v51 = vmax.f32 %v1095_v45, 0.0  ;;  %v1087_v52 = vadd.f32 %v9806_v42, %v1086_v48 }
 0x197   : > { %v8833_v55 = vpop.f32.mrf.mxu0 }
 0x198   : > { %v1247_v57 = vmin.f32 %v1215_v51, 6.0  ;;  %v1213_v58 = vmax.f32 %v1087_v52, 0.0  ;;  %v1098_v59 = vadd.f32 %v8833_v55, %v9806_v42 }
 0x199   : > { %v1089_v61 = vpop.f32.mrf.mxu0 }
 0x19a   : > { %1281 = vst.msk [vmem:[#allocation3 + $0x31] sm:$0xff] %vm1278_vm7, %v1247_v57  ;;  %v1245_v1 = vmin.f32 %v1213_v58, 6.0  ;;  %v1216_v2 = vmax.f32 %v1098_v59, 0.0  ;;  %v1090_v3 = vadd.f32 %v9806_v42, %v1089_v61  ;;  %v9891_v57 = vld [vmem:[%s14027_s26 + $0x8] ss:$0 sm:$0xff] }
 0x19b   : > { %v8836_v7 = vpop.f32.mrf.mxu0 }
 0x19c   : > { %1279 = vst.msk [vmem:[#allocation3 + $0x19] sm:$0xff] %vm1278_vm7, %v1245_v1  ;;  %v1248_v11 = vmin.f32 %v1216_v2, 6.0  ;;  %v1214_v12 = vmax.f32 %v1090_v3, 0.0  ;;  %v1111_v13 = vadd.f32 %v8836_v7, %v9806_v42 }
 0x19d   : > { %v1102_v15 = vpop.f32.mrf.mxu0 }
 0x19e   : > { %1282 = vst.msk [vmem:[#allocation3 + $0x39] sm:$0xff] %vm1278_vm7, %v1248_v11  ;;  %v1246_v20 = vmin.f32 %v1214_v12, 6.0  ;;  %v1219_v21 = vmax.f32 %v1111_v13, 0.0  ;;  %v1103_v22 = vadd.f32 %v9806_v42, %v1102_v15 }
 0x19f   : > { %v8837_v24 = vpop.f32.mrf.mxu0 }
 0x1a0   : > { %1280 = vst.msk [vmem:[#allocation3 + $0x21] sm:$0xff] %vm1278_vm7, %v1246_v20  ;;  %v1251_v28 = vmin.f32 %v1219_v21, 6.0  ;;  %v1217_v29 = vmax.f32 %v1103_v22, 0.0  ;;  %v1114_v30 = vadd.f32 %v8837_v24, %v9806_v42 }
 0x1a1   : > { %v1105_v31 = vpop.f32.mrf.mxu0  ;;  %v1882_v35 = vld [vmem:[#allocation3 + $0x30] sm:$0xff] }
 0x1a2   : > { %v1982_v36 = vld [vmem:[#allocation3 + $0x31] sm:$0xff]  ;;  %1285 = vst.msk [vmem:[#allocation3 + $0x61] sm:$0xff] %vm1278_vm7, %v1251_v28  ;;  %v1249_v37 = vmin.f32 %v1217_v29, 6.0  ;;  %v1220_v38 = vmax.f32 %v1114_v30, 0.0  ;;  %v1106_v43 = vadd.f32 %v9806_v42, %v1105_v31  ;;  %v9872_v45 = vmul.f32 %v9849_v23, %v1882_v35 }
 0x1a3   : > { %v8840_v46 = vpop.f32.mrf.mxu0  ;;  %v1581_v48 = vld [vmem:[#allocation3 + $0x18] sm:$0xff]  ;;  %v9875_v51 = vmul.f32 %v9861_v27, %v1982_v36  ;;  %v9878_v40 = vmul.f32 %v1882_v35, %v9853_v25  ;;  %v9881_v52 = vmul.f32 %v1982_v36, %v9857_v26  ;;  %v9884_v53 = vmul.f32 %v1882_v35, %v9810_v44 }
 0x1a4   : > { %v1681_v49 = vld [vmem:[#allocation3 + $0x19] sm:$0xff]  ;;  %1283 = vst.msk [vmem:[#allocation3 + $0x49] sm:$0xff] %vm1278_vm7, %v1249_v37  ;;  %v1252_v54 = vmin.f32 %v1220_v38, 6.0  ;;  %v1218_v55 = vmax.f32 %v1106_v43, 0.0  ;;  %v1127_v56 = vadd.f32 %v8840_v46, %v9806_v42  ;;  %v1617_v58 = vmul.f32 %v9853_v25, %v1581_v48 }
 0x1a5   : > { %v9894_v59 = vld [vmem:[#allocation3 + $0x38] sm:$0xff]  ;;  %v1118_v61 = vpop.f32.mrf.mxu0  ;;  %v1717_v62 = vmul.f32 %v9857_v26, %v1681_v49  ;;  %v1351_v1 = vmul.f32 %v1581_v48, %v9810_v44  ;;  %v1419_v2 = vmul.f32 %v1681_v49, %v9815_v47  ;;  %v9904_v3 = vmul.f32 %v1982_v36, %v9815_v47 }
 0x1a6   : > { %v9896_v60 = vld [vmem:[#allocation3 + $0x32] sm:$0xff]  ;;  %1286 = vst.msk [vmem:[#allocation3 + $0x69] sm:$0xff] %vm1278_vm7, %v1252_v54  ;;  %v1250_v4 = vmin.f32 %v1218_v55, 6.0  ;;  %v1223_v5 = vmax.f32 %v1127_v56, 0.0  ;;  %v1119_v7 = vadd.f32 %v9806_v42, %v1118_v61  ;;  %v1649_v11 = vadd.f32 %v1617_v58, %v1549_v32  ;;  %v9908_v12 = vld [vmem:[#allocation3 + $0x3a] sm:$0xff] }
 0x1a7   : > { %v9899_v63 = vld [vmem:[#allocation3 + $0x39] sm:$0xff]  ;;  %v8841_v14 = vpop.f32.mrf.mxu0  ;;  %v1682_v15 = vld [vmem:[#allocation3 + $0x21] sm:$0xff]  ;;  %v1919_v17 = vmul.f32 %v9849_v23, %v9894_v59  ;;  %v2118_v20 = vmul.f32 %v9891_v57, %v9896_v60  ;;  %v9918_v21 = vmul.f32 %v9891_v57, %v9908_v12  ;;  %v1451_v58 = vadd.f32 %v1419_v2, %v1351_v1 }
 0x1a8   : > { %v1316_v13 = vld [vmem:[#allocation3 + $0x20] sm:$0xff]  ;;  %v2019_v18 = vmul.f32 %v9861_v27, %v9899_v63  ;;  %1284 = vst.msk [vmem:[#allocation3 + $0x51] sm:$0xff] %vm1278_vm7, %v1250_v4  ;;  %v1255_v22 = vmin.f32 %v1223_v5, 6.0  ;;  %v1221_v24 = vmax.f32 %v1119_v7, 0.0  ;;  %v1130_v28 = vadd.f32 %v8841_v14, %v9806_v42 }
 0x1a9   : > { %v1781_v16 = vld [vmem:[#allocation3 + $0x1a] sm:$0xff]  ;;  %v1618_v29 = vmul.f32 %v9853_v25, %v1316_v13  ;;  %v1782_v30 = vld [vmem:[#allocation3 + $0x22] sm:$0xff]  ;;  %v1121_v31 = vpop.f32.mrf.mxu0  ;;  %v1718_v32 = vmul.f32 %v9857_v26, %v1682_v15  ;;  %v1749_v35 = vadd.f32 %v1717_v62, %v1649_v11  ;;  %v1352_v55 = vmul.f32 %v9810_v44, %v1316_v13 }
 0x1aa   : > { %v1817_v36 = vmul.f32 %v9867_v34, %v1781_v16  ;;  %v1818_v37 = vmul.f32 %v9867_v34, %v1782_v30  ;;  %1289 = vst.msk [vmem:[#allocation3 + $0x91] sm:$0xff] %vm1278_vm7, %v1255_v22  ;;  %v1253_v38 = vmin.f32 %v1221_v24, 6.0  ;;  %v1224_v43 = vmax.f32 %v1130_v28, 0.0 }
 0x1ab   : > { %v1122_v46 = vadd.f32 %v9806_v42, %v1121_v31  ;;  %v1650_v48 = vadd.f32 %v1618_v29, %v1550_v33  ;;  %v8844_v49 = vpop.f32.mrf.mxu0  ;;  %v1420_v56 = vmul.f32 %v1682_v15, %v9815_v47  ;;  %v1519_v33 = vmul.f32 %v1781_v16, %v9827_v0 }
 0x1ac   : > { %v1849_v54 = vadd.f32 %v1817_v36, %v1749_v35  ;;  %1287 = vst.msk [vmem:[#allocation3 + $0x79] sm:$0xff] %vm1278_vm7, %v1253_v38  ;;  %v1256_v61 = vmin.f32 %v1224_v43, 6.0  ;;  %v1143_v4 = vadd.f32 %v8844_v49, %v9806_v42  ;;  %v1520_v22 = vmul.f32 %v1782_v30, %v9827_v0  ;;  %v9945_v36 = vld [vmem:[%s14029_s8] ss:$0 sm:$0xff] }
 0x1ad   : > { %v1222_v62 = vmax.f32 %v1122_v46, 0.0  ;;  %v1750_v5 = vadd.f32 %v1718_v32, %v1650_v48  ;;  %v1134_v7 = vpop.f32.mrf.mxu0  ;;  %v1452_v14 = vadd.f32 %v1420_v56, %v1352_v55  ;;  %v1551_v29 = vadd.f32 %v1519_v33, %v1451_v58  ;;  %v9952_v55 = vld [vmem:[#allocation3 + $0x48] sm:$0xff] }
 0x1ae   : > { %v1950_v11 = vadd.f32 %v9872_v45, %v1849_v54  ;;  %1290 = vst.msk [vmem:[#allocation3 + $0x99] sm:$0xff] %vm1278_vm7, %v1256_v61  ;;  %v1227_v15 = vmax.f32 %v1143_v4, 0.0  ;;  %v1135_v1 = vadd.f32 %v9806_v42, %v1134_v7  ;;  %v1620_v45 = vmul.f32 %v9853_v25, %v9894_v59 }
 0x1af   : > { %v1254_v13 = vmin.f32 %v1222_v62, 6.0  ;;  %v1850_v2 = vadd.f32 %v1818_v37, %v1750_v5  ;;  %v8845_v24 = vpop.f32.mrf.mxu0  ;;  %v1552_v31 = vadd.f32 %v1520_v22, %v1452_v14  ;;  %v1720_v46 = vmul.f32 %v9899_v63, %v9857_v26  ;;  %v9958_v62 = vld [vmem:[#allocation3 + $0x50] sm:$0xff] }
 0x1b0   : > { %v2050_v28 = vadd.f32 %v9875_v51, %v1950_v11  ;;  %v1259_v16 = vmin.f32 %v1227_v15, 6.0  ;;  %v1225_v32 = vmax.f32 %v1135_v1, 0.0  ;;  %v1146_v30 = vadd.f32 %v8845_v24, %v9806_v42  ;;  %v9970_v24 = vld [vmem:[#allocation3 + $0x49] sm:$0xff] }
 0x1b1   : > { %1288 = vst.msk [vmem:[#allocation3 + $0x81] sm:$0xff] %vm1278_vm7, %v1254_v13  ;;  %v1951_v35 = vadd.f32 %v1919_v17, %v1850_v2  ;;  %v1137_v37 = vpop.f32.mrf.mxu0  ;;  %v1651_v51 = vadd.f32 %v9878_v40, %v1551_v29  ;;  %v1652_v43 = vadd.f32 %v1620_v45, %v1552_v31  ;;  %v1819_v40 = vmul.f32 %v9867_v34, %v9896_v60 }
 0x1b2   : > { %v2150_v38 = vadd.f32 %v2118_v20, %v2050_v28  ;;  %1293 = vst.msk [vmem:[#allocation3 + $0xc1] sm:$0xff] %vm1278_vm7, %v1259_v16  ;;  %v1257_v48 = vmin.f32 %v1225_v32, 6.0  ;;  %v1228_v49 = vmax.f32 %v1146_v30, 0.0  ;;  %v1138_v54 = vadd.f32 %v9806_v42, %v1137_v37  ;;  %v9974_v28 = vld [vmem:[#allocation3 + $0x4a] sm:$0xff] }
 0x1b3   : > { %v2051_v17 = vadd.f32 %v2019_v18, %v1951_v35  ;;  %v8848_v56 = vpop.f32.mrf.mxu0  ;;  %v1751_v20 = vadd.f32 %v9881_v52, %v1651_v51  ;;  %v1752_v61 = vadd.f32 %v1720_v46, %v1652_v43  ;;  %v1820_v33 = vmul.f32 %v9908_v12, %v9867_v34  ;;  %v9980_v51 = vld [vmem:[#allocation3 + $0x52] sm:$0xff] }
 0x1b4   : > { %v2189_v58 = vadd.f32 %v9945_v36, %v2150_v38  ;;  %1291 = vst.msk [vmem:[#allocation3 + $0xa9] sm:$0xff] %vm1278_vm7, %v1257_v48  ;;  %v1260_v4 = vmin.f32 %v1228_v49, 6.0  ;;  %v1226_v5 = vmax.f32 %v1138_v54, 0.0  ;;  %v1159_v7 = vadd.f32 %v8848_v56, %v9806_v42 }
 0x1b5   : > { %v2151_v18 = vadd.f32 %v9918_v21, %v2051_v17  ;;  %v1150_v11 = vpop.f32.mrf.mxu0  ;;  %v1851_v52 = vadd.f32 %v1819_v40, %v1751_v20  ;;  %v1920_v22 = vmul.f32 %v9849_v23, %v9952_v55  ;;  %v9972_v21 = vld [vmem:[#allocation3 + $0x51] sm:$0xff]  ;;  %v1852_v45 = vadd.f32 %v1820_v33, %v1752_v61 }
 0x1b6   : > { %v2221_v14 = vmax.f32 %v2189_v58, 0.0  ;;  %1294 = vst.msk [vmem:[#allocation3 + $0xc9] sm:$0xff] %vm1278_vm7, %v1260_v4  ;;  %v1258_v13 = vmin.f32 %v1226_v5, 6.0  ;;  %v1231_v15 = vmax.f32 %v1159_v7, 0.0  ;;  %v1151_v1 = vadd.f32 %v9806_v42, %v1150_v11 }
 0x1b7   : > { %v2190_v2 = vadd.f32 %v9945_v36, %v2151_v18  ;;  %v8849_v29 = vpop.f32.mrf.mxu0  ;;  %v1921_v16 = vmul.f32 %v9849_v23, %v9958_v62  ;;  %v1952_v32 = vadd.f32 %v1920_v22, %v1851_v52  ;;  %v2020_v48 = vmul.f32 %v9861_v27, %v9970_v24 }
 0x1b8   : > { %v2253_v31 = vmin.f32 %v2221_v14, 6.0  ;;  %1292 = vst.msk [vmem:[#allocation3 + $0xb1] sm:$0xff] %vm1278_vm7, %v1258_v13  ;;  %v1263_v30 = vmin.f32 %v1231_v15, 6.0  ;;  %v1229_v35 = vmax.f32 %v1151_v1, 0.0  ;;  %v1162_v37 = vadd.f32 %v8849_v29, %v9806_v42 }
 0x1b9   : > { %v2222_v38 = vmax.f32 %v2190_v2, 0.0  ;;  %v1153_v43 = vpop.f32.mrf.mxu0  ;;  %v1953_v46 = vadd.f32 %v1921_v16, %v1852_v45  ;;  %v2021_v49 = vmul.f32 %v9861_v27, %v9972_v21  ;;  %v2120_v54 = vmul.f32 %v9891_v57, %v9974_v28 }
 0x1ba   : > { %1297 = vst.msk [vmem:[#allocation3 + $0xf1] sm:$0xff] %vm1278_vm7, %v1263_v30  ;;  %v1261_v17 = vmin.f32 %v1229_v35, 6.0  ;;  %v1232_v56 = vmax.f32 %v1162_v37, 0.0  ;;  %v1154_v58 = vadd.f32 %v9806_v42, %v1153_v43  ;;  %v2052_v40 = vadd.f32 %v2020_v48, %v1952_v32 }
 0x1bb   : > { %v2254_v20 = vmin.f32 %v2222_v38, 6.0  ;;  %v8852_v61 = vpop.f32.mrf.mxu0  ;;  %v2053_v4 = vadd.f32 %v2021_v49, %v1953_v46  ;;  %v2121_v5 = vmul.f32 %v9891_v57, %v9980_v51  ;;  %v1354_v7 = vmul.f32 %v9810_v44, %v9894_v59 }
 0x1bc   : > { %1295 = vst.msk [vmem:[#allocation3 + $0xd9] sm:$0xff] %vm1278_vm7, %v1261_v17  ;;  %v1264_v18 = vmin.f32 %v1232_v56, 6.0  ;;  %v1230_v11 = vmax.f32 %v1154_v58, 0.0  ;;  %v1175_v14 = vadd.f32 %v8852_v61, %v9806_v42  ;;  %v2152_v22 = vadd.f32 %v2120_v54, %v2052_v40 }
 0x1bd   : > { %v2285_v33 = vpack.c.bf16 %v2254_v20, %v2253_v31  ;;  %v1166_v52 = vpop.f32.mrf.mxu0  ;;  %v2153_v13 = vadd.f32 %v2121_v5, %v2053_v4  ;;  %v1422_v15 = vmul.f32 %v9899_v63, %v9815_v47  ;;  %v1453_v1 = vadd.f32 %v9904_v3, %v9884_v53  ;;  %v10019_v4 = vld [vmem:[#allocation3 + $0x68] sm:$0xff] }
 0x1be   : > { %1298 = vst.msk [vmem:[#allocation3 + $0xf9] sm:$0xff] %vm1278_vm7, %v1264_v18  ;;  %v1262_v2 = vmin.f32 %v1230_v11, 6.0  ;;  %v1235_v59 = vmax.f32 %v1175_v14, 0.0  ;;  %v1167_v29 = vadd.f32 %v9806_v42, %v1166_v52  ;;  %v1521_v31 = vmul.f32 %v9827_v0, %v9896_v60  ;;  %v10023_v14 = vld [vmem:[#allocation3 + $0x60] sm:$0xff] }
 0x1bf   : > { %8864 = vmatprep.mubr.msk.bf16.mxu1 %vm1278_vm7, %v2285_v33  ;;  %v8853_v45 = vpop.f32.mrf.mxu0  ;;  %v2191_v16 = vadd.f32 %v9945_v36, %v2152_v22  ;;  %v2192_v32 = vadd.f32 %v9945_v36, %v2153_v13  ;;  %v1454_v63 = vadd.f32 %v1422_v15, %v1354_v7  ;;  %v1522_v53 = vmul.f32 %v9908_v12, %v9827_v0 }
 0x1c0   : > { %1296 = vst.msk [vmem:[#allocation3 + $0xe1] sm:$0xff] %vm1278_vm7, %v1262_v2  ;;  %v1267_v3 = vmin.f32 %v1235_v59, 6.0  ;;  %v1233_v30 = vmax.f32 %v1167_v29, 0.0  ;;  %v1178_v35 = vadd.f32 %v8853_v45, %v9806_v42  ;;  %v1553_v37 = vadd.f32 %v1521_v31, %v1453_v1  ;;  %v10029_v1 = vld [vmem:[#allocation3 + $0x61] sm:$0xff]  ;;  %v10031_v2 = vld [vmem:[#allocation3 + $0x69] sm:$0xff] }
 0x1c1   : > { %v1169_v38 = vpop.f32.mrf.mxu0  ;;  %v2223_v43 = vmax.f32 %v2191_v16, 0.0  ;;  %v2224_v46 = vmax.f32 %v2192_v32, 0.0  ;;  %v1554_v60 = vadd.f32 %v1522_v53, %v1454_v63  ;;  %v1621_v48 = vmul.f32 %v9952_v55, %v9853_v25  ;;  %v10033_v59 = vld [vmem:[#allocation3 + $0x62] sm:$0xff]  ;;  %v10039_v32 = vld [vmem:[#allocation3 + $0x6a] sm:$0xff] }
 0x1c2   : > { %1301 = vst.msk [vmem:[#allocation3 + $0x121] sm:$0xff] %vm1278_vm7, %v1267_v3  ;;  %v1265_v49 = vmin.f32 %v1233_v30, 6.0  ;;  %v1236_v54 = vmax.f32 %v1178_v35, 0.0  ;;  %v1170_v12 = vadd.f32 %v9806_v42, %v1169_v38  ;;  %v1622_v17 = vmul.f32 %v9853_v25, %v9958_v62 }
 0x1c3   : > { %v2255_v56 = vmin.f32 %v2223_v43, 6.0  ;;  %v2256_v58 = vmin.f32 %v2224_v46, 6.0  ;;  %v8856_v20 = vpop.f32.mrf.mxu0  ;;  %v1653_v61 = vadd.f32 %v1621_v48, %v1553_v37  ;;  %v1721_v40 = vmul.f32 %v9970_v24, %v9857_v26 }
 0x1c4   : > { %1299 = vst.msk [vmem:[#allocation3 + $0x109] sm:$0xff] %vm1278_vm7, %v1265_v49  ;;  %v1268_v5 = vmin.f32 %v1236_v54, 6.0  ;;  %v1234_v7 = vmax.f32 %v1170_v12, 0.0  ;;  %v1191_v18 = vadd.f32 %v8856_v20, %v9806_v42  ;;  %v1654_v11 = vadd.f32 %v1622_v17, %v1554_v60 }
 0x1c5   : > { %v2286_v33 = vpack.c.bf16 %v2256_v58, %v2255_v56  ;;  %v1182_v52 = vpop.f32.mrf.mxu0  ;;  %v1722_v22 = vmul.f32 %v9972_v21, %v9857_v26  ;;  %v1753_v13 = vadd.f32 %v1721_v40, %v1653_v61  ;;  %v1821_v15 = vmul.f32 %v9974_v28, %v9867_v34 }
 0x1c6   : > { %1302 = vst.msk [vmem:[#allocation3 + $0x129] sm:$0xff] %vm1278_vm7, %v1268_v5  ;;  %v1266_v29 = vmin.f32 %v1234_v7, 6.0  ;;  %v1239_v31 = vmax.f32 %v1191_v18, 0.0  ;;  %v1183_v45 = vadd.f32 %v9806_v42, %v1182_v52  ;;  %v1822_v16 = vmul.f32 %v9980_v51, %v9867_v34 }
 0x1c7   : > { %8865 = vmatmul.mubr.msk.bf16.vlgmr.msra.gmra.mxu1 %vm1278_vm7, %v2286_v33  ;;  %v1754_v63 = vadd.f32 %v1722_v22, %v1654_v11  ;;  %v1853_v53 = vadd.f32 %v1821_v15, %v1753_v13  ;;  %v1922_v3 = vmul.f32 %v9849_v23, %v10023_v14  ;;  %v1923_v30 = vmul.f32 %v9849_v23, %v10019_v4  ;;  %v8857_v35 = vpop.f32.mrf.mxu0 }
 0x1c8   : > { %1300 = vst.msk [vmem:[#allocation3 + $0x111] sm:$0xff] %vm1278_vm7, %v1266_v29  ;;  %v1271_v37 = vmin.f32 %v1239_v31, 6.0  ;;  %v1237_v38 = vmax.f32 %v1183_v45, 0.0  ;;  %v2022_v43 = vmul.f32 %v9861_v27, %v10029_v1  ;;  %v2023_v46 = vmul.f32 %v9861_v27, %v10031_v2 }
 0x1c9   : > { %v1854_v60 = vadd.f32 %v1822_v16, %v1754_v63  ;;  %v1954_v48 = vadd.f32 %v1922_v3, %v1853_v53  ;;  %v2122_v49 = vmul.f32 %v9891_v57, %v10033_v59  ;;  %v2123_v54 = vmul.f32 %v9891_v57, %v10039_v32  ;;  %v1185_v12 = vpop.f32.mrf.mxu0  ;;  %v10073_v16 = vld [vmem:[#allocation3 + $0x80] sm:$0xff]  ;;  %v10078_v3 = vld [vmem:[#allocation3 + $0x78] sm:$0xff] }
 0x1ca   : > { %1305 = vst.msk [vmem:[#allocation3 + $0x151] sm:$0xff] %vm1278_vm7, %v1271_v37  ;;  %v1269_v17 = vmin.f32 %v1237_v38, 6.0  ;;  %v1194_v56 = vadd.f32 %v8857_v35, %v9806_v42  ;;  %v1186_v58 = vadd.f32 %v9806_v42, %v1185_v12  ;;  %v1355_v20 = vmul.f32 %v9952_v55, %v9810_v44  ;;  %v10097_v12 = vld [vmem:[#allocation3 + $0x82] sm:$0xff] }
 0x1cb   : > { %v1955_v61 = vadd.f32 %v1923_v30, %v1854_v60  ;;  %v2054_v40 = vadd.f32 %v2022_v43, %v1954_v48  ;;  %v1356_v5 = vmul.f32 %v9810_v44, %v9958_v62  ;;  %v1423_v7 = vmul.f32 %v9970_v24, %v9815_v47  ;;  %v8860_v45 = vpop.f32.mrf.mxu0  ;;  %v10080_v30 = vld [vmem:[#allocation3 + $0x79] sm:$0xff]  ;;  %v10090_v43 = vld [vmem:[#allocation3 + $0x81] sm:$0xff] }
 0x1cc   : > { %1303 = vst.msk [vmem:[#allocation3 + $0x139] sm:$0xff] %vm1278_vm7, %v1269_v17  ;;  %v1240_v18 = vmax.f32 %v1194_v56, 0.0  ;;  %v1238_v11 = vmax.f32 %v1186_v58, 0.0  ;;  %v1424_v33 = vmul.f32 %v9972_v21, %v9815_v47  ;;  %v1523_v52 = vmul.f32 %v9974_v28, %v9827_v0 }
 0x1cd   : > { %v2055_v22 = vadd.f32 %v2023_v46, %v1955_v61  ;;  %v2154_v55 = vadd.f32 %v2122_v49, %v2054_v40  ;;  %v1455_v13 = vadd.f32 %v1423_v7, %v1355_v20  ;;  %v1524_v15 = vmul.f32 %v9980_v51, %v9827_v0  ;;  %v1198_v61 = vpop.f32.mrf.mxu0 }
 0x1ce   : > { %v1272_v62 = vmin.f32 %v1240_v18, 6.0  ;;  %v1270_v29 = vmin.f32 %v1238_v11, 6.0  ;;  %v1456_v31 = vadd.f32 %v1424_v33, %v1356_v5  ;;  %v1623_v24 = vmul.f32 %v10023_v14, %v9853_v25 }
 0x1cf   : > { %v2155_v63 = vadd.f32 %v2123_v54, %v2055_v22  ;;  %v2193_v21 = vadd.f32 %v9945_v36, %v2154_v55  ;;  %v1555_v53 = vadd.f32 %v1523_v52, %v1455_v13  ;;  %v1624_v28 = vmul.f32 %v9853_v25, %v10019_v4  ;;  %v10095_v54 = vld [vmem:[#allocation3 + $0x7a] sm:$0xff] }
 0x1d0   : > { %1306 = vst.msk [vmem:[#allocation3 + $0x159] sm:$0xff] %vm1278_vm7, %v1272_v62  ;;  %1304 = vst.msk [vmem:[#allocation3 + $0x141] sm:$0xff] %vm1278_vm7, %v1270_v29  ;;  %v1556_v51 = vadd.f32 %v1524_v15, %v1456_v31  ;;  %v1723_v35 = vmul.f32 %v10029_v1, %v9857_v26  ;;  %v1724_v37 = vmul.f32 %v10031_v2, %v9857_v26 }
 0x1d1   : > { %v1823_v38 = vmul.f32 %v9867_v34, %v10033_v59  ;;  %v2194_v46 = vadd.f32 %v9945_v36, %v2155_v63  ;;  %v2225_v60 = vmax.f32 %v2193_v21, 0.0  ;;  %v1655_v48 = vadd.f32 %v1623_v24, %v1555_v53 }
 0x1d2   : > { %v1824_v49 = vmul.f32 %v10039_v32, %v9867_v34  ;;  %v1656_v17 = vadd.f32 %v1624_v28, %v1556_v51  ;;  %v1924_v56 = vmul.f32 %v9849_v23, %v10078_v3  ;;  %v1925_v58 = vmul.f32 %v9849_v23, %v10073_v16 }
 0x1d3   : > { %v2024_v20 = vmul.f32 %v9861_v27, %v10080_v30  ;;  %v2226_v40 = vmax.f32 %v2194_v46, 0.0  ;;  %v2257_v5 = vmin.f32 %v2225_v60, 6.0  ;;  %v1755_v7 = vadd.f32 %v1723_v35, %v1655_v48  ;;  %v8861_v60 = vpop.f32.mrf.mxu0  ;;  %v10126_v48 = vld [vmem:[#allocation3 + $0x98] sm:$0xff] }
 0x1d4   : > { %v2025_v18 = vmul.f32 %v9861_v27, %v10090_v43  ;;  %v1756_v11 = vadd.f32 %v1724_v37, %v1656_v17  ;;  %v2124_v33 = vmul.f32 %v9891_v57, %v10095_v54  ;;  %v2125_v52 = vmul.f32 %v9891_v57, %v10097_v12 }
 0x1d5   : > { %v1207_v22 = vadd.f32 %v8860_v45, %v9806_v42  ;;  %v2258_v55 = vmin.f32 %v2226_v40, 6.0  ;;  %v1855_v13 = vadd.f32 %v1823_v38, %v1755_v7  ;;  %v1199_v15 = vadd.f32 %v9806_v42, %v1198_v61  ;;  %v10140_v40 = vld [vmem:[#allocation3 + $0x91] sm:$0xff] }
 0x1d6   : > { %v1357_v62 = vmul.f32 %v10023_v14, %v9810_v44  ;;  %v1856_v29 = vadd.f32 %v1824_v49, %v1756_v11  ;;  %v1358_v24 = vmul.f32 %v9810_v44, %v10019_v4  ;;  %v1425_v63 = vmul.f32 %v10029_v1, %v9815_v47  ;;  %v10144_v7 = vld [vmem:[#allocation3 + $0x92] sm:$0xff] }
 0x1d7   : > { %v1243_v31 = vmax.f32 %v1207_v22, 0.0  ;;  %v2287_v21 = vpack.c.bf16 %v2258_v55, %v2257_v5  ;;  %v1956_v53 = vadd.f32 %v1924_v56, %v1855_v13  ;;  %v1241_v28 = vmax.f32 %v1199_v15, 0.0  ;;  %v10133_v56 = vld [vmem:[#allocation3 + $0x90] sm:$0xff]  ;;  %v10142_v5 = vld [vmem:[#allocation3 + $0x99] sm:$0xff] }
 0x1d8   : > { %v1426_v45 = vmul.f32 %v10031_v2, %v9815_v47  ;;  %v1957_v51 = vadd.f32 %v1925_v58, %v1856_v29  ;;  %v1457_v37 = vadd.f32 %v1425_v63, %v1357_v62  ;;  %v1525_v14 = vmul.f32 %v9827_v0, %v10033_v59  ;;  %v10150_v55 = vld [vmem:[#allocation3 + $0x9a] sm:$0xff] }
 0x1d9   : > { %v1275_v35 = vmin.f32 %v1243_v31, 6.0  ;;  %8868 = vmatprep.mubr.msk.bf16.mxu1 %vm1278_vm7, %v2287_v21  ;;  %v2056_v38 = vadd.f32 %v2024_v20, %v1956_v53  ;;  %v1273_v46 = vmin.f32 %v1241_v28, 6.0  ;;  %v1526_v1 = vmul.f32 %v10039_v32, %v9827_v0  ;;  %v1201_v31 = vpop.f32.mrf.mxu0 }
 0x1da   : > { %v1458_v4 = vadd.f32 %v1426_v45, %v1358_v24  ;;  %v2057_v49 = vadd.f32 %v2025_v18, %v1957_v51  ;;  %v1557_v2 = vadd.f32 %v1525_v14, %v1457_v37  ;;  %v1625_v17 = vmul.f32 %v10078_v3, %v9853_v25 }
 0x1db   : > { %1309 = vst.msk [vmem:[#allocation3 + $0x181] sm:$0xff] %vm1278_vm7, %v1275_v35  ;;  %v1626_v59 = vmul.f32 %v9853_v25, %v10073_v16  ;;  %v2156_v58 = vadd.f32 %v2124_v33, %v2056_v38  ;;  %1307 = vst.msk [vmem:[#allocation3 + $0x169] sm:$0xff] %vm1278_vm7, %v1273_v46  ;;  %v1725_v32 = vmul.f32 %v10080_v30, %v9857_v26 }
 0x1dc   : > { %v1558_v20 = vadd.f32 %v1526_v1, %v1458_v4  ;;  %v1726_v61 = vmul.f32 %v10090_v43, %v9857_v26  ;;  %v2157_v18 = vadd.f32 %v2125_v52, %v2057_v49  ;;  %v1657_v11 = vadd.f32 %v1625_v17, %v1557_v2 }
 0x1dd   : > { %v1825_v33 = vmul.f32 %v10095_v54, %v9867_v34  ;;  %v1826_v22 = vmul.f32 %v10097_v12, %v9867_v34  ;;  %v2195_v13 = vadd.f32 %v9945_v36, %v2156_v58  ;;  %v1926_v62 = vmul.f32 %v9849_v23, %v10133_v56 }
 0x1de   : > { %v1658_v15 = vadd.f32 %v1626_v59, %v1558_v20  ;;  %v1927_v29 = vmul.f32 %v9849_v23, %v10126_v48  ;;  %v2196_v52 = vadd.f32 %v9945_v36, %v2157_v18  ;;  %v1757_v24 = vadd.f32 %v1725_v32, %v1657_v11 }
 0x1df   : > { %v2026_v63 = vmul.f32 %v9861_v27, %v10140_v40  ;;  %v2027_v21 = vmul.f32 %v9861_v27, %v10142_v5  ;;  %v2227_v53 = vmax.f32 %v2195_v13, 0.0  ;;  %v2126_v45 = vmul.f32 %v9891_v57, %v10144_v7 }
 0x1e0   : > { %v1758_v28 = vadd.f32 %v1726_v61, %v1658_v15  ;;  %v2127_v51 = vmul.f32 %v9891_v57, %v10150_v55  ;;  %v2228_v35 = vmax.f32 %v2196_v52, 0.0  ;;  %v1857_v37 = vadd.f32 %v1825_v33, %v1757_v24  ;;  %v1791_v15 = vld [vmem:[#allocation3 + $0x92] sm:$0xff] }
 0x1e1   : > { %v1210_v14 = vadd.f32 %v8861_v60, %v9806_v42  ;;  %v1202_v38 = vadd.f32 %v9806_v42, %v1201_v31  ;;  %v2259_v46 = vmin.f32 %v2227_v53, 6.0  ;;  %v1359_v1 = vmul.f32 %v10078_v3, %v9810_v44  ;;  %v10197_v53 = vld [vmem:[#allocation3 + $0xb1] sm:$0xff] }
 0x1e2   : > { %v1858_v4 = vadd.f32 %v1826_v22, %v1758_v28  ;;  %v1360_v49 = vmul.f32 %v9810_v44, %v10073_v16  ;;  %v2260_v2 = vmin.f32 %v2228_v35, 6.0  ;;  %v1958_v17 = vadd.f32 %v1926_v62, %v1857_v37  ;;  %v10180_v62 = vld [vmem:[#allocation3 + $0xa8] sm:$0xff] }
 0x1e3   : > { %v1244_v59 = vmax.f32 %v1210_v14, 0.0  ;;  %v1242_v58 = vmax.f32 %v1202_v38, 0.0  ;;  %v1427_v32 = vmul.f32 %v10080_v30, %v9815_v47  ;;  %v1428_v60 = vmul.f32 %v10090_v43, %v9815_v47  ;;  %v10182_v30 = vld [vmem:[#allocation3 + $0xb0] sm:$0xff] }
 0x1e4   : > { %v1959_v20 = vadd.f32 %v1927_v29, %v1858_v4  ;;  %v1527_v42 = vmul.f32 %v10095_v54, %v9827_v0  ;;  %v2288_v61 = vpack.c.bf16 %v2260_v2, %v2259_v46  ;;  %v2058_v18 = vadd.f32 %v2026_v63, %v1958_v17  ;;  %v10199_v28 = vld [vmem:[#allocation3 + $0xaa] sm:$0xff]  ;;  %v10207_v14 = vld [vmem:[#allocation3 + $0xb2] sm:$0xff] }
 0x1e5   : > { %v1276_v3 = vmin.f32 %v1244_v59, 6.0  ;;  %v1274_v11 = vmin.f32 %v1242_v58, 6.0  ;;  %v1459_v16 = vadd.f32 %v1427_v32, %v1359_v1  ;;  %v1460_v22 = vadd.f32 %v1428_v60, %v1360_v49 }
 0x1e6   : > { %v2059_v33 = vadd.f32 %v2027_v21, %v1959_v20  ;;  %v1528_v13 = vmul.f32 %v10097_v12, %v9827_v0  ;;  %8869 = vmatmul.mubr.msk.bf16.gmra.mxu1 %vm1278_vm7, %v2288_v61  ;;  %v2158_v43 = vadd.f32 %v2126_v45, %v2058_v18  ;;  %v1627_v54 = vmul.f32 %v10133_v56, %v9853_v25  ;;  %v10195_v21 = vld [vmem:[#allocation3 + $0xa9] sm:$0xff] }
 0x1e7   : > { %1310 = vst.msk [vmem:[#allocation3 + $0x189] sm:$0xff] %vm1278_vm7, %v1276_v3  ;;  %1308 = vst.msk [vmem:[#allocation3 + $0x171] sm:$0xff] %vm1278_vm7, %v1274_v11  ;;  %v1628_v29 = vmul.f32 %v9853_v25, %v10126_v48  ;;  %v1727_v12 = vmul.f32 %v10140_v40, %v9857_v26  ;;  %v1559_v52 = vadd.f32 %v1527_v42, %v1459_v16 }
 0x1e8   : > { %v2159_v31 = vadd.f32 %v2127_v51, %v2059_v33  ;;  %v1560_v24 = vadd.f32 %v1528_v13, %v1460_v22  ;;  %v1728_v63 = vmul.f32 %v10142_v5, %v9857_v26  ;;  %v2197_v45 = vadd.f32 %v9945_v36, %v2158_v43  ;;  %v1594_v13 = vld [vmem:[#allocation3 + $0xb0] sm:$0xff] }
 0x1e9   : > { %v1827_v35 = vmul.f32 %v9867_v34, %v1791_v15  ;;  %v1828_v37 = vmul.f32 %v10150_v55, %v9867_v34  ;;  %v1928_v51 = vmul.f32 %v9849_v23, %v10180_v62  ;;  %v1659_v46 = vadd.f32 %v1627_v54, %v1559_v52  ;;  %v1895_v52 = vld [vmem:[#allocation3 + $0xc8] sm:$0xff] }
 0x1ea   : > { %v2198_v38 = vadd.f32 %v9945_v36, %v2159_v31  ;;  %v1660_v4 = vadd.f32 %v1628_v29, %v1560_v24  ;;  %v1929_v1 = vmul.f32 %v9849_v23, %v10182_v30  ;;  %v2229_v49 = vmax.f32 %v2197_v45, 0.0  ;;  %v10234_v31 = vld [vmem:[#allocation3 + $0xc0] sm:$0xff] }
 0x1eb   : > { %v2028_v2 = vmul.f32 %v9861_v27, %v10195_v21  ;;  %v2029_v17 = vmul.f32 %v9861_v27, %v10197_v53  ;;  %v2128_v59 = vmul.f32 %v9891_v57, %v10199_v28  ;;  %v1759_v20 = vadd.f32 %v1727_v12, %v1659_v46  ;;  %v2094_v46 = vld [vmem:[#allocation3 + $0xc2] sm:$0xff] }
 0x1ec   : > { %v2230_v58 = vmax.f32 %v2198_v38, 0.0  ;;  %v1760_v32 = vadd.f32 %v1728_v63, %v1660_v4  ;;  %v2129_v60 = vmul.f32 %v9891_v57, %v10207_v14  ;;  %v2261_v42 = vmin.f32 %v2229_v49, 6.0  ;;  %v10246_v38 = vld [vmem:[#allocation3 + $0xc9] sm:$0xff] }
 0x1ed   : > { %v1361_v61 = vmul.f32 %v10133_v56, %v9810_v44  ;;  %v1362_v18 = vmul.f32 %v9810_v44, %v10126_v48  ;;  %v1429_v3 = vmul.f32 %v10140_v40, %v9815_v47  ;;  %v1859_v33 = vadd.f32 %v1827_v35, %v1759_v20  ;;  %v10248_v4 = vld [vmem:[#allocation3 + $0xca] sm:$0xff] }
 0x1ee   : > { %v2262_v11 = vmin.f32 %v2230_v58, 6.0  ;;  %v1860_v16 = vadd.f32 %v1828_v37, %v1760_v32  ;;  %v1430_v22 = vmul.f32 %v10142_v5, %v9815_v47  ;;  %v1529_v43 = vmul.f32 %v9827_v0, %v10144_v7 }
 0x1ef   : > { %v1461_v15 = vadd.f32 %v1429_v3, %v1361_v61  ;;  %v1530_v56 = vmul.f32 %v10150_v55, %v9827_v0  ;;  %v1629_v48 = vmul.f32 %v10180_v62, %v9853_v25  ;;  %v1960_v29 = vadd.f32 %v1928_v51, %v1859_v33  ;;  %v10241_v55 = vld [vmem:[#allocation3 + $0xc1] sm:$0xff] }
 0x1f0   : > { %v2289_v54 = vpack.c.bf16 %v2262_v11, %v2261_v42  ;;  %v1961_v40 = vadd.f32 %v1929_v1, %v1860_v16  ;;  %v1462_v12 = vadd.f32 %v1430_v22, %v1362_v18  ;;  %v1630_v5 = vmul.f32 %v9853_v25, %v1594_v13 }
 0x1f1   : > { %v1561_v24 = vadd.f32 %v1529_v43, %v1461_v15  ;;  %v1729_v63 = vmul.f32 %v10195_v21, %v9857_v26  ;;  %v1730_v7 = vmul.f32 %v10197_v53, %v9857_v26  ;;  %v2060_v45 = vadd.f32 %v2028_v2, %v1960_v29 }
 0x1f2   : > { %8872 = vmatprep.mubr.msk.bf16.mxu1 %vm1278_vm7, %v2289_v54  ;;  %v2061_v35 = vadd.f32 %v2029_v17, %v1961_v40  ;;  %v1562_v37 = vadd.f32 %v1530_v56, %v1462_v12  ;;  %v1829_v51 = vmul.f32 %v10199_v28, %v9867_v34  ;;  %v1830_v49 = vmul.f32 %v10207_v14, %v9867_v34 }
 0x1f3   : > { %v1661_v1 = vadd.f32 %v1629_v48, %v1561_v24  ;;  %v1930_v58 = vmul.f32 %v9849_v23, %v10234_v31  ;;  %v1931_v20 = vmul.f32 %v9849_v23, %v1895_v52  ;;  %v2160_v2 = vadd.f32 %v2128_v59, %v2060_v45 }
 0x1f4   : > { %v2161_v17 = vadd.f32 %v2129_v60, %v2061_v35  ;;  %v1662_v32 = vadd.f32 %v1630_v5, %v1562_v37  ;;  %v2030_v42 = vmul.f32 %v9861_v27, %v10241_v55  ;;  %v2031_v18 = vmul.f32 %v9861_v27, %v10246_v38  ;;  %v10279_v37 = vld [vmem:[#allocation3 + $0xd8] sm:$0xff] }
 0x1f5   : > { %v1761_v61 = vadd.f32 %v1729_v63, %v1661_v1  ;;  %v2130_v3 = vmul.f32 %v9891_v57, %v2094_v46  ;;  %v2131_v11 = vmul.f32 %v9891_v57, %v10248_v4  ;;  %v2199_v33 = vadd.f32 %v9945_v36, %v2160_v2 }
 0x1f6   : > { %v2200_v16 = vadd.f32 %v9945_v36, %v2161_v17  ;;  %v1762_v22 = vadd.f32 %v1730_v7, %v1662_v32  ;;  %v1363_v59 = vmul.f32 %v10180_v62, %v9810_v44  ;;  %v1364_v13 = vmul.f32 %v9810_v44, %v10182_v30 }
 0x1f7   : > { %v1861_v60 = vadd.f32 %v1829_v51, %v1761_v61  ;;  %v1431_v15 = vmul.f32 %v10195_v21, %v9815_v47  ;;  %v1432_v43 = vmul.f32 %v10197_v53, %v9815_v47  ;;  %v2231_v56 = vmax.f32 %v2199_v33, 0.0  ;;  %v10290_v61 = vld [vmem:[#allocation3 + $0xe2] sm:$0xff] }
 0x1f8   : > { %v2232_v48 = vmax.f32 %v2200_v16, 0.0  ;;  %v1862_v54 = vadd.f32 %v1830_v49, %v1762_v22  ;;  %v1531_v29 = vmul.f32 %v10199_v28, %v9827_v0  ;;  %v1532_v62 = vmul.f32 %v10207_v14, %v9827_v0  ;;  %v1897_v28 = vld [vmem:[#allocation3 + $0xe0] sm:$0xff]  ;;  %v1330_v22 = vld [vmem:[#allocation3 + $0xc8] sm:$0xff] }
 0x1f9   : > { %v1962_v40 = vadd.f32 %v1930_v58, %v1861_v60  ;;  %v1463_v12 = vadd.f32 %v1431_v15, %v1363_v59  ;;  %v1464_v24 = vadd.f32 %v1432_v43, %v1364_v13  ;;  %v2263_v5 = vmin.f32 %v2231_v56, 6.0  ;;  %v10285_v58 = vld [vmem:[#allocation3 + $0xd9] sm:$0xff]  ;;  %v1497_v15 = vld [vmem:[#allocation3 + $0xc2] sm:$0xff] }
 0x1fa   : > { %v2264_v30 = vmin.f32 %v2232_v48, 6.0  ;;  %v1963_v63 = vadd.f32 %v1931_v20, %v1862_v54  ;;  %v1631_v21 = vmul.f32 %v10234_v31, %v9853_v25  ;;  %v1632_v35 = vmul.f32 %v1895_v52, %v9853_v25  ;;  %v2096_v52 = vld [vmem:[#allocation3 + $0xda] sm:$0xff] }
 0x1fb   : > { %v2062_v7 = vadd.f32 %v2030_v42, %v1962_v40  ;;  %v1563_v53 = vadd.f32 %v1531_v29, %v1463_v12  ;;  %v1564_v45 = vadd.f32 %v1532_v62, %v1464_v24  ;;  %v1731_v49 = vmul.f32 %v10241_v55, %v9857_v26  ;;  %v10288_v42 = vld [vmem:[#allocation3 + $0xe1] sm:$0xff] }
 0x1fc   : > { %v2290_v51 = vpack.c.bf16 %v2264_v30, %v2263_v5  ;;  %v2063_v1 = vadd.f32 %v2031_v18, %v1963_v63  ;;  %v1732_v14 = vmul.f32 %v10246_v38, %v9857_v26  ;;  %v1831_v32 = vmul.f32 %v2094_v46, %v9867_v34 }
 0x1fd   : > { %v2162_v20 = vadd.f32 %v2130_v3, %v2062_v7  ;;  %v1663_v2 = vadd.f32 %v1631_v21, %v1563_v53  ;;  %v1664_v17 = vadd.f32 %v1632_v35, %v1564_v45  ;;  %v1832_v33 = vmul.f32 %v10248_v4, %v9867_v34 }
 0x1fe   : > { %8873 = vmatmul.mubr.msk.bf16.gmra.mxu1 %vm1278_vm7, %v2290_v51  ;;  %v2163_v18 = vadd.f32 %v2131_v11, %v2063_v1  ;;  %v1932_v16 = vmul.f32 %v9849_v23, %v10279_v37  ;;  %v1933_v3 = vmul.f32 %v9849_v23, %v1897_v28  ;;  %v2032_v13 = vmul.f32 %v9861_v27, %v10285_v58 }
 0x1ff   : > { %v2201_v59 = vadd.f32 %v9945_v36, %v2162_v20  ;;  %v1763_v46 = vadd.f32 %v1731_v49, %v1663_v2  ;;  %v1764_v60 = vadd.f32 %v1732_v14, %v1664_v17  ;;  %v2033_v11 = vmul.f32 %v9861_v27, %v10288_v42  ;;  %v10320_v2 = vld [vmem:[#allocation3 + $0xf0] sm:$0xff]  ;;  %v1899_v17 = vld [vmem:[#allocation3 + $0xf8] sm:$0xff] }
 0x200   : > { %v2202_v43 = vadd.f32 %v9945_v36, %v2163_v18  ;;  %v2132_v56 = vmul.f32 %v9891_v57, %v2096_v52  ;;  %v2133_v48 = vmul.f32 %v9891_v57, %v10290_v61  ;;  %v1365_v12 = vmul.f32 %v10234_v31, %v9810_v44 }
 0x201   : > { %v2233_v54 = vmax.f32 %v2201_v59, 0.0  ;;  %v1863_v29 = vadd.f32 %v1831_v32, %v1763_v46  ;;  %v1864_v40 = vadd.f32 %v1832_v33, %v1764_v60  ;;  %v1366_v62 = vmul.f32 %v9810_v44, %v1330_v22  ;;  %v2098_v60 = vld [vmem:[#allocation3 + $0xf2] sm:$0xff] }
 0x202   : > { %v2234_v24 = vmax.f32 %v2202_v43, 0.0  ;;  %v1433_v5 = vmul.f32 %v10241_v55, %v9815_v47  ;;  %v1434_v30 = vmul.f32 %v10246_v38, %v9815_v47  ;;  %v1533_v57 = vmul.f32 %v9827_v0, %v1497_v15 }
 0x203   : > { %v2265_v63 = vmin.f32 %v2233_v54, 6.0  ;;  %v1964_v21 = vadd.f32 %v1932_v16, %v1863_v29  ;;  %v1965_v7 = vadd.f32 %v1933_v3, %v1864_v40  ;;  %v1534_v31 = vmul.f32 %v10248_v4, %v9827_v0  ;;  %v10326_v16 = vld [vmem:[#allocation3 + $0xf1] sm:$0xff]  ;;  %v10328_v3 = vld [vmem:[#allocation3 + $0xf9] sm:$0xff] }
 0x204   : > { %v2266_v53 = vmin.f32 %v2234_v24, 6.0  ;;  %v1465_v45 = vadd.f32 %v1433_v5, %v1365_v12  ;;  %v1466_v35 = vadd.f32 %v1434_v30, %v1366_v62  ;;  %v1633_v49 = vmul.f32 %v10279_v37, %v9853_v25  ;;  %v2099_v62 = vld [vmem:[#allocation3 + $0xfa] sm:$0xff]  ;;  %v10346_v5 = vld [vmem:[%s14027_s26 + $0x8] ss:$0 sm:$0xff] }
 0x205   : > { %v2064_v51 = vadd.f32 %v2032_v13, %v1964_v21  ;;  %v2065_v1 = vadd.f32 %v2033_v11, %v1965_v7  ;;  %v1634_v55 = vmul.f32 %v1897_v28, %v9853_v25  ;;  %v1733_v33 = vmul.f32 %v10285_v58, %v9857_v26  ;;  %v1332_v13 = vld [vmem:[#allocation3 + $0xe0] sm:$0xff] }
 0x206   : > { %v2291_v14 = vpack.c.bf16 %v2266_v53, %v2265_v63  ;;  %v1565_v38 = vadd.f32 %v1533_v57, %v1465_v45  ;;  %v1566_v20 = vadd.f32 %v1534_v31, %v1466_v35  ;;  %v1734_v4 = vmul.f32 %v10288_v42, %v9857_v26 }
 0x207   : > { %v2164_v32 = vadd.f32 %v2132_v56, %v2064_v51  ;;  %v2165_v18 = vadd.f32 %v2133_v48, %v2065_v1  ;;  %v1833_v59 = vmul.f32 %v2096_v52, %v9867_v34  ;;  %v1834_v46 = vmul.f32 %v10290_v61, %v9867_v34  ;;  %v1499_v48 = vld [vmem:[#allocation3 + $0xda] sm:$0xff] }
 0x208   : > { %8876 = vmatprep.mubr.msk.bf16.mxu1 %vm1278_vm7, %v2291_v14  ;;  %v1665_v28 = vadd.f32 %v1633_v49, %v1565_v38  ;;  %v1666_v22 = vadd.f32 %v1634_v55, %v1566_v20  ;;  %v1934_v11 = vmul.f32 %v9849_v23, %v10320_v2  ;;  %v1935_v56 = vmul.f32 %v9849_v23, %v1899_v17 }
 0x209   : > { %v2203_v15 = vadd.f32 %v9945_v36, %v2164_v32  ;;  %v2204_v43 = vadd.f32 %v9945_v36, %v2165_v18  ;;  %v2034_v52 = vmul.f32 %v9861_v27, %v10326_v16  ;;  %v2035_v40 = vmul.f32 %v9861_v27, %v10328_v3 }
 0x20a   : > { %v1765_v54 = vadd.f32 %v1733_v33, %v1665_v28  ;;  %v1766_v29 = vadd.f32 %v1734_v4, %v1666_v22  ;;  %v2134_v30 = vmul.f32 %v10346_v5, %v2098_v60  ;;  %v1367_v63 = vmul.f32 %v10279_v37, %v9810_v44  ;;  %v10363_v4 = vld [vmem:[#allocation3 + $0x108] sm:$0xff]  ;;  %v1901_v28 = vld [vmem:[#allocation3 + $0x110] sm:$0xff] }
 0x20b   : > { %v2235_v12 = vmax.f32 %v2203_v15, 0.0  ;;  %v2236_v24 = vmax.f32 %v2204_v43, 0.0  ;;  %v1368_v57 = vmul.f32 %v9810_v44, %v1332_v13  ;;  %v1435_v53 = vmul.f32 %v10285_v58, %v9815_v47  ;;  %v10365_v22 = vld [vmem:[#allocation3 + $0x109] sm:$0xff]  ;;  %v10373_v15 = vld [vmem:[#allocation3 + $0x111] sm:$0xff] }
 0x20c   : > { %v1865_v21 = vadd.f32 %v1833_v59, %v1765_v54  ;;  %v1866_v7 = vadd.f32 %v1834_v46, %v1766_v29  ;;  %v1436_v31 = vmul.f32 %v10288_v42, %v9815_v47  ;;  %v1535_v51 = vmul.f32 %v9827_v0, %v1499_v48  ;;  %v1334_v43 = vld [vmem:[#allocation3 + $0xf8] sm:$0xff]  ;;  %v2100_v54 = vld [vmem:[#allocation3 + $0x10a] sm:$0xff] }
 0x20d   : > { %v2267_v45 = vmin.f32 %v2235_v12, 6.0  ;;  %v2268_v35 = vmin.f32 %v2236_v24, 6.0  ;;  %v2135_v55 = vmul.f32 %v10346_v5, %v2099_v62  ;;  %v1467_v14 = vadd.f32 %v1435_v53, %v1367_v63  ;;  %v1501_v24 = vld [vmem:[#allocation3 + $0xf2] sm:$0xff] }
 0x20e   : > { %v1966_v1 = vadd.f32 %v1934_v11, %v1865_v21  ;;  %v1967_v49 = vadd.f32 %v1935_v56, %v1866_v7  ;;  %v1468_v38 = vadd.f32 %v1436_v31, %v1368_v57  ;;  %v1536_v20 = vmul.f32 %v10290_v61, %v9827_v0 }
 0x20f   : > { %v2292_v37 = vpack.c.bf16 %v2268_v35, %v2267_v45  ;;  %v1635_v58 = vmul.f32 %v10320_v2, %v9853_v25  ;;  %v1567_v33 = vadd.f32 %v1535_v51, %v1467_v14  ;;  %v1636_v42 = vmul.f32 %v1899_v17, %v9853_v25 }
 0x210   : > { %v2066_v32 = vadd.f32 %v2034_v52, %v1966_v1  ;;  %v2067_v18 = vadd.f32 %v2035_v40, %v1967_v49  ;;  %v1568_v59 = vadd.f32 %v1536_v20, %v1468_v38  ;;  %v1735_v46 = vmul.f32 %v10326_v16, %v9857_v26 }
 0x211   : > { %8877 = vmatmul.mubr.msk.bf16.gmra.mxu1 %vm1278_vm7, %v2292_v37  ;;  %v1736_v61 = vmul.f32 %v10328_v3, %v9857_v26  ;;  %v1835_v13 = vmul.f32 %v2098_v60, %v9867_v34  ;;  %v1667_v56 = vadd.f32 %v1635_v58, %v1567_v33  ;;  %v1836_v48 = vmul.f32 %v2099_v62, %v9867_v34 }
 0x212   : > { %v2166_v17 = vadd.f32 %v2134_v30, %v2066_v32  ;;  %v2167_v11 = vadd.f32 %v2135_v55, %v2067_v18  ;;  %v1668_v29 = vadd.f32 %v1636_v42, %v1568_v59  ;;  %v1936_v52 = vmul.f32 %v9849_v23, %v10363_v4 }
 0x213   : > { %v1937_v40 = vmul.f32 %v9849_v23, %v1901_v28  ;;  %v2036_v12 = vmul.f32 %v9861_v27, %v10365_v22  ;;  %v1767_v30 = vadd.f32 %v1735_v46, %v1667_v56  ;;  %v2037_v21 = vmul.f32 %v9861_v27, %v10373_v15  ;;  %v10405_v56 = vld [vmem:[#allocation3 + $0x121] sm:$0xff] }
 0x214   : > { %v2205_v60 = vadd.f32 %v9945_v36, %v2166_v17  ;;  %v2206_v63 = vadd.f32 %v9945_v36, %v2167_v11  ;;  %v1768_v7 = vadd.f32 %v1736_v61, %v1668_v29  ;;  %v2136_v57 = vmul.f32 %v10346_v5, %v2100_v54  ;;  %v2101_v36 = vld [vmem:[#allocation3 + $0x112] sm:$0xff]  ;;  %v10399_v61 = vld [vmem:[#allocation3 + $0x120] sm:$0xff] }
 0x215   : > { %v1369_v53 = vmul.f32 %v10320_v2, %v9810_v44  ;;  %v1370_v45 = vmul.f32 %v9810_v44, %v1334_v43  ;;  %v1867_v51 = vadd.f32 %v1835_v13, %v1767_v30  ;;  %v1437_v1 = vmul.f32 %v10326_v16, %v9815_v47  ;;  %v1903_v13 = vld [vmem:[#allocation3 + $0x128] sm:$0xff] }
 0x216   : > { %v2237_v35 = vmax.f32 %v2205_v60, 0.0  ;;  %v2238_v31 = vmax.f32 %v2206_v63, 0.0  ;;  %v1868_v49 = vadd.f32 %v1836_v48, %v1768_v7  ;;  %v1438_v55 = vmul.f32 %v10328_v3, %v9815_v47  ;;  %v10407_v48 = vld [vmem:[#allocation3 + $0x129] sm:$0xff] }
 0x217   : > { %v1537_v14 = vmul.f32 %v9827_v0, %v1501_v24  ;;  %v1538_v37 = vmul.f32 %v2099_v62, %v9827_v0  ;;  %v1968_v2 = vadd.f32 %v1936_v52, %v1867_v51  ;;  %v1469_v58 = vadd.f32 %v1437_v1, %v1369_v53  ;;  %v1336_v24 = vld [vmem:[#allocation3 + $0x110] sm:$0xff]  ;;  %v10418_v53 = vld [vmem:[%s14029_s8] ss:$0 sm:$0xff] }
 0x218   : > { %v2269_v38 = vmin.f32 %v2237_v35, 6.0  ;;  %v2270_v20 = vmin.f32 %v2238_v31, 6.0  ;;  %v1969_v32 = vadd.f32 %v1937_v40, %v1868_v49  ;;  %v1470_v18 = vadd.f32 %v1438_v55, %v1370_v45  ;;  %v1503_v7 = vld [vmem:[#allocation3 + $0x10a] sm:$0xff] }
 0x219   : > { %v1637_v33 = vmul.f32 %v10363_v4, %v9853_v25  ;;  %v1638_v16 = vmul.f32 %v1901_v28, %v9853_v25  ;;  %v2068_v59 = vadd.f32 %v2036_v12, %v1968_v2  ;;  %v2137_v46 = vmul.f32 %v10346_v5, %v2101_v36  ;;  %v2102_v12 = vld [vmem:[#allocation3 + $0x122] sm:$0xff]  ;;  %v10426_v1 = vld [vmem:[#allocation3 + $0x12a] sm:$0xff] }
 0x21a   : > { %v2293_v42 = vpack.c.bf16 %v2270_v20, %v2269_v38  ;;  %v1569_v3 = vadd.f32 %v1537_v14, %v1469_v58  ;;  %v2069_v62 = vadd.f32 %v2037_v21, %v1969_v32  ;;  %v1570_v43 = vadd.f32 %v1538_v37, %v1470_v18 }
 0x21b   : > { %v1737_v17 = vmul.f32 %v10365_v22, %v9857_v26  ;;  %v1738_v11 = vmul.f32 %v10373_v15, %v9857_v26  ;;  %v2168_v28 = vadd.f32 %v2136_v57, %v2068_v59  ;;  %v1837_v52 = vmul.f32 %v2100_v54, %v9867_v34 }
 0x21c   : > { %8880 = vmatprep.mubr.msk.bf16.mxu1 %vm1278_vm7, %v2293_v42  ;;  %v1669_v29 = vadd.f32 %v1637_v33, %v1569_v3  ;;  %v1838_v40 = vmul.f32 %v2101_v36, %v9867_v34  ;;  %v2169_v60 = vadd.f32 %v2137_v46, %v2069_v62  ;;  %v1670_v63 = vadd.f32 %v1638_v16, %v1570_v43 }
 0x21d   : > { %v1938_v30 = vmul.f32 %v9849_v23, %v10399_v61  ;;  %v1939_v21 = vmul.f32 %v9849_v23, %v1903_v13  ;;  %v2207_v57 = vadd.f32 %v10418_v53, %v2168_v28  ;;  %v2038_v45 = vmul.f32 %v9861_v27, %v10405_v56 }
 0x21e   : > { %v1769_v54 = vadd.f32 %v1737_v17, %v1669_v29  ;;  %v2039_v35 = vmul.f32 %v9861_v27, %v10407_v48  ;;  %v2208_v31 = vadd.f32 %v10418_v53, %v2169_v60  ;;  %v1770_v51 = vadd.f32 %v1738_v11, %v1670_v63  ;;  %v10443_v11 = vld [vmem:[#allocation3 + $0x138] sm:$0xff] }
 0x21f   : > { %v2138_v49 = vmul.f32 %v10346_v5, %v2102_v12  ;;  %v1371_v55 = vmul.f32 %v10363_v4, %v9810_v44  ;;  %v2239_v14 = vmax.f32 %v2207_v57, 0.0  ;;  %v1372_v38 = vmul.f32 %v9810_v44, %v1336_v24  ;;  %v1905_v24 = vld [vmem:[#allocation3 + $0x140] sm:$0xff]  ;;  %v1338_v57 = vld [vmem:[#allocation3 + $0x128] sm:$0xff] }
 0x220   : > { %v1869_v37 = vadd.f32 %v1837_v52, %v1769_v54  ;;  %v1439_v20 = vmul.f32 %v10365_v22, %v9815_v47  ;;  %v2240_v2 = vmax.f32 %v2208_v31, 0.0  ;;  %v1870_v58 = vadd.f32 %v1838_v40, %v1770_v51  ;;  %v10447_v60 = vld [vmem:[#allocation3 + $0x139] sm:$0xff] }
 0x221   : > { %v1440_v32 = vmul.f32 %v10373_v15, %v9815_v47  ;;  %v1539_v18 = vmul.f32 %v9827_v0, %v1503_v7  ;;  %v2271_v33 = vmin.f32 %v2239_v14, 6.0  ;;  %v2139_v42 = vmul.f32 %v10346_v5, %v10426_v1  ;;  %v10452_v7 = vld [vmem:[#allocation3 + $0x141] sm:$0xff] }
 0x222   : > { %v1970_v16 = vadd.f32 %v1938_v30, %v1869_v37  ;;  %v1471_v4 = vadd.f32 %v1439_v20, %v1371_v55  ;;  %v2272_v59 = vmin.f32 %v2240_v2, 6.0  ;;  %v1971_v46 = vadd.f32 %v1939_v21, %v1870_v58  ;;  %v1505_v14 = vld [vmem:[#allocation3 + $0x122] sm:$0xff] }
 0x223   : > { %v1472_v3 = vadd.f32 %v1440_v32, %v1372_v38  ;;  %v1540_v62 = vmul.f32 %v2101_v36, %v9827_v0  ;;  %v1639_v17 = vmul.f32 %v10399_v61, %v9853_v25  ;;  %v1640_v15 = vmul.f32 %v1903_v13, %v9853_v25  ;;  %v2104_v13 = vld [vmem:[#allocation3 + $0x13a] sm:$0xff] }
 0x224   : > { %v2070_v43 = vadd.f32 %v2038_v45, %v1970_v16  ;;  %v1571_v22 = vadd.f32 %v1539_v18, %v1471_v4  ;;  %v2294_v28 = vpack.c.bf16 %v2272_v59, %v2271_v33  ;;  %v2071_v29 = vadd.f32 %v2039_v35, %v1971_v46  ;;  %v2105_v4 = vld [vmem:[#allocation3 + $0x142] sm:$0xff] }
 0x225   : > { %v1572_v52 = vadd.f32 %v1540_v62, %v1472_v3  ;;  %v1739_v40 = vmul.f32 %v10405_v56, %v9857_v26  ;;  %v1740_v30 = vmul.f32 %v10407_v48, %v9857_v26  ;;  %v1839_v21 = vmul.f32 %v2102_v12, %v9867_v34 }
 0x226   : > { %v2170_v63 = vadd.f32 %v2138_v49, %v2070_v43  ;;  %v1671_v36 = vadd.f32 %v1639_v17, %v1571_v22  ;;  %8881 = vmatmul.mubr.msk.bf16.gmra.mxu1 %vm1278_vm7, %v2294_v28  ;;  %v2171_v54 = vadd.f32 %v2139_v42, %v2071_v29  ;;  %v1840_v35 = vmul.f32 %v10426_v1, %v9867_v34 }
 0x227   : > { %v1672_v45 = vadd.f32 %v1640_v15, %v1572_v52  ;;  %v1940_v31 = vmul.f32 %v9849_v23, %v10443_v11  ;;  %v1941_v55 = vmul.f32 %v9849_v23, %v1905_v24  ;;  %v2040_v12 = vmul.f32 %v9861_v27, %v10447_v60 }
 0x228   : > { %v2209_v51 = vadd.f32 %v10418_v53, %v2170_v63  ;;  %v1771_v49 = vadd.f32 %v1739_v40, %v1671_v36  ;;  %v2210_v37 = vadd.f32 %v10418_v53, %v2171_v54  ;;  %v2041_v20 = vmul.f32 %v9861_v27, %v10452_v7 }
 0x229   : > { %v1772_v38 = vadd.f32 %v1740_v30, %v1672_v45  ;;  %v2140_v2 = vmul.f32 %v10346_v5, %v2104_v13  ;;  %v1373_v18 = vmul.f32 %v10399_v61, %v9810_v44  ;;  %v1374_v33 = vmul.f32 %v9810_v44, %v1338_v57  ;;  %v1907_v57 = vld [vmem:[#allocation3 + $0x158] sm:$0xff] }
 0x22a   : > { %v2241_v58 = vmax.f32 %v2209_v51, 0.0  ;;  %v1871_v32 = vadd.f32 %v1839_v21, %v1771_v49  ;;  %v2242_v16 = vmax.f32 %v2210_v37, 0.0  ;;  %v1441_v59 = vmul.f32 %v10405_v56, %v9815_v47  ;;  %v10481_v21 = vld [vmem:[#allocation3 + $0x150] sm:$0xff] }
 0x22b   : > { %v1872_v42 = vadd.f32 %v1840_v35, %v1772_v38  ;;  %v1442_v46 = vmul.f32 %v10407_v48, %v9815_v47  ;;  %v1541_v43 = vmul.f32 %v9827_v0, %v1505_v14  ;;  %v1542_v22 = vmul.f32 %v10426_v1, %v9827_v0  ;;  %v10487_v35 = vld [vmem:[#allocation3 + $0x151] sm:$0xff] }
 0x22c   : > { %v2273_v3 = vmin.f32 %v2241_v58, 6.0  ;;  %v1972_v62 = vadd.f32 %v1940_v31, %v1871_v32  ;;  %v2274_v17 = vmin.f32 %v2242_v16, 6.0  ;;  %v1473_v15 = vadd.f32 %v1441_v59, %v1373_v18  ;;  %v1340_v31 = vld [vmem:[#allocation3 + $0x140] sm:$0xff] }
 0x22d   : > { %v1973_v61 = vadd.f32 %v1941_v55, %v1872_v42  ;;  %v1474_v28 = vadd.f32 %v1442_v46, %v1374_v33  ;;  %v2141_v52 = vmul.f32 %v10346_v5, %v2105_v4  ;;  %v1641_v56 = vmul.f32 %v10443_v11, %v9853_v25 }
 0x22e   : > { %v2072_v29 = vadd.f32 %v2040_v12, %v1972_v62  ;;  %v1642_v40 = vmul.f32 %v1905_v24, %v9853_v25  ;;  %v2295_v48 = vpack.c.bf16 %v2274_v17, %v2273_v3  ;;  %v1573_v36 = vadd.f32 %v1541_v43, %v1473_v15  ;;  %v10491_v12 = vld [vmem:[#allocation3 + $0x159] sm:$0xff] }
 0x22f   : > { %v2073_v63 = vadd.f32 %v2041_v20, %v1973_v61  ;;  %v1574_v30 = vadd.f32 %v1542_v22, %v1474_v28  ;;  %v1741_v54 = vmul.f32 %v10447_v60, %v9857_v26  ;;  %v1742_v45 = vmul.f32 %v10452_v7, %v9857_v26  ;;  %v2107_v22 = vld [vmem:[#allocation3 + $0x15a] sm:$0xff] }
 0x230   : > { %v2172_v1 = vadd.f32 %v2140_v2, %v2072_v29  ;;  %8884 = vmatprep.mubr.msk.bf16.mxu1 %vm1278_vm7, %v2295_v48  ;;  %v1673_v51 = vadd.f32 %v1641_v56, %v1573_v36  ;;  %v1841_v55 = vmul.f32 %v2104_v13, %v9867_v34  ;;  %v1842_v37 = vmul.f32 %v2105_v4, %v9867_v34  ;;  %v1507_v2 = vld [vmem:[#allocation3 + $0x13a] sm:$0xff]  ;;  %v2106_v13 = vld [vmem:[#allocation3 + $0x152] sm:$0xff] }
 0x231   : > { %v2173_v24 = vadd.f32 %v2141_v52, %v2073_v63  ;;  %v1674_v49 = vadd.f32 %v1642_v40, %v1574_v30  ;;  %v1942_v38 = vmul.f32 %v9849_v23, %v10481_v21  ;;  %v1943_v20 = vmul.f32 %v9849_v23, %v1907_v57  ;;  %v10516_v30 = vld [vmem:[#allocation3 + $0x170] sm:$0xff] }
 0x232   : > { %v2211_v14 = vadd.f32 %v10418_v53, %v2172_v1  ;;  %v1773_v32 = vadd.f32 %v1741_v54, %v1673_v51  ;;  %v2042_v33 = vmul.f32 %v9861_v27, %v10487_v35  ;;  %v2043_v42 = vmul.f32 %v9861_v27, %v10491_v12 }
 0x233   : > { %v2212_v58 = vadd.f32 %v10418_v53, %v2173_v24  ;;  %v1774_v18 = vadd.f32 %v1742_v45, %v1674_v49  ;;  %v1375_v59 = vmul.f32 %v10443_v11, %v9810_v44  ;;  %v1376_v46 = vmul.f32 %v9810_v44, %v1340_v31  ;;  %v10518_v31 = vld [vmem:[#allocation3 + $0x168] sm:$0xff] }
 0x234   : > { %v2243_v16 = vmax.f32 %v2211_v14, 0.0  ;;  %v1873_v62 = vadd.f32 %v1841_v55, %v1773_v32  ;;  %v1443_v17 = vmul.f32 %v10447_v60, %v9815_v47  ;;  %v2142_v15 = vmul.f32 %v10346_v5, %v2106_v13  ;;  %v10525_v55 = vld [vmem:[#allocation3 + $0x169] sm:$0xff]  ;;  %v1342_v14 = vld [vmem:[#allocation3 + $0x158] sm:$0xff] }
 0x235   : > { %v2244_v3 = vmax.f32 %v2212_v58, 0.0  ;;  %v1874_v43 = vadd.f32 %v1842_v37, %v1774_v18  ;;  %v1444_v28 = vmul.f32 %v10452_v7, %v9815_v47  ;;  %v1543_v29 = vmul.f32 %v9827_v0, %v1507_v2  ;;  %v10529_v58 = vld [vmem:[#allocation3 + $0x171] sm:$0xff] }
 0x236   : > { %v2275_v61 = vmin.f32 %v2243_v16, 6.0  ;;  %v1974_v56 = vadd.f32 %v1942_v38, %v1873_v62  ;;  %v1475_v40 = vadd.f32 %v1443_v17, %v1375_v59  ;;  %v2143_v48 = vmul.f32 %v10346_v5, %v2107_v22  ;;  %v1509_v16 = vld [vmem:[#allocation3 + $0x152] sm:$0xff] }
 0x237   : > { %v2276_v52 = vmin.f32 %v2244_v3, 6.0  ;;  %v1975_v11 = vadd.f32 %v1943_v20, %v1874_v43  ;;  %v1476_v63 = vadd.f32 %v1444_v28, %v1376_v46  ;;  %v1544_v36 = vmul.f32 %v2105_v4, %v9827_v0 }
 0x238   : > { %v1643_v60 = vmul.f32 %v10481_v21, %v9853_v25  ;;  %v2074_v54 = vadd.f32 %v2042_v33, %v1974_v56  ;;  %v1575_v7 = vadd.f32 %v1543_v29, %v1475_v40  ;;  %v1644_v51 = vmul.f32 %v1907_v57, %v9853_v25  ;;  %v1511_v56 = vld [vmem:[#allocation3 + $0x16a] sm:$0xff] }
 0x239   : > { %v2296_v1 = vpack.c.bf16 %v2276_v52, %v2275_v61  ;;  %v2075_v45 = vadd.f32 %v2043_v42, %v1975_v11  ;;  %v1576_v24 = vadd.f32 %v1544_v36, %v1476_v63  ;;  %v1743_v49 = vmul.f32 %v10487_v35, %v9857_v26  ;;  %v1610_v52 = vld [vmem:[#allocation3 + $0x170] sm:$0xff] }
 0x23a   : > { %v1744_v4 = vmul.f32 %v10491_v12, %v9857_v26  ;;  %v2174_v37 = vadd.f32 %v2142_v15, %v2074_v54  ;;  %v1675_v20 = vadd.f32 %v1643_v60, %v1575_v7  ;;  %v1843_v2 = vmul.f32 %v2106_v13, %v9867_v34 }
 0x23b   : > { %8885 = vmatmul.mubr.msk.bf16.gmra.mxu1 %vm1278_vm7, %v2296_v1  ;;  %v2175_v38 = vadd.f32 %v2143_v48, %v2075_v45  ;;  %v1676_v32 = vadd.f32 %v1644_v51, %v1576_v24  ;;  %v1844_v57 = vmul.f32 %v2107_v22, %v9867_v34  ;;  %v1944_v18 = vmul.f32 %v9849_v23, %v10518_v31  ;;  %v2109_v1 = vld [vmem:[#allocation3 + $0x172] sm:$0xff]  ;;  %v1809_v51 = vld [vmem:[#allocation3 + $0x16a] sm:$0xff] }
 0x23c   : > { %v1945_v33 = vmul.f32 %v9849_v23, %v10516_v30  ;;  %v2213_v42 = vadd.f32 %v10418_v53, %v2174_v37  ;;  %v1775_v46 = vadd.f32 %v1743_v49, %v1675_v20  ;;  %v2044_v13 = vmul.f32 %v9861_v27, %v10525_v55  ;;  %v1910_v37 = vld [vmem:[#allocation3 + $0x180] sm:$0xff] }
 0x23d   : > { %v2214_v59 = vadd.f32 %v10418_v53, %v2175_v38  ;;  %v1776_v3 = vadd.f32 %v1744_v4, %v1676_v32  ;;  %v2045_v62 = vmul.f32 %v9861_v27, %v10529_v58  ;;  %v1377_v43 = vmul.f32 %v10481_v21, %v9810_v44  ;;  %v1911_v32 = vld [vmem:[#allocation3 + $0x188] sm:$0xff] }
 0x23e   : > { %v1378_v17 = vmul.f32 %v9810_v44, %v1342_v14  ;;  %v2245_v61 = vmax.f32 %v2213_v42, 0.0  ;;  %v1875_v28 = vadd.f32 %v1843_v2, %v1775_v46  ;;  %v1445_v29 = vmul.f32 %v10487_v35, %v9815_v47 }
 0x23f   : > { %v2246_v15 = vmax.f32 %v2214_v59, 0.0  ;;  %v1876_v11 = vadd.f32 %v1844_v57, %v1776_v3  ;;  %v1446_v40 = vmul.f32 %v10491_v12, %v9815_v47  ;;  %v1545_v48 = vmul.f32 %v9827_v0, %v1509_v16  ;;  %v2010_v57 = vld [vmem:[#allocation3 + $0x181] sm:$0xff]  ;;  %v2011_v59 = vld [vmem:[#allocation3 + $0x189] sm:$0xff] }
 0x240   : > { %v1546_v63 = vmul.f32 %v2107_v22, %v9827_v0  ;;  %v2277_v36 = vmin.f32 %v2245_v61, 6.0  ;;  %v1976_v60 = vadd.f32 %v1944_v18, %v1875_v28  ;;  %v1477_v54 = vadd.f32 %v1445_v29, %v1377_v43 }
 0x241   : > { %v2278_v21 = vmin.f32 %v2246_v15, 6.0  ;;  %v1977_v45 = vadd.f32 %v1945_v33, %v1876_v11  ;;  %v1478_v7 = vadd.f32 %v1446_v40, %v1378_v17  ;;  %v1645_v35 = vmul.f32 %v10518_v31, %v9853_v25  ;;  %v2110_v11 = vld [vmem:[#allocation3 + $0x182] sm:$0xff] }
 0x242   : > { %v1646_v24 = vmul.f32 %v9853_v25, %v1610_v52  ;;  %v2076_v4 = vadd.f32 %v2044_v13, %v1976_v60  ;;  %v2144_v12 = vmul.f32 %v10346_v5, %v1511_v56  ;;  %v1577_v14 = vadd.f32 %v1545_v48, %v1477_v54 }
 0x243   : > { %v2297_v49 = vpack.c.bf16 %v2278_v21, %v2277_v36  ;;  %v2077_v22 = vadd.f32 %v2045_v62, %v1977_v45  ;;  %v2145_v38 = vmul.f32 %v10346_v5, %v2109_v1  ;;  %v1578_v20 = vadd.f32 %v1546_v63, %v1478_v7  ;;  %v2111_v45 = vld [vmem:[#allocation3 + $0x18a] sm:$0xff] }
 0x244   : > { %v1745_v2 = vmul.f32 %v10525_v55, %v9857_v26  ;;  %v2176_v18 = vadd.f32 %v2144_v12, %v2076_v4  ;;  %v1677_v33 = vadd.f32 %v1645_v35, %v1577_v14  ;;  %v1746_v16 = vmul.f32 %v10529_v58, %v9857_v26 }
 0x245   : > { %8888 = vmatprep.mubr.msk.bf16.mxu1 %vm1278_vm7, %v2297_v49  ;;  %v1845_v42 = vmul.f32 %v9867_v34, %v1809_v51  ;;  %v2177_v46 = vadd.f32 %v2145_v38, %v2077_v22  ;;  %v1678_v13 = vadd.f32 %v1646_v24, %v1578_v20  ;;  %v1846_v3 = vmul.f32 %v2109_v1, %v9867_v34 }
 0x246   : > { %v1946_v62 = vmul.f32 %v9849_v23, %v1910_v37  ;;  %v2215_v43 = vadd.f32 %v10418_v53, %v2176_v18  ;;  %v1777_v17 = vadd.f32 %v1745_v2, %v1677_v33  ;;  %v1947_v61 = vmul.f32 %v9849_v23, %v1911_v32  ;;  %v1912_v2 = vld [vmem:[#allocation3 + $0x198] sm:$0xff] }
 0x247   : > { %v2046_v15 = vmul.f32 %v9861_v27, %v2010_v57  ;;  %v2216_v28 = vadd.f32 %v10418_v53, %v2177_v46  ;;  %v1778_v29 = vadd.f32 %v1746_v16, %v1678_v13  ;;  %v2047_v52 = vmul.f32 %v9861_v27, %v2011_v59  ;;  %v2012_v13 = vld [vmem:[#allocation3 + $0x199] sm:$0xff] }
 0x248   : > { %v1379_v40 = vmul.f32 %v10518_v31, %v9810_v44  ;;  %v2247_v48 = vmax.f32 %v2215_v43, 0.0  ;;  %v1877_v63 = vadd.f32 %v1845_v42, %v1777_v17  ;;  %v1380_v36 = vmul.f32 %v9810_v44, %v10516_v30  ;;  %v1913_v42 = vld [vmem:[#allocation3 + $0x1a0] sm:$0xff] }
 0x249   : > { %v1447_v21 = vmul.f32 %v10525_v55, %v9815_v47  ;;  %v2248_v60 = vmax.f32 %v2216_v28, 0.0  ;;  %v1878_v54 = vadd.f32 %v1846_v3, %v1778_v29  ;;  %v1448_v7 = vmul.f32 %v10529_v58, %v9815_v47 }
 0x24a   : > { %v1547_v35 = vmul.f32 %v9827_v0, %v1511_v56  ;;  %v2279_v24 = vmin.f32 %v2247_v48, 6.0  ;;  %v1978_v51 = vadd.f32 %v1946_v62, %v1877_v63  ;;  %v2146_v31 = vmul.f32 %v10346_v5, %v2110_v11 }
 0x24b   : > { %v1479_v49 = vadd.f32 %v1447_v21, %v1379_v40  ;;  %v2280_v4 = vmin.f32 %v2248_v60, 6.0  ;;  %v1979_v12 = vadd.f32 %v1947_v61, %v1878_v54  ;;  %v1480_v14 = vadd.f32 %v1448_v7, %v1380_v36 }
 0x24c   : > { %v1548_v44 = vmul.f32 %v2109_v1, %v9827_v0  ;;  %v2078_v30 = vadd.f32 %v2046_v15, %v1978_v51  ;;  %v2147_v55 = vmul.f32 %v10346_v5, %v2111_v45  ;;  %v1647_v38 = vmul.f32 %v1910_v37, %v9853_v25  ;;  %v2112_v15 = vld [vmem:[#allocation3 + $0x19a] sm:$0xff] }
 0x24d   : > { %v1579_v22 = vadd.f32 %v1547_v35, %v1479_v49  ;;  %v2298_v20 = vpack.c.bf16 %v2280_v4, %v2279_v24  ;;  %v2079_v47 = vadd.f32 %v2047_v52, %v1979_v12  ;;  %v1648_v56 = vmul.f32 %v1911_v32, %v9853_v25  ;;  %v2013_v32 = vld [vmem:[#allocation3 + $0x1a1] sm:$0xff] }
 0x24e   : > { %v1580_v58 = vadd.f32 %v1548_v44, %v1480_v14  ;;  %v2178_v18 = vadd.f32 %v2146_v31, %v2078_v30  ;;  %v1747_v16 = vmul.f32 %v2010_v57, %v9857_v26  ;;  %v1748_v46 = vmul.f32 %v2011_v59, %v9857_v26  ;;  %v2113_v59 = vld [vmem:[#allocation3 + $0x1a2] sm:$0xff]  ;;  %v2561_v14 = vpop.permute.xlu0 %2560  ;;  %v10603_v44 = vld [vmem:[%s14030_s6] ss:$0 sm:$0xff]  ;;  %s13802_s6 = scalar_lea.vmem [#allocation7], %s8518_s4  ;;  %s14038_s4 = sld [smem:[#allocation12_spill]] }
 0x24f   : > { %v1679_v33 = vadd.f32 %v1647_v38, %v1579_v22  ;;  %8889 = vmatmul.mubr.msk.bf16.gmra.mxu1 %vm1278_vm7, %v2298_v20  ;;  %v2179_v0 = vadd.f32 %v2147_v55, %v2079_v47  ;;  %v1847_v62 = vmul.f32 %v2110_v11, %v9867_v34  ;;  %v1948_v25 = vmul.f32 %v9849_v23, %v1912_v2  ;;  %v2563_v22 = vpop.permute.xlu1 %2562  ;;  %s8438_s9 = sshll.u32 %s13802_s6, 4  ;;  %s13904_s9 = int_to_ptr.vmem [resolvable:$true] %s8438_s9 }
 0x250   : > { %v1680_v1 = vadd.f32 %v1648_v56, %v1580_v58  ;;  %v2217_v37 = vadd.f32 %v10418_v53, %v2178_v18  ;;  %v1848_v57 = vmul.f32 %v2111_v45, %v9867_v34  ;;  %v1949_v61 = vmul.f32 %v9849_v23, %v1913_v42 }
 0x251   : > { %v1779_v3 = vadd.f32 %v1747_v16, %v1679_v33  ;;  %v2218_v43 = vadd.f32 %v10418_v53, %v2179_v0  ;;  %v2048_v26 = vmul.f32 %v9861_v27, %v2012_v13  ;;  %v2049_v11 = vmul.f32 %v9861_v27, %v2013_v32 }
 0x252   : > { %v1780_v17 = vadd.f32 %v1748_v46, %v1680_v1  ;;  %v2249_v28 = vmax.f32 %v2217_v37, 0.0  ;;  %v2148_v63 = vmul.f32 %v10346_v5, %v2112_v15  ;;  %v2149_v34 = vmul.f32 %v10346_v5, %v2113_v59  ;;  %v2565_v47 = vpop.permute.xlu0 %2564 }
 0x253   : > { %v1879_v29 = vadd.f32 %v1847_v62, %v1779_v3  ;;  %v2250_v52 = vmax.f32 %v2218_v43, 0.0  ;;  %v2567_v16 = vpop.permute.xlu1 %2566 }
 0x254   : > { %v1880_v40 = vadd.f32 %v1848_v57, %v1780_v17  ;;  %v2281_v36 = vmin.f32 %v2249_v28, 6.0 }
 0x255   : > { %v1980_v48 = vadd.f32 %v1948_v25, %v1879_v29  ;;  %v2282_v21 = vmin.f32 %v2250_v52, 6.0 }
 0x256   : > { %v1981_v60 = vadd.f32 %v1949_v61, %v1880_v40  ;;  %v2569_v0 = vpop.permute.xlu0 %2568 }
 0x257   : > { %v2080_v54 = vadd.f32 %v2048_v26, %v1980_v48  ;;  %v2299_v23 = vpack.c.bf16 %v2282_v21, %v2281_v36  ;;  %v2571_v37 = vpop.permute.xlu1 %2570 }
 0x258   : > { %v2081_v45 = vadd.f32 %v2049_v11, %v1981_v60 }
 0x259   : > { %v2180_v7 = vadd.f32 %v2148_v63, %v2080_v54  ;;  %8892 = vmatprep.mubr.msk.bf16.mxu1 %vm1278_vm7, %v2299_v23 }
 0x25a   : > { %v2181_v35 = vadd.f32 %v2149_v34, %v2081_v45  ;;  %v2573_v32 = vpop.permute.xlu0 %2572 }
 0x25b   : > { %v2219_v24 = vadd.f32 %v10418_v53, %v2180_v7  ;;  %v2575_v28 = vpop.permute.xlu1 %2574 }
 0x25c   : > { %v2220_v51 = vadd.f32 %v10418_v53, %v2181_v35 }
 0x25d   : > { %v2251_v27 = vmax.f32 %v2219_v24, 0.0 }
 0x25e   : > { %v2252_v31 = vmax.f32 %v2220_v51, 0.0  ;;  %v2577_v26 = vpop.permute.xlu0 %2576 }
 0x25f   : > { %v2283_v49 = vmin.f32 %v2251_v27, 6.0  ;;  %v2579_v52 = vpop.permute.xlu1 %2578 }
 0x260   : > { %v2284_v4 = vmin.f32 %v2252_v31, 6.0 }
 0x262   : > { %v2300_v12 = vpack.c.bf16 %v2284_v4, %v2283_v49  ;;  %v2581_v11 = vpop.permute.xlu0 %2580 }
 0x263   : > { %v2583_v60 = vpop.permute.xlu1 %2582 }
 0x264   : > { %8893 = vmatmul.mubr.msk.bf16.gmra.mxu1 %vm1278_vm7, %v2300_v12 }
 0x266   : > { %v2585_v7 = vpop.permute.xlu0 %2584 }
 0x267   : > { %v2587_v24 = vpop.permute.xlu1 %2586 }
 0x26a   : > { %v2589_v27 = vpop.permute.xlu0 %2588 }
 0x26b   : > { %v2591_v31 = vpop.permute.xlu1 %2590 }
 0x26e   : > { %v2593_v12 = vpop.permute.xlu0 %2592 }
 0x287   : > { %v8866_v5 = vpop.f32.mrf.mxu1 }
 0x288   : > { %v2410_v53 = vadd.f32 %v8866_v5, %v10603_v44 }
 0x289   : > { %v2401_v30 = vpop.f32.mrf.mxu1 }
 0x28a   : > { %v2402_v55 = vadd.f32 %v10603_v44, %v2401_v30  ;;  %v2658_v2 = vadd.f32 %v2565_v47, %v2410_v53 }
 0x28b   : > { %v8867_v38 = vpop.f32.mrf.mxu1 }
 0x28c   : > { %v2656_v20 = vadd.f32 %v2561_v14, %v2402_v55  ;;  %v2413_v18 = vadd.f32 %v8867_v38, %v10603_v44 }
 0x28d   : > { %v2404_v58 = vpop.f32.mrf.mxu1 }
 0x28e   : > { %v2405_v56 = vadd.f32 %v10603_v44, %v2404_v58  ;;  %2720 = vrot.lane.b32.xlu0 %v2656_v20, %s9300_s7  ;;  %v2659_v42 = vadd.f32 %v2567_v16, %v2413_v18  ;;  %v2597_v20 = vpop.permute.xlu0 %2596 }
 0x290   : > { %v2657_v33 = vadd.f32 %v2563_v22, %v2405_v56  ;;  %v2595_v22 = vpop.permute.xlu1 %2594 }
 0x292   : > { %2722 = vrot.lane.b32.xlu1 %v2657_v33, %s9300_s7  ;;  %2724 = vrot.lane.b32.xlu0 %v2658_v2, %s9300_s7  ;;  %v2601_v33 = vpop.permute.xlu0 %2600 }
 0x294   : > { %v2599_v2 = vpop.permute.xlu1 %2598 }
 0x296   : > { %2726 = vrot.lane.b32.xlu1 %v2659_v42, %s9300_s7  ;;  %v2605_v42 = vpop.permute.xlu0 %2604 }
 0x298   : > { %v2603_v16 = vpop.permute.xlu1 %2602 }
 0x2a6   : > { %v8870_v1 = vpop.f32.mrf.mxu1 }
 0x2a7   : > { %v2426_v62 = vadd.f32 %v8870_v1, %v10603_v44  ;;  %v2607_v1 = vpop.permute.xlu1 %2606 }
 0x2a8   : > { %v2417_v46 = vpop.f32.mrf.mxu1 }
 0x2a9   : > { %v2418_v13 = vadd.f32 %v10603_v44, %v2417_v46  ;;  %v2662_v57 = vadd.f32 %v2573_v32, %v2426_v62 }
 0x2aa   : > { %v8871_v3 = vpop.f32.mrf.mxu1 }
 0x2ab   : > { %v2660_v25 = vadd.f32 %v2569_v0, %v2418_v13  ;;  %v2429_v61 = vadd.f32 %v8871_v3, %v10603_v44  ;;  %v2609_v3 = vpop.permute.xlu0 %2608 }
 0x2ac   : > { %v2420_v43 = vpop.f32.mrf.mxu1 }
 0x2ad   : > { %v2421_v17 = vadd.f32 %v10603_v44, %v2420_v43  ;;  %2728 = vrot.lane.b32.xlu0 %v2660_v25, %s9300_s7  ;;  %v2663_v29 = vadd.f32 %v2575_v28, %v2429_v61 }
 0x2af   : > { %v2661_v15 = vadd.f32 %v2571_v37, %v2421_v17  ;;  %v2611_v17 = vpop.permute.xlu1 %2610  ;;  %v2613_v28 = vpop.permute.xlu0 %2612 }
 0x2b1   : > { %2730 = vrot.lane.b32.xlu1 %v2661_v15, %s9300_s7  ;;  %2732 = vrot.lane.b32.xlu0 %v2662_v57, %s9300_s7 }
 0x2b5   : > { %2734 = vrot.lane.b32.xlu1 %v2663_v29, %s9300_s7 }
 0x2be   : > { %v8874_v59 = vpop.f32.mrf.mxu1 }
 0x2bf   : > { %v2442_v36 = vadd.f32 %v8874_v59, %v10603_v44  ;;  %v2617_v59 = vpop.permute.xlu0 %2616 }
 0x2c0   : > { %v2433_v40 = vpop.f32.mrf.mxu1 }
 0x2c1   : > { %v2434_v48 = vadd.f32 %v10603_v44, %v2433_v40  ;;  %v2666_v23 = vadd.f32 %v2581_v11, %v2442_v36 }
 0x2c2   : > { %v8875_v63 = vpop.f32.mrf.mxu1 }
 0x2c3   : > { %v2664_v21 = vadd.f32 %v2577_v26, %v2434_v48  ;;  %v2445_v45 = vadd.f32 %v8875_v63, %v10603_v44  ;;  %v2615_v26 = vpop.permute.xlu1 %2614  ;;  %v10647_v48 = vpop.permute.xlu0 %2620 }
 0x2c4   : > { %v2436_v34 = vpop.f32.mrf.mxu1 }
 0x2c5   : > { %v2437_v54 = vadd.f32 %v10603_v44, %v2436_v34  ;;  %2736 = vrot.lane.b32.xlu0 %v2664_v21, %s9300_s7  ;;  %v2667_v51 = vadd.f32 %v2583_v60, %v2445_v45 }
 0x2c7   : > { %v2665_v35 = vadd.f32 %v2579_v52, %v2437_v54  ;;  %v10645_v52 = vpop.permute.xlu1 %2618 }
 0x2c9   : > { %2738 = vrot.lane.b32.xlu1 %v2665_v35, %s9300_s7  ;;  %2740 = vrot.lane.b32.xlu0 %v2666_v23, %s9300_s7 }
 0x2cb   : > { %v10651_v34 = vpop.permute.xlu1 %2622 }
 0x2cd   : > { %2742 = vrot.lane.b32.xlu1 %v2667_v51, %s9300_s7 }
 0x2d1   : > { %v8878_v49 = vpop.f32.mrf.mxu1 }
 0x2d2   : > { %v2458_v30 = vadd.f32 %v8878_v49, %v10603_v44 }
 0x2d3   : > { %v2449_v4 = vpop.f32.mrf.mxu1 }
 0x2d4   : > { %v2450_v14 = vadd.f32 %v10603_v44, %v2449_v4  ;;  %v2670_v47 = vadd.f32 %v2589_v27, %v2458_v30 }
 0x2d5   : > { %v8879_v5 = vpop.f32.mrf.mxu1 }
 0x2d6   : > { %v2668_v55 = vadd.f32 %v2585_v7, %v2450_v14  ;;  %v2461_v58 = vadd.f32 %v8879_v5, %v10603_v44 }
 0x2d7   : > { %v2452_v38 = vpop.f32.mrf.mxu1 }
 0x2d8   : > { %v2453_v53 = vadd.f32 %v10603_v44, %v2452_v38  ;;  %2744 = vrot.lane.b32.xlu0 %v2668_v55, %s9300_s7  ;;  %v2671_v18 = vadd.f32 %v2591_v31, %v2461_v58 }
 0x2da   : > { %v2669_v56 = vadd.f32 %v2587_v24, %v2453_v53 }
 0x2dc   : > { %2746 = vrot.lane.b32.xlu1 %v2669_v56, %s9300_s7  ;;  %2748 = vrot.lane.b32.xlu0 %v2670_v47, %s9300_s7 }
 0x2e0   : > { %2750 = vrot.lane.b32.xlu1 %v2671_v18, %s9300_s7 }
 0x2e6   : > { %v8882_v0 = vpop.f32.mrf.mxu1 }
 0x2e7   : > { %v2474_v62 = vadd.f32 %v8882_v0, %v10603_v44 }
 0x2e8   : > { %v2465_v46 = vpop.f32.mrf.mxu1 }
 0x2e9   : > { %v2466_v13 = vadd.f32 %v10603_v44, %v2465_v46  ;;  %v2674_v57 = vadd.f32 %v2597_v20, %v2474_v62 }
 0x2ea   : > { %v8883_v37 = vpop.f32.mrf.mxu1 }
 0x2eb   : > { %v2672_v25 = vadd.f32 %v2593_v12, %v2466_v13  ;;  %v2477_v61 = vadd.f32 %v8883_v37, %v10603_v44 }
 0x2ec   : > { %v2468_v32 = vpop.f32.mrf.mxu1 }
 0x2ed   : > { %v2469_v43 = vadd.f32 %v10603_v44, %v2468_v32  ;;  %2752 = vrot.lane.b32.xlu0 %v2672_v25, %s9300_s7  ;;  %v2675_v29 = vadd.f32 %v2599_v2, %v2477_v61 }
 0x2ef   : > { %v2673_v15 = vadd.f32 %v2595_v22, %v2469_v43 }
 0x2f1   : > { %2754 = vrot.lane.b32.xlu1 %v2673_v15, %s9300_s7  ;;  %2756 = vrot.lane.b32.xlu0 %v2674_v57, %s9300_s7 }
 0x2f5   : > { %2758 = vrot.lane.b32.xlu1 %v2675_v29, %s9300_s7 }
 0x2fb   : > { %v8886_v40 = vpop.f32.mrf.mxu1 }
 0x2fc   : > { %v2490_v21 = vadd.f32 %v8886_v40, %v10603_v44 }
 0x2fd   : > { %v2481_v11 = vpop.f32.mrf.mxu1 }
 0x2fe   : > { %v2482_v63 = vadd.f32 %v10603_v44, %v2481_v11  ;;  %v2678_v7 = vadd.f32 %v2605_v42, %v2490_v21  ;;  %v2897_v42 = vld [vmem:[%s14031_s3] sm:$0x3]  ;;  %s13992_s3 = smov 8  }
 0x2ff   : > { %v8887_v36 = vpop.f32.mrf.mxu1  ;;  %9118 = vmatprep.subr.msk.bf16.mxu0 %vm3002_vm9, %v2897_v42 }
 0x300   : > { %v2676_v60 = vadd.f32 %v2601_v33, %v2482_v63  ;;  %v2721_v23 = vpop.permute.xlu0 %2720  ;;  %v2493_v35 = vadd.f32 %v8887_v36, %v10603_v44 }
 0x301   : > { %v2484_v54 = vpop.f32.mrf.mxu1  ;;  %2817 = vst.msk [vmem:[#allocation2] sm:$0xff] %vm2816_vm8, %v2721_v23 }
 0x302   : > { %v2485_v45 = vadd.f32 %v10603_v44, %v2484_v54  ;;  %2760 = vrot.lane.b32.xlu0 %v2676_v60, %s9300_s7  ;;  %v2679_v31 = vadd.f32 %v2607_v1, %v2493_v35  ;;  %v3004_v1 = vsel %vm3002_vm9, %v2897_v42, 0 }
 0x303   : > { %8897 = vmatpush3.bf16.msra.mxu0 %v3004_v1 }
 0x304   : > { %v2677_v24 = vadd.f32 %v2603_v16, %v2485_v45  ;;  %v2723_v51 = vpop.permute.xlu1 %2722  ;;  %v2725_v27 = vpop.permute.xlu0 %2724 }
 0x305   : > { %2818 = vst.msk [vmem:[#allocation2 + $0x8] sm:$0xff] %vm2816_vm8, %v2723_v51  ;;  %2819 = vst.msk [vmem:[#allocation2 + $0x10] sm:$0xff] %vm2816_vm8, %v2725_v27 }
 0x306   : > { %2762 = vrot.lane.b32.xlu1 %v2677_v24, %s9300_s7  ;;  %2764 = vrot.lane.b32.xlu0 %v2678_v7, %s9300_s7 }
 0x308   : > { %v2727_v49 = vpop.permute.xlu1 %2726  ;;  %v10687_v61 = vld [vmem:[#allocation2] sm:$0xff] }
 0x309   : > { %2820 = vst.msk [vmem:[#allocation2 + $0x18] sm:$0xff] %vm2816_vm8, %v2727_v49 }
 0x30a   : > { %2766 = vrot.lane.b32.xlu1 %v2679_v31, %s9300_s7 }
 0x30c   : > { %v10682_v32 = vld [vmem:[#allocation2 + $0x8] sm:$0xff] }
 0x30d   : > { %v2881_v15 = vpack.c.bf16 %v10682_v32, %v10687_v61 }
 0x30f   : > { %v8890_v4 = vpop.f32.mrf.mxu1 }
 0x310   : > { %v2506_v30 = vadd.f32 %v8890_v4, %v10603_v44 }
 0x311   : > { %v2497_v12 = vpop.f32.mrf.mxu1 }
 0x312   : > { %v2498_v14 = vadd.f32 %v10603_v44, %v2497_v12  ;;  %v2682_v53 = vadd.f32 %v2613_v28, %v2506_v30  ;;  %v10693_v28 = vld [vmem:[#allocation2 + $0x18] sm:$0xff] }
 0x313   : > { %v8891_v5 = vpop.f32.mrf.mxu1 }
 0x314   : > { %v2680_v55 = vadd.f32 %v2609_v3, %v2498_v14  ;;  %v2509_v20 = vadd.f32 %v8891_v5, %v10603_v44 }
 0x315   : > { %v2500_v22 = vpop.f32.mrf.mxu1 }
 0x316   : > { %v2501_v38 = vadd.f32 %v10603_v44, %v2500_v22  ;;  %2768 = vrot.lane.b32.xlu0 %v2680_v55, %s9300_s7  ;;  %v2683_v58 = vadd.f32 %v2615_v26, %v2509_v20 }
 0x318   : > { %v2681_v47 = vadd.f32 %v2611_v17, %v2501_v38 }
 0x31a   : > { %2770 = vrot.lane.b32.xlu1 %v2681_v47, %s9300_s7  ;;  %2772 = vrot.lane.b32.xlu0 %v2682_v53, %s9300_s7 }
 0x31e   : > { %2774 = vrot.lane.b32.xlu1 %v2683_v58, %s9300_s7 }
 0x31f   : > { %v2729_v56 = vpop.permute.xlu0 %2728 }
 0x320   : > { %2821 = vst.msk [vmem:[#allocation2 + $0x20] sm:$0xff] %vm2816_vm8, %v2729_v56 }
 0x323   : > { %v2731_v18 = vpop.permute.xlu1 %2730  ;;  %v2733_v33 = vpop.permute.xlu0 %2732 }
 0x324   : > { %v8894_v2 = vpop.f32.mrf.mxu1  ;;  %2822 = vst.msk [vmem:[#allocation2 + $0x28] sm:$0xff] %vm2816_vm8, %v2731_v18  ;;  %2823 = vst.msk [vmem:[#allocation2 + $0x30] sm:$0xff] %vm2816_vm8, %v2733_v33 }
 0x325   : > { %v2522_v37 = vadd.f32 %v8894_v2, %v10603_v44 }
 0x326   : > { %v2513_v16 = vpop.f32.mrf.mxu1 }
 0x327   : > { %v2514_v0 = vadd.f32 %v10603_v44, %v2513_v16  ;;  %v2735_v13 = vpop.permute.xlu1 %2734  ;;  %v2686_v43 = vadd.f32 %v10647_v48, %v2522_v37 }
 0x328   : > { %v8895_v46 = vpop.f32.mrf.mxu1  ;;  %2824 = vst.msk [vmem:[#allocation2 + $0x38] sm:$0xff] %vm2816_vm8, %v2735_v13 }
 0x329   : > { %v2684_v3 = vadd.f32 %v2617_v59, %v2514_v0  ;;  %v2525_v17 = vadd.f32 %v8895_v46, %v10603_v44  ;;  %v10698_v59 = vld [vmem:[#allocation2 + $0x10] sm:$0xff] }
 0x32a   : > { %v2516_v62 = vpop.f32.mrf.mxu1 }
 0x32b   : > { %v2517_v25 = vadd.f32 %v10603_v44, %v2516_v62  ;;  %2776 = vrot.lane.b32.xlu0 %v2684_v3, %s9300_s7  ;;  %v10695_v29 = vld [vmem:[#allocation2 + $0x28] sm:$0xff]  ;;  %v2687_v26 = vadd.f32 %v10651_v34, %v2525_v17  ;;  %v10700_v44 = vld [vmem:[#allocation2 + $0x20] sm:$0xff]  ;;  %v10710_v48 = vld [vmem:[#allocation2 + $0x30] sm:$0xff] }
 0x32c   : > { %v2883_v40 = vpack.c.bf16 %v10695_v29, %v10700_v44 }
 0x32d   : > { %v2685_v57 = vadd.f32 %v10645_v52, %v2517_v25  ;;  %v2882_v52 = vpack.c.bf16 %v10693_v28, %v10698_v59 }
 0x32f   : > { %2778 = vrot.lane.b32.xlu1 %v2685_v57, %s9300_s7  ;;  %2780 = vrot.lane.b32.xlu0 %v2686_v43, %s9300_s7  ;;  %v10708_v11 = vld [vmem:[#allocation2 + $0x38] sm:$0xff] }
 0x330   : > { %v2884_v36 = vpack.c.bf16 %v10708_v11, %v10710_v48 }
 0x333   : > { %2782 = vrot.lane.b32.xlu1 %v2687_v26, %s9300_s7  ;;  %2921 = vrot.lane.b32.xlu0 %v2881_v15, %s9301_s29  ;;  %s14039_s7 = sld [smem:[#allocation15_spill]] }
 0x337   : > { %v2737_v63 = vpop.permute.xlu0 %2736  ;;  %2923 = vrot.lane.b32.xlu1 %v2882_v52, %s9301_s29  ;;  %2925 = vrot.lane.b32.xlu0 %v2883_v40, %s9301_s29 }
 0x338   : > { %2825 = vst.msk [vmem:[#allocation2 + $0x40] sm:$0xff] %vm2816_vm8, %v2737_v63 }
 0x339   : > { %p14041_p12 = scmp.ne.s32.totalorder %s14039_s7, 0 }
 0x33b   : > { %v2739_v21 = vpop.permute.xlu1 %2738  ;;  %v2741_v60 = vpop.permute.xlu0 %2740  ;;  %2927 = vrot.lane.b32.xlu1 %v2884_v36, %s9301_s29 }
 0x33c   : > { %2826 = vst.msk [vmem:[#allocation2 + $0x48] sm:$0xff] %vm2816_vm8, %v2739_v21  ;;  %2827 = vst.msk [vmem:[#allocation2 + $0x50] sm:$0xff] %vm2816_vm8, %v2741_v60 }
 0x33f   : > { %v2743_v34 = vpop.permute.xlu1 %2742  ;;  %v10721_v54 = vld [vmem:[#allocation2 + $0x40] sm:$0xff] }
 0x340   : > { %2828 = vst.msk [vmem:[#allocation2 + $0x58] sm:$0xff] %vm2816_vm8, %v2743_v34 }
 0x343   : > { %v10723_v23 = vld [vmem:[#allocation2 + $0x48] sm:$0xff]  ;;  %v10728_v7 = vld [vmem:[#allocation2 + $0x50] sm:$0xff] }
 0x344   : > { %v2885_v45 = vpack.c.bf16 %v10723_v23, %v10721_v54 }
 0x346   : > { %2929 = vrot.lane.b32.xlu0 %v2885_v45, %s9301_s29 }
 0x347   : > { %v10730_v35 = vld [vmem:[#allocation2 + $0x58] sm:$0xff] }
 0x348   : > { %v2886_v24 = vpack.c.bf16 %v10730_v35, %v10728_v7 }
 0x34a   : > { %v2745_v51 = vpop.permute.xlu0 %2744  ;;  %2931 = vrot.lane.b32.xlu1 %v2886_v24, %s9301_s29 }
 0x34b   : > { %2829 = vst.msk [vmem:[#allocation2 + $0x60] sm:$0xff] %vm2816_vm8, %v2745_v51 }
 0x34e   : > { %v2747_v27 = vpop.permute.xlu1 %2746  ;;  %v2749_v31 = vpop.permute.xlu0 %2748 }
 0x34f   : > { %2830 = vst.msk [vmem:[#allocation2 + $0x68] sm:$0xff] %vm2816_vm8, %v2747_v27  ;;  %2831 = vst.msk [vmem:[#allocation2 + $0x70] sm:$0xff] %vm2816_vm8, %v2749_v31 }
 0x352   : > { %v2751_v49 = vpop.permute.xlu1 %2750  ;;  %v10739_v4 = vld [vmem:[#allocation2 + $0x60] sm:$0xff] }
 0x353   : > { %2832 = vst.msk [vmem:[#allocation2 + $0x78] sm:$0xff] %vm2816_vm8, %v2751_v49 }
 0x356   : > { %v10741_v12 = vld [vmem:[#allocation2 + $0x68] sm:$0xff]  ;;  %v10746_v5 = vld [vmem:[#allocation2 + $0x70] sm:$0xff] }
 0x357   : > { %v2887_v14 = vpack.c.bf16 %v10741_v12, %v10739_v4 }
 0x359   : > { %2933 = vrot.lane.b32.xlu0 %v2887_v14, %s9301_s29 }
 0x35a   : > { %v10748_v30 = vld [vmem:[#allocation2 + $0x78] sm:$0xff] }
 0x35b   : > { %v2888_v55 = vpack.c.bf16 %v10748_v30, %v10746_v5 }
 0x35d   : > { %2935 = vrot.lane.b32.xlu1 %v2888_v55, %s9301_s29 }
 0x35f   : > { %v2753_v22 = vpop.permute.xlu0 %2752 }
 0x360   : > { %2833 = vst.msk [vmem:[#allocation2 + $0x80] sm:$0xff] %vm2816_vm8, %v2753_v22 }
 0x363   : > { %v2755_v38 = vpop.permute.xlu1 %2754  ;;  %v2757_v53 = vpop.permute.xlu0 %2756 }
 0x364   : > { %2834 = vst.msk [vmem:[#allocation2 + $0x88] sm:$0xff] %vm2816_vm8, %v2755_v38  ;;  %2835 = vst.msk [vmem:[#allocation2 + $0x90] sm:$0xff] %vm2816_vm8, %v2757_v53 }
 0x367   : > { %v2759_v20 = vpop.permute.xlu1 %2758  ;;  %v10757_v47 = vld [vmem:[#allocation2 + $0x80] sm:$0xff] }
 0x368   : > { %2836 = vst.msk [vmem:[#allocation2 + $0x98] sm:$0xff] %vm2816_vm8, %v2759_v20 }
 0x36b   : > { %v10759_v58 = vld [vmem:[#allocation2 + $0x88] sm:$0xff]  ;;  %v10764_v2 = vld [vmem:[#allocation2 + $0x90] sm:$0xff] }
 0x36c   : > { %v2889_v56 = vpack.c.bf16 %v10759_v58, %v10757_v47 }
 0x36e   : > { %2937 = vrot.lane.b32.xlu0 %v2889_v56, %s9301_s29 }
 0x36f   : > { %v10766_v18 = vld [vmem:[#allocation2 + $0x98] sm:$0xff] }
 0x370   : > { %v2890_v33 = vpack.c.bf16 %v10766_v18, %v10764_v2 }
 0x372   : > { %2939 = vrot.lane.b32.xlu1 %v2890_v33, %s9301_s29 }
 0x374   : > { %v2761_v16 = vpop.permute.xlu0 %2760 }
 0x375   : > { %2837 = vst.msk [vmem:[#allocation2 + $0xa0] sm:$0xff] %vm2816_vm8, %v2761_v16 }
 0x378   : > { %v2763_v42 = vpop.permute.xlu1 %2762  ;;  %v2765_v0 = vpop.permute.xlu0 %2764 }
 0x379   : > { %2838 = vst.msk [vmem:[#allocation2 + $0xa8] sm:$0xff] %vm2816_vm8, %v2763_v42  ;;  %2839 = vst.msk [vmem:[#allocation2 + $0xb0] sm:$0xff] %vm2816_vm8, %v2765_v0  ;;  %v3266_v0 = vld [vmem:[#allocation3] sm:$0xff] }
 0x37c   : > { %v2767_v1 = vpop.permute.xlu1 %2766  ;;  %v10775_v46 = vld [vmem:[#allocation2 + $0xa0] sm:$0xff] }
 0x37d   : > { %2840 = vst.msk [vmem:[#allocation2 + $0xb8] sm:$0xff] %vm2816_vm8, %v2767_v1  ;;  %v3267_v1 = vld [vmem:[#allocation3 + $0x8] sm:$0xff] }
 0x380   : > { %v10777_v13 = vld [vmem:[#allocation2 + $0xa8] sm:$0xff]  ;;  %v10782_v3 = vld [vmem:[#allocation2 + $0xb0] sm:$0xff] }
 0x381   : > { %v2891_v37 = vpack.c.bf16 %v10777_v13, %v10775_v46 }
 0x383   : > { %2941 = vrot.lane.b32.xlu0 %v2891_v37, %s9301_s29  ;;  %v3335_v37 = vld [vmem:[#allocation3 + $0x9] sm:$0xff] }
 0x384   : > { %v10784_v62 = vld [vmem:[#allocation2 + $0xb8] sm:$0xff] }
 0x385   : > { %v2892_v25 = vpack.c.bf16 %v10784_v62, %v10782_v3 }
 0x387   : > { %2943 = vrot.lane.b32.xlu1 %v2892_v25, %s9301_s29 }
 0x388   : > { %v2769_v43 = vpop.permute.xlu0 %2768 }
 0x389   : > { %2841 = vst.msk [vmem:[#allocation2 + $0xc0] sm:$0xff] %vm2816_vm8, %v2769_v43 }
 0x38c   : > { %v2771_v17 = vpop.permute.xlu1 %2770  ;;  %v2773_v57 = vpop.permute.xlu0 %2772 }
 0x38d   : > { %2842 = vst.msk [vmem:[#allocation2 + $0xc8] sm:$0xff] %vm2816_vm8, %v2771_v17  ;;  %2843 = vst.msk [vmem:[#allocation2 + $0xd0] sm:$0xff] %vm2816_vm8, %v2773_v57 }
 0x390   : > { %v2775_v15 = vpop.permute.xlu1 %2774  ;;  %v10793_v26 = vld [vmem:[#allocation2 + $0xc0] sm:$0xff] }
 0x391   : > { %2844 = vst.msk [vmem:[#allocation2 + $0xd8] sm:$0xff] %vm2816_vm8, %v2775_v15 }
 0x394   : > { %v10795_v52 = vld [vmem:[#allocation2 + $0xc8] sm:$0xff]  ;;  %v10800_v63 = vld [vmem:[#allocation2 + $0xd0] sm:$0xff] }
 0x395   : > { %v2893_v40 = vpack.c.bf16 %v10795_v52, %v10793_v26 }
 0x397   : > { %2945 = vrot.lane.b32.xlu0 %v2893_v40, %s9301_s29 }
 0x398   : > { %v10802_v36 = vld [vmem:[#allocation2 + $0xd8] sm:$0xff] }
 0x399   : > { %v2894_v21 = vpack.c.bf16 %v10802_v36, %v10800_v63 }
 0x39b   : > { %2947 = vrot.lane.b32.xlu1 %v2894_v21, %s9301_s29  ;;  %v3434_v21 = vld [vmem:[#allocation3 + $0x2] sm:$0xff] }
 0x39d   : > { %v2777_v60 = vpop.permute.xlu0 %2776 }
 0x39e   : > { %2845 = vst.msk [vmem:[#allocation2 + $0xe0] sm:$0xff] %vm2816_vm8, %v2777_v60  ;;  %v3435_v60 = vld [vmem:[#allocation3 + $0xa] sm:$0xff] }
 0x3a1   : > { %v2779_v34 = vpop.permute.xlu1 %2778  ;;  %v2781_v45 = vpop.permute.xlu0 %2780 }
 0x3a2   : > { %2846 = vst.msk [vmem:[#allocation2 + $0xe8] sm:$0xff] %vm2816_vm8, %v2779_v34  ;;  %2847 = vst.msk [vmem:[#allocation2 + $0xf0] sm:$0xff] %vm2816_vm8, %v2781_v45 }
 0x3a5   : > { %v2783_v24 = vpop.permute.xlu1 %2782  ;;  %v2922_v51 = vpop.permute.xlu0 %2921  ;;  %v2877_v27 = vld [vmem:[#allocation2 + $0xe0] sm:$0xff] }
 0x3a6   : > { %2848 = vst.msk [vmem:[#allocation2 + $0xf8] sm:$0xff] %vm2816_vm8, %v2783_v24  ;;  %8898 = vmatprep.mubr.msk.bf16.mxu0 %vm2953_vm10, %v2922_v51 }
 0x3a9   : > { %v2878_v31 = vld [vmem:[#allocation2 + $0xe8] sm:$0xff]  ;;  %v2924_v49 = vpop.permute.xlu1 %2923  ;;  %v2926_v14 = vpop.permute.xlu0 %2925  ;;  %v2879_v22 = vld [vmem:[#allocation2 + $0xf0] sm:$0xff] }
 0x3aa   : > { %v2895_v55 = vpack.c.bf16 %v2878_v31, %v2877_v27  ;;  %8899 = vmatmul.mubr.msk.bf16.vlgmr.msra.gmra.mxu0 %vm2953_vm10, %v2924_v49 }
 0x3ab   : > { %8902 = vmatprep.mubr.msk.bf16.mxu0 %vm2953_vm10, %v2926_v14 }
 0x3ac   : > { %2949 = vrot.lane.b32.xlu0 %v2895_v55, %s9301_s29 }
 0x3ad   : > { %v2880_v38 = vld [vmem:[#allocation2 + $0xf8] sm:$0xff]  ;;  %v2928_v20 = vpop.permute.xlu1 %2927 }
 0x3ae   : > { %v2896_v53 = vpack.c.bf16 %v2880_v38, %v2879_v22 }
 0x3b0   : > { %4517 = vrot.lane.b32.xlu0 %v10687_v61, %s9301_s29  ;;  %2951 = vrot.lane.b32.xlu1 %v2896_v53, %s9301_s29 }
 0x3b2   : > { %8903 = vmatmul.mubr.msk.bf16.gmra.mxu0 %vm2953_vm10, %v2928_v20 }
 0x3b4   : > { %4521 = vrot.lane.b32.xlu0 %v10698_v59, %s9301_s29  ;;  %4519 = vrot.lane.b32.xlu1 %v10682_v32, %s9301_s29  ;;  %v9178_v59 = vld [vmem:[%s14032_s0 + $0x8] ss:$0 sps:$4 sm:$0xff]  }
 0x3b5   : > { %9119 = vmatprep.subr.msk.bf16.mxu1 %vm4320_vm11, %v9178_v59 }
 0x3b8   : > { %4525 = vrot.lane.b32.xlu0 %v10700_v44, %s9301_s29  ;;  %4523 = vrot.lane.b32.xlu1 %v10693_v28, %s9301_s29  ;;  %v2930_v56 = vpop.permute.xlu0 %2929  ;;  %v4322_v44 = vsel %vm4320_vm11, %v9178_v59, 0 }
 0x3b9   : > { %8906 = vmatprep.mubr.msk.bf16.mxu0 %vm2953_vm10, %v2930_v56  ;;  %8931 = vmatpush3.bf16.msra.mxu1 %v4322_v44 }
 0x3bc   : > { %4529 = vrot.lane.b32.xlu0 %v10710_v48, %s9301_s29  ;;  %4527 = vrot.lane.b32.xlu1 %v10695_v29, %s9301_s29  ;;  %v2932_v61 = vpop.permute.xlu1 %2931 }
 0x3bd   : > { %8907 = vmatmul.mubr.msk.bf16.gmra.mxu0 %vm2953_vm10, %v2932_v61 }
 0x3c0   : > { %4533 = vrot.lane.b32.xlu0 %v10721_v54, %s9301_s29  ;;  %4531 = vrot.lane.b32.xlu1 %v10708_v11, %s9301_s29 }
 0x3c4   : > { %4537 = vrot.lane.b32.xlu0 %v10728_v7, %s9301_s29  ;;  %4535 = vrot.lane.b32.xlu1 %v10723_v23, %s9301_s29  ;;  %v9179_v23 = vld [vmem:[%s14032_s0] sm:$0xff]   ;;  %s9229_s0 = scalar_lea.vmem %s13904_s9, 4096 }
 0x3c5   : > { %8932 = vmatprep.subr.bf16.mxu1 %v9179_v23  ;;  %p9230_p11 = scmp.ne.s32.totalorder %s13904_s9, %s9229_s0 }
 0x3c6   : > { %8933 = vmatpush3.bf16.msra.mxu1 %v9179_v23 }
 0x3c7   : > { %p9231_p13 = pnand %p9230_p11, %p14041_p12 }
 0x3c8   : > { %4541 = vrot.lane.b32.xlu0 %v10739_v4, %s9301_s29  ;;  %4539 = vrot.lane.b32.xlu1 %v10730_v35, %s9301_s29 }
 0x3c9   : > { %p9232_p4 = pneg %p9231_p13 }
 0x3cb   : > { %v2934_v32 = vpop.permute.xlu0 %2933 }
 0x3cc   : > { %4545 = vrot.lane.b32.xlu0 %v10746_v5, %s9301_s29  ;;  %4543 = vrot.lane.b32.xlu1 %v10741_v12, %s9301_s29  ;;  %v10900_v5 = vld [vmem:[%s14033_s10] ss:$0 sm:$0xff] }
 0x3cd   : > { %8910 = vmatprep.mubr.msk.bf16.mxu0 %vm2953_vm10, %v2934_v32 }
 0x3cf   : > { %v2936_v28 = vpop.permute.xlu1 %2935 }
 0x3d0   : > { %4549 = vrot.lane.b32.xlu0 %v10757_v47, %s9301_s29  ;;  %4547 = vrot.lane.b32.xlu1 %v10748_v30, %s9301_s29 }
 0x3d1   : > { %8911 = vmatmul.mubr.msk.bf16.gmra.mxu0 %vm2953_vm10, %v2936_v28 }
 0x3d4   : > { %4553 = vrot.lane.b32.xlu0 %v10764_v2, %s9301_s29  ;;  %4551 = vrot.lane.b32.xlu1 %v10759_v58, %s9301_s29 }
 0x3d8   : > { %4557 = vrot.lane.b32.xlu0 %v10775_v46, %s9301_s29  ;;  %4555 = vrot.lane.b32.xlu1 %v10766_v18, %s9301_s29  ;;  %v3334_v46 = vld [vmem:[#allocation3 + $0x1] sm:$0xff] }
 0x3dc   : > { %4561 = vrot.lane.b32.xlu0 %v10782_v3, %s9301_s29  ;;  %4559 = vrot.lane.b32.xlu1 %v10777_v13, %s9301_s29 }
 0x3e0   : > { %4565 = vrot.lane.b32.xlu0 %v10793_v26, %s9301_s29  ;;  %4563 = vrot.lane.b32.xlu1 %v10784_v62, %s9301_s29  ;;  %v2938_v29 = vpop.permute.xlu0 %2937 }
 0x3e1   : > { %8914 = vmatprep.mubr.msk.bf16.mxu0 %vm2953_vm10, %v2938_v29 }
 0x3e4   : > { %4569 = vrot.lane.b32.xlu0 %v10800_v63, %s9301_s29  ;;  %4567 = vrot.lane.b32.xlu1 %v10795_v52, %s9301_s29  ;;  %v2940_v11 = vpop.permute.xlu1 %2939 }
 0x3e5   : > { %8915 = vmatmul.mubr.msk.bf16.gmra.mxu0 %vm2953_vm10, %v2940_v11 }
 0x3e8   : > { %4573 = vrot.lane.b32.xlu0 %v2877_v27, %s9301_s29  ;;  %4571 = vrot.lane.b32.xlu1 %v10802_v36, %s9301_s29 }
 0x3ec   : > { %4577 = vrot.lane.b32.xlu0 %v2879_v22, %s9301_s29  ;;  %4575 = vrot.lane.b32.xlu1 %v2878_v31, %s9301_s29 }
 0x3f0   : > { %4579 = vrot.lane.b32.xlu1 %v2880_v38, %s9301_s29  ;;  %s14034_s29 = sld [smem:[#allocation25_spill]] }
 0x3f5   : > { %v2942_v48 = vpop.permute.xlu0 %2941 }
 0x3f6   : > { %8918 = vmatprep.mubr.msk.bf16.mxu0 %vm2953_vm10, %v2942_v48  ;;  %s14035_s5 = smov %s14034_s29  ;;  %v3264_v30 = vld [vmem:[%s14034_s29] sm:$0xff]  ;;  %s9303_s29 = smov 120  }
 0x3f7   : > { %v10907_v18 = vrot.slane %v3264_v30, %v9794_v39  ;;  %v10910_v33 = vrot.slane %v3264_v30, %v9801_v41  ;;  %v10918_v26 = vrot.slane %v3264_v30, %v9817_v50  ;;  %v10930_v56 = vrot.slane %v3264_v30, %v9833_v8 }
 0x3f8   : > { %v10933_v61 = vrot.slane %v3264_v30, %v9835_v9  ;;  %v10936_v32 = vrot.slane %v3264_v30, %v9831_v6  ;;  %v10939_v28 = vrot.slane %v3264_v30, %v9837_v10 }
 0x3f9   : > { %v2944_v54 = vpop.permute.xlu1 %2943  ;;  %v3302_v17 = vmul.f32 %v10907_v18, %v3266_v0  ;;  %v3303_v57 = vmul.f32 %v10907_v18, %v3267_v1  ;;  %v3370_v15 = vmul.f32 %v10910_v33, %v3334_v46  ;;  %v3371_v36 = vmul.f32 %v10910_v33, %v3335_v37 }
 0x3fa   : > { %8919 = vmatmul.mubr.msk.bf16.gmra.mxu0 %vm2953_vm10, %v2944_v54  ;;  %v3470_v49 = vmul.f32 %v10918_v26, %v3434_v21  ;;  %v3471_v14 = vmul.f32 %v10918_v26, %v3435_v60  ;;  %v10944_v54 = vrot.slane %v3264_v30, %v9843_v19 }
 0x3fb   : > { %v3402_v31 = vadd.f32 %v3370_v15, %v3302_v17  ;;  %v3403_v53 = vadd.f32 %v3371_v36, %v3303_v57 }
 0x3fd   : > { %v3502_v48 = vadd.f32 %v3470_v49, %v3402_v31 }
 0x409   : > { %v2946_v7 = vpop.permute.xlu0 %2945 }
 0x40a   : > { %8922 = vmatprep.mubr.msk.bf16.mxu0 %vm2953_vm10, %v2946_v7 }
 0x40d   : > { %v2948_v35 = vpop.permute.xlu1 %2947 }
 0x40e   : > { %8923 = vmatmul.mubr.msk.bf16.gmra.mxu0 %vm2953_vm10, %v2948_v35 }
 0x41e   : > { %v2950_v4 = vpop.permute.xlu0 %2949 }
 0x41f   : > { %8926 = vmatprep.mubr.msk.bf16.mxu0 %vm2953_vm10, %v2950_v4 }
 0x422   : > { %v2952_v12 = vpop.permute.xlu1 %2951 }
 0x423   : > { %8927 = vmatmul.mubr.msk.bf16.gmra.mxu0 %vm2953_vm10, %v2952_v12 }
 0x46a   : > { %v8900_v47 = vpop.f32.mrf.mxu0 }
 0x46b   : > { %v3049_v58 = vadd.f32 %v8900_v47, %v10900_v5  ;;  %v3503_v47 = vadd.f32 %v3471_v14, %v3403_v53 }
 0x46c   : > { %v3040_v2 = vpop.f32.mrf.mxu0 }
 0x46d   : > { %v3169_v16 = vmax.f32 %v3049_v58, 0.0  ;;  %v3041_v42 = vadd.f32 %v10900_v5, %v3040_v2 }
 0x46e   : > { %v8901_v13 = vpop.f32.mrf.mxu0 }
 0x46f   : > { %v3201_v3 = vmin.f32 %v3169_v16, 6.0  ;;  %v3167_v62 = vmax.f32 %v3041_v42, 0.0  ;;  %v3052_v25 = vadd.f32 %v8901_v13, %v10900_v5  ;;  %v10957_v13 = vld [vmem:[%s14035_s5 + $0x8] ss:$0 sm:$0xff] }
 0x470   : > { %v3043_v43 = vpop.f32.mrf.mxu0 }
 0x471   : > { %v3199_v52 = vmin.f32 %v3167_v62, 6.0  ;;  %v3170_v40 = vmax.f32 %v3052_v25, 0.0  ;;  %v3044_v63 = vadd.f32 %v10900_v5, %v3043_v43  ;;  %3234 = vst.msk [vmem:[#allocation3 + $0x31] sm:$0xff] %vm3231_vm12, %v3201_v3 }
 0x472   : > { %v8904_v34 = vpop.f32.mrf.mxu0 }
 0x473   : > { %v3202_v45 = vmin.f32 %v3170_v40, 6.0  ;;  %v3168_v24 = vmax.f32 %v3044_v63, 0.0  ;;  %v3065_v51 = vadd.f32 %v8904_v34, %v10900_v5  ;;  %3232 = vst.msk [vmem:[#allocation3 + $0x19] sm:$0xff] %vm3231_vm12, %v3199_v52 }
 0x474   : > { %v3056_v27 = vpop.f32.mrf.mxu0 }
 0x475   : > { %v3200_v55 = vmin.f32 %v3168_v24, 6.0  ;;  %v3173_v22 = vmax.f32 %v3065_v51, 0.0  ;;  %v3057_v38 = vadd.f32 %v10900_v5, %v3056_v27  ;;  %3235 = vst.msk [vmem:[#allocation3 + $0x39] sm:$0xff] %vm3231_vm12, %v3202_v45 }
 0x476   : > { %v8905_v20 = vpop.f32.mrf.mxu0 }
 0x477   : > { %v3205_v29 = vmin.f32 %v3173_v22, 6.0  ;;  %v3171_v59 = vmax.f32 %v3057_v38, 0.0  ;;  %v3068_v44 = vadd.f32 %v8905_v20, %v10900_v5  ;;  %3233 = vst.msk [vmem:[#allocation3 + $0x21] sm:$0xff] %vm3231_vm12, %v3200_v55 }
 0x478   : > { %v3059_v11 = vpop.f32.mrf.mxu0  ;;  %v3834_v23 = vld [vmem:[#allocation3 + $0x30] sm:$0xff] }
 0x479   : > { %v3934_v7 = vld [vmem:[#allocation3 + $0x31] sm:$0xff]  ;;  %v3203_v35 = vmin.f32 %v3171_v59, 6.0  ;;  %v3174_v4 = vmax.f32 %v3068_v44, 0.0  ;;  %v3060_v12 = vadd.f32 %v10900_v5, %v3059_v11  ;;  %3238 = vst.msk [vmem:[#allocation3 + $0x61] sm:$0xff] %vm3231_vm12, %v3205_v29  ;;  %v3870_v16 = vmul.f32 %v10936_v32, %v3834_v23 }
 0x47a   : > { %v3534_v58 = vld [vmem:[#allocation3 + $0x18] sm:$0xff]  ;;  %v3970_v42 = vmul.f32 %v10939_v28, %v3934_v7  ;;  %v3572_v0 = vmul.f32 %v3834_v23, %v10930_v56  ;;  %v10952_v30 = vmul.f32 %v3934_v7, %v10933_v61  ;;  %v10962_v3 = vmul.f32 %v3834_v23, %v10907_v18 }
 0x47b   : > { %v3634_v2 = vld [vmem:[#allocation3 + $0x19] sm:$0xff]  ;;  %v3206_v1 = vmin.f32 %v3174_v4, 6.0  ;;  %v3172_v46 = vmax.f32 %v3060_v12, 0.0  ;;  %v3570_v37 = vmul.f32 %v10930_v56, %v3534_v58  ;;  %3236 = vst.msk [vmem:[#allocation3 + $0x49] sm:$0xff] %vm3231_vm12, %v3203_v35  ;;  %v3304_v57 = vmul.f32 %v3534_v58, %v10907_v18 }
 0x47c   : > { %v3670_v62 = vmul.f32 %v10933_v61, %v3634_v2  ;;  %v10965_v25 = vld [vmem:[#allocation3 + $0x38] sm:$0xff]  ;;  %v3372_v15 = vmul.f32 %v3634_v2, %v10910_v33  ;;  %v10974_v52 = vmul.f32 %v3934_v7, %v10910_v33 }
 0x47d   : > { %v10967_v43 = vld [vmem:[#allocation3 + $0x39] sm:$0xff]  ;;  %v3204_v40 = vmin.f32 %v3172_v46, 6.0  ;;  %v8908_v63 = vpop.f32.mrf.mxu0  ;;  %v3602_v36 = vadd.f32 %v3570_v37, %v3502_v48  ;;  %v3871_v21 = vmul.f32 %v10936_v32, %v10965_v25  ;;  %3239 = vst.msk [vmem:[#allocation3 + $0x69] sm:$0xff] %vm3231_vm12, %v3206_v1 }
 0x47e   : > { %v10969_v17 = vld [vmem:[#allocation3 + $0x32] sm:$0xff]  ;;  %v10980_v60 = vmul.f32 %v10939_v28, %v10967_v43  ;;  %v10982_v34 = vld [vmem:[#allocation3 + $0x3a] sm:$0xff]  ;;  %v3081_v45 = vadd.f32 %v8908_v63, %v10900_v5  ;;  %v3404_v14 = vadd.f32 %v3372_v15, %v3304_v57  ;;  %v3735_v20 = vld [vmem:[#allocation3 + $0x22] sm:$0xff] }
 0x47f   : > { %v3535_v24 = vld [vmem:[#allocation3 + $0x20] sm:$0xff]  ;;  %v4070_v31 = vmul.f32 %v10957_v13, %v10969_v17  ;;  %v10990_v49 = vmul.f32 %v10957_v13, %v10982_v34  ;;  %v3072_v55 = vpop.f32.mrf.mxu0  ;;  %v3702_v53 = vadd.f32 %v3670_v62, %v3602_v36  ;;  %3237 = vst.msk [vmem:[#allocation3 + $0x51] sm:$0xff] %vm3231_vm12, %v3204_v40  ;;  %v3771_v11 = vmul.f32 %v10944_v54, %v3735_v20 }
 0x480   : > { %v3635_v51 = vld [vmem:[#allocation3 + $0x21] sm:$0xff]  ;;  %v3571_v22 = vmul.f32 %v10930_v56, %v3535_v24  ;;  %v3177_v59 = vmax.f32 %v3081_v45, 0.0  ;;  %v3073_v44 = vadd.f32 %v10900_v5, %v3072_v55  ;;  %v3305_v48 = vmul.f32 %v3535_v24, %v10907_v18 }
 0x481   : > { %v3734_v27 = vld [vmem:[#allocation3 + $0x1a] sm:$0xff]  ;;  %v3671_v38 = vmul.f32 %v10933_v61, %v3635_v51  ;;  %v8909_v23 = vpop.f32.mrf.mxu0  ;;  %v3373_v4 = vmul.f32 %v3635_v51, %v10910_v33  ;;  %v3473_v46 = vmul.f32 %v3735_v20, %v10918_v26  ;;  %v3573_v45 = vmul.f32 %v10965_v25, %v10930_v56 }
 0x482   : > { %v3770_v29 = vmul.f32 %v10944_v54, %v3734_v27  ;;  %v3603_v7 = vadd.f32 %v3571_v22, %v3503_v47  ;;  %v3472_v12 = vmul.f32 %v3734_v27, %v10918_v26  ;;  %v3209_v58 = vmin.f32 %v3177_v59, 6.0  ;;  %v11007_v22 = vld [vmem:[#allocation3 + $0x48] sm:$0xff] }
 0x483   : > { %v3175_v2 = vmax.f32 %v3073_v44, 0.0  ;;  %v3084_v1 = vadd.f32 %v8909_v23, %v10900_v5  ;;  %v3075_v37 = vpop.f32.mrf.mxu0  ;;  %v3405_v15 = vadd.f32 %v3373_v4, %v3305_v48  ;;  %v3772_v20 = vmul.f32 %v10969_v17, %v10944_v54 }
 0x484   : > { %v3802_v35 = vadd.f32 %v3770_v29, %v3702_v53  ;;  %v3703_v62 = vadd.f32 %v3671_v38, %v3603_v7  ;;  %v3504_v40 = vadd.f32 %v3472_v12, %v3404_v14  ;;  %v3076_v47 = vadd.f32 %v10900_v5, %v3075_v37  ;;  %3242 = vst.msk [vmem:[#allocation3 + $0x91] sm:$0xff] %vm3231_vm12, %v3209_v58 }
 0x485   : > { %v3207_v63 = vmin.f32 %v3175_v2, 6.0  ;;  %v3178_v36 = vmax.f32 %v3084_v1, 0.0  ;;  %v3505_v27 = vadd.f32 %v3473_v46, %v3405_v15  ;;  %v3673_v14 = vmul.f32 %v10967_v43, %v10933_v61 }
 0x486   : > { %v3902_v57 = vadd.f32 %v3870_v16, %v3802_v35  ;;  %v3803_v24 = vadd.f32 %v3771_v11, %v3703_v62  ;;  %v3604_v55 = vadd.f32 %v3572_v0, %v3504_v40  ;;  %v3176_v38 = vmax.f32 %v3076_v47, 0.0  ;;  %v11012_v16 = vld [vmem:[%s14036_s11] ss:$0 sm:$0xff]  ;;  %v11021_v0 = vld [vmem:[#allocation3 + $0x49] sm:$0xff]  ;;  %v11024_v48 = vld [vmem:[#allocation3 + $0x51] sm:$0xff] }
 0x487   : > { %v3210_v53 = vmin.f32 %v3178_v36, 6.0  ;;  %3240 = vst.msk [vmem:[#allocation3 + $0x79] sm:$0xff] %vm3231_vm12, %v3207_v63  ;;  %v3605_v44 = vadd.f32 %v3573_v45, %v3505_v27  ;;  %v11026_v23 = vld [vmem:[#allocation3 + $0x4a] sm:$0xff]  ;;  %v11028_v7 = vld [vmem:[#allocation3 + $0x52] sm:$0xff]  ;;  %v3773_v4 = vmul.f32 %v10982_v34, %v10944_v54  ;;  %v3872_v12 = vmul.f32 %v10936_v32, %v11007_v22 }
 0x488   : > { %v4002_v51 = vadd.f32 %v3970_v42, %v3902_v57  ;;  %v11019_v42 = vld [vmem:[#allocation3 + $0x50] sm:$0xff]  ;;  %v3903_v29 = vadd.f32 %v3871_v21, %v3803_v24  ;;  %v3704_v11 = vadd.f32 %v10952_v30, %v3604_v55  ;;  %v3208_v35 = vmin.f32 %v3176_v38, 6.0 }
 0x489   : > { %3243 = vst.msk [vmem:[#allocation3 + $0x99] sm:$0xff] %vm3231_vm12, %v3210_v53  ;;  %v3873_v21 = vmul.f32 %v10936_v32, %v11019_v42  ;;  %v3705_v58 = vadd.f32 %v3673_v14, %v3605_v44  ;;  %v3972_v1 = vmul.f32 %v10939_v28, %v11021_v0  ;;  %v3973_v46 = vmul.f32 %v10939_v28, %v11024_v48  ;;  %v11068_v44 = vld [vmem:[#allocation3 + $0x60] sm:$0xff] }
 0x48a   : > { %v4102_v59 = vadd.f32 %v4070_v31, %v4002_v51  ;;  %v4003_v30 = vadd.f32 %v10980_v60, %v3903_v29  ;;  %v3804_v2 = vadd.f32 %v3772_v20, %v3704_v11  ;;  %3241 = vst.msk [vmem:[#allocation3 + $0x81] sm:$0xff] %vm3231_vm12, %v3208_v35  ;;  %v4072_v37 = vmul.f32 %v10957_v13, %v11026_v23 }
 0x48b   : > { %v4073_v62 = vmul.f32 %v10957_v13, %v11028_v7  ;;  %v3805_v15 = vadd.f32 %v3773_v4, %v3705_v58  ;;  %v3307_v63 = vmul.f32 %v10965_v25, %v10907_v18  ;;  %v3375_v36 = vmul.f32 %v10967_v43, %v10910_v33 }
 0x48c   : > { %v4141_v31 = vadd.f32 %v11012_v16, %v4102_v59  ;;  %v4103_v60 = vadd.f32 %v10990_v49, %v4003_v30  ;;  %v3904_v40 = vadd.f32 %v3872_v12, %v3804_v2  ;;  %v3406_v47 = vadd.f32 %v10974_v52, %v10962_v3  ;;  %v11076_v2 = vld [vmem:[#allocation3 + $0x68] sm:$0xff] }
 0x48d   : > { %v3474_v45 = vmul.f32 %v10969_v17, %v10918_v26  ;;  %v3905_v27 = vadd.f32 %v3873_v21, %v3805_v15  ;;  %v3407_v55 = vadd.f32 %v3375_v36, %v3307_v63  ;;  %v3475_v53 = vmul.f32 %v10982_v34, %v10918_v26 }
 0x48e   : > { %v4173_v57 = vmax.f32 %v4141_v31, 0.0  ;;  %v4142_v24 = vadd.f32 %v11012_v16, %v4103_v60  ;;  %v4004_v49 = vadd.f32 %v3972_v1, %v3904_v40  ;;  %v3574_v25 = vmul.f32 %v11007_v22, %v10930_v56  ;;  %v11078_v1 = vld [vmem:[#allocation3 + $0x61] sm:$0xff] }
 0x48f   : > { %v3506_v38 = vadd.f32 %v3474_v45, %v3406_v47  ;;  %v4005_v14 = vadd.f32 %v3973_v46, %v3905_v27  ;;  %v3575_v3 = vmul.f32 %v11019_v42, %v10930_v56  ;;  %v3507_v17 = vadd.f32 %v3475_v53, %v3407_v55  ;;  %v11084_v47 = vld [vmem:[#allocation3 + $0x69] sm:$0xff] }
 0x490   : > { %v4205_v51 = vmin.f32 %v4173_v57, 6.0  ;;  %v4174_v43 = vmax.f32 %v4142_v24, 0.0  ;;  %v4104_v20 = vadd.f32 %v4072_v37, %v4004_v49  ;;  %v3674_v29 = vmul.f32 %v11021_v0, %v10933_v61  ;;  %v11086_v45 = vld [vmem:[#allocation3 + $0x62] sm:$0xff] }
 0x491   : > { %v3606_v52 = vadd.f32 %v3574_v25, %v3506_v38  ;;  %v3675_v59 = vmul.f32 %v11024_v48, %v10933_v61  ;;  %v8912_v34 = vpop.f32.mrf.mxu0  ;;  %v4105_v35 = vadd.f32 %v4073_v62, %v4005_v14  ;;  %v3774_v12 = vmul.f32 %v11026_v23, %v10944_v54  ;;  %v11094_v14 = vld [vmem:[#allocation3 + $0x6a] sm:$0xff] }
 0x492   : > { %v4206_v11 = vmin.f32 %v4174_v43, 6.0  ;;  %v4143_v4 = vadd.f32 %v11012_v16, %v4104_v20  ;;  %v3097_v21 = vadd.f32 %v8912_v34, %v10900_v5  ;;  %v3607_v30 = vadd.f32 %v3575_v3, %v3507_v17 }
 0x493   : > { %v3706_v31 = vadd.f32 %v3674_v29, %v3606_v52  ;;  %v3775_v58 = vmul.f32 %v11028_v7, %v10944_v54  ;;  %v3088_v46 = vpop.f32.mrf.mxu0  ;;  %v4144_v62 = vadd.f32 %v11012_v16, %v4105_v35  ;;  %v3874_v57 = vmul.f32 %v10936_v32, %v11068_v44 }
 0x494   : > { %v4237_v37 = vpack.c.bf16 %v4206_v11, %v4205_v51  ;;  %v4175_v60 = vmax.f32 %v4143_v4, 0.0  ;;  %v3181_v15 = vmax.f32 %v3097_v21, 0.0  ;;  %v3089_v40 = vadd.f32 %v10900_v5, %v3088_v46 }
 0x495   : > { %v3707_v63 = vadd.f32 %v3675_v59, %v3607_v30  ;;  %v3806_v36 = vadd.f32 %v3774_v12, %v3706_v31  ;;  %v8913_v24 = vpop.f32.mrf.mxu0  ;;  %v4176_v27 = vmax.f32 %v4144_v62, 0.0  ;;  %v3875_v49 = vmul.f32 %v10936_v32, %v11076_v2 }
 0x496   : > { %8934 = vmatprep.mubr.msk.bf16.mxu1 %vm3231_vm12, %v4237_v37  ;;  %v4207_v51 = vmin.f32 %v4175_v60, 6.0  ;;  %v3974_v55 = vmul.f32 %v10939_v28, %v11078_v1  ;;  %v3213_v53 = vmin.f32 %v3181_v15, 6.0  ;;  %v3179_v38 = vmax.f32 %v3089_v40, 0.0 }
 0x497   : > { %v3100_v25 = vadd.f32 %v8913_v24, %v10900_v5  ;;  %v3807_v43 = vadd.f32 %v3775_v58, %v3707_v63  ;;  %v3091_v20 = vpop.f32.mrf.mxu0  ;;  %v4208_v3 = vmin.f32 %v4176_v27, 6.0  ;;  %v3906_v17 = vadd.f32 %v3874_v57, %v3806_v36  ;;  %v11124_v27 = vld [vmem:[#allocation3 + $0x78] sm:$0xff] }
 0x498   : > { %v3975_v52 = vmul.f32 %v10939_v28, %v11084_v47  ;;  %v4074_v29 = vmul.f32 %v10957_v13, %v11086_v45  ;;  %v3211_v59 = vmin.f32 %v3179_v38, 6.0  ;;  %v3092_v11 = vadd.f32 %v10900_v5, %v3091_v20  ;;  %3246 = vst.msk [vmem:[#allocation3 + $0xc1] sm:$0xff] %vm3231_vm12, %v3213_v53  ;;  %v11138_v38 = vld [vmem:[#allocation3 + $0x81] sm:$0xff] }
 0x499   : > { %v3182_v34 = vmax.f32 %v3100_v25, 0.0  ;;  %v3907_v35 = vadd.f32 %v3875_v49, %v3807_v43  ;;  %v4238_v4 = vpack.c.bf16 %v4208_v3, %v4207_v51  ;;  %v4006_v12 = vadd.f32 %v3974_v55, %v3906_v17  ;;  %v11128_v51 = vld [vmem:[#allocation3 + $0x79] sm:$0xff] }
 0x49a   : > { %v4075_v21 = vmul.f32 %v10957_v13, %v11094_v14  ;;  %v3308_v30 = vmul.f32 %v11007_v22, %v10907_v18  ;;  %v3180_v58 = vmax.f32 %v3092_v11, 0.0  ;;  %3244 = vst.msk [vmem:[#allocation3 + $0xa9] sm:$0xff] %vm3231_vm12, %v3211_v59  ;;  %v3309_v37 = vmul.f32 %v11019_v42, %v10907_v18  ;;  %v11142_v17 = vld [vmem:[#allocation3 + $0x7a] sm:$0xff] }
 0x49b   : > { %v3214_v31 = vmin.f32 %v3182_v34, 6.0  ;;  %v4007_v46 = vadd.f32 %v3975_v52, %v3907_v35  ;;  %8935 = vmatmul.mubr.msk.bf16.vlgmr.msra.gmra.mxu1 %vm3231_vm12, %v4238_v4  ;;  %v4106_v62 = vadd.f32 %v4074_v29, %v4006_v12  ;;  %v3376_v60 = vmul.f32 %v11021_v0, %v10910_v33  ;;  %v11144_v52 = vld [vmem:[#allocation3 + $0x82] sm:$0xff] }
 0x49c   : > { %v3377_v57 = vmul.f32 %v11024_v48, %v10910_v33  ;;  %v3476_v22 = vmul.f32 %v11026_v23, %v10918_v26  ;;  %v3212_v15 = vmin.f32 %v3180_v58, 6.0  ;;  %v3477_v63 = vmul.f32 %v11028_v7, %v10918_v26  ;;  %v11126_v23 = vld [vmem:[#allocation3 + $0x80] sm:$0xff] }
 0x49d   : > { %3247 = vst.msk [vmem:[#allocation3 + $0xc9] sm:$0xff] %vm3231_vm12, %v3214_v31  ;;  %v4107_v40 = vadd.f32 %v4075_v21, %v4007_v46  ;;  %v3576_v42 = vmul.f32 %v11068_v44, %v10930_v56  ;;  %v4145_v36 = vadd.f32 %v11012_v16, %v4106_v62  ;;  %v3408_v24 = vadd.f32 %v3376_v60, %v3308_v30 }
 0x49e   : > { %v3409_v0 = vadd.f32 %v3377_v57, %v3309_v37  ;;  %v3577_v48 = vmul.f32 %v11076_v2, %v10930_v56  ;;  %3245 = vst.msk [vmem:[#allocation3 + $0xb1] sm:$0xff] %vm3231_vm12, %v3212_v15  ;;  %v3676_v49 = vmul.f32 %v11078_v1, %v10933_v61  ;;  %v3677_v55 = vmul.f32 %v11084_v47, %v10933_v61 }
 0x49f   : > { %v4146_v7 = vadd.f32 %v11012_v16, %v4107_v40  ;;  %v3776_v53 = vmul.f32 %v11086_v45, %v10944_v54  ;;  %v4177_v25 = vmax.f32 %v4145_v36, 0.0  ;;  %v3508_v43 = vadd.f32 %v3476_v22, %v3408_v24 }
 0x4a0   : > { %v3509_v20 = vadd.f32 %v3477_v63, %v3409_v0  ;;  %v3777_v3 = vmul.f32 %v11094_v14, %v10944_v54  ;;  %v3876_v59 = vmul.f32 %v10936_v32, %v11124_v27  ;;  %v3877_v34 = vmul.f32 %v10936_v32, %v11126_v23 }
 0x4a1   : > { %v4178_v29 = vmax.f32 %v4146_v7, 0.0  ;;  %v3976_v11 = vmul.f32 %v10939_v28, %v11128_v51  ;;  %v4209_v35 = vmin.f32 %v4177_v25, 6.0  ;;  %v3608_v4 = vadd.f32 %v3576_v42, %v3508_v43  ;;  %v11184_v25 = vld [vmem:[#allocation3 + $0x91] sm:$0xff] }
 0x4a2   : > { %v3609_v12 = vadd.f32 %v3577_v48, %v3509_v20  ;;  %v3977_v21 = vmul.f32 %v10939_v28, %v11138_v38  ;;  %v4076_v31 = vmul.f32 %v10957_v13, %v11142_v17  ;;  %v4077_v58 = vmul.f32 %v10957_v13, %v11144_v52 }
 0x4a3   : > { %v4210_v30 = vmin.f32 %v4178_v29, 6.0  ;;  %v3310_v46 = vmul.f32 %v11068_v44, %v10907_v18  ;;  %v3708_v37 = vadd.f32 %v3676_v49, %v3608_v4  ;;  %v3311_v60 = vmul.f32 %v11076_v2, %v10907_v18  ;;  %v11172_v2 = vld [vmem:[#allocation3 + $0x90] sm:$0xff] }
 0x4a4   : > { %v3709_v62 = vadd.f32 %v3677_v55, %v3609_v12  ;;  %v3378_v57 = vmul.f32 %v11078_v1, %v10910_v33  ;;  %v3379_v15 = vmul.f32 %v11084_v47, %v10910_v33  ;;  %v3478_v40 = vmul.f32 %v11086_v45, %v10918_v26 }
 0x4a5   : > { %v4239_v22 = vpack.c.bf16 %v4210_v30, %v4209_v35  ;;  %v3479_v63 = vmul.f32 %v11094_v14, %v10918_v26  ;;  %v3808_v42 = vadd.f32 %v3776_v53, %v3708_v37  ;;  %v3578_v24 = vmul.f32 %v11124_v27, %v10930_v56  ;;  %v8916_v0 = vpop.f32.mrf.mxu0  ;;  %v11182_v53 = vld [vmem:[#allocation3 + $0x98] sm:$0xff] }
 0x4a6   : > { %v3809_v44 = vadd.f32 %v3777_v3, %v3709_v62  ;;  %v3410_v36 = vadd.f32 %v3378_v57, %v3310_v46  ;;  %v3411_v1 = vadd.f32 %v3379_v15, %v3311_v60  ;;  %v3579_v47 = vmul.f32 %v11126_v23, %v10930_v56  ;;  %v11193_v30 = vld [vmem:[#allocation3 + $0x99] sm:$0xff] }
 0x4a7   : > { %8938 = vmatprep.mubr.msk.bf16.mxu1 %vm3231_vm12, %v4239_v22  ;;  %v3678_v45 = vmul.f32 %v11128_v51, %v10933_v61  ;;  %v3679_v14 = vmul.f32 %v11138_v38, %v10933_v61  ;;  %v3113_v48 = vadd.f32 %v8916_v0, %v10900_v5  ;;  %v3908_v7 = vadd.f32 %v3876_v59, %v3808_v42  ;;  %v3104_v43 = vpop.f32.mrf.mxu0  ;;  %v11200_v42 = vld [vmem:[#allocation3 + $0x92] sm:$0xff]  ;;  %v11204_v0 = vld [vmem:[#allocation3 + $0x9a] sm:$0xff] }
 0x4a8   : > { %v3909_v49 = vadd.f32 %v3877_v34, %v3809_v44  ;;  %v3510_v55 = vadd.f32 %v3478_v40, %v3410_v36  ;;  %v3511_v20 = vadd.f32 %v3479_v63, %v3411_v1  ;;  %v3778_v3 = vmul.f32 %v11142_v17, %v10944_v54 }
 0x4a9   : > { %v3779_v29 = vmul.f32 %v11144_v52, %v10944_v54  ;;  %v3878_v35 = vmul.f32 %v10936_v32, %v11172_v2  ;;  %v3185_v4 = vmax.f32 %v3113_v48, 0.0  ;;  %v3105_v59 = vadd.f32 %v10900_v5, %v3104_v43  ;;  %v8917_v46 = vpop.f32.mrf.mxu0 }
 0x4aa   : > { %v4008_v34 = vadd.f32 %v3976_v11, %v3908_v7  ;;  %v4009_v12 = vadd.f32 %v3977_v21, %v3909_v49  ;;  %v3610_v37 = vadd.f32 %v3578_v24, %v3510_v55  ;;  %v3611_v62 = vadd.f32 %v3579_v47, %v3511_v20 }
 0x4ab   : > { %v3879_v60 = vmul.f32 %v10936_v32, %v11182_v53  ;;  %v3978_v57 = vmul.f32 %v10939_v28, %v11184_v25  ;;  %v3217_v22 = vmin.f32 %v3185_v4, 6.0  ;;  %v3183_v15 = vmax.f32 %v3105_v59, 0.0  ;;  %v3107_v11 = vpop.f32.mrf.mxu0 }
 0x4ac   : > { %v3116_v40 = vadd.f32 %v8917_v46, %v10900_v5  ;;  %v4108_v63 = vadd.f32 %v4076_v31, %v4008_v34  ;;  %v4109_v21 = vadd.f32 %v4077_v58, %v4009_v12  ;;  %v3710_v44 = vadd.f32 %v3678_v45, %v3610_v37 }
 0x4ad   : > { %v3711_v36 = vadd.f32 %v3679_v14, %v3611_v62  ;;  %v3979_v24 = vmul.f32 %v10939_v28, %v11193_v30  ;;  %v3215_v1 = vmin.f32 %v3183_v15, 6.0  ;;  %v3108_v48 = vadd.f32 %v10900_v5, %v3107_v11  ;;  %3250 = vst.msk [vmem:[#allocation3 + $0xf1] sm:$0xff] %vm3231_vm12, %v3217_v22 }
 0x4ae   : > { %v3186_v47 = vmax.f32 %v3116_v40, 0.0  ;;  %v4147_v7 = vadd.f32 %v11012_v16, %v4108_v63  ;;  %v4148_v31 = vadd.f32 %v11012_v16, %v4109_v21  ;;  %v3810_v49 = vadd.f32 %v3778_v3, %v3710_v44  ;;  %v11231_v21 = vld [vmem:[#allocation3 + $0xa8] sm:$0xff]  ;;  %v11233_v44 = vld [vmem:[#allocation3 + $0xb0] sm:$0xff] }
 0x4af   : > { %v3811_v55 = vadd.f32 %v3779_v29, %v3711_v36  ;;  %v4078_v58 = vmul.f32 %v10957_v13, %v11200_v42  ;;  %v3184_v14 = vmax.f32 %v3108_v48, 0.0  ;;  %3248 = vst.msk [vmem:[#allocation3 + $0xd9] sm:$0xff] %vm3231_vm12, %v3215_v1  ;;  %v4079_v20 = vmul.f32 %v10957_v13, %v11204_v0 }
 0x4b0   : > { %v3218_v45 = vmin.f32 %v3186_v47, 6.0  ;;  %v4179_v43 = vmax.f32 %v4147_v7, 0.0  ;;  %v4180_v4 = vmax.f32 %v4148_v31, 0.0  ;;  %v3910_v59 = vadd.f32 %v3878_v35, %v3810_v49  ;;  %v11248_v31 = vld [vmem:[#allocation3 + $0xb1] sm:$0xff] }
 0x4b1   : > { %v3911_v34 = vadd.f32 %v3879_v60, %v3811_v55  ;;  %v3312_v12 = vmul.f32 %v11124_v27, %v10907_v18  ;;  %v3216_v46 = vmin.f32 %v3184_v14, 6.0  ;;  %v3313_v29 = vmul.f32 %v11126_v23, %v10907_v18  ;;  %v11250_v49 = vld [vmem:[#allocation3 + $0xaa] sm:$0xff]  ;;  %v11252_v55 = vld [vmem:[#allocation3 + $0xb2] sm:$0xff] }
 0x4b2   : > { %3251 = vst.msk [vmem:[#allocation3 + $0xf9] sm:$0xff] %vm3231_vm12, %v3218_v45  ;;  %v4211_v3 = vmin.f32 %v4179_v43, 6.0  ;;  %v3380_v37 = vmul.f32 %v11128_v51, %v10910_v33  ;;  %v4212_v62 = vmin.f32 %v4180_v4, 6.0  ;;  %v4010_v22 = vadd.f32 %v3978_v57, %v3910_v59 }
 0x4b3   : > { %v4011_v15 = vadd.f32 %v3979_v24, %v3911_v34  ;;  %v3381_v35 = vmul.f32 %v11138_v38, %v10910_v33  ;;  %3249 = vst.msk [vmem:[#allocation3 + $0xe1] sm:$0xff] %vm3231_vm12, %v3216_v46  ;;  %v3480_v27 = vmul.f32 %v11142_v17, %v10918_v26  ;;  %v3481_v40 = vmul.f32 %v11144_v52, %v10918_v26  ;;  %v11241_v24 = vld [vmem:[#allocation3 + $0xa9] sm:$0xff] }
 0x4b4   : > { %v3412_v60 = vadd.f32 %v3380_v37, %v3312_v12  ;;  %v3580_v23 = vmul.f32 %v11172_v2, %v10930_v56  ;;  %v4240_v63 = vpack.c.bf16 %v4212_v62, %v4211_v3  ;;  %v4110_v51 = vadd.f32 %v4078_v58, %v4010_v22 }
 0x4b5   : > { %v4111_v11 = vadd.f32 %v4079_v20, %v4011_v15  ;;  %v3413_v57 = vadd.f32 %v3381_v35, %v3313_v29  ;;  %v3581_v36 = vmul.f32 %v11182_v53, %v10930_v56  ;;  %v3680_v17 = vmul.f32 %v11184_v25, %v10933_v61 }
 0x4b6   : > { %v3512_v38 = vadd.f32 %v3480_v27, %v3412_v60  ;;  %v3681_v52 = vmul.f32 %v11193_v30, %v10933_v61  ;;  %8939 = vmatmul.mubr.msk.bf16.gmra.mxu1 %vm3231_vm12, %v4240_v63  ;;  %v4149_v1 = vadd.f32 %v11012_v16, %v4110_v51  ;;  %v3780_v7 = vmul.f32 %v11200_v42, %v10944_v54 }
 0x4b7   : > { %v4150_v47 = vadd.f32 %v11012_v16, %v4111_v11  ;;  %v3513_v48 = vadd.f32 %v3481_v40, %v3413_v57  ;;  %v3781_v45 = vmul.f32 %v11204_v0, %v10944_v54  ;;  %v3880_v14 = vmul.f32 %v10936_v32, %v11231_v21 }
 0x4b8   : > { %v3612_v58 = vadd.f32 %v3580_v23, %v3512_v38  ;;  %v3881_v43 = vmul.f32 %v10936_v32, %v11233_v44  ;;  %v4181_v20 = vmax.f32 %v4149_v1, 0.0  ;;  %v3980_v34 = vmul.f32 %v10939_v28, %v11241_v24 }
 0x4b9   : > { %v4182_v4 = vmax.f32 %v4150_v47, 0.0  ;;  %v3613_v59 = vadd.f32 %v3581_v36, %v3513_v48  ;;  %v3981_v46 = vmul.f32 %v10939_v28, %v11248_v31  ;;  %v4080_v3 = vmul.f32 %v10957_v13, %v11250_v49 }
 0x4ba   : > { %v3712_v12 = vadd.f32 %v3680_v17, %v3612_v58  ;;  %v4081_v29 = vmul.f32 %v10957_v13, %v11252_v55  ;;  %v8920_v37 = vpop.f32.mrf.mxu0  ;;  %v4213_v62 = vmin.f32 %v4181_v20, 6.0  ;;  %v3314_v35 = vmul.f32 %v11172_v2, %v10907_v18 }
 0x4bb   : > { %v4214_v22 = vmin.f32 %v4182_v4, 6.0  ;;  %v3713_v15 = vadd.f32 %v3681_v52, %v3613_v59  ;;  %v3129_v60 = vadd.f32 %v8920_v37, %v10900_v5  ;;  %v3315_v40 = vmul.f32 %v11182_v53, %v10907_v18 }
 0x4bc   : > { %v3812_v27 = vadd.f32 %v3780_v7, %v3712_v12  ;;  %v3382_v23 = vmul.f32 %v11184_v25, %v10910_v33  ;;  %v3120_v63 = vpop.f32.mrf.mxu0  ;;  %v3383_v57 = vmul.f32 %v11193_v30, %v10910_v33  ;;  %v3482_v38 = vmul.f32 %v11200_v42, %v10918_v26 }
 0x4bd   : > { %v4241_v51 = vpack.c.bf16 %v4214_v22, %v4213_v62  ;;  %v3813_v11 = vadd.f32 %v3781_v45, %v3713_v15  ;;  %v3189_v36 = vmax.f32 %v3129_v60, 0.0  ;;  %v3121_v2 = vadd.f32 %v10900_v5, %v3120_v63 }
 0x4be   : > { %v3912_v17 = vadd.f32 %v3880_v14, %v3812_v27  ;;  %v3414_v52 = vadd.f32 %v3382_v23, %v3314_v35  ;;  %v8921_v1 = vpop.f32.mrf.mxu0  ;;  %v3415_v47 = vadd.f32 %v3383_v57, %v3315_v40  ;;  %v3483_v25 = vmul.f32 %v11204_v0, %v10918_v26  ;;  %v11292_v35 = vld [vmem:[#allocation3 + $0xc0] sm:$0xff]  ;;  %v11298_v23 = vld [vmem:[#allocation3 + $0xc8] sm:$0xff] }
 0x4bf   : > { %8942 = vmatprep.mubr.msk.bf16.mxu1 %vm3231_vm12, %v4241_v51  ;;  %v3913_v53 = vadd.f32 %v3881_v43, %v3813_v11  ;;  %v3582_v48 = vmul.f32 %v11231_v21, %v10930_v56  ;;  %v3221_v30 = vmin.f32 %v3189_v36, 6.0  ;;  %v3187_v7 = vmax.f32 %v3121_v2, 0.0  ;;  %v11307_v57 = vld [vmem:[#allocation3 + $0xc9] sm:$0xff] }
 0x4c0   : > { %v3132_v42 = vadd.f32 %v8921_v1, %v10900_v5  ;;  %v4012_v58 = vadd.f32 %v3980_v34, %v3912_v17  ;;  %v3123_v45 = vpop.f32.mrf.mxu0  ;;  %v3514_v14 = vadd.f32 %v3482_v38, %v3414_v52  ;;  %v3515_v4 = vadd.f32 %v3483_v25, %v3415_v47  ;;  %v11309_v38 = vld [vmem:[#allocation3 + $0xc2] sm:$0xff]  ;;  %v11314_v1 = vld [vmem:[#allocation3 + $0xca] sm:$0xff] }
 0x4c1   : > { %v4013_v20 = vadd.f32 %v3981_v46, %v3913_v53  ;;  %v3583_v59 = vmul.f32 %v11233_v44, %v10930_v56  ;;  %v3219_v43 = vmin.f32 %v3187_v7, 6.0  ;;  %3254 = vst.msk [vmem:[#allocation3 + $0x121] sm:$0xff] %vm3231_vm12, %v3221_v30  ;;  %v3124_v0 = vadd.f32 %v10900_v5, %v3123_v45 }
 0x4c2   : > { %v3190_v12 = vmax.f32 %v3132_v42, 0.0  ;;  %v4112_v37 = vadd.f32 %v4080_v3, %v4012_v58  ;;  %v3614_v22 = vadd.f32 %v3582_v48, %v3514_v14  ;;  %v3682_v34 = vmul.f32 %v11241_v24, %v10933_v61  ;;  %v11300_v3 = vld [vmem:[#allocation3 + $0xc1] sm:$0xff] }
 0x4c3   : > { %v4113_v62 = vadd.f32 %v4081_v29, %v4013_v20  ;;  %v3615_v15 = vadd.f32 %v3583_v59, %v3515_v4  ;;  %3252 = vst.msk [vmem:[#allocation3 + $0x109] sm:$0xff] %vm3231_vm12, %v3219_v43  ;;  %v3188_v60 = vmax.f32 %v3124_v0, 0.0  ;;  %v3683_v40 = vmul.f32 %v11248_v31, %v10933_v61 }
 0x4c4   : > { %v3222_v46 = vmin.f32 %v3190_v12, 6.0  ;;  %v4151_v27 = vadd.f32 %v11012_v16, %v4112_v37  ;;  %v3714_v63 = vadd.f32 %v3682_v34, %v3614_v22  ;;  %v3782_v51 = vmul.f32 %v11250_v49, %v10944_v54 }
 0x4c5   : > { %v4152_v29 = vadd.f32 %v11012_v16, %v4113_v62  ;;  %v3783_v11 = vmul.f32 %v11252_v55, %v10944_v54  ;;  %v3220_v36 = vmin.f32 %v3188_v60, 6.0  ;;  %v3715_v17 = vadd.f32 %v3683_v40, %v3615_v15  ;;  %v11341_v60 = vld [vmem:[#allocation3 + $0xd8] sm:$0xff] }
 0x4c6   : > { %3255 = vst.msk [vmem:[#allocation3 + $0x129] sm:$0xff] %vm3231_vm12, %v3222_v46  ;;  %v4183_v2 = vmax.f32 %v4151_v27, 0.0  ;;  %v3882_v52 = vmul.f32 %v10936_v32, %v11292_v35  ;;  %v3814_v47 = vadd.f32 %v3782_v51, %v3714_v63  ;;  %v3883_v25 = vmul.f32 %v10936_v32, %v11298_v23  ;;  %v11352_v40 = vld [vmem:[#allocation3 + $0xd9] sm:$0xff] }
 0x4c7   : > { %v4184_v53 = vmax.f32 %v4152_v29, 0.0  ;;  %v3982_v48 = vmul.f32 %v10939_v28, %v11300_v3  ;;  %3253 = vst.msk [vmem:[#allocation3 + $0x111] sm:$0xff] %vm3231_vm12, %v3220_v36  ;;  %v3815_v7 = vadd.f32 %v3783_v11, %v3715_v17  ;;  %v3983_v42 = vmul.f32 %v10939_v28, %v11307_v57  ;;  %v11356_v36 = vld [vmem:[#allocation3 + $0xe1] sm:$0xff] }
 0x4c8   : > { %v4215_v30 = vmin.f32 %v4183_v2, 6.0  ;;  %v4082_v58 = vmul.f32 %v10957_v13, %v11309_v38  ;;  %v3914_v20 = vadd.f32 %v3882_v52, %v3814_v47  ;;  %v4083_v14 = vmul.f32 %v10957_v13, %v11314_v1  ;;  %v11358_v2 = vld [vmem:[#allocation3 + $0xda] sm:$0xff] }
 0x4c9   : > { %v4216_v45 = vmin.f32 %v4184_v53, 6.0  ;;  %v3316_v4 = vmul.f32 %v11231_v21, %v10907_v18  ;;  %v3915_v59 = vadd.f32 %v3883_v25, %v3815_v7  ;;  %v3317_v43 = vmul.f32 %v11233_v44, %v10907_v18  ;;  %v11367_v25 = vld [vmem:[#allocation3 + $0xe2] sm:$0xff] }
 0x4ca   : > { %v3384_v12 = vmul.f32 %v11241_v24, %v10910_v33  ;;  %v3385_v0 = vmul.f32 %v11248_v31, %v10910_v33  ;;  %v4014_v62 = vadd.f32 %v3982_v48, %v3914_v20  ;;  %v3484_v22 = vmul.f32 %v11250_v49, %v10918_v26  ;;  %v11343_v24 = vld [vmem:[#allocation3 + $0xe0] sm:$0xff] }
 0x4cb   : > { %v4242_v37 = vpack.c.bf16 %v4216_v45, %v4215_v30  ;;  %v3485_v15 = vmul.f32 %v11252_v55, %v10918_v26  ;;  %v4015_v34 = vadd.f32 %v3983_v42, %v3915_v59  ;;  %v3584_v44 = vmul.f32 %v11292_v35, %v10930_v56 }
 0x4cc   : > { %v3416_v21 = vadd.f32 %v3384_v12, %v3316_v4  ;;  %v3417_v46 = vadd.f32 %v3385_v0, %v3317_v43  ;;  %v4114_v31 = vadd.f32 %v4082_v58, %v4014_v62  ;;  %v3585_v27 = vmul.f32 %v11298_v23, %v10930_v56 }
 0x4cd   : > { %8943 = vmatmul.mubr.msk.bf16.gmra.mxu1 %vm3231_vm12, %v4242_v37  ;;  %v3684_v49 = vmul.f32 %v11300_v3, %v10933_v61  ;;  %v3685_v55 = vmul.f32 %v11307_v57, %v10933_v61  ;;  %v4115_v29 = vadd.f32 %v4083_v14, %v4015_v34  ;;  %v3784_v11 = vmul.f32 %v11309_v38, %v10944_v54 }
 0x4ce   : > { %v3516_v63 = vadd.f32 %v3484_v22, %v3416_v21  ;;  %v3517_v51 = vadd.f32 %v3485_v15, %v3417_v46  ;;  %v4153_v17 = vadd.f32 %v11012_v16, %v4114_v31  ;;  %v3785_v52 = vmul.f32 %v11314_v1, %v10944_v54  ;;  %v8924_v48 = vpop.f32.mrf.mxu0  ;;  %v11382_v22 = vld [vmem:[%s14033_s10] ss:$0 sm:$0xff] }
 0x4cf   : > { %v3884_v53 = vmul.f32 %v10936_v32, %v11341_v60  ;;  %v3885_v47 = vmul.f32 %v10936_v32, %v11343_v24  ;;  %v4154_v30 = vadd.f32 %v11012_v16, %v4115_v29  ;;  %v3984_v58 = vmul.f32 %v10939_v28, %v11352_v40 }
 0x4d0   : > { %v3616_v7 = vadd.f32 %v3584_v44, %v3516_v63  ;;  %v3617_v42 = vadd.f32 %v3585_v27, %v3517_v51  ;;  %v3145_v45 = vadd.f32 %v8924_v48, %v10900_v5  ;;  %v4185_v20 = vmax.f32 %v4153_v17, 0.0  ;;  %v3136_v59 = vpop.f32.mrf.mxu0 }
 0x4d1   : > { %v3985_v14 = vmul.f32 %v10939_v28, %v11356_v36  ;;  %v4084_v4 = vmul.f32 %v10957_v13, %v11358_v2  ;;  %v4186_v43 = vmax.f32 %v4154_v30, 0.0  ;;  %v4085_v37 = vmul.f32 %v10957_v13, %v11367_v25 }
 0x4d2   : > { %v3716_v12 = vadd.f32 %v3684_v49, %v3616_v7  ;;  %v3717_v0 = vadd.f32 %v3685_v55, %v3617_v42  ;;  %v3193_v62 = vmax.f32 %v3145_v45, 0.0  ;;  %v3137_v5 = vadd.f32 %v11382_v22, %v3136_v59  ;;  %v8925_v21 = vpop.f32.mrf.mxu0 }
 0x4d3   : > { %v4217_v15 = vmin.f32 %v4185_v20, 6.0  ;;  %v3318_v34 = vmul.f32 %v11292_v35, %v10907_v18  ;;  %v4218_v46 = vmin.f32 %v4186_v43, 6.0  ;;  %v3319_v27 = vmul.f32 %v11298_v23, %v10907_v18 }
 0x4d4   : > { %v3816_v44 = vadd.f32 %v3784_v11, %v3716_v12  ;;  %v3817_v31 = vadd.f32 %v3785_v52, %v3717_v0  ;;  %v3225_v49 = vmin.f32 %v3193_v62, 6.0  ;;  %v3191_v55 = vmax.f32 %v3137_v5, 0.0  ;;  %v3139_v51 = vpop.f32.mrf.mxu0  ;;  %v11408_v62 = vld [vmem:[#allocation3 + $0xf8] sm:$0xff] }
 0x4d5   : > { %v3148_v29 = vadd.f32 %v11382_v22, %v8925_v21  ;;  %v3386_v63 = vmul.f32 %v11300_v3, %v10910_v33  ;;  %v4243_v17 = vpack.c.bf16 %v4218_v46, %v4217_v15  ;;  %v3387_v35 = vmul.f32 %v11307_v57, %v10910_v33 }
 0x4d6   : > { %v3916_v48 = vadd.f32 %v3884_v53, %v3816_v44  ;;  %v3917_v30 = vadd.f32 %v3885_v47, %v3817_v31  ;;  %3258 = vst.msk [vmem:[#allocation3 + $0x151] sm:$0xff] %vm3231_vm12, %v3225_v49  ;;  %v3223_v11 = vmin.f32 %v3191_v55, 6.0  ;;  %v3140_v23 = vadd.f32 %v11382_v22, %v3139_v51  ;;  %v11421_v44 = vld [vmem:[#allocation3 + $0xf9] sm:$0xff] }
 0x4d7   : > { %v3194_v52 = vmax.f32 %v3148_v29, 0.0  ;;  %v3418_v7 = vadd.f32 %v3386_v63, %v3318_v34  ;;  %8946 = vmatprep.mubr.msk.bf16.mxu1 %vm3231_vm12, %v4243_v17  ;;  %v3419_v20 = vadd.f32 %v3387_v35, %v3319_v27  ;;  %v3486_v3 = vmul.f32 %v11309_v38, %v10918_v26  ;;  %v11423_v31 = vld [vmem:[#allocation3 + $0xf2] sm:$0xff]  ;;  %v11425_v27 = vld [vmem:[#allocation3 + $0xfa] sm:$0xff] }
 0x4d8   : > { %v4016_v42 = vadd.f32 %v3984_v58, %v3916_v48  ;;  %v4017_v45 = vadd.f32 %v3985_v14, %v3917_v30  ;;  %3256 = vst.msk [vmem:[#allocation3 + $0x139] sm:$0xff] %vm3231_vm12, %v3223_v11  ;;  %v3192_v47 = vmax.f32 %v3140_v23, 0.0  ;;  %v3487_v57 = vmul.f32 %v11314_v1, %v10918_v26  ;;  %v11406_v14 = vld [vmem:[#allocation3 + $0xf0] sm:$0xff] }
 0x4d9   : > { %v3226_v53 = vmin.f32 %v3194_v52, 6.0  ;;  %v3586_v59 = vmul.f32 %v11341_v60, %v10930_v56  ;;  %v3518_v0 = vadd.f32 %v3486_v3, %v3418_v7  ;;  %v3587_v58 = vmul.f32 %v11343_v24, %v10930_v56 }
 0x4da   : > { %v4116_v43 = vadd.f32 %v4084_v4, %v4016_v42  ;;  %v4117_v12 = vadd.f32 %v4085_v37, %v4017_v45  ;;  %v3224_v38 = vmin.f32 %v3192_v47, 6.0  ;;  %v3519_v5 = vadd.f32 %v3487_v57, %v3419_v20  ;;  %v11415_v4 = vld [vmem:[#allocation3 + $0xf1] sm:$0xff] }
 0x4db   : > { %3259 = vst.msk [vmem:[#allocation3 + $0x159] sm:$0xff] %vm3231_vm12, %v3226_v53  ;;  %v3686_v1 = vmul.f32 %v11352_v40, %v10933_v61  ;;  %v3687_v15 = vmul.f32 %v11356_v36, %v10933_v61  ;;  %v3618_v21 = vadd.f32 %v3586_v59, %v3518_v0  ;;  %v3786_v46 = vmul.f32 %v11358_v2, %v10944_v54 }
 0x4dc   : > { %v4155_v37 = vadd.f32 %v11012_v16, %v4116_v43  ;;  %v4156_v34 = vadd.f32 %v11012_v16, %v4117_v12  ;;  %3257 = vst.msk [vmem:[#allocation3 + $0x141] sm:$0xff] %vm3231_vm12, %v3224_v38  ;;  %v3619_v49 = vadd.f32 %v3587_v58, %v3519_v5  ;;  %v3787_v55 = vmul.f32 %v11367_v25, %v10944_v54  ;;  %v11456_v38 = vld [vmem:[#allocation3 + $0x108] sm:$0xff] }
 0x4dd   : > { %v3886_v29 = vmul.f32 %v10936_v32, %v11406_v14  ;;  %v3887_v63 = vmul.f32 %v10936_v32, %v11408_v62  ;;  %v3718_v48 = vadd.f32 %v3686_v1, %v3618_v21  ;;  %v3986_v30 = vmul.f32 %v10939_v28, %v11415_v4  ;;  %v11466_v21 = vld [vmem:[#allocation3 + $0x110] sm:$0xff] }
 0x4de   : > { %v4187_v51 = vmax.f32 %v4155_v37, 0.0  ;;  %v4188_v17 = vmax.f32 %v4156_v34, 0.0  ;;  %v3719_v35 = vadd.f32 %v3687_v15, %v3619_v49  ;;  %v3987_v11 = vmul.f32 %v10939_v28, %v11421_v44 }
 0x4df   : > { %v4086_v52 = vmul.f32 %v10957_v13, %v11423_v31  ;;  %v4087_v23 = vmul.f32 %v10957_v13, %v11425_v27  ;;  %v3818_v45 = vadd.f32 %v3786_v46, %v3718_v48  ;;  %v3320_v20 = vmul.f32 %v11341_v60, %v10907_v18  ;;  %v11468_v46 = vld [vmem:[#allocation3 + $0x109] sm:$0xff] }
 0x4e0   : > { %v4219_v7 = vmin.f32 %v4187_v51, 6.0  ;;  %v4220_v42 = vmin.f32 %v4188_v17, 6.0  ;;  %v3819_v3 = vadd.f32 %v3787_v55, %v3719_v35  ;;  %v3321_v53 = vmul.f32 %v11343_v24, %v10907_v18 }
 0x4e1   : > { %v3388_v47 = vmul.f32 %v11352_v40, %v10910_v33  ;;  %v3389_v57 = vmul.f32 %v11356_v36, %v10910_v33  ;;  %v3918_v43 = vadd.f32 %v3886_v29, %v3818_v45  ;;  %v3488_v13 = vmul.f32 %v11358_v2, %v10918_v26 }
 0x4e2   : > { %v4244_v59 = vpack.c.bf16 %v4220_v42, %v4219_v7  ;;  %v3489_v12 = vmul.f32 %v11367_v25, %v10918_v26  ;;  %v3919_v0 = vadd.f32 %v3887_v63, %v3819_v3  ;;  %v3588_v24 = vmul.f32 %v11406_v14, %v10930_v56 }
 0x4e3   : > { %v3420_v60 = vadd.f32 %v3388_v47, %v3320_v20  ;;  %v3421_v58 = vadd.f32 %v3389_v57, %v3321_v53  ;;  %v8928_v40 = vpop.f32.mrf.mxu0  ;;  %v4018_v36 = vadd.f32 %v3986_v30, %v3918_v43  ;;  %v3589_v5 = vmul.f32 %v11408_v62, %v10930_v56 }
 0x4e4   : > { %8947 = vmatmul.mubr.msk.bf16.gmra.mxu1 %vm3231_vm12, %v4244_v59  ;;  %v3688_v2 = vmul.f32 %v11415_v4, %v10933_v61  ;;  %v3689_v25 = vmul.f32 %v11421_v44, %v10933_v61  ;;  %v3161_v1 = vadd.f32 %v11382_v22, %v8928_v40  ;;  %v4019_v15 = vadd.f32 %v3987_v11, %v3919_v0  ;;  %v11477_v11 = vld [vmem:[#allocation3 + $0x111] sm:$0xff] }
 0x4e5   : > { %v3520_v37 = vadd.f32 %v3488_v13, %v3420_v60  ;;  %v3521_v34 = vadd.f32 %v3489_v12, %v3421_v58  ;;  %v3152_v49 = vpop.f32.mrf.mxu0  ;;  %v4118_v55 = vadd.f32 %v4086_v52, %v4018_v36  ;;  %v3788_v29 = vmul.f32 %v11423_v31, %v10944_v54  ;;  %v11490_v60 = vld [vmem:[#allocation3 + $0x112] sm:$0xff] }
 0x4e6   : > { %v3789_v63 = vmul.f32 %v11425_v27, %v10944_v54  ;;  %v3888_v51 = vmul.f32 %v10936_v32, %v11456_v38  ;;  %v3197_v17 = vmax.f32 %v3161_v1, 0.0  ;;  %v3153_v48 = vadd.f32 %v11382_v22, %v3152_v49 }
 0x4e7   : > { %v4119_v30 = vadd.f32 %v4087_v23, %v4019_v15  ;;  %v3620_v35 = vadd.f32 %v3588_v24, %v3520_v37  ;;  %v8929_v7 = vpop.f32.mrf.mxu0  ;;  %v4157_v42 = vadd.f32 %v11012_v16, %v4118_v55  ;;  %v3621_v52 = vadd.f32 %v3589_v5, %v3521_v34  ;;  %v11486_v23 = vld [vmem:[#allocation3 + $0x10a] sm:$0xff] }
 0x4e8   : > { %v3889_v45 = vmul.f32 %v10936_v32, %v11466_v21  ;;  %v3988_v20 = vmul.f32 %v10939_v28, %v11468_v46  ;;  %v3229_v3 = vmin.f32 %v3197_v17, 6.0  ;;  %v3195_v53 = vmax.f32 %v3153_v48, 0.0 }
 0x4e9   : > { %v3164_v47 = vadd.f32 %v11382_v22, %v8929_v7  ;;  %v4158_v57 = vadd.f32 %v11012_v16, %v4119_v30  ;;  %v3155_v59 = vpop.f32.mrf.mxu0  ;;  %v4189_v43 = vmax.f32 %v4157_v42, 0.0  ;;  %v3720_v13 = vadd.f32 %v3688_v2, %v3620_v35  ;;  %v11497_v2 = vld [vmem:[%s14035_s5 + $0x8] ss:$0 sm:$0xff] }
 0x4ea   : > { %v3721_v12 = vadd.f32 %v3689_v25, %v3621_v52  ;;  %v3989_v0 = vmul.f32 %v10939_v28, %v11477_v11  ;;  %3262 = vst.msk [vmem:[#allocation3 + $0x181] sm:$0xff] %vm3231_vm12, %v3229_v3  ;;  %v3227_v58 = vmin.f32 %v3195_v53, 6.0  ;;  %v3156_v40 = vadd.f32 %v11382_v22, %v3155_v59  ;;  %v11529_v53 = vld [vmem:[#allocation3 + $0x121] sm:$0xff] }
 0x4eb   : > { %v3198_v24 = vmax.f32 %v3164_v47, 0.0  ;;  %v4190_v36 = vmax.f32 %v4158_v57, 0.0  ;;  %v4221_v5 = vmin.f32 %v4189_v43, 6.0  ;;  %v3820_v16 = vadd.f32 %v3788_v29, %v3720_v13  ;;  %v11535_v13 = vld [vmem:[#allocation3 + $0x129] sm:$0xff] }
 0x4ec   : > { %v3821_v1 = vadd.f32 %v3789_v63, %v3721_v12  ;;  %v4088_v25 = vmul.f32 %v11497_v2, %v11486_v23  ;;  %3260 = vst.msk [vmem:[#allocation3 + $0x169] sm:$0xff] %vm3231_vm12, %v3227_v58  ;;  %v3196_v37 = vmax.f32 %v3156_v40, 0.0  ;;  %v4089_v22 = vmul.f32 %v11497_v2, %v11490_v60  ;;  %v11537_v12 = vld [vmem:[#allocation3 + $0x122] sm:$0xff] }
 0x4ed   : > { %v3230_v15 = vmin.f32 %v3198_v24, 6.0  ;;  %v4222_v34 = vmin.f32 %v4190_v36, 6.0  ;;  %v3920_v49 = vadd.f32 %v3888_v51, %v3820_v16  ;;  %v3322_v29 = vmul.f32 %v11406_v14, %v10907_v18 }
 0x4ee   : > { %v3921_v55 = vadd.f32 %v3889_v45, %v3821_v1  ;;  %v3323_v63 = vmul.f32 %v11408_v62, %v10907_v18  ;;  %v3228_v17 = vmin.f32 %v3196_v37, 6.0  ;;  %v3390_v30 = vmul.f32 %v11415_v4, %v10910_v33  ;;  %v11523_v45 = vld [vmem:[#allocation3 + $0x120] sm:$0xff] }
 0x4ef   : > { %3263 = vst.msk [vmem:[#allocation3 + $0x189] sm:$0xff] %vm3231_vm12, %v3230_v15  ;;  %v4245_v48 = vpack.c.bf16 %v4222_v34, %v4221_v5  ;;  %v3391_v35 = vmul.f32 %v11421_v44, %v10910_v33  ;;  %v4020_v7 = vadd.f32 %v3988_v20, %v3920_v49  ;;  %v3490_v51 = vmul.f32 %v11423_v31, %v10918_v26 }
 0x4f0   : > { %v4021_v42 = vadd.f32 %v3989_v0, %v3921_v55  ;;  %v3491_v14 = vmul.f32 %v11425_v27, %v10918_v26  ;;  %3261 = vst.msk [vmem:[#allocation3 + $0x171] sm:$0xff] %vm3231_vm12, %v3228_v17  ;;  %v3422_v62 = vadd.f32 %v3390_v30, %v3322_v29  ;;  %v3590_v4 = vmul.f32 %v11456_v38, %v10930_v56  ;;  %v11527_v27 = vld [vmem:[#allocation3 + $0x128] sm:$0xff]  ;;  %v11542_v0 = vld [vmem:[%s14036_s11] ss:$0 sm:$0xff] }
 0x4f1   : > { %8950 = vmatprep.mubr.msk.bf16.mxu1 %vm3231_vm12, %v4245_v48  ;;  %v3423_v52 = vadd.f32 %v3391_v35, %v3323_v63  ;;  %v3591_v44 = vmul.f32 %v11466_v21, %v10930_v56  ;;  %v4120_v20 = vadd.f32 %v4088_v25, %v4020_v7  ;;  %v3690_v31 = vmul.f32 %v11468_v46, %v10933_v61 }
 0x4f2   : > { %v4121_v3 = vadd.f32 %v4089_v22, %v4021_v42  ;;  %v3522_v47 = vadd.f32 %v3490_v51, %v3422_v62  ;;  %v3691_v59 = vmul.f32 %v11477_v11, %v10933_v61  ;;  %v3790_v43 = vmul.f32 %v11486_v23, %v10944_v54  ;;  %v4055_v22 = vld [vmem:[#allocation3 + $0x12a] sm:$0xff] }
 0x4f3   : > { %v3523_v57 = vadd.f32 %v3491_v14, %v3423_v52  ;;  %v4159_v58 = vadd.f32 %v11542_v0, %v4120_v20  ;;  %v3791_v40 = vmul.f32 %v11490_v60, %v10944_v54  ;;  %v3890_v36 = vmul.f32 %v10936_v32, %v11523_v45 }
 0x4f4   : > { %v4160_v24 = vadd.f32 %v11542_v0, %v4121_v3  ;;  %v3622_v5 = vadd.f32 %v3590_v4, %v3522_v47  ;;  %v3891_v1 = vmul.f32 %v10936_v32, %v11527_v27  ;;  %v3990_v25 = vmul.f32 %v10939_v28, %v11529_v53  ;;  %v11575_v3 = vld [vmem:[#allocation3 + $0x138] sm:$0xff] }
 0x4f5   : > { %v3623_v16 = vadd.f32 %v3591_v44, %v3523_v57  ;;  %v4191_v15 = vmax.f32 %v4159_v58, 0.0  ;;  %v3991_v34 = vmul.f32 %v10939_v28, %v11535_v13  ;;  %v4090_v49 = vmul.f32 %v11497_v2, %v11537_v12 }
 0x4f6   : > { %v4192_v37 = vmax.f32 %v4160_v24, 0.0  ;;  %v3722_v55 = vadd.f32 %v3690_v31, %v3622_v5  ;;  %v3324_v63 = vmul.f32 %v11456_v38, %v10907_v18  ;;  %v3325_v17 = vmul.f32 %v11466_v21, %v10907_v18  ;;  %v11577_v31 = vld [vmem:[#allocation3 + $0x140] sm:$0xff] }
 0x4f7   : > { %v3723_v29 = vadd.f32 %v3691_v59, %v3623_v16  ;;  %v4223_v48 = vmin.f32 %v4191_v15, 6.0  ;;  %v3392_v35 = vmul.f32 %v11468_v46, %v10910_v33  ;;  %v3393_v7 = vmul.f32 %v11477_v11, %v10910_v33  ;;  %v11584_v59 = vld [vmem:[#allocation3 + $0x139] sm:$0xff] }
 0x4f8   : > { %v4224_v30 = vmin.f32 %v4192_v37, 6.0  ;;  %v3822_v42 = vadd.f32 %v3790_v43, %v3722_v55  ;;  %v4091_v14 = vmul.f32 %v11497_v2, %v4055_v22  ;;  %v3492_v62 = vmul.f32 %v11486_v23, %v10918_v26  ;;  %v11586_v43 = vld [vmem:[#allocation3 + $0x141] sm:$0xff] }
 0x4f9   : > { %v3823_v51 = vadd.f32 %v3791_v40, %v3723_v29  ;;  %v3424_v38 = vadd.f32 %v3392_v35, %v3324_v63  ;;  %v3425_v4 = vadd.f32 %v3393_v7, %v3325_v17  ;;  %v3493_v21 = vmul.f32 %v11490_v60, %v10918_v26  ;;  %v11591_v5 = vld [vmem:[#allocation3 + $0x13a] sm:$0xff] }
 0x4fa   : > { %v4246_v52 = vpack.c.bf16 %v4224_v30, %v4223_v48  ;;  %v3922_v44 = vadd.f32 %v3890_v36, %v3822_v42  ;;  %v3592_v46 = vmul.f32 %v11523_v45, %v10930_v56  ;;  %v3593_v11 = vmul.f32 %v11527_v27, %v10930_v56 }
 0x4fb   : > { %v3923_v20 = vadd.f32 %v3891_v1, %v3823_v51  ;;  %v3524_v23 = vadd.f32 %v3492_v62, %v3424_v38  ;;  %v3525_v47 = vadd.f32 %v3493_v21, %v3425_v4  ;;  %v3692_v57 = vmul.f32 %v11529_v53, %v10933_v61  ;;  %v4057_v4 = vld [vmem:[#allocation3 + $0x142] sm:$0xff] }
 0x4fc   : > { %8951 = vmatmul.mubr.msk.bf16.gmra.mxu1 %vm3231_vm12, %v4246_v52  ;;  %v3693_v60 = vmul.f32 %v11535_v13, %v10933_v61  ;;  %v4022_v58 = vadd.f32 %v3990_v25, %v3922_v44  ;;  %v3792_v40 = vmul.f32 %v11537_v12, %v10944_v54  ;;  %v3793_v36 = vmul.f32 %v4055_v22, %v10944_v54 }
 0x4fd   : > { %v4023_v24 = vadd.f32 %v3991_v34, %v3923_v20  ;;  %v3624_v16 = vadd.f32 %v3592_v46, %v3524_v23  ;;  %v3625_v1 = vadd.f32 %v3593_v11, %v3525_v47  ;;  %v3892_v15 = vmul.f32 %v10936_v32, %v11575_v3 }
 0x4fe   : > { %v3893_v37 = vmul.f32 %v10936_v32, %v11577_v31  ;;  %v4122_v55 = vadd.f32 %v4090_v49, %v4022_v58  ;;  %v3992_v25 = vmul.f32 %v10939_v28, %v11584_v59  ;;  %v3993_v34 = vmul.f32 %v10939_v28, %v11586_v43 }
 0x4ff   : > { %v4123_v29 = vadd.f32 %v4091_v14, %v4023_v24  ;;  %v3724_v63 = vadd.f32 %v3692_v57, %v3624_v16  ;;  %v3725_v17 = vadd.f32 %v3693_v60, %v3625_v1  ;;  %v4092_v48 = vmul.f32 %v11497_v2, %v11591_v5  ;;  %v11621_v24 = vld [vmem:[#allocation3 + $0x150] sm:$0xff] }
 0x500   : > { %v3326_v30 = vmul.f32 %v11523_v45, %v10907_v18  ;;  %v4161_v35 = vadd.f32 %v11542_v0, %v4122_v55  ;;  %v3327_v49 = vmul.f32 %v11527_v27, %v10907_v18  ;;  %v3394_v42 = vmul.f32 %v11529_v53, %v10910_v33 }
 0x501   : > { %v4162_v7 = vadd.f32 %v11542_v0, %v4123_v29  ;;  %v3824_v51 = vadd.f32 %v3792_v40, %v3724_v63  ;;  %v3825_v14 = vadd.f32 %v3793_v36, %v3725_v17  ;;  %v3395_v62 = vmul.f32 %v11535_v13, %v10910_v33  ;;  %v11635_v63 = vld [vmem:[#allocation3 + $0x152] sm:$0xff] }
 0x502   : > { %v3494_v52 = vmul.f32 %v11537_v12, %v10918_v26  ;;  %v4193_v38 = vmax.f32 %v4161_v35, 0.0  ;;  %v3426_v21 = vadd.f32 %v3394_v42, %v3326_v30  ;;  %v3495_v44 = vmul.f32 %v4055_v22, %v10918_v26  ;;  %v11623_v22 = vld [vmem:[#allocation3 + $0x158] sm:$0xff] }
 0x503   : > { %v4194_v45 = vmax.f32 %v4162_v7, 0.0  ;;  %v3924_v20 = vadd.f32 %v3892_v15, %v3824_v51  ;;  %v3925_v46 = vadd.f32 %v3893_v37, %v3825_v14  ;;  %v3427_v27 = vadd.f32 %v3395_v62, %v3327_v49  ;;  %v11629_v15 = vld [vmem:[#allocation3 + $0x151] sm:$0xff] }
 0x504   : > { %v3594_v53 = vmul.f32 %v11575_v3, %v10930_v56  ;;  %v4225_v11 = vmin.f32 %v4193_v38, 6.0  ;;  %v3526_v47 = vadd.f32 %v3494_v52, %v3426_v21  ;;  %v3595_v13 = vmul.f32 %v11577_v31, %v10930_v56  ;;  %v4059_v52 = vld [vmem:[#allocation3 + $0x15a] sm:$0xff] }
 0x505   : > { %v4226_v23 = vmin.f32 %v4194_v45, 6.0  ;;  %v4024_v57 = vadd.f32 %v3992_v25, %v3924_v20  ;;  %v4025_v12 = vadd.f32 %v3993_v34, %v3925_v46  ;;  %v4093_v60 = vmul.f32 %v11497_v2, %v4057_v4  ;;  %v11633_v34 = vld [vmem:[#allocation3 + $0x159] sm:$0xff] }
 0x506   : > { %v3527_v58 = vadd.f32 %v3495_v44, %v3427_v27  ;;  %v3626_v36 = vadd.f32 %v3594_v53, %v3526_v47  ;;  %v3694_v16 = vmul.f32 %v11584_v59, %v10933_v61  ;;  %v3794_v1 = vmul.f32 %v11591_v5, %v10944_v54 }
 0x507   : > { %v4247_v40 = vpack.c.bf16 %v4226_v23, %v4225_v11  ;;  %v4124_v37 = vadd.f32 %v4092_v48, %v4024_v57  ;;  %v4125_v55 = vadd.f32 %v4093_v60, %v4025_v12  ;;  %v3695_v25 = vmul.f32 %v11586_v43, %v10933_v61 }
 0x508   : > { %v3627_v29 = vadd.f32 %v3595_v13, %v3527_v58  ;;  %v3726_v17 = vadd.f32 %v3694_v16, %v3626_v36  ;;  %v3795_v30 = vmul.f32 %v4057_v4, %v10944_v54  ;;  %v3894_v35 = vmul.f32 %v10936_v32, %v11621_v24  ;;  %v11667_v16 = vld [vmem:[#allocation3 + $0x168] sm:$0xff] }
 0x509   : > { %8954 = vmatprep.mubr.msk.bf16.mxu1 %vm3231_vm12, %v4247_v40  ;;  %v3895_v48 = vmul.f32 %v10936_v32, %v11623_v22  ;;  %v4163_v7 = vadd.f32 %v11542_v0, %v4124_v37  ;;  %v4164_v49 = vadd.f32 %v11542_v0, %v4125_v55  ;;  %v3994_v51 = vmul.f32 %v10939_v28, %v11629_v15 }
 0x50a   : > { %v3727_v42 = vadd.f32 %v3695_v25, %v3627_v29  ;;  %v3826_v14 = vadd.f32 %v3794_v1, %v3726_v17  ;;  %v3995_v62 = vmul.f32 %v10939_v28, %v11633_v34  ;;  %v4094_v38 = vmul.f32 %v11497_v2, %v11635_v63  ;;  %v11671_v29 = vld [vmem:[#allocation3 + $0x170] sm:$0xff] }
 0x50b   : > { %v3328_v45 = vmul.f32 %v11575_v3, %v10907_v18  ;;  %v4195_v21 = vmax.f32 %v4163_v7, 0.0  ;;  %v4196_v44 = vmax.f32 %v4164_v49, 0.0  ;;  %v3329_v46 = vmul.f32 %v11577_v31, %v10907_v18  ;;  %v11673_v25 = vld [vmem:[#allocation3 + $0x169] sm:$0xff] }
 0x50c   : > { %v3827_v20 = vadd.f32 %v3795_v30, %v3727_v42  ;;  %v3926_v27 = vadd.f32 %v3894_v35, %v3826_v14  ;;  %v3396_v53 = vmul.f32 %v11584_v59, %v10910_v33  ;;  %v3397_v11 = vmul.f32 %v11586_v43, %v10910_v33  ;;  %v11683_v7 = vld [vmem:[#allocation3 + $0x16a] sm:$0xff] }
 0x50d   : > { %v3496_v23 = vmul.f32 %v11591_v5, %v10918_v26  ;;  %v4227_v47 = vmin.f32 %v4195_v21, 6.0  ;;  %v4228_v13 = vmin.f32 %v4196_v44, 6.0  ;;  %v4095_v3 = vmul.f32 %v11497_v2, %v4059_v52 }
 0x50e   : > { %v3927_v57 = vadd.f32 %v3895_v48, %v3827_v20  ;;  %v4026_v12 = vadd.f32 %v3994_v51, %v3926_v27  ;;  %v3428_v60 = vadd.f32 %v3396_v53, %v3328_v45  ;;  %v3429_v58 = vadd.f32 %v3397_v11, %v3329_v46 }
 0x50f   : > { %v3497_v31 = vmul.f32 %v4057_v4, %v10918_v26  ;;  %v4248_v40 = vpack.c.bf16 %v4228_v13, %v4227_v47  ;;  %v3596_v59 = vmul.f32 %v11621_v24, %v10930_v56  ;;  %v3597_v43 = vmul.f32 %v11623_v22, %v10930_v56  ;;  %v11675_v4 = vld [vmem:[#allocation3 + $0x171] sm:$0xff] }
 0x510   : > { %v4027_v36 = vadd.f32 %v3995_v62, %v3927_v57  ;;  %v4126_v5 = vadd.f32 %v4094_v38, %v4026_v12  ;;  %v3528_v1 = vadd.f32 %v3496_v23, %v3428_v60  ;;  %v3696_v55 = vmul.f32 %v11629_v15, %v10933_v61  ;;  %v4061_v12 = vld [vmem:[#allocation3 + $0x172] sm:$0xff] }
 0x511   : > { %v3529_v37 = vadd.f32 %v3497_v31, %v3429_v58  ;;  %8955 = vmatmul.mubr.msk.bf16.gmra.mxu1 %vm3231_vm12, %v4248_v40  ;;  %v3697_v30 = vmul.f32 %v11633_v34, %v10933_v61  ;;  %v3796_v35 = vmul.f32 %v11635_v63, %v10944_v54  ;;  %v3797_v48 = vmul.f32 %v4059_v52, %v10944_v54 }
 0x512   : > { %v4127_v17 = vadd.f32 %v4095_v3, %v4027_v36  ;;  %v4165_v49 = vadd.f32 %v11542_v0, %v4126_v5  ;;  %v3628_v42 = vadd.f32 %v3596_v59, %v3528_v1  ;;  %v3896_v14 = vmul.f32 %v10936_v32, %v11667_v16 }
 0x513   : > { %v3629_v51 = vadd.f32 %v3597_v43, %v3529_v37  ;;  %v3897_v38 = vmul.f32 %v10936_v32, %v11671_v29  ;;  %v3996_v45 = vmul.f32 %v10939_v28, %v11673_v25  ;;  %v3997_v21 = vmul.f32 %v10939_v28, %v11675_v4  ;;  %v3862_v37 = vld [vmem:[#allocation3 + $0x180] sm:$0xff] }
 0x514   : > { %v4166_v62 = vadd.f32 %v11542_v0, %v4127_v17  ;;  %v4197_v44 = vmax.f32 %v4165_v49, 0.0  ;;  %v3728_v20 = vadd.f32 %v3696_v55, %v3628_v42  ;;  %v4096_v27 = vmul.f32 %v11497_v2, %v11683_v7 }
 0x515   : > { %v3729_v46 = vadd.f32 %v3697_v30, %v3629_v51  ;;  %v3330_v11 = vmul.f32 %v11621_v24, %v10907_v18  ;;  %v3331_v23 = vmul.f32 %v11623_v22, %v10907_v18  ;;  %v3398_v47 = vmul.f32 %v11629_v15, %v10910_v33 }
 0x516   : > { %v4198_v53 = vmax.f32 %v4166_v62, 0.0  ;;  %v4229_v13 = vmin.f32 %v4197_v44, 6.0  ;;  %v3828_v57 = vadd.f32 %v3796_v35, %v3728_v20  ;;  %v3399_v60 = vmul.f32 %v11633_v34, %v10910_v33  ;;  %v3962_v35 = vld [vmem:[#allocation3 + $0x181] sm:$0xff] }
 0x517   : > { %v3829_v3 = vadd.f32 %v3797_v48, %v3729_v46  ;;  %v3430_v31 = vadd.f32 %v3398_v47, %v3330_v11  ;;  %v3498_v40 = vmul.f32 %v11635_v63, %v10918_v26  ;;  %v3499_v24 = vmul.f32 %v4059_v52, %v10918_v26  ;;  %v3863_v52 = vld [vmem:[#allocation3 + $0x188] sm:$0xff] }
 0x518   : > { %v4230_v58 = vmin.f32 %v4198_v53, 6.0  ;;  %v3928_v36 = vadd.f32 %v3896_v14, %v3828_v57  ;;  %v3431_v22 = vadd.f32 %v3399_v60, %v3331_v23  ;;  %v3598_v15 = vmul.f32 %v11667_v16, %v10930_v56  ;;  %v3963_v48 = vld [vmem:[#allocation3 + $0x189] sm:$0xff] }
 0x519   : > { %v3929_v59 = vadd.f32 %v3897_v38, %v3829_v3  ;;  %v4097_v5 = vmul.f32 %v11497_v2, %v4061_v12  ;;  %v3530_v1 = vadd.f32 %v3498_v40, %v3430_v31  ;;  %v3599_v34 = vmul.f32 %v11671_v29, %v10930_v56  ;;  %v4062_v62 = vld [vmem:[#allocation3 + $0x182] sm:$0xff] }
 0x51a   : > { %v4249_v43 = vpack.c.bf16 %v4230_v58, %v4229_v13  ;;  %v4028_v55 = vadd.f32 %v3996_v45, %v3928_v36  ;;  %v3531_v30 = vadd.f32 %v3499_v24, %v3431_v22  ;;  %v3698_v63 = vmul.f32 %v11673_v25, %v10933_v61  ;;  %v4063_v36 = vld [vmem:[#allocation3 + $0x18a] sm:$0xff] }
 0x51b   : > { %v4029_v17 = vadd.f32 %v3997_v21, %v3929_v59  ;;  %v3630_v49 = vadd.f32 %v3598_v15, %v3530_v1  ;;  %v3699_v42 = vmul.f32 %v11675_v4, %v10933_v61  ;;  %v3798_v51 = vmul.f32 %v11683_v7, %v10944_v54 }
 0x51c   : > { %8958 = vmatprep.mubr.msk.bf16.mxu1 %vm3231_vm12, %v4249_v43  ;;  %v3799_v14 = vmul.f32 %v4061_v12, %v10944_v54  ;;  %v4128_v38 = vadd.f32 %v4096_v27, %v4028_v55  ;;  %v3631_v21 = vadd.f32 %v3599_v34, %v3531_v30  ;;  %v3898_v44 = vmul.f32 %v10936_v32, %v3862_v37 }
 0x51d   : > { %v4129_v45 = vadd.f32 %v4097_v5, %v4029_v17  ;;  %v3730_v20 = vadd.f32 %v3698_v63, %v3630_v49  ;;  %v3899_v46 = vmul.f32 %v10936_v32, %v3863_v52  ;;  %v3998_v53 = vmul.f32 %v10939_v28, %v3962_v35  ;;  %v3864_v49 = vld [vmem:[#allocation3 + $0x198] sm:$0xff] }
 0x51e   : > { %v3999_v11 = vmul.f32 %v10939_v28, %v3963_v48  ;;  %v4167_v23 = vadd.f32 %v11542_v0, %v4128_v38  ;;  %v3731_v13 = vadd.f32 %v3699_v42, %v3631_v21  ;;  %v4098_v57 = vmul.f32 %v11497_v2, %v4062_v62 }
 0x51f   : > { %v4168_v47 = vadd.f32 %v11542_v0, %v4129_v45  ;;  %v3830_v3 = vadd.f32 %v3798_v51, %v3730_v20  ;;  %v3332_v27 = vmul.f32 %v11667_v16, %v10907_v18  ;;  %v3333_v60 = vmul.f32 %v11671_v29, %v10907_v18  ;;  %v3964_v45 = vld [vmem:[#allocation3 + $0x199] sm:$0xff] }
 0x520   : > { %v3400_v58 = vmul.f32 %v11673_v25, %v10910_v33  ;;  %v4199_v31 = vmax.f32 %v4167_v23, 0.0  ;;  %v3831_v24 = vadd.f32 %v3799_v14, %v3731_v13  ;;  %v3401_v59 = vmul.f32 %v11675_v4, %v10910_v33 }
 0x521   : > { %v4200_v40 = vmax.f32 %v4168_v47, 0.0  ;;  %v3930_v22 = vadd.f32 %v3898_v44, %v3830_v3  ;;  %v3500_v43 = vmul.f32 %v11683_v7, %v10918_v26  ;;  %v3501_v16 = vmul.f32 %v4061_v12, %v10918_v26  ;;  %v3865_v12 = vld [vmem:[#allocation3 + $0x1a0] sm:$0xff] }
 0x522   : > { %v3432_v15 = vadd.f32 %v3400_v58, %v3332_v27  ;;  %v4231_v5 = vmin.f32 %v4199_v31, 6.0  ;;  %v3931_v18 = vadd.f32 %v3899_v46, %v3831_v24  ;;  %v3433_v29 = vadd.f32 %v3401_v59, %v3333_v60 }
 0x523   : > { %v4232_v1 = vmin.f32 %v4200_v40, 6.0  ;;  %v4030_v34 = vadd.f32 %v3998_v53, %v3930_v22  ;;  %v4099_v25 = vmul.f32 %v11497_v2, %v4063_v36  ;;  %v3600_v17 = vmul.f32 %v3862_v37, %v10930_v56 }
 0x524   : > { %v3532_v55 = vadd.f32 %v3500_v43, %v3432_v15  ;;  %v4031_v63 = vadd.f32 %v3999_v11, %v3931_v18  ;;  %v3533_v33 = vadd.f32 %v3501_v16, %v3433_v29  ;;  %v3601_v4 = vmul.f32 %v3863_v52, %v10930_v56  ;;  %v3965_v52 = vld [vmem:[#allocation3 + $0x1a1] sm:$0xff]  ;;  %v11762_v29 = vld [vmem:[%s13962_s12] ss:$0 sm:$0xff] }
 0x525   : > { %v4250_v30 = vpack.c.bf16 %v4232_v1, %v4231_v5  ;;  %v4130_v42 = vadd.f32 %v4098_v57, %v4030_v34  ;;  %v3700_v26 = vmul.f32 %v3962_v35, %v10933_v61  ;;  %v3701_v38 = vmul.f32 %v3963_v48, %v10933_v61  ;;  %v4064_v11 = vld [vmem:[#allocation3 + $0x19a] sm:$0xff]  ;;  %v4065_v48 = vld [vmem:[#allocation3 + $0x1a2] sm:$0xff] }
 0x526   : > { %v3632_v7 = vadd.f32 %v3600_v17, %v3532_v55  ;;  %v4131_v51 = vadd.f32 %v4099_v25, %v4031_v63  ;;  %v3633_v14 = vadd.f32 %v3601_v4, %v3533_v33  ;;  %v3800_v44 = vmul.f32 %v4062_v62, %v10944_v54 }
 0x527   : > { %8959 = vmatmul.mubr.msk.bf16.gmra.mxu1 %vm3231_vm12, %v4250_v30  ;;  %v4169_v37 = vadd.f32 %v11542_v0, %v4130_v42  ;;  %v3900_v56 = vmul.f32 %v10936_v32, %v3864_v49  ;;  %v3801_v35 = vmul.f32 %v4063_v36, %v10944_v54  ;;  %v3901_v53 = vmul.f32 %v10936_v32, %v3865_v12  ;;  %v4520_v30 = vpop.permute.xlu1 %4519 }
 0x528   : > { %v3732_v21 = vadd.f32 %v3700_v26, %v3632_v7  ;;  %v4170_v20 = vadd.f32 %v11542_v0, %v4131_v51  ;;  %v3733_v46 = vadd.f32 %v3701_v38, %v3633_v14  ;;  %v4000_v61 = vmul.f32 %v10939_v28, %v3964_v45 }
 0x529   : > { %v4201_v23 = vmax.f32 %v4169_v37, 0.0  ;;  %v4001_v62 = vmul.f32 %v10939_v28, %v3965_v52  ;;  %v4100_v27 = vmul.f32 %v11497_v2, %v4064_v11  ;;  %v4101_v54 = vmul.f32 %v11497_v2, %v4065_v48  ;;  %v4518_v2 = vpop.permute.xlu0 %4517 }
 0x52a   : > { %v3832_v47 = vadd.f32 %v3800_v44, %v3732_v21  ;;  %v4202_v13 = vmax.f32 %v4170_v20, 0.0  ;;  %v3833_v57 = vadd.f32 %v3801_v35, %v3733_v46 }
 0x52b   : > { %v4233_v60 = vmin.f32 %v4201_v23, 6.0  ;;  %v4524_v26 = vpop.permute.xlu1 %4523 }
 0x52c   : > { %v3932_v3 = vadd.f32 %v3900_v56, %v3832_v47  ;;  %v4234_v58 = vmin.f32 %v4202_v13, 6.0  ;;  %v3933_v31 = vadd.f32 %v3901_v53, %v3833_v57 }
 0x52d   : > { %v4522_v4 = vpop.permute.xlu0 %4521 }
 0x52e   : > { %v4032_v40 = vadd.f32 %v4000_v61, %v3932_v3  ;;  %v4251_v32 = vpack.c.bf16 %v4234_v58, %v4233_v60  ;;  %v4033_v24 = vadd.f32 %v4001_v62, %v3933_v31 }
 0x52f   : > { %v4528_v56 = vpop.permute.xlu1 %4527 }
 0x530   : > { %v4132_v36 = vadd.f32 %v4100_v27, %v4032_v40  ;;  %8962 = vmatprep.mubr.msk.bf16.mxu1 %vm3231_vm12, %v4251_v32  ;;  %v4133_v59 = vadd.f32 %v4101_v54, %v4033_v24 }
 0x531   : > { %v4526_v14 = vpop.permute.xlu0 %4525 }
 0x532   : > { %v4171_v22 = vadd.f32 %v11542_v0, %v4132_v36  ;;  %v4172_v15 = vadd.f32 %v11542_v0, %v4133_v59 }
 0x533   : > { %v4532_v23 = vpop.permute.xlu1 %4531 }
 0x534   : > { %v4203_v28 = vmax.f32 %v4171_v22, 0.0  ;;  %v4204_v43 = vmax.f32 %v4172_v15, 0.0 }
 0x535   : > { %v4530_v46 = vpop.permute.xlu0 %4529 }
 0x536   : > { %v4235_v16 = vmin.f32 %v4203_v28, 6.0  ;;  %v4236_v5 = vmin.f32 %v4204_v43, 6.0 }
 0x537   : > { %v4536_v60 = vpop.permute.xlu1 %4535 }
 0x538   : > { %v4252_v1 = vpack.c.bf16 %v4236_v5, %v4235_v16 }
 0x539   : > { %v4534_v48 = vpop.permute.xlu0 %4533 }
 0x53a   : > { %8963 = vmatmul.mubr.msk.bf16.gmra.mxu1 %vm3231_vm12, %v4252_v1 }
 0x53b   : > { %v4540_v36 = vpop.permute.xlu1 %4539 }
 0x53d   : > { %v4538_v54 = vpop.permute.xlu0 %4537 }
 0x53f   : > { %v4544_v15 = vpop.permute.xlu1 %4543 }
 0x541   : > { %v4542_v22 = vpop.permute.xlu0 %4541 }
 0x543   : > { %v4548_v16 = vpop.permute.xlu1 %4547 }
 0x545   : > { %v4546_v28 = vpop.permute.xlu0 %4545 }
 0x549   : > { %v4550_v1 = vpop.permute.xlu0 %4549 }
 0x55b   : > { %v8936_v18 = vpop.f32.mrf.mxu1 }
 0x55c   : > { %v4367_v0 = vadd.f32 %v8936_v18, %v11762_v29 }
 0x55d   : > { %v4358_v34 = vpop.f32.mrf.mxu1 }
 0x55e   : > { %v4359_v25 = vadd.f32 %v11762_v29, %v4358_v34  ;;  %v4615_v49 = vadd.f32 %v4522_v4, %v4367_v0  ;;  %v4552_v0 = vpop.permute.xlu1 %4551 }
 0x55f   : > { %v8937_v55 = vpop.f32.mrf.mxu1 }
 0x560   : > { %v4613_v17 = vadd.f32 %v4518_v2, %v4359_v25  ;;  %v4370_v42 = vadd.f32 %v8937_v55, %v11762_v29 }
 0x561   : > { %v4361_v63 = vpop.f32.mrf.mxu1 }
 0x562   : > { %v4362_v33 = vadd.f32 %v11762_v29, %v4361_v63  ;;  %4677 = vrot.lane.b32.xlu0 %v4613_v17, %s9302_s28  ;;  %v4616_v12 = vadd.f32 %v4524_v26, %v4370_v42 }
 0x564   : > { %v4614_v7 = vadd.f32 %v4520_v30, %v4362_v33  ;;  %v4554_v30 = vpop.permute.xlu0 %4553 }
 0x566   : > { %4679 = vrot.lane.b32.xlu1 %v4614_v7, %s9302_s28  ;;  %4681 = vrot.lane.b32.xlu0 %v4615_v49, %s9302_s28  ;;  %v4556_v49 = vpop.permute.xlu1 %4555 }
 0x568   : > { %v4558_v7 = vpop.permute.xlu0 %4557 }
 0x56a   : > { %4683 = vrot.lane.b32.xlu1 %v4616_v12, %s9302_s28  ;;  %v4560_v26 = vpop.permute.xlu1 %4559 }
 0x56c   : > { %v4562_v12 = vpop.permute.xlu0 %4561 }
 0x576   : > { %v8940_v51 = vpop.f32.mrf.mxu1 }
 0x577   : > { %v4383_v21 = vadd.f32 %v8940_v51, %v11762_v29 }
 0x578   : > { %v4374_v38 = vpop.f32.mrf.mxu1 }
 0x579   : > { %v4375_v45 = vadd.f32 %v11762_v29, %v4374_v38  ;;  %v4619_v35 = vadd.f32 %v4530_v46, %v4383_v21 }
 0x57a   : > { %v8941_v37 = vpop.f32.mrf.mxu1 }
 0x57b   : > { %v4617_v44 = vadd.f32 %v4526_v14, %v4375_v45  ;;  %v4386_v53 = vadd.f32 %v8941_v37, %v11762_v29  ;;  %v4564_v14 = vpop.permute.xlu1 %4563  ;;  %v4566_v45 = vpop.permute.xlu0 %4565 }
 0x57c   : > { %v4377_v52 = vpop.f32.mrf.mxu1 }
 0x57d   : > { %v4378_v20 = vadd.f32 %v11762_v29, %v4377_v52  ;;  %4685 = vrot.lane.b32.xlu0 %v4617_v44, %s9302_s28  ;;  %v4620_v47 = vadd.f32 %v4532_v23, %v4386_v53 }
 0x57f   : > { %v4618_v11 = vadd.f32 %v4528_v56, %v4378_v20  ;;  %v4568_v20 = vpop.permute.xlu1 %4567 }
 0x581   : > { %4687 = vrot.lane.b32.xlu1 %v4618_v11, %s9302_s28  ;;  %4689 = vrot.lane.b32.xlu0 %v4619_v35, %s9302_s28  ;;  %v4570_v35 = vpop.permute.xlu0 %4569 }
 0x585   : > { %4691 = vrot.lane.b32.xlu1 %v4620_v47, %s9302_s28  ;;  %v4572_v47 = vpop.permute.xlu1 %4571 }
 0x58d   : > { %v8944_v61 = vpop.f32.mrf.mxu1 }
 0x58e   : > { %v4399_v3 = vadd.f32 %v8944_v61, %v11762_v29 }
 0x58f   : > { %v4390_v13 = vpop.f32.mrf.mxu1 }
 0x590   : > { %v4391_v57 = vadd.f32 %v11762_v29, %v4390_v13  ;;  %v4623_v40 = vadd.f32 %v4538_v54, %v4399_v3  ;;  %v11806_v13 = vpop.permute.xlu1 %4575 }
 0x591   : > { %v8945_v62 = vpop.f32.mrf.mxu1 }
 0x592   : > { %v4621_v27 = vadd.f32 %v4534_v48, %v4391_v57  ;;  %v4402_v32 = vadd.f32 %v8945_v62, %v11762_v29  ;;  %v11803_v48 = vpop.permute.xlu0 %4573 }
 0x593   : > { %v4393_v58 = vpop.f32.mrf.mxu1 }
 0x594   : > { %v4394_v31 = vadd.f32 %v11762_v29, %v4393_v58  ;;  %4693 = vrot.lane.b32.xlu0 %v4621_v27, %s9302_s28  ;;  %v4624_v59 = vadd.f32 %v4540_v36, %v4402_v32  ;;  %v11810_v27 = vpop.permute.xlu1 %4579 }
 0x596   : > { %v4622_v24 = vadd.f32 %v4536_v60, %v4394_v31  ;;  %v11808_v57 = vpop.permute.xlu0 %4577 }
 0x598   : > { %4695 = vrot.lane.b32.xlu1 %v4622_v24, %s9302_s28  ;;  %4697 = vrot.lane.b32.xlu0 %v4623_v40, %s9302_s28 }
 0x59c   : > { %4699 = vrot.lane.b32.xlu1 %v4624_v59, %s9302_s28 }
 0x5a4   : > { %v8948_v43 = vpop.f32.mrf.mxu1 }
 0x5a5   : > { %v4415_v34 = vadd.f32 %v8948_v43, %v11762_v29 }
 0x5a6   : > { %v4406_v5 = vpop.f32.mrf.mxu1 }
 0x5a7   : > { %v4407_v18 = vadd.f32 %v11762_v29, %v4406_v5  ;;  %v4627_v63 = vadd.f32 %v4546_v28, %v4415_v34 }
 0x5a8   : > { %v8949_v2 = vpop.f32.mrf.mxu1 }
 0x5a9   : > { %v4625_v25 = vadd.f32 %v4542_v22, %v4407_v18  ;;  %v4418_v33 = vadd.f32 %v8949_v2, %v11762_v29 }
 0x5aa   : > { %v4409_v55 = vpop.f32.mrf.mxu1 }
 0x5ab   : > { %v4410_v17 = vadd.f32 %v11762_v29, %v4409_v55  ;;  %4701 = vrot.lane.b32.xlu0 %v4625_v25, %s9302_s28  ;;  %v4628_v42 = vadd.f32 %v4548_v16, %v4418_v33 }
 0x5ad   : > { %v4626_v4 = vadd.f32 %v4544_v15, %v4410_v17 }
 0x5af   : > { %4703 = vrot.lane.b32.xlu1 %v4626_v4, %s9302_s28  ;;  %4705 = vrot.lane.b32.xlu0 %v4627_v63, %s9302_s28 }
 0x5b3   : > { %4707 = vrot.lane.b32.xlu1 %v4628_v42, %s9302_s28 }
 0x5bc   : > { %v8952_v51 = vpop.f32.mrf.mxu1 }
 0x5bd   : > { %v4431_v44 = vadd.f32 %v8952_v51, %v11762_v29  ;;  %v4854_v51 = vld [vmem:[%s13963_s13] sm:$0xf] }
 0x5be   : > { %v4422_v38 = vpop.f32.mrf.mxu1  ;;  %9120 = vmatprep.subr.msk.bf16.mxu0 %vm4320_vm11, %v4854_v51 }
 0x5bf   : > { %v4423_v37 = vadd.f32 %v11762_v29, %v4422_v38  ;;  %v4631_v53 = vadd.f32 %v4554_v30, %v4431_v44  ;;  %v4960_v38 = vsel %vm4320_vm11, %v4854_v51, 0 }
 0x5c0   : > { %v8953_v21 = vpop.f32.mrf.mxu1  ;;  %8967 = vmatpush3.bf16.msra.mxu0 %v4960_v38 }
 0x5c1   : > { %v4629_v56 = vadd.f32 %v4550_v1, %v4423_v37  ;;  %v4434_v11 = vadd.f32 %v8953_v21, %v11762_v29 }
 0x5c2   : > { %v4425_v52 = vpop.f32.mrf.mxu1 }
 0x5c3   : > { %v4426_v46 = vadd.f32 %v11762_v29, %v4425_v52  ;;  %4709 = vrot.lane.b32.xlu0 %v4629_v56, %s9302_s28  ;;  %v4632_v61 = vadd.f32 %v4556_v49, %v4434_v11 }
 0x5c5   : > { %v4630_v23 = vadd.f32 %v4552_v0, %v4426_v46 }
 0x5c7   : > { %4711 = vrot.lane.b32.xlu1 %v4630_v23, %s9302_s28  ;;  %4713 = vrot.lane.b32.xlu0 %v4631_v53, %s9302_s28 }
 0x5cb   : > { %4715 = vrot.lane.b32.xlu1 %v4632_v61, %s9302_s28 }
 0x5d1   : > { %v8956_v62 = vpop.f32.mrf.mxu1 }
 0x5d2   : > { %v4447_v54 = vadd.f32 %v8956_v62, %v11762_v29 }
 0x5d3   : > { %v4438_v3 = vpop.f32.mrf.mxu1 }
 0x5d4   : > { %v4439_v60 = vadd.f32 %v11762_v29, %v4438_v3  ;;  %v4678_v58 = vpop.permute.xlu0 %4677  ;;  %v4635_v22 = vadd.f32 %v4562_v12, %v4447_v54 }
 0x5d5   : > { %v8957_v31 = vpop.f32.mrf.mxu1  ;;  %4774 = vst.msk [vmem:[#allocation2] sm:$0xff] %vm4773_vm13, %v4678_v58 }
 0x5d6   : > { %v4633_v40 = vadd.f32 %v4558_v7, %v4439_v60  ;;  %v4450_v15 = vadd.f32 %v8957_v31, %v11762_v29 }
 0x5d7   : > { %v4441_v32 = vpop.f32.mrf.mxu1 }
 0x5d8   : > { %v4442_v24 = vadd.f32 %v11762_v29, %v4441_v32  ;;  %4717 = vrot.lane.b32.xlu0 %v4633_v40, %s9302_s28  ;;  %v4680_v36 = vpop.permute.xlu1 %4679  ;;  %v4682_v59 = vpop.permute.xlu0 %4681  ;;  %v4636_v16 = vadd.f32 %v4564_v14, %v4450_v15 }
 0x5d9   : > { %4775 = vst.msk [vmem:[#allocation2 + $0x8] sm:$0xff] %vm4773_vm13, %v4680_v36  ;;  %4776 = vst.msk [vmem:[#allocation2 + $0x10] sm:$0xff] %vm4773_vm13, %v4682_v59 }
 0x5da   : > { %v4634_v28 = vadd.f32 %v4560_v26, %v4442_v24 }
 0x5dc   : > { %4719 = vrot.lane.b32.xlu1 %v4634_v28, %s9302_s28  ;;  %4721 = vrot.lane.b32.xlu0 %v4635_v22, %s9302_s28  ;;  %v4684_v43 = vpop.permute.xlu1 %4683  ;;  %v11851_v53 = vld [vmem:[#allocation2] sm:$0xff] }
 0x5dd   : > { %4777 = vst.msk [vmem:[#allocation2 + $0x18] sm:$0xff] %vm4773_vm13, %v4684_v43 }
 0x5e0   : > { %4723 = vrot.lane.b32.xlu1 %v4636_v16, %s9302_s28  ;;  %v11846_v52 = vld [vmem:[#allocation2 + $0x8] sm:$0xff] }
 0x5e1   : > { %v4838_v11 = vpack.c.bf16 %v11846_v52, %v11851_v53 }
 0x5e7   : > { %v8960_v5 = vpop.f32.mrf.mxu1 }
 0x5e8   : > { %v4463_v34 = vadd.f32 %v8960_v5, %v11762_v29 }
 0x5e9   : > { %v4454_v1 = vpop.f32.mrf.mxu1 }
 0x5ea   : > { %v4455_v18 = vadd.f32 %v11762_v29, %v4454_v1  ;;  %v4639_v17 = vadd.f32 %v4570_v35, %v4463_v34 }
 0x5eb   : > { %v8961_v2 = vpop.f32.mrf.mxu1 }
 0x5ec   : > { %v4637_v25 = vadd.f32 %v4566_v45, %v4455_v18  ;;  %v4466_v30 = vadd.f32 %v8961_v2, %v11762_v29 }
 0x5ed   : > { %v4457_v55 = vpop.f32.mrf.mxu1 }
 0x5ee   : > { %v4458_v0 = vadd.f32 %v11762_v29, %v4457_v55  ;;  %4725 = vrot.lane.b32.xlu0 %v4637_v25, %s9302_s28  ;;  %v4640_v4 = vadd.f32 %v4572_v47, %v4466_v30  ;;  %v11858_v47 = vld [vmem:[#allocation2 + $0x18] sm:$0xff] }
 0x5ef   : > { %v4686_v33 = vpop.permute.xlu0 %4685 }
 0x5f0   : > { %v4638_v63 = vadd.f32 %v4568_v20, %v4458_v0  ;;  %4778 = vst.msk [vmem:[#allocation2 + $0x20] sm:$0xff] %vm4773_vm13, %v4686_v33 }
 0x5f2   : > { %4727 = vrot.lane.b32.xlu1 %v4638_v63, %s9302_s28  ;;  %4729 = vrot.lane.b32.xlu0 %v4639_v17, %s9302_s28 }
 0x5f3   : > { %v4688_v49 = vpop.permute.xlu1 %4687  ;;  %v4690_v42 = vpop.permute.xlu0 %4689 }
 0x5f4   : > { %4779 = vst.msk [vmem:[#allocation2 + $0x28] sm:$0xff] %vm4773_vm13, %v4688_v49  ;;  %4780 = vst.msk [vmem:[#allocation2 + $0x30] sm:$0xff] %vm4773_vm13, %v4690_v42 }
 0x5f6   : > { %4731 = vrot.lane.b32.xlu1 %v4640_v4, %s9302_s28 }
 0x5f7   : > { %v4692_v7 = vpop.permute.xlu1 %4691 }
 0x5f8   : > { %4781 = vst.msk [vmem:[#allocation2 + $0x38] sm:$0xff] %vm4773_vm13, %v4692_v7 }
 0x5fa   : > { %v8964_v26 = vpop.f32.mrf.mxu1 }
 0x5fb   : > { %v4479_v37 = vadd.f32 %v8964_v26, %v11762_v29  ;;  %v11860_v61 = vld [vmem:[#allocation2 + $0x28] sm:$0xff]  ;;  %v11877_v58 = vld [vmem:[#allocation2 + $0x30] sm:$0xff] }
 0x5fc   : > { %v4470_v12 = vpop.f32.mrf.mxu1 }
 0x5fd   : > { %v4471_v14 = vadd.f32 %v11762_v29, %v4470_v12  ;;  %v4643_v20 = vadd.f32 %v11808_v57, %v4479_v37 }
 0x5fe   : > { %v8965_v45 = vpop.f32.mrf.mxu1 }
 0x5ff   : > { %v4641_v21 = vadd.f32 %v11803_v48, %v4471_v14  ;;  %v4482_v46 = vadd.f32 %v8965_v45, %v11762_v29  ;;  %v11863_v48 = vld [vmem:[#allocation2 + $0x10] sm:$0xff] }
 0x600   : > { %v4473_v44 = vpop.f32.mrf.mxu1  ;;  %v4839_v57 = vpack.c.bf16 %v11858_v47, %v11863_v48 }
 0x601   : > { %v4474_v56 = vadd.f32 %v11762_v29, %v4473_v44  ;;  %4733 = vrot.lane.b32.xlu0 %v4641_v21, %s9302_s28  ;;  %v4644_v29 = vadd.f32 %v11810_v27, %v4482_v46  ;;  %v11875_v27 = vld [vmem:[#allocation2 + $0x38] sm:$0xff] }
 0x602   : > { %v4841_v54 = vpack.c.bf16 %v11875_v27, %v11877_v58 }
 0x603   : > { %v4642_v35 = vadd.f32 %v11806_v13, %v4474_v56  ;;  %v11865_v13 = vld [vmem:[#allocation2 + $0x20] sm:$0xff] }
 0x604   : > { %v4840_v60 = vpack.c.bf16 %v11860_v61, %v11865_v13 }
 0x605   : > { %4735 = vrot.lane.b32.xlu1 %v4642_v35, %s9302_s28  ;;  %4737 = vrot.lane.b32.xlu0 %v4643_v20, %s9302_s28 }
 0x606   : > { %v4694_v23 = vpop.permute.xlu0 %4693 }
 0x607   : > { %4782 = vst.msk [vmem:[#allocation2 + $0x40] sm:$0xff] %vm4773_vm13, %v4694_v23 }
 0x609   : > { %4739 = vrot.lane.b32.xlu1 %v4644_v29, %s9302_s28  ;;  %4878 = vrot.lane.b32.xlu0 %v4838_v11, %s9303_s29  ;;  %s8683_s28 = sshll.u32 %s14038_s4, 12 }
 0x60a   : > { %v4696_v62 = vpop.permute.xlu1 %4695  ;;  %v4698_v3 = vpop.permute.xlu0 %4697 }
 0x60b   : > { %4783 = vst.msk [vmem:[#allocation2 + $0x48] sm:$0xff] %vm4773_vm13, %v4696_v62  ;;  %4784 = vst.msk [vmem:[#allocation2 + $0x50] sm:$0xff] %vm4773_vm13, %v4698_v3 }
 0x60d   : > { %4880 = vrot.lane.b32.xlu1 %v4839_v57, %s9303_s29  ;;  %4882 = vrot.lane.b32.xlu0 %v4840_v60, %s9303_s29 }
 0x60e   : > { %v4700_v31 = vpop.permute.xlu1 %4699  ;;  %v11885_v40 = vld [vmem:[#allocation2 + $0x40] sm:$0xff] }
 0x60f   : > { %4785 = vst.msk [vmem:[#allocation2 + $0x58] sm:$0xff] %vm4773_vm13, %v4700_v31 }
 0x611   : > { %4884 = vrot.lane.b32.xlu1 %v4841_v54, %s9303_s29 }
 0x612   : > { %v11887_v32 = vld [vmem:[#allocation2 + $0x48] sm:$0xff]  ;;  %v11892_v36 = vld [vmem:[#allocation2 + $0x50] sm:$0xff] }
 0x613   : > { %v4842_v24 = vpack.c.bf16 %v11887_v32, %v11885_v40 }
 0x615   : > { %4886 = vrot.lane.b32.xlu0 %v4842_v24, %s9303_s29 }
 0x616   : > { %v11894_v59 = vld [vmem:[#allocation2 + $0x58] sm:$0xff] }
 0x617   : > { %v4843_v22 = vpack.c.bf16 %v11894_v59, %v11892_v36 }
 0x619   : > { %4888 = vrot.lane.b32.xlu1 %v4843_v22, %s9303_s29 }
 0x61d   : > { %v4702_v15 = vpop.permute.xlu0 %4701 }
 0x61e   : > { %4786 = vst.msk [vmem:[#allocation2 + $0x60] sm:$0xff] %vm4773_vm13, %v4702_v15 }
 0x621   : > { %v4704_v28 = vpop.permute.xlu1 %4703  ;;  %v4706_v43 = vpop.permute.xlu0 %4705 }
 0x622   : > { %4787 = vst.msk [vmem:[#allocation2 + $0x68] sm:$0xff] %vm4773_vm13, %v4704_v28  ;;  %4788 = vst.msk [vmem:[#allocation2 + $0x70] sm:$0xff] %vm4773_vm13, %v4706_v43 }
 0x625   : > { %v4708_v16 = vpop.permute.xlu1 %4707  ;;  %v11903_v5 = vld [vmem:[#allocation2 + $0x60] sm:$0xff] }
 0x626   : > { %4789 = vst.msk [vmem:[#allocation2 + $0x78] sm:$0xff] %vm4773_vm13, %v4708_v16 }
 0x629   : > { %v11905_v1 = vld [vmem:[#allocation2 + $0x68] sm:$0xff]  ;;  %v11910_v2 = vld [vmem:[#allocation2 + $0x70] sm:$0xff] }
 0x62a   : > { %v4844_v18 = vpack.c.bf16 %v11905_v1, %v11903_v5 }
 0x62c   : > { %4890 = vrot.lane.b32.xlu0 %v4844_v18, %s9303_s29 }
 0x62d   : > { %v11912_v34 = vld [vmem:[#allocation2 + $0x78] sm:$0xff] }
 0x62e   : > { %v4845_v25 = vpack.c.bf16 %v11912_v34, %v11910_v2 }
 0x630   : > { %4892 = vrot.lane.b32.xlu1 %v4845_v25, %s9303_s29 }
 0x635   : > { %v4710_v55 = vpop.permute.xlu0 %4709 }
 0x636   : > { %4790 = vst.msk [vmem:[#allocation2 + $0x80] sm:$0xff] %vm4773_vm13, %v4710_v55 }
 0x639   : > { %v4712_v0 = vpop.permute.xlu1 %4711  ;;  %v4714_v17 = vpop.permute.xlu0 %4713 }
 0x63a   : > { %4791 = vst.msk [vmem:[#allocation2 + $0x88] sm:$0xff] %vm4773_vm13, %v4712_v0  ;;  %4792 = vst.msk [vmem:[#allocation2 + $0x90] sm:$0xff] %vm4773_vm13, %v4714_v17 }
 0x63d   : > { %v4716_v30 = vpop.permute.xlu1 %4715  ;;  %v11921_v63 = vld [vmem:[#allocation2 + $0x80] sm:$0xff] }
 0x63e   : > { %4793 = vst.msk [vmem:[#allocation2 + $0x98] sm:$0xff] %vm4773_vm13, %v4716_v30 }
 0x641   : > { %v11923_v33 = vld [vmem:[#allocation2 + $0x88] sm:$0xff]  ;;  %v11928_v49 = vld [vmem:[#allocation2 + $0x90] sm:$0xff] }
 0x642   : > { %v4846_v4 = vpack.c.bf16 %v11923_v33, %v11921_v63 }
 0x644   : > { %4894 = vrot.lane.b32.xlu0 %v4846_v4, %s9303_s29 }
 0x645   : > { %v11930_v42 = vld [vmem:[#allocation2 + $0x98] sm:$0xff] }
 0x646   : > { %v4847_v7 = vpack.c.bf16 %v11930_v42, %v11928_v49 }
 0x648   : > { %4896 = vrot.lane.b32.xlu1 %v4847_v7, %s9303_s29 }
 0x64a   : > { %v4718_v26 = vpop.permute.xlu0 %4717 }
 0x64b   : > { %4794 = vst.msk [vmem:[#allocation2 + $0xa0] sm:$0xff] %vm4773_vm13, %v4718_v26 }
 0x64e   : > { %v4720_v12 = vpop.permute.xlu1 %4719  ;;  %v4722_v51 = vpop.permute.xlu0 %4721 }
 0x64f   : > { %4795 = vst.msk [vmem:[#allocation2 + $0xa8] sm:$0xff] %vm4773_vm13, %v4720_v12  ;;  %4796 = vst.msk [vmem:[#allocation2 + $0xb0] sm:$0xff] %vm4773_vm13, %v4722_v51 }
 0x652   : > { %v4724_v14 = vpop.permute.xlu1 %4723  ;;  %v11939_v38 = vld [vmem:[#allocation2 + $0xa0] sm:$0xff] }
 0x653   : > { %4797 = vst.msk [vmem:[#allocation2 + $0xb8] sm:$0xff] %vm4773_vm13, %v4724_v14  ;;  %v5223_v14 = vld [vmem:[#allocation3 + $0x8] sm:$0xff] }
 0x656   : > { %v11941_v45 = vld [vmem:[#allocation2 + $0xa8] sm:$0xff]  ;;  %v11946_v21 = vld [vmem:[#allocation2 + $0xb0] sm:$0xff] }
 0x657   : > { %v4848_v37 = vpack.c.bf16 %v11941_v45, %v11939_v38 }
 0x659   : > { %4898 = vrot.lane.b32.xlu0 %v4848_v37, %s9303_s29 }
 0x65a   : > { %v11948_v44 = vld [vmem:[#allocation2 + $0xb8] sm:$0xff] }
 0x65b   : > { %v4849_v56 = vpack.c.bf16 %v11948_v44, %v11946_v21 }
 0x65d   : > { %4900 = vrot.lane.b32.xlu1 %v4849_v56, %s9303_s29 }
 0x660   : > { %v4726_v20 = vpop.permute.xlu0 %4725 }
 0x661   : > { %4798 = vst.msk [vmem:[#allocation2 + $0xc0] sm:$0xff] %vm4773_vm13, %v4726_v20 }
 0x664   : > { %v4728_v46 = vpop.permute.xlu1 %4727  ;;  %v4730_v35 = vpop.permute.xlu0 %4729 }
 0x665   : > { %4799 = vst.msk [vmem:[#allocation2 + $0xc8] sm:$0xff] %vm4773_vm13, %v4728_v46  ;;  %4800 = vst.msk [vmem:[#allocation2 + $0xd0] sm:$0xff] %vm4773_vm13, %v4730_v35 }
 0x668   : > { %v4732_v11 = vpop.permute.xlu1 %4731  ;;  %v11957_v23 = vld [vmem:[#allocation2 + $0xc0] sm:$0xff] }
 0x669   : > { %4801 = vst.msk [vmem:[#allocation2 + $0xd8] sm:$0xff] %vm4773_vm13, %v4732_v11 }
 0x66c   : > { %v11959_v29 = vld [vmem:[#allocation2 + $0xc8] sm:$0xff]  ;;  %v11964_v62 = vld [vmem:[#allocation2 + $0xd0] sm:$0xff] }
 0x66d   : > { %v4850_v57 = vpack.c.bf16 %v11959_v29, %v11957_v23 }
 0x66f   : > { %4902 = vrot.lane.b32.xlu0 %v4850_v57, %s9303_s29 }
 0x670   : > { %v11966_v3 = vld [vmem:[#allocation2 + $0xd8] sm:$0xff] }
 0x671   : > { %v4851_v60 = vpack.c.bf16 %v11966_v3, %v11964_v62 }
 0x673   : > { %4904 = vrot.lane.b32.xlu1 %v4851_v60, %s9303_s29  ;;  %v4734_v31 = vpop.permute.xlu0 %4733  ;;  %v5390_v60 = vld [vmem:[#allocation3 + $0x2] sm:$0xff] }
 0x674   : > { %4802 = vst.msk [vmem:[#allocation2 + $0xe0] sm:$0xff] %vm4773_vm13, %v4734_v31  ;;  %v5391_v31 = vld [vmem:[#allocation3 + $0xa] sm:$0xff] }
 0x677   : > { %v4736_v54 = vpop.permute.xlu1 %4735  ;;  %v4738_v24 = vpop.permute.xlu0 %4737 }
 0x678   : > { %4803 = vst.msk [vmem:[#allocation2 + $0xe8] sm:$0xff] %vm4773_vm13, %v4736_v54  ;;  %4804 = vst.msk [vmem:[#allocation2 + $0xf0] sm:$0xff] %vm4773_vm13, %v4738_v24 }
 0x67b   : > { %v4740_v22 = vpop.permute.xlu1 %4739  ;;  %v4879_v15 = vpop.permute.xlu0 %4878  ;;  %v4834_v28 = vld [vmem:[#allocation2 + $0xe0] sm:$0xff] }
 0x67c   : > { %4805 = vst.msk [vmem:[#allocation2 + $0xf8] sm:$0xff] %vm4773_vm13, %v4740_v22  ;;  %8968 = vmatprep.mubr.msk.bf16.mxu0 %vm4910_vm14, %v4879_v15 }
 0x67f   : > { %v4835_v43 = vld [vmem:[#allocation2 + $0xe8] sm:$0xff]  ;;  %v4881_v16 = vpop.permute.xlu1 %4880  ;;  %v4883_v18 = vpop.permute.xlu0 %4882  ;;  %v4836_v55 = vld [vmem:[#allocation2 + $0xf0] sm:$0xff] }
 0x680   : > { %v4852_v25 = vpack.c.bf16 %v4835_v43, %v4834_v28  ;;  %8969 = vmatmul.mubr.msk.bf16.vlgmr.msra.gmra.mxu0 %vm4910_vm14, %v4881_v16 }
 0x681   : > { %8972 = vmatprep.mubr.msk.bf16.mxu0 %vm4910_vm14, %v4883_v18 }
 0x682   : > { %4906 = vrot.lane.b32.xlu0 %v4852_v25, %s9303_s29 }
 0x683   : > { %v4837_v0 = vld [vmem:[#allocation2 + $0xf8] sm:$0xff]  ;;  %v4885_v30 = vpop.permute.xlu1 %4884 }
 0x684   : > { %v4853_v17 = vpack.c.bf16 %v4837_v0, %v4836_v55 }
 0x686   : > { %6481 = vrot.lane.b32.xlu0 %v11851_v53, %s9303_s29  ;;  %4908 = vrot.lane.b32.xlu1 %v4853_v17, %s9303_s29 }
 0x687   : > { %v4887_v4 = vpop.permute.xlu0 %4886 }
 0x688   : > { %8973 = vmatmul.mubr.msk.bf16.gmra.mxu0 %vm4910_vm14, %v4885_v30 }
 0x689   : > { %8976 = vmatprep.mubr.msk.bf16.mxu0 %vm4910_vm14, %v4887_v4 }
 0x68a   : > { %6485 = vrot.lane.b32.xlu0 %v11863_v48, %s9303_s29  ;;  %6483 = vrot.lane.b32.xlu1 %v11846_v52, %s9303_s29 }
 0x68b   : > { %v4889_v7 = vpop.permute.xlu1 %4888 }
 0x68e   : > { %6489 = vrot.lane.b32.xlu0 %v11865_v13, %s9303_s29  ;;  %6487 = vrot.lane.b32.xlu1 %v11858_v47, %s9303_s29  ;;  %v9181_v13 = vld [vmem:[%s13965_s15 + $0x8] sm:$0xff]  }
 0x690   : > { %8977 = vmatmul.mubr.msk.bf16.gmra.mxu0 %vm4910_vm14, %v4889_v7 }
 0x692   : > { %6493 = vrot.lane.b32.xlu0 %v11877_v58, %s9303_s29  ;;  %6491 = vrot.lane.b32.xlu1 %v11860_v61, %s9303_s29  ;;  %v9180_v61 = vld [vmem:[%s13965_s15 + $0x10] sm:$0xff]  }
 0x693   : > { %9000 = vmatprep.subr.bf16.mxu1 %v9180_v61 }
 0x694   : > { %9001 = vmatpush3.bf16.msra.mxu1 %v9180_v61 }
 0x695   : > { %9002 = vmatprep.subr.bf16.mxu1 %v9181_v13 }
 0x696   : > { %6497 = vrot.lane.b32.xlu0 %v11885_v40, %s9303_s29  ;;  %6495 = vrot.lane.b32.xlu1 %v11875_v27, %s9303_s29 }
 0x698   : > { %9003 = vmatpush3.bf16.msra.mxu1 %v9181_v13 }
 0x69a   : > { %6501 = vrot.lane.b32.xlu0 %v11892_v36, %s9303_s29  ;;  %6499 = vrot.lane.b32.xlu1 %v11887_v32, %s9303_s29  ;;  %v9182_v36 = vld [vmem:[%s13965_s15] sm:$0xff]  }
 0x69b   : > { %9004 = vmatprep.subr.bf16.mxu1 %v9182_v36 }
 0x69c   : > { %9005 = vmatpush3.bf16.msra.mxu1 %v9182_v36 }
 0x69e   : > { %v4891_v52 = vpop.permute.xlu0 %4890  ;;  %6505 = vrot.lane.b32.xlu0 %v11903_v5, %s9303_s29  ;;  %6503 = vrot.lane.b32.xlu1 %v11894_v59, %s9303_s29 }
 0x69f   : > { %8980 = vmatprep.mubr.msk.bf16.mxu0 %vm4910_vm14, %v4891_v52 }
 0x6a2   : > { %v4893_v53 = vpop.permute.xlu1 %4892  ;;  %6509 = vrot.lane.b32.xlu0 %v11910_v2, %s9303_s29  ;;  %6507 = vrot.lane.b32.xlu1 %v11905_v1, %s9303_s29  ;;  %v12065_v1 = vld [vmem:[%s13966_s16] ss:$0 sm:$0xff] }
 0x6a3   : > { %8981 = vmatmul.mubr.msk.bf16.gmra.mxu0 %vm4910_vm14, %v4893_v53  ;;  %v5220_v2 = vld [vmem:[%s13964_s14] sm:$0xff] }
 0x6a4   : > { %v12075_v26 = vrot.slane %v5220_v2, %v9801_v41  ;;  %v12080_v20 = vrot.slane %v5220_v2, %v9817_v50  ;;  %v12095_v30 = vrot.slane %v5220_v2, %v9831_v6  ;;  %v12098_v7 = vrot.slane %v5220_v2, %v9833_v8 }
 0x6a5   : > { %v12101_v52 = vrot.slane %v5220_v2, %v9835_v9  ;;  %v12104_v53 = vrot.slane %v5220_v2, %v9837_v10 }
 0x6a6   : > { %6513 = vrot.lane.b32.xlu0 %v11921_v63, %s9303_s29  ;;  %6511 = vrot.lane.b32.xlu1 %v11912_v34, %s9303_s29  ;;  %v5426_v18 = vmul.f32 %v12080_v20, %v5390_v60  ;;  %v5427_v25 = vmul.f32 %v12080_v20, %v5391_v31 }
 0x6aa   : > { %6517 = vrot.lane.b32.xlu0 %v11928_v49, %s9303_s29  ;;  %6515 = vrot.lane.b32.xlu1 %v11923_v33, %s9303_s29  ;;  %v5222_v49 = vld [vmem:[#allocation3] sm:$0xff] }
 0x6ae   : > { %6521 = vrot.lane.b32.xlu0 %v11939_v38, %s9303_s29  ;;  %6519 = vrot.lane.b32.xlu1 %v11930_v42, %s9303_s29  ;;  %v12072_v42 = vrot.slane %v5220_v2, %v9794_v39  ;;  %v5290_v38 = vld [vmem:[#allocation3 + $0x1] sm:$0xff] }
 0x6b0   : > { %v5258_v35 = vmul.f32 %v12072_v42, %v5222_v49  ;;  %v5259_v11 = vmul.f32 %v12072_v42, %v5223_v14 }
 0x6b2   : > { %6525 = vrot.lane.b32.xlu0 %v11946_v21, %s9303_s29  ;;  %6523 = vrot.lane.b32.xlu1 %v11941_v45, %s9303_s29  ;;  %v5291_v45 = vld [vmem:[#allocation3 + $0x9] sm:$0xff] }
 0x6b6   : > { %v4895_v47 = vpop.permute.xlu0 %4894  ;;  %6529 = vrot.lane.b32.xlu0 %v11957_v23, %s9303_s29  ;;  %6527 = vrot.lane.b32.xlu1 %v11948_v44, %s9303_s29  ;;  %v5326_v23 = vmul.f32 %v12075_v26, %v5290_v38 }
 0x6b7   : > { %8984 = vmatprep.mubr.msk.bf16.mxu0 %vm4910_vm14, %v4895_v47 }
 0x6ba   : > { %v4897_v48 = vpop.permute.xlu1 %4896  ;;  %6533 = vrot.lane.b32.xlu0 %v11964_v62, %s9303_s29  ;;  %6531 = vrot.lane.b32.xlu1 %v11959_v29, %s9303_s29  ;;  %v5327_v29 = vmul.f32 %v12075_v26, %v5291_v45 }
 0x6bb   : > { %8985 = vmatmul.mubr.msk.bf16.gmra.mxu0 %vm4910_vm14, %v4897_v48 }
 0x6bc   : > { %v5359_v16 = vadd.f32 %v5327_v29, %v5259_v11 }
 0x6be   : > { %6537 = vrot.lane.b32.xlu0 %v4834_v28, %s9303_s29  ;;  %6535 = vrot.lane.b32.xlu1 %v11966_v3, %s9303_s29 }
 0x6c2   : > { %6541 = vrot.lane.b32.xlu0 %v4836_v55, %s9303_s29  ;;  %6539 = vrot.lane.b32.xlu1 %v4835_v43, %s9303_s29  ;;  %v5358_v43 = vadd.f32 %v5326_v23, %v5258_v35 }
 0x6c6   : > { %6543 = vrot.lane.b32.xlu1 %v4837_v0, %s9303_s29  ;;  %s9305_s29 = smov [#allocation7]  }
 0x6cb   : > { %v4899_v27 = vpop.permute.xlu0 %4898 }
 0x6cc   : > { %8988 = vmatprep.mubr.msk.bf16.mxu0 %vm4910_vm14, %v4899_v27  ;;  %v5458_v27 = vadd.f32 %v5426_v18, %v5358_v43 }
 0x6cf   : > { %v4901_v58 = vpop.permute.xlu1 %4900 }
 0x6d0   : > { %8989 = vmatmul.mubr.msk.bf16.gmra.mxu0 %vm4910_vm14, %v4901_v58  ;;  %v5459_v58 = vadd.f32 %v5427_v25, %v5359_v16 }
 0x6e1   : > { %v4903_v40 = vpop.permute.xlu0 %4902 }
 0x6e2   : > { %8992 = vmatprep.mubr.msk.bf16.mxu0 %vm4910_vm14, %v4903_v40  ;;  %v12109_v40 = vrot.slane %v5220_v2, %v9843_v19 }
 0x6e5   : > { %v4905_v32 = vpop.permute.xlu1 %4904 }
 0x6e6   : > { %8993 = vmatmul.mubr.msk.bf16.gmra.mxu0 %vm4910_vm14, %v4905_v32 }
 0x6f4   : > { %v4907_v59 = vpop.permute.xlu0 %4906 }
 0x6f5   : > { %8996 = vmatprep.mubr.msk.bf16.mxu0 %vm4910_vm14, %v4907_v59 }
 0x6f8   : > { %v4909_v5 = vpop.permute.xlu1 %4908 }
 0x6f9   : > { %8997 = vmatmul.mubr.msk.bf16.gmra.mxu0 %vm4910_vm14, %v4909_v5 }
 0x740   : > { %v8970_v34 = vpop.f32.mrf.mxu0 }
 0x741   : > { %v5005_v63 = vadd.f32 %v8970_v34, %v12065_v1 }
 0x742   : > { %v4996_v33 = vpop.f32.mrf.mxu0 }
 0x743   : > { %v5125_v12 = vmax.f32 %v5005_v63, 0.0  ;;  %v4997_v51 = vadd.f32 %v12065_v1, %v4996_v33 }
 0x744   : > { %v8971_v37 = vpop.f32.mrf.mxu0 }
 0x745   : > { %v5157_v21 = vmin.f32 %v5125_v12, 6.0  ;;  %v5123_v44 = vmax.f32 %v4997_v51, 0.0  ;;  %v5008_v56 = vadd.f32 %v8971_v37, %v12065_v1 }
 0x746   : > { %v4999_v46 = vpop.f32.mrf.mxu0 }
 0x747   : > { %v5155_v57 = vmin.f32 %v5123_v44, 6.0  ;;  %v5126_v62 = vmax.f32 %v5008_v56, 0.0  ;;  %v5000_v3 = vadd.f32 %v12065_v1, %v4999_v46  ;;  %5190 = vst.msk [vmem:[#allocation3 + $0x31] sm:$0xff] %vm5187_vm15, %v5157_v21  ;;  %v12130_v44 = vld [vmem:[%s13964_s14 + $0x8] ss:$0 sm:$0xff] }
 0x748   : > { %v8974_v54 = vpop.f32.mrf.mxu0 }
 0x749   : > { %v5158_v24 = vmin.f32 %v5126_v62, 6.0  ;;  %v5124_v22 = vmax.f32 %v5000_v3, 0.0  ;;  %v5021_v15 = vadd.f32 %v8974_v54, %v12065_v1  ;;  %5188 = vst.msk [vmem:[#allocation3 + $0x19] sm:$0xff] %vm5187_vm15, %v5155_v57 }
 0x74a   : > { %v5012_v28 = vpop.f32.mrf.mxu0 }
 0x74b   : > { %v5156_v55 = vmin.f32 %v5124_v22, 6.0  ;;  %v5129_v0 = vmax.f32 %v5021_v15, 0.0  ;;  %v5013_v17 = vadd.f32 %v12065_v1, %v5012_v28  ;;  %5191 = vst.msk [vmem:[#allocation3 + $0x39] sm:$0xff] %vm5187_vm15, %v5158_v24 }
 0x74c   : > { %v8975_v4 = vpop.f32.mrf.mxu0 }
 0x74d   : > { %v5161_v47 = vmin.f32 %v5129_v0, 6.0  ;;  %v5127_v61 = vmax.f32 %v5013_v17, 0.0  ;;  %v5024_v48 = vadd.f32 %v8975_v4, %v12065_v1  ;;  %5189 = vst.msk [vmem:[#allocation3 + $0x21] sm:$0xff] %vm5187_vm15, %v5156_v55 }
 0x74e   : > { %v5015_v13 = vpop.f32.mrf.mxu0  ;;  %v5790_v32 = vld [vmem:[#allocation3 + $0x30] sm:$0xff] }
 0x74f   : > { %v5890_v36 = vld [vmem:[#allocation3 + $0x31] sm:$0xff]  ;;  %v5159_v59 = vmin.f32 %v5127_v61, 6.0  ;;  %v5130_v5 = vmax.f32 %v5024_v48, 0.0  ;;  %v5016_v34 = vadd.f32 %v12065_v1, %v5015_v13  ;;  %v5826_v63 = vmul.f32 %v12095_v30, %v5790_v32  ;;  %5194 = vst.msk [vmem:[#allocation3 + $0x61] sm:$0xff] %vm5187_vm15, %v5161_v47 }
 0x750   : > { %v8978_v33 = vpop.f32.mrf.mxu0  ;;  %v5490_v49 = vld [vmem:[#allocation3 + $0x18] sm:$0xff]  ;;  %v12115_v51 = vmul.f32 %v12104_v53, %v5890_v36  ;;  %v12118_v14 = vmul.f32 %v5790_v32, %v12098_v7  ;;  %v12121_v2 = vmul.f32 %v5890_v36, %v12101_v52  ;;  %v12124_v38 = vmul.f32 %v5790_v32, %v12072_v42 }
 0x751   : > { %v5590_v12 = vld [vmem:[#allocation3 + $0x19] sm:$0xff]  ;;  %v5162_v45 = vmin.f32 %v5130_v5, 6.0  ;;  %v5128_v37 = vmax.f32 %v5016_v34, 0.0  ;;  %v5037_v21 = vadd.f32 %v8978_v33, %v12065_v1  ;;  %v5526_v56 = vmul.f32 %v12098_v7, %v5490_v49  ;;  %5192 = vst.msk [vmem:[#allocation3 + $0x49] sm:$0xff] %vm5187_vm15, %v5159_v59 }
 0x752   : > { %v5028_v46 = vpop.f32.mrf.mxu0  ;;  %v5626_v35 = vmul.f32 %v12101_v52, %v5590_v12  ;;  %v12135_v11 = vld [vmem:[#allocation3 + $0x38] sm:$0xff]  ;;  %v5260_v57 = vmul.f32 %v5490_v49, %v12072_v42  ;;  %v5328_v62 = vmul.f32 %v5590_v12, %v12075_v26  ;;  %v12144_v3 = vmul.f32 %v5890_v36, %v12075_v26 }
 0x753   : > { %v12137_v23 = vld [vmem:[#allocation3 + $0x39] sm:$0xff]  ;;  %v5160_v60 = vmin.f32 %v5128_v37, 6.0  ;;  %v5133_v31 = vmax.f32 %v5037_v21, 0.0  ;;  %v5029_v54 = vadd.f32 %v12065_v1, %v5028_v46  ;;  %v5558_v24 = vadd.f32 %v5526_v56, %v5458_v27  ;;  %5195 = vst.msk [vmem:[#allocation3 + $0x69] sm:$0xff] %vm5187_vm15, %v5162_v45 }
 0x754   : > { %v12139_v29 = vld [vmem:[#allocation3 + $0x32] sm:$0xff]  ;;  %v12147_v22 = vld [vmem:[#allocation3 + $0x3a] sm:$0xff]  ;;  %v8979_v15 = vpop.f32.mrf.mxu0  ;;  %v5827_v18 = vmul.f32 %v12095_v30, %v12135_v11  ;;  %v5927_v25 = vmul.f32 %v12104_v53, %v12137_v23  ;;  %v5691_v48 = vld [vmem:[#allocation3 + $0x22] sm:$0xff]  ;;  %v5360_v21 = vadd.f32 %v5328_v62, %v5260_v57  ;;  %v5629_v62 = vmul.f32 %v12137_v23, %v12101_v52 }
 0x755   : > { %v5491_v28 = vld [vmem:[#allocation3 + $0x20] sm:$0xff]  ;;  %v6026_v55 = vmul.f32 %v12130_v44, %v12139_v29  ;;  %v12158_v0 = vmul.f32 %v12130_v44, %v12147_v22  ;;  %v5165_v17 = vmin.f32 %v5133_v31, 6.0  ;;  %v5131_v4 = vmax.f32 %v5029_v54, 0.0  ;;  %5193 = vst.msk [vmem:[#allocation3 + $0x51] sm:$0xff] %vm5187_vm15, %v5160_v60 }
 0x756   : > { %v5591_v43 = vld [vmem:[#allocation3 + $0x21] sm:$0xff]  ;;  %v5040_v47 = vadd.f32 %v8979_v15, %v12065_v1  ;;  %v5527_v61 = vmul.f32 %v12098_v7, %v5491_v28  ;;  %v5031_v13 = vpop.f32.mrf.mxu0  ;;  %v5658_v32 = vadd.f32 %v5626_v35, %v5558_v24  ;;  %v5727_v59 = vmul.f32 %v12109_v40, %v5691_v48 }
 0x757   : > { %v5690_v16 = vld [vmem:[#allocation3 + $0x1a] sm:$0xff]  ;;  %v5627_v27 = vmul.f32 %v12101_v52, %v5591_v43  ;;  %v5163_v5 = vmin.f32 %v5131_v4, 6.0  ;;  %v5032_v33 = vadd.f32 %v12065_v1, %v5031_v13  ;;  %5198 = vst.msk [vmem:[#allocation3 + $0x91] sm:$0xff] %vm5187_vm15, %v5165_v17  ;;  %v5261_v45 = vmul.f32 %v5491_v28, %v12072_v42 }
 0x758   : > { %v5726_v36 = vmul.f32 %v12109_v40, %v5690_v16  ;;  %v5134_v34 = vmax.f32 %v5040_v47, 0.0  ;;  %v5559_v49 = vadd.f32 %v5527_v61, %v5459_v58  ;;  %v5329_v37 = vmul.f32 %v5591_v43, %v12075_v26  ;;  %v12175_v15 = vld [vmem:[#allocation3 + $0x48] sm:$0xff] }
 0x759   : > { %v5132_v46 = vmax.f32 %v5032_v33, 0.0  ;;  %5196 = vst.msk [vmem:[#allocation3 + $0x79] sm:$0xff] %vm5187_vm15, %v5163_v5  ;;  %v5428_v60 = vmul.f32 %v5690_v16, %v12080_v20  ;;  %v5429_v24 = vmul.f32 %v5691_v48, %v12080_v20  ;;  %v5529_v58 = vmul.f32 %v12135_v11, %v12098_v7  ;;  %v12180_v43 = vld [vmem:[#allocation3 + $0x49] sm:$0xff] }
 0x75a   : > { %v5758_v12 = vadd.f32 %v5726_v36, %v5658_v32  ;;  %v5166_v56 = vmin.f32 %v5134_v34, 6.0  ;;  %v5659_v35 = vadd.f32 %v5627_v27, %v5559_v49  ;;  %v5361_v54 = vadd.f32 %v5329_v37, %v5261_v45  ;;  %v12196_v32 = vld [vmem:[%s13967_s17] ss:$0 sm:$0xff] }
 0x75b   : > { %v5164_v28 = vmin.f32 %v5132_v46, 6.0  ;;  %v5460_v57 = vadd.f32 %v5428_v60, %v5360_v21  ;;  %v5728_v4 = vmul.f32 %v12139_v29, %v12109_v40  ;;  %v5729_v47 = vmul.f32 %v12147_v22, %v12109_v40 }
 0x75c   : > { %v5858_v31 = vadd.f32 %v5826_v63, %v5758_v12  ;;  %v5759_v17 = vadd.f32 %v5727_v59, %v5659_v35  ;;  %5199 = vst.msk [vmem:[#allocation3 + $0x99] sm:$0xff] %vm5187_vm15, %v5166_v56  ;;  %v5461_v16 = vadd.f32 %v5429_v24, %v5361_v54  ;;  %v12187_v61 = vld [vmem:[#allocation3 + $0x50] sm:$0xff]  ;;  %v5828_v36 = vmul.f32 %v12095_v30, %v12175_v15 }
 0x75d   : > { %v12189_v48 = vld [vmem:[#allocation3 + $0x51] sm:$0xff]  ;;  %5197 = vst.msk [vmem:[#allocation3 + $0x81] sm:$0xff] %vm5187_vm15, %v5164_v28  ;;  %v5829_v59 = vmul.f32 %v12095_v30, %v12187_v61  ;;  %v5331_v46 = vmul.f32 %v12137_v23, %v12075_v26  ;;  %v5430_v60 = vmul.f32 %v12139_v29, %v12080_v20 }
 0x75e   : > { %v5958_v63 = vadd.f32 %v12115_v51, %v5858_v31  ;;  %v12191_v13 = vld [vmem:[#allocation3 + $0x4a] sm:$0xff]  ;;  %v5859_v27 = vadd.f32 %v5827_v18, %v5759_v17  ;;  %v5560_v51 = vadd.f32 %v12118_v14, %v5460_v57  ;;  %v12204_v5 = vld [vmem:[#allocation3 + $0x52] sm:$0xff]  ;;  %v5561_v33 = vadd.f32 %v5529_v58, %v5461_v16 }
 0x75f   : > { %v5928_v18 = vmul.f32 %v12104_v53, %v12180_v43  ;;  %v5929_v49 = vmul.f32 %v12104_v53, %v12189_v48  ;;  %v6028_v14 = vmul.f32 %v12130_v44, %v12191_v13  ;;  %v6029_v37 = vmul.f32 %v12130_v44, %v12204_v5 }
 0x760   : > { %v6058_v34 = vadd.f32 %v6026_v55, %v5958_v63  ;;  %v5959_v12 = vadd.f32 %v5927_v25, %v5859_v27  ;;  %v5660_v45 = vadd.f32 %v12121_v2, %v5560_v51  ;;  %v5661_v56 = vadd.f32 %v5629_v62, %v5561_v33 }
 0x761   : > { %v5263_v55 = vmul.f32 %v12135_v11, %v12072_v42  ;;  %v5362_v2 = vadd.f32 %v12144_v3, %v12124_v38  ;;  %v5431_v58 = vmul.f32 %v12147_v22, %v12080_v20 }
 0x762   : > { %v6097_v21 = vadd.f32 %v12196_v32, %v6058_v34  ;;  %v6059_v35 = vadd.f32 %v12158_v0, %v5959_v12  ;;  %v5760_v25 = vadd.f32 %v5728_v4, %v5660_v45  ;;  %v5761_v54 = vadd.f32 %v5729_v47, %v5661_v56 }
 0x763   : > { %v5363_v24 = vadd.f32 %v5331_v46, %v5263_v55  ;;  %v8982_v28 = vpop.f32.mrf.mxu0  ;;  %v5462_v23 = vadd.f32 %v5430_v60, %v5362_v2  ;;  %v5530_v0 = vmul.f32 %v12175_v15, %v12098_v7  ;;  %v5531_v4 = vmul.f32 %v12187_v61, %v12098_v7  ;;  %v12239_v46 = vld [vmem:[#allocation3 + $0x60] sm:$0xff] }
 0x764   : > { %v6129_v31 = vmax.f32 %v6097_v21, 0.0  ;;  %v6098_v11 = vadd.f32 %v12196_v32, %v6059_v35  ;;  %v5860_v17 = vadd.f32 %v5828_v36, %v5760_v25  ;;  %v5053_v57 = vadd.f32 %v8982_v28, %v12065_v1  ;;  %v12247_v28 = vld [vmem:[#allocation3 + $0x61] sm:$0xff] }
 0x765   : > { %v5861_v3 = vadd.f32 %v5829_v59, %v5761_v54  ;;  %v5463_v62 = vadd.f32 %v5431_v58, %v5363_v24  ;;  %v5044_v29 = vpop.f32.mrf.mxu0  ;;  %v5562_v22 = vadd.f32 %v5530_v0, %v5462_v23  ;;  %v5630_v36 = vmul.f32 %v12180_v43, %v12101_v52  ;;  %v12256_v0 = vld [vmem:[#allocation3 + $0x69] sm:$0xff] }
 0x766   : > { %v6161_v38 = vmin.f32 %v6129_v31, 6.0  ;;  %v6130_v63 = vmax.f32 %v6098_v11, 0.0  ;;  %v5960_v16 = vadd.f32 %v5928_v18, %v5860_v17  ;;  %v5137_v47 = vmax.f32 %v5053_v57, 0.0  ;;  %v12242_v31 = vld [vmem:[#allocation3 + $0x68] sm:$0xff] }
 0x767   : > { %v5045_v27 = vadd.f32 %v12065_v1, %v5044_v29  ;;  %v5961_v51 = vadd.f32 %v5929_v49, %v5861_v3  ;;  %v8983_v34 = vpop.f32.mrf.mxu0  ;;  %v5563_v45 = vadd.f32 %v5531_v4, %v5463_v62  ;;  %v5631_v59 = vmul.f32 %v12189_v48, %v12101_v52  ;;  %v12258_v57 = vld [vmem:[#allocation3 + $0x62] sm:$0xff] }
 0x768   : > { %v6162_v33 = vmin.f32 %v6130_v63, 6.0  ;;  %v6060_v12 = vadd.f32 %v6028_v14, %v5960_v16  ;;  %v5169_v21 = vmin.f32 %v5137_v47, 6.0  ;;  %v5056_v56 = vadd.f32 %v8983_v34, %v12065_v1  ;;  %v12263_v63 = vld [vmem:[#allocation3 + $0x6a] sm:$0xff] }
 0x769   : > { %v5135_v18 = vmax.f32 %v5045_v27, 0.0  ;;  %v6061_v55 = vadd.f32 %v6029_v37, %v5961_v51  ;;  %v5047_v35 = vpop.f32.mrf.mxu0  ;;  %v5662_v2 = vadd.f32 %v5630_v36, %v5562_v22  ;;  %v5663_v60 = vadd.f32 %v5631_v59, %v5563_v45 }
 0x76a   : > { %v6193_v25 = vpack.c.bf16 %v6162_v33, %v6161_v38  ;;  %v6099_v49 = vadd.f32 %v12196_v32, %v6060_v12  ;;  %v5138_v54 = vmax.f32 %v5056_v56, 0.0  ;;  %v5048_v24 = vadd.f32 %v12065_v1, %v5047_v35  ;;  %5202 = vst.msk [vmem:[#allocation3 + $0xc1] sm:$0xff] %vm5187_vm15, %v5169_v21 }
 0x76b   : > { %v5167_v14 = vmin.f32 %v5135_v18, 6.0  ;;  %v6100_v58 = vadd.f32 %v12196_v32, %v6061_v55  ;;  %v5730_v11 = vmul.f32 %v12191_v13, %v12109_v40  ;;  %v5731_v17 = vmul.f32 %v12204_v5, %v12109_v40 }
 0x76c   : > { %9006 = vmatprep.mubr.msk.bf16.mxu1 %vm5187_vm15, %v6193_v25  ;;  %v6131_v37 = vmax.f32 %v6099_v49, 0.0  ;;  %v5830_v23 = vmul.f32 %v12095_v30, %v12239_v46  ;;  %v5170_v38 = vmin.f32 %v5138_v54, 6.0  ;;  %v5136_v3 = vmax.f32 %v5048_v24, 0.0 }
 0x76d   : > { %5200 = vst.msk [vmem:[#allocation3 + $0xa9] sm:$0xff] %vm5187_vm15, %v5167_v14  ;;  %v6132_v62 = vmax.f32 %v6100_v58, 0.0  ;;  %v5831_v29 = vmul.f32 %v12095_v30, %v12242_v31  ;;  %v5762_v4 = vadd.f32 %v5730_v11, %v5662_v2  ;;  %v5763_v22 = vadd.f32 %v5731_v17, %v5663_v60  ;;  %v12292_v14 = vld [vmem:[#allocation3 + $0x78] sm:$0xff] }
 0x76e   : > { %v6163_v16 = vmin.f32 %v6131_v37, 6.0  ;;  %v5930_v47 = vmul.f32 %v12104_v53, %v12247_v28  ;;  %v5168_v27 = vmin.f32 %v5136_v3, 6.0  ;;  %5203 = vst.msk [vmem:[#allocation3 + $0xc9] sm:$0xff] %vm5187_vm15, %v5170_v38  ;;  %v5931_v36 = vmul.f32 %v12104_v53, %v12256_v0  ;;  %v12300_v58 = vld [vmem:[#allocation3 + $0x79] sm:$0xff]  ;;  %v12302_v37 = vld [vmem:[#allocation3 + $0x81] sm:$0xff] }
 0x76f   : > { %v6164_v51 = vmin.f32 %v6132_v62, 6.0  ;;  %v6030_v34 = vmul.f32 %v12130_v44, %v12258_v57  ;;  %v5862_v33 = vadd.f32 %v5830_v23, %v5762_v4  ;;  %v5863_v12 = vadd.f32 %v5831_v29, %v5763_v22  ;;  %v12308_v3 = vld [vmem:[#allocation3 + $0x7a] sm:$0xff]  ;;  %v12310_v62 = vld [vmem:[#allocation3 + $0x82] sm:$0xff] }
 0x770   : > { %v6031_v45 = vmul.f32 %v12130_v44, %v12263_v63  ;;  %v5264_v59 = vmul.f32 %v12175_v15, %v12072_v42  ;;  %5201 = vst.msk [vmem:[#allocation3 + $0xb1] sm:$0xff] %vm5187_vm15, %v5168_v27  ;;  %v5265_v18 = vmul.f32 %v12187_v61, %v12072_v42  ;;  %v5332_v56 = vmul.f32 %v12180_v43, %v12075_v26 }
 0x771   : > { %v6194_v21 = vpack.c.bf16 %v6164_v51, %v6163_v16  ;;  %v5333_v55 = vmul.f32 %v12189_v48, %v12075_v26  ;;  %v5962_v35 = vadd.f32 %v5930_v47, %v5862_v33  ;;  %v5963_v25 = vadd.f32 %v5931_v36, %v5863_v12  ;;  %v12294_v48 = vld [vmem:[#allocation3 + $0x80] sm:$0xff] }
 0x772   : > { %v5432_v49 = vmul.f32 %v12191_v13, %v12080_v20  ;;  %v5433_v15 = vmul.f32 %v12204_v5, %v12080_v20  ;;  %v5364_v2 = vadd.f32 %v5332_v56, %v5264_v59  ;;  %v5532_v61 = vmul.f32 %v12239_v46, %v12098_v7 }
 0x773   : > { %9007 = vmatmul.mubr.msk.bf16.vlgmr.msra.gmra.mxu1 %vm5187_vm15, %v6194_v21  ;;  %v5365_v60 = vadd.f32 %v5333_v55, %v5265_v18  ;;  %v5533_v43 = vmul.f32 %v12242_v31, %v12098_v7  ;;  %v6062_v54 = vadd.f32 %v6030_v34, %v5962_v35  ;;  %v6063_v24 = vadd.f32 %v6031_v45, %v5963_v25 }
 0x774   : > { %v5632_v13 = vmul.f32 %v12247_v28, %v12101_v52  ;;  %v5633_v5 = vmul.f32 %v12256_v0, %v12101_v52  ;;  %v5464_v11 = vadd.f32 %v5432_v49, %v5364_v2  ;;  %v5732_v23 = vmul.f32 %v12258_v57, %v12109_v40 }
 0x775   : > { %v5465_v17 = vadd.f32 %v5433_v15, %v5365_v60  ;;  %v5733_v38 = vmul.f32 %v12263_v63, %v12109_v40  ;;  %v6101_v29 = vadd.f32 %v12196_v32, %v6062_v54  ;;  %v6102_v16 = vadd.f32 %v12196_v32, %v6063_v24 }
 0x776   : > { %v5832_v4 = vmul.f32 %v12095_v30, %v12292_v14  ;;  %v5833_v22 = vmul.f32 %v12095_v30, %v12294_v48  ;;  %v5564_v47 = vadd.f32 %v5532_v61, %v5464_v11  ;;  %v5932_v51 = vmul.f32 %v12104_v53, %v12300_v58 }
 0x777   : > { %v5565_v27 = vadd.f32 %v5533_v43, %v5465_v17  ;;  %v5933_v36 = vmul.f32 %v12104_v53, %v12302_v37  ;;  %v6133_v34 = vmax.f32 %v6101_v29, 0.0  ;;  %v6134_v33 = vmax.f32 %v6102_v16, 0.0 }
 0x778   : > { %v6032_v12 = vmul.f32 %v12130_v44, %v12308_v3  ;;  %v6033_v45 = vmul.f32 %v12130_v44, %v12310_v62  ;;  %v5664_v59 = vadd.f32 %v5632_v13, %v5564_v47  ;;  %v5266_v18 = vmul.f32 %v12239_v46, %v12072_v42 }
 0x779   : > { %v5665_v21 = vadd.f32 %v5633_v5, %v5565_v27  ;;  %v5267_v56 = vmul.f32 %v12242_v31, %v12072_v42  ;;  %v6165_v55 = vmin.f32 %v6133_v34, 6.0  ;;  %v6166_v35 = vmin.f32 %v6134_v33, 6.0 }
 0x77a   : > { %v5334_v25 = vmul.f32 %v12247_v28, %v12075_v26  ;;  %v5335_v49 = vmul.f32 %v12256_v0, %v12075_v26  ;;  %v5764_v15 = vadd.f32 %v5732_v23, %v5664_v59  ;;  %v5434_v60 = vmul.f32 %v12258_v57, %v12080_v20 }
 0x77b   : > { %v5765_v2 = vadd.f32 %v5733_v38, %v5665_v21  ;;  %v5435_v61 = vmul.f32 %v12263_v63, %v12080_v20  ;;  %v8986_v46 = vpop.f32.mrf.mxu0  ;;  %v6195_v43 = vpack.c.bf16 %v6166_v35, %v6165_v55  ;;  %v5534_v24 = vmul.f32 %v12292_v14, %v12098_v7  ;;  %v12356_v35 = vld [vmem:[#allocation3 + $0x98] sm:$0xff] }
 0x77c   : > { %v5366_v54 = vadd.f32 %v5334_v25, %v5266_v18  ;;  %v5367_v31 = vadd.f32 %v5335_v49, %v5267_v56  ;;  %v5069_v28 = vadd.f32 %v8986_v46, %v12065_v1  ;;  %v5864_v13 = vadd.f32 %v5832_v4, %v5764_v15 }
 0x77d   : > { %v5865_v5 = vadd.f32 %v5833_v22, %v5765_v2  ;;  %v5535_v0 = vmul.f32 %v12294_v48, %v12098_v7  ;;  %v5060_v11 = vpop.f32.mrf.mxu0  ;;  %9010 = vmatprep.mubr.msk.bf16.mxu1 %vm5187_vm15, %v6195_v43  ;;  %v5634_v63 = vmul.f32 %v12300_v58, %v12101_v52  ;;  %v5635_v23 = vmul.f32 %v12302_v37, %v12101_v52  ;;  %v12349_v22 = vld [vmem:[#allocation3 + $0x90] sm:$0xff] }
 0x77e   : > { %v5466_v57 = vadd.f32 %v5434_v60, %v5366_v54  ;;  %v5467_v17 = vadd.f32 %v5435_v61, %v5367_v31  ;;  %v5141_v38 = vmax.f32 %v5069_v28, 0.0  ;;  %v5061_v29 = vadd.f32 %v12065_v1, %v5060_v11  ;;  %v12360_v2 = vld [vmem:[#allocation3 + $0x91] sm:$0xff] }
 0x77f   : > { %v5964_v16 = vadd.f32 %v5932_v51, %v5864_v13  ;;  %v5965_v4 = vadd.f32 %v5933_v36, %v5865_v5  ;;  %v8987_v47 = vpop.f32.mrf.mxu0  ;;  %v5734_v33 = vmul.f32 %v12308_v3, %v12109_v40  ;;  %v5735_v59 = vmul.f32 %v12310_v62, %v12109_v40  ;;  %v12370_v28 = vld [vmem:[#allocation3 + $0x92] sm:$0xff]  ;;  %v12372_v13 = vld [vmem:[#allocation3 + $0x9a] sm:$0xff] }
 0x780   : > { %v5566_v27 = vadd.f32 %v5534_v24, %v5466_v57  ;;  %v5567_v34 = vadd.f32 %v5535_v0, %v5467_v17  ;;  %v5173_v21 = vmin.f32 %v5141_v38, 6.0  ;;  %v5139_v18 = vmax.f32 %v5061_v29, 0.0 }
 0x781   : > { %v5072_v56 = vadd.f32 %v8987_v47, %v12065_v1  ;;  %v6064_v55 = vadd.f32 %v6032_v12, %v5964_v16  ;;  %v5063_v51 = vpop.f32.mrf.mxu0  ;;  %v6065_v36 = vadd.f32 %v6033_v45, %v5965_v4  ;;  %v5834_v15 = vmul.f32 %v12095_v30, %v12349_v22  ;;  %v12365_v12 = vld [vmem:[#allocation3 + $0x99] sm:$0xff] }
 0x782   : > { %v5666_v25 = vadd.f32 %v5634_v63, %v5566_v27  ;;  %v5667_v49 = vadd.f32 %v5635_v23, %v5567_v34  ;;  %v5171_v60 = vmin.f32 %v5139_v18, 6.0  ;;  %v5064_v46 = vadd.f32 %v12065_v1, %v5063_v51  ;;  %5206 = vst.msk [vmem:[#allocation3 + $0xf1] sm:$0xff] %vm5187_vm15, %v5173_v21 }
 0x783   : > { %v5142_v61 = vmax.f32 %v5072_v56, 0.0  ;;  %v6103_v43 = vadd.f32 %v12196_v32, %v6064_v55  ;;  %v6104_v54 = vadd.f32 %v12196_v32, %v6065_v36  ;;  %v5835_v24 = vmul.f32 %v12095_v30, %v12356_v35 }
 0x784   : > { %v5766_v45 = vadd.f32 %v5734_v33, %v5666_v25  ;;  %v5767_v31 = vadd.f32 %v5735_v59, %v5667_v49  ;;  %v5140_v0 = vmax.f32 %v5064_v46, 0.0  ;;  %5204 = vst.msk [vmem:[#allocation3 + $0xd9] sm:$0xff] %vm5187_vm15, %v5171_v60  ;;  %v5934_v57 = vmul.f32 %v12104_v53, %v12360_v2  ;;  %v12401_v60 = vld [vmem:[#allocation3 + $0xa8] sm:$0xff] }
 0x785   : > { %v5174_v5 = vmin.f32 %v5142_v61, 6.0  ;;  %v6135_v11 = vmax.f32 %v6103_v43, 0.0  ;;  %v6136_v17 = vmax.f32 %v6104_v54, 0.0  ;;  %v5935_v38 = vmul.f32 %v12104_v53, %v12365_v12  ;;  %v12412_v43 = vld [vmem:[#allocation3 + $0xa9] sm:$0xff]  ;;  %v12414_v54 = vld [vmem:[#allocation3 + $0xb1] sm:$0xff] }
 0x786   : > { %v5866_v63 = vadd.f32 %v5834_v15, %v5766_v45  ;;  %v5867_v23 = vadd.f32 %v5835_v24, %v5767_v31  ;;  %v5172_v29 = vmin.f32 %v5140_v0, 6.0  ;;  %v6034_v4 = vmul.f32 %v12130_v44, %v12370_v28  ;;  %v12420_v0 = vld [vmem:[#allocation3 + $0xaa] sm:$0xff] }
 0x787   : > { %5207 = vst.msk [vmem:[#allocation3 + $0xf9] sm:$0xff] %vm5187_vm15, %v5174_v5  ;;  %v6167_v16 = vmin.f32 %v6135_v11, 6.0  ;;  %v6035_v47 = vmul.f32 %v12130_v44, %v12372_v13  ;;  %v6168_v27 = vmin.f32 %v6136_v17, 6.0  ;;  %v5268_v59 = vmul.f32 %v12292_v14, %v12072_v42  ;;  %v12422_v11 = vld [vmem:[#allocation3 + $0xb2] sm:$0xff] }
 0x788   : > { %v5966_v34 = vadd.f32 %v5934_v57, %v5866_v63  ;;  %v5967_v33 = vadd.f32 %v5935_v38, %v5867_v23  ;;  %5205 = vst.msk [vmem:[#allocation3 + $0xe1] sm:$0xff] %vm5187_vm15, %v5172_v29  ;;  %v5269_v21 = vmul.f32 %v12294_v48, %v12072_v42  ;;  %v5336_v18 = vmul.f32 %v12300_v58, %v12075_v26 }
 0x789   : > { %v5337_v56 = vmul.f32 %v12302_v37, %v12075_v26  ;;  %v5436_v55 = vmul.f32 %v12308_v3, %v12080_v20  ;;  %v6196_v51 = vpack.c.bf16 %v6168_v27, %v6167_v16  ;;  %v5437_v14 = vmul.f32 %v12310_v62, %v12080_v20  ;;  %v12403_v37 = vld [vmem:[#allocation3 + $0xb0] sm:$0xff] }
 0x78a   : > { %v6066_v36 = vadd.f32 %v6034_v4, %v5966_v34  ;;  %v6067_v25 = vadd.f32 %v6035_v47, %v5967_v33  ;;  %v5368_v49 = vadd.f32 %v5336_v18, %v5268_v59  ;;  %v5536_v48 = vmul.f32 %v12349_v22, %v12098_v7 }
 0x78b   : > { %v5369_v15 = vadd.f32 %v5337_v56, %v5269_v21  ;;  %v5537_v58 = vmul.f32 %v12356_v35, %v12098_v7  ;;  %9011 = vmatmul.mubr.msk.bf16.gmra.mxu1 %vm5187_vm15, %v6196_v51  ;;  %v5636_v62 = vmul.f32 %v12360_v2, %v12101_v52  ;;  %v5637_v46 = vmul.f32 %v12365_v12, %v12101_v52 }
 0x78c   : > { %v6105_v3 = vadd.f32 %v12196_v32, %v6066_v36  ;;  %v6106_v61 = vadd.f32 %v12196_v32, %v6067_v25  ;;  %v5468_v45 = vadd.f32 %v5436_v55, %v5368_v49  ;;  %v5736_v24 = vmul.f32 %v12370_v28, %v12109_v40 }
 0x78d   : > { %v5469_v31 = vadd.f32 %v5437_v14, %v5369_v15  ;;  %v5737_v5 = vmul.f32 %v12372_v13, %v12109_v40  ;;  %v5836_v63 = vmul.f32 %v12095_v30, %v12401_v60  ;;  %v5837_v23 = vmul.f32 %v12095_v30, %v12403_v37 }
 0x78e   : > { %v6137_v57 = vmax.f32 %v6105_v3, 0.0  ;;  %v6138_v17 = vmax.f32 %v6106_v61, 0.0  ;;  %v5568_v38 = vadd.f32 %v5536_v48, %v5468_v45  ;;  %v5936_v16 = vmul.f32 %v12104_v53, %v12412_v43 }
 0x78f   : > { %v5569_v29 = vadd.f32 %v5537_v58, %v5469_v31  ;;  %v5937_v4 = vmul.f32 %v12104_v53, %v12414_v54  ;;  %v6036_v34 = vmul.f32 %v12130_v44, %v12420_v0  ;;  %v6037_v33 = vmul.f32 %v12130_v44, %v12422_v11 }
 0x790   : > { %v6169_v47 = vmin.f32 %v6137_v57, 6.0  ;;  %v6170_v27 = vmin.f32 %v6138_v17, 6.0  ;;  %v8990_v59 = vpop.f32.mrf.mxu0  ;;  %v5668_v21 = vadd.f32 %v5636_v62, %v5568_v38  ;;  %v5270_v56 = vmul.f32 %v12349_v22, %v12072_v42 }
 0x791   : > { %v5669_v18 = vadd.f32 %v5637_v46, %v5569_v29  ;;  %v5271_v55 = vmul.f32 %v12356_v35, %v12072_v42  ;;  %v5085_v51 = vadd.f32 %v8990_v59, %v12065_v1  ;;  %v5338_v25 = vmul.f32 %v12360_v2, %v12075_v26 }
 0x792   : > { %v6197_v36 = vpack.c.bf16 %v6170_v27, %v6169_v47  ;;  %v5339_v14 = vmul.f32 %v12365_v12, %v12075_v26  ;;  %v5076_v49 = vpop.f32.mrf.mxu0  ;;  %v5768_v15 = vadd.f32 %v5736_v24, %v5668_v21  ;;  %v5438_v58 = vmul.f32 %v12370_v28, %v12080_v20 }
 0x793   : > { %v5769_v48 = vadd.f32 %v5737_v5, %v5669_v18  ;;  %v5439_v22 = vmul.f32 %v12372_v13, %v12080_v20  ;;  %v5145_v3 = vmax.f32 %v5085_v51, 0.0  ;;  %v5077_v35 = vadd.f32 %v12065_v1, %v5076_v49  ;;  %v12462_v51 = vld [vmem:[#allocation3 + $0xc0] sm:$0xff] }
 0x794   : > { %9014 = vmatprep.mubr.msk.bf16.mxu1 %vm5187_vm15, %v6197_v36  ;;  %v5370_v61 = vadd.f32 %v5338_v25, %v5270_v56  ;;  %v5371_v62 = vadd.f32 %v5339_v14, %v5271_v55  ;;  %v8991_v2 = vpop.f32.mrf.mxu0  ;;  %v5868_v46 = vadd.f32 %v5836_v63, %v5768_v15  ;;  %v5538_v12 = vmul.f32 %v12401_v60, %v12098_v7  ;;  %v12469_v49 = vld [vmem:[#allocation3 + $0xc1] sm:$0xff] }
 0x795   : > { %v5869_v45 = vadd.f32 %v5837_v23, %v5769_v48  ;;  %v5539_v31 = vmul.f32 %v12403_v37, %v12098_v7  ;;  %v5177_v28 = vmin.f32 %v5145_v3, 6.0  ;;  %v5143_v24 = vmax.f32 %v5077_v35, 0.0  ;;  %v12479_v3 = vld [vmem:[#allocation3 + $0xca] sm:$0xff] }
 0x796   : > { %v5088_v13 = vadd.f32 %v8991_v2, %v12065_v1  ;;  %v5470_v5 = vadd.f32 %v5438_v58, %v5370_v61  ;;  %v5079_v57 = vpop.f32.mrf.mxu0  ;;  %v5968_v17 = vadd.f32 %v5936_v16, %v5868_v46  ;;  %v5471_v29 = vadd.f32 %v5439_v22, %v5371_v62  ;;  %v12464_v16 = vld [vmem:[#allocation3 + $0xc8] sm:$0xff] }
 0x797   : > { %v5969_v38 = vadd.f32 %v5937_v4, %v5869_v45  ;;  %v5638_v47 = vmul.f32 %v12412_v43, %v12101_v52  ;;  %v5175_v63 = vmin.f32 %v5143_v24, 6.0  ;;  %5210 = vst.msk [vmem:[#allocation3 + $0x121] sm:$0xff] %vm5187_vm15, %v5177_v28  ;;  %v5080_v27 = vadd.f32 %v12065_v1, %v5079_v57  ;;  %v12475_v58 = vld [vmem:[#allocation3 + $0xc9] sm:$0xff] }
 0x798   : > { %v5146_v23 = vmax.f32 %v5088_v13, 0.0  ;;  %v5570_v59 = vadd.f32 %v5538_v12, %v5470_v5  ;;  %v6068_v21 = vadd.f32 %v6036_v34, %v5968_v17  ;;  %v5571_v56 = vadd.f32 %v5539_v31, %v5471_v29  ;;  %v12477_v22 = vld [vmem:[#allocation3 + $0xc2] sm:$0xff] }
 0x799   : > { %v6069_v18 = vadd.f32 %v6037_v33, %v5969_v38  ;;  %v5639_v55 = vmul.f32 %v12414_v54, %v12101_v52  ;;  %5208 = vst.msk [vmem:[#allocation3 + $0x109] sm:$0xff] %vm5187_vm15, %v5175_v63  ;;  %v5144_v36 = vmax.f32 %v5080_v27, 0.0  ;;  %v5738_v14 = vmul.f32 %v12420_v0, %v12109_v40 }
 0x79a   : > { %v5178_v4 = vmin.f32 %v5146_v23, 6.0  ;;  %v5670_v25 = vadd.f32 %v5638_v47, %v5570_v59  ;;  %v6107_v34 = vadd.f32 %v12196_v32, %v6068_v21  ;;  %v5739_v48 = vmul.f32 %v12422_v11, %v12109_v40 }
 0x79b   : > { %v6108_v33 = vadd.f32 %v12196_v32, %v6069_v18  ;;  %v5671_v15 = vadd.f32 %v5639_v55, %v5571_v56  ;;  %v5176_v35 = vmin.f32 %v5144_v36, 6.0  ;;  %v5838_v62 = vmul.f32 %v12095_v30, %v12462_v51  ;;  %v12509_v36 = vld [vmem:[#allocation3 + $0xd8] sm:$0xff] }
 0x79c   : > { %5211 = vst.msk [vmem:[#allocation3 + $0x129] sm:$0xff] %vm5187_vm15, %v5178_v4  ;;  %v5770_v61 = vadd.f32 %v5738_v14, %v5670_v25  ;;  %v5839_v2 = vmul.f32 %v12095_v30, %v12464_v16  ;;  %v6139_v46 = vmax.f32 %v6107_v34, 0.0  ;;  %v5938_v31 = vmul.f32 %v12104_v53, %v12469_v49  ;;  %v12520_v14 = vld [vmem:[#allocation3 + $0xd9] sm:$0xff] }
 0x79d   : > { %v6140_v45 = vmax.f32 %v6108_v33, 0.0  ;;  %v5771_v12 = vadd.f32 %v5739_v48, %v5671_v15  ;;  %5209 = vst.msk [vmem:[#allocation3 + $0x111] sm:$0xff] %vm5187_vm15, %v5176_v35  ;;  %v5939_v24 = vmul.f32 %v12104_v53, %v12475_v58  ;;  %v6038_v13 = vmul.f32 %v12130_v44, %v12477_v22  ;;  %v12525_v35 = vld [vmem:[#allocation3 + $0xe1] sm:$0xff] }
 0x79e   : > { %v5870_v28 = vadd.f32 %v5838_v62, %v5770_v61  ;;  %v6039_v5 = vmul.f32 %v12130_v44, %v12479_v3  ;;  %v6171_v57 = vmin.f32 %v6139_v46, 6.0  ;;  %v5272_v29 = vmul.f32 %v12401_v60, %v12072_v42  ;;  %v12527_v61 = vld [vmem:[#allocation3 + $0xda] sm:$0xff] }
 0x79f   : > { %v6172_v17 = vmin.f32 %v6140_v45, 6.0  ;;  %v5871_v38 = vadd.f32 %v5839_v2, %v5771_v12  ;;  %v5273_v63 = vmul.f32 %v12403_v37, %v12072_v42  ;;  %v5340_v23 = vmul.f32 %v12412_v43, %v12075_v26  ;;  %v12511_v43 = vld [vmem:[#allocation3 + $0xe0] sm:$0xff] }
 0x7a0   : > { %v5970_v47 = vadd.f32 %v5938_v31, %v5870_v28  ;;  %v5341_v27 = vmul.f32 %v12414_v54, %v12075_v26  ;;  %v5440_v18 = vmul.f32 %v12420_v0, %v12080_v20  ;;  %v5441_v56 = vmul.f32 %v12422_v11, %v12080_v20  ;;  %v12536_v12 = vld [vmem:[#allocation3 + $0xe2] sm:$0xff] }
 0x7a1   : > { %v6198_v59 = vpack.c.bf16 %v6172_v17, %v6171_v57  ;;  %v5971_v21 = vadd.f32 %v5939_v24, %v5871_v38  ;;  %v5372_v60 = vadd.f32 %v5340_v23, %v5272_v29  ;;  %v5540_v37 = vmul.f32 %v12462_v51, %v12098_v7 }
 0x7a2   : > { %v6070_v55 = vadd.f32 %v6038_v13, %v5970_v47  ;;  %v5373_v4 = vadd.f32 %v5341_v27, %v5273_v63  ;;  %v5541_v25 = vmul.f32 %v12464_v16, %v12098_v7  ;;  %v5640_v0 = vmul.f32 %v12469_v49, %v12101_v52 }
 0x7a3   : > { %9015 = vmatmul.mubr.msk.bf16.gmra.mxu1 %vm5187_vm15, %v6198_v59  ;;  %v6071_v54 = vadd.f32 %v6039_v5, %v5971_v21  ;;  %v5641_v11 = vmul.f32 %v12475_v58, %v12101_v52  ;;  %v5472_v33 = vadd.f32 %v5440_v18, %v5372_v60  ;;  %v5740_v48 = vmul.f32 %v12477_v22, %v12109_v40  ;;  %v12550_v18 = vld [vmem:[%s13966_s16] ss:$0 sm:$0xff] }
 0x7a4   : > { %v6109_v34 = vadd.f32 %v12196_v32, %v6070_v55  ;;  %v5473_v15 = vadd.f32 %v5441_v56, %v5373_v4  ;;  %v5741_v2 = vmul.f32 %v12479_v3, %v12109_v40  ;;  %v5840_v46 = vmul.f32 %v12095_v30, %v12509_v36 }
 0x7a5   : > { %v6110_v62 = vadd.f32 %v12196_v32, %v6071_v54  ;;  %v5841_v45 = vmul.f32 %v12095_v30, %v12511_v43  ;;  %v5572_v24 = vadd.f32 %v5540_v37, %v5472_v33  ;;  %v5940_v5 = vmul.f32 %v12104_v53, %v12520_v14 }
 0x7a6   : > { %v8994_v31 = vpop.f32.mrf.mxu0  ;;  %v6141_v28 = vmax.f32 %v6109_v34, 0.0  ;;  %v5573_v13 = vadd.f32 %v5541_v25, %v5473_v15  ;;  %v5941_v38 = vmul.f32 %v12104_v53, %v12525_v35  ;;  %v6040_v29 = vmul.f32 %v12130_v44, %v12527_v61 }
 0x7a7   : > { %v5101_v57 = vadd.f32 %v8994_v31, %v12065_v1  ;;  %v6142_v17 = vmax.f32 %v6110_v62, 0.0  ;;  %v5672_v23 = vadd.f32 %v5640_v0, %v5572_v24  ;;  %v6041_v59 = vmul.f32 %v12130_v44, %v12536_v12 }
 0x7a8   : > { %v5092_v47 = vpop.f32.mrf.mxu0  ;;  %v6173_v63 = vmin.f32 %v6141_v28, 6.0  ;;  %v5673_v27 = vadd.f32 %v5641_v11, %v5573_v13  ;;  %v5274_v55 = vmul.f32 %v12462_v51, %v12072_v42  ;;  %v5275_v54 = vmul.f32 %v12464_v16, %v12072_v42 }
 0x7a9   : > { %v5149_v21 = vmax.f32 %v5101_v57, 0.0  ;;  %v5093_v1 = vadd.f32 %v12550_v18, %v5092_v47  ;;  %v6174_v56 = vmin.f32 %v6142_v17, 6.0  ;;  %v5772_v4 = vadd.f32 %v5740_v48, %v5672_v23 }
 0x7aa   : > { %v8995_v60 = vpop.f32.mrf.mxu0  ;;  %v5773_v37 = vadd.f32 %v5741_v2, %v5673_v27  ;;  %v5342_v25 = vmul.f32 %v12469_v49, %v12075_v26  ;;  %v5343_v51 = vmul.f32 %v12475_v58, %v12075_v26  ;;  %v5442_v49 = vmul.f32 %v12477_v22, %v12080_v20 }
 0x7ab   : > { %v5181_v0 = vmin.f32 %v5149_v21, 6.0  ;;  %v5147_v11 = vmax.f32 %v5093_v1, 0.0  ;;  %v5104_v34 = vadd.f32 %v12550_v18, %v8995_v60  ;;  %v6199_v33 = vpack.c.bf16 %v6174_v56, %v6173_v63  ;;  %v12581_v56 = vld [vmem:[#allocation3 + $0xf8] sm:$0xff] }
 0x7ac   : > { %v5095_v15 = vpop.f32.mrf.mxu0  ;;  %v5872_v62 = vadd.f32 %v5840_v46, %v5772_v4  ;;  %v5873_v31 = vadd.f32 %v5841_v45, %v5773_v37  ;;  %v5374_v28 = vadd.f32 %v5342_v25, %v5274_v55  ;;  %v5375_v57 = vadd.f32 %v5343_v51, %v5275_v54  ;;  %v12587_v4 = vld [vmem:[#allocation3 + $0xf1] sm:$0xff]  ;;  %v12589_v37 = vld [vmem:[#allocation3 + $0xf9] sm:$0xff] }
 0x7ad   : > { %5214 = vst.msk [vmem:[#allocation3 + $0x151] sm:$0xff] %vm5187_vm15, %v5181_v0  ;;  %v5179_v48 = vmin.f32 %v5147_v11, 6.0  ;;  %v5150_v2 = vmax.f32 %v5104_v34, 0.0  ;;  %v5096_v16 = vadd.f32 %v12550_v18, %v5095_v15  ;;  %9018 = vmatprep.mubr.msk.bf16.mxu1 %vm5187_vm15, %v6199_v33  ;;  %v5443_v46 = vmul.f32 %v12479_v3, %v12080_v20  ;;  %v12591_v54 = vld [vmem:[#allocation3 + $0xf2] sm:$0xff] }
 0x7ae   : > { %v5972_v24 = vadd.f32 %v5940_v5, %v5872_v62  ;;  %v5973_v13 = vadd.f32 %v5941_v38, %v5873_v31  ;;  %v5474_v17 = vadd.f32 %v5442_v49, %v5374_v28  ;;  %v5542_v47 = vmul.f32 %v12509_v36, %v12098_v7  ;;  %v12574_v5 = vld [vmem:[#allocation3 + $0xf0] sm:$0xff] }
 0x7af   : > { %5212 = vst.msk [vmem:[#allocation3 + $0x139] sm:$0xff] %vm5187_vm15, %v5179_v48  ;;  %v5182_v58 = vmin.f32 %v5150_v2, 6.0  ;;  %v5148_v45 = vmax.f32 %v5096_v16, 0.0  ;;  %v5475_v27 = vadd.f32 %v5443_v46, %v5375_v57  ;;  %v5543_v22 = vmul.f32 %v12511_v43, %v12098_v7  ;;  %v12604_v48 = vld [vmem:[#allocation3 + $0xfa] sm:$0xff] }
 0x7b0   : > { %v6072_v63 = vadd.f32 %v6040_v29, %v5972_v24  ;;  %v6073_v23 = vadd.f32 %v6041_v59, %v5973_v13  ;;  %v5574_v3 = vadd.f32 %v5542_v47, %v5474_v17  ;;  %v5642_v21 = vmul.f32 %v12520_v14, %v12101_v52 }
 0x7b1   : > { %5215 = vst.msk [vmem:[#allocation3 + $0x159] sm:$0xff] %vm5187_vm15, %v5182_v58  ;;  %v5180_v38 = vmin.f32 %v5148_v45, 6.0  ;;  %v5643_v1 = vmul.f32 %v12525_v35, %v12101_v52  ;;  %v5575_v55 = vadd.f32 %v5543_v22, %v5475_v27  ;;  %v5742_v60 = vmul.f32 %v12527_v61, %v12109_v40 }
 0x7b2   : > { %v6111_v29 = vadd.f32 %v12196_v32, %v6072_v63  ;;  %v6112_v59 = vadd.f32 %v12196_v32, %v6073_v23  ;;  %v5674_v25 = vadd.f32 %v5642_v21, %v5574_v3  ;;  %v5743_v0 = vmul.f32 %v12536_v12, %v12109_v40 }
 0x7b3   : > { %5213 = vst.msk [vmem:[#allocation3 + $0x141] sm:$0xff] %vm5187_vm15, %v5180_v38  ;;  %v5842_v11 = vmul.f32 %v12095_v30, %v12574_v5  ;;  %v5675_v15 = vadd.f32 %v5643_v1, %v5575_v55  ;;  %v5843_v62 = vmul.f32 %v12095_v30, %v12581_v56  ;;  %v5942_v51 = vmul.f32 %v12104_v53, %v12587_v4  ;;  %v12635_v55 = vld [vmem:[#allocation3 + $0x108] sm:$0xff] }
 0x7b4   : > { %v6143_v34 = vmax.f32 %v6111_v29, 0.0  ;;  %v6144_v33 = vmax.f32 %v6112_v59, 0.0  ;;  %v5774_v31 = vadd.f32 %v5742_v60, %v5674_v25  ;;  %v5943_v28 = vmul.f32 %v12104_v53, %v12589_v37 }
 0x7b5   : > { %v6042_v2 = vmul.f32 %v12130_v44, %v12591_v54  ;;  %v5775_v24 = vadd.f32 %v5743_v0, %v5675_v15  ;;  %v5276_v13 = vmul.f32 %v12509_v36, %v12072_v42  ;;  %v5277_v46 = vmul.f32 %v12511_v43, %v12072_v42  ;;  %v12619_v44 = vld [vmem:[%s13964_s14 + $0x8] ss:$0 sm:$0xff] }
 0x7b6   : > { %v6175_v16 = vmin.f32 %v6143_v34, 6.0  ;;  %v6176_v49 = vmin.f32 %v6144_v33, 6.0  ;;  %v5874_v57 = vadd.f32 %v5842_v11, %v5774_v31  ;;  %v5344_v58 = vmul.f32 %v12520_v14, %v12075_v26 }
 0x7b7   : > { %v5345_v45 = vmul.f32 %v12525_v35, %v12075_v26  ;;  %v5875_v47 = vadd.f32 %v5843_v62, %v5775_v24  ;;  %v6043_v36 = vmul.f32 %v12619_v44, %v12604_v48  ;;  %v5444_v63 = vmul.f32 %v12527_v61, %v12080_v20 }
 0x7b8   : > { %v6200_v17 = vpack.c.bf16 %v6176_v49, %v6175_v16  ;;  %v5974_v43 = vadd.f32 %v5942_v51, %v5874_v57  ;;  %v5376_v23 = vadd.f32 %v5344_v58, %v5276_v13  ;;  %v5445_v14 = vmul.f32 %v12536_v12, %v12080_v20  ;;  %v12637_v12 = vld [vmem:[#allocation3 + $0x110] sm:$0xff] }
 0x7b9   : > { %v5377_v27 = vadd.f32 %v5345_v45, %v5277_v46  ;;  %v8998_v35 = vpop.f32.mrf.mxu0  ;;  %v5975_v22 = vadd.f32 %v5943_v28, %v5875_v47  ;;  %v5544_v38 = vmul.f32 %v12574_v5, %v12098_v7  ;;  %v5545_v3 = vmul.f32 %v12581_v56, %v12098_v7  ;;  %v12647_v51 = vld [vmem:[#allocation3 + $0x109] sm:$0xff]  ;;  %v12654_v13 = vld [vmem:[#allocation3 + $0x111] sm:$0xff] }
 0x7ba   : > { %9019 = vmatmul.mubr.msk.bf16.gmra.mxu1 %vm5187_vm15, %v6200_v17  ;;  %v5644_v21 = vmul.f32 %v12587_v4, %v12101_v52  ;;  %v5117_v61 = vadd.f32 %v12550_v18, %v8998_v35  ;;  %v6074_v1 = vadd.f32 %v6042_v2, %v5974_v43  ;;  %v5476_v29 = vadd.f32 %v5444_v63, %v5376_v23  ;;  %v12659_v43 = vld [vmem:[#allocation3 + $0x10a] sm:$0xff] }
 0x7bb   : > { %v5477_v59 = vadd.f32 %v5445_v14, %v5377_v27  ;;  %v5108_v60 = vpop.f32.mrf.mxu0  ;;  %v6075_v25 = vadd.f32 %v6043_v36, %v5975_v22  ;;  %v5645_v0 = vmul.f32 %v12589_v37, %v12101_v52  ;;  %v5744_v11 = vmul.f32 %v12591_v54, %v12109_v40 }
 0x7bc   : > { %v5745_v34 = vmul.f32 %v12604_v48, %v12109_v40  ;;  %v5153_v33 = vmax.f32 %v5117_v61, 0.0  ;;  %v5109_v15 = vadd.f32 %v12550_v18, %v5108_v60  ;;  %v6113_v62 = vadd.f32 %v12196_v32, %v6074_v1 }
 0x7bd   : > { %v5576_v31 = vadd.f32 %v5544_v38, %v5476_v29  ;;  %v8999_v28 = vpop.f32.mrf.mxu0  ;;  %v6114_v2 = vadd.f32 %v12196_v32, %v6075_v25  ;;  %v5577_v16 = vadd.f32 %v5545_v3, %v5477_v59  ;;  %v5844_v49 = vmul.f32 %v12095_v30, %v12635_v55  ;;  %v12666_v29 = vld [vmem:[#allocation3 + $0x112] sm:$0xff] }
 0x7be   : > { %v5845_v24 = vmul.f32 %v12095_v30, %v12637_v12  ;;  %v5185_v57 = vmin.f32 %v5153_v33, 6.0  ;;  %v5151_v46 = vmax.f32 %v5109_v15, 0.0  ;;  %v5120_v58 = vadd.f32 %v12550_v18, %v8999_v28 }
 0x7bf   : > { %v6145_v45 = vmax.f32 %v6113_v62, 0.0  ;;  %v5111_v17 = vpop.f32.mrf.mxu0  ;;  %v6146_v47 = vmax.f32 %v6114_v2, 0.0  ;;  %v5676_v36 = vadd.f32 %v5644_v21, %v5576_v31  ;;  %v5677_v63 = vadd.f32 %v5645_v0, %v5577_v16  ;;  %v12691_v16 = vld [vmem:[#allocation3 + $0x120] sm:$0xff] }
 0x7c0   : > { %v5944_v32 = vmul.f32 %v12104_v53, %v12647_v51  ;;  %5218 = vst.msk [vmem:[#allocation3 + $0x181] sm:$0xff] %vm5187_vm15, %v5185_v57  ;;  %v5183_v23 = vmin.f32 %v5151_v46, 6.0  ;;  %v5154_v27 = vmax.f32 %v5120_v58, 0.0  ;;  %v5112_v14 = vadd.f32 %v12550_v18, %v5111_v17  ;;  %v12699_v58 = vld [vmem:[#allocation3 + $0x121] sm:$0xff] }
 0x7c1   : > { %v5945_v35 = vmul.f32 %v12104_v53, %v12654_v13  ;;  %v6177_v22 = vmin.f32 %v6145_v45, 6.0  ;;  %v6178_v38 = vmin.f32 %v6146_v47, 6.0  ;;  %v5776_v3 = vadd.f32 %v5744_v11, %v5676_v36  ;;  %v12701_v45 = vld [vmem:[#allocation3 + $0x129] sm:$0xff] }
 0x7c2   : > { %v5777_v61 = vadd.f32 %v5745_v34, %v5677_v63  ;;  %5216 = vst.msk [vmem:[#allocation3 + $0x169] sm:$0xff] %vm5187_vm15, %v5183_v23  ;;  %v5186_v21 = vmin.f32 %v5154_v27, 6.0  ;;  %v5152_v1 = vmax.f32 %v5112_v14, 0.0  ;;  %v6044_v59 = vmul.f32 %v12619_v44, %v12659_v43  ;;  %v12712_v23 = vld [vmem:[%s13967_s17] ss:$0 sm:$0xff] }
 0x7c3   : > { %v5278_v60 = vmul.f32 %v12574_v5, %v12072_v42  ;;  %v6201_v18 = vpack.c.bf16 %v6178_v38, %v6177_v22  ;;  %v5876_v25 = vadd.f32 %v5844_v49, %v5776_v3  ;;  %v5279_v33 = vmul.f32 %v12581_v56, %v12072_v42  ;;  %v12693_v49 = vld [vmem:[#allocation3 + $0x128] sm:$0xff] }
 0x7c4   : > { %v5877_v0 = vadd.f32 %v5845_v24, %v5777_v61  ;;  %5219 = vst.msk [vmem:[#allocation3 + $0x189] sm:$0xff] %vm5187_vm15, %v5186_v21  ;;  %v5184_v11 = vmin.f32 %v5152_v1, 6.0  ;;  %v5346_v34 = vmul.f32 %v12587_v4, %v12075_v26  ;;  %v5347_v15 = vmul.f32 %v12589_v37, %v12075_v26 }
 0x7c5   : > { %v5446_v62 = vmul.f32 %v12591_v54, %v12080_v20  ;;  %9022 = vmatprep.mubr.msk.bf16.mxu1 %vm5187_vm15, %v6201_v18  ;;  %v5976_v5 = vadd.f32 %v5944_v32, %v5876_v25  ;;  %v6045_v28 = vmul.f32 %v12619_v44, %v12666_v29  ;;  %v5447_v56 = vmul.f32 %v12604_v48, %v12080_v20  ;;  %v12707_v32 = vld [vmem:[#allocation3 + $0x122] sm:$0xff] }
 0x7c6   : > { %v5977_v31 = vadd.f32 %v5945_v35, %v5877_v0  ;;  %5217 = vst.msk [vmem:[#allocation3 + $0x171] sm:$0xff] %vm5187_vm15, %v5184_v11  ;;  %v5378_v2 = vadd.f32 %v5346_v34, %v5278_v60  ;;  %v5379_v4 = vadd.f32 %v5347_v15, %v5279_v33  ;;  %v5546_v37 = vmul.f32 %v12635_v55, %v12098_v7  ;;  %v6011_v60 = vld [vmem:[#allocation3 + $0x12a] sm:$0xff] }
 0x7c7   : > { %v5547_v54 = vmul.f32 %v12637_v12, %v12098_v7  ;;  %v6076_v24 = vadd.f32 %v6044_v59, %v5976_v5  ;;  %v5646_v46 = vmul.f32 %v12647_v51, %v12101_v52  ;;  %v5647_v48 = vmul.f32 %v12654_v13, %v12101_v52 }
 0x7c8   : > { %v6077_v57 = vadd.f32 %v6045_v28, %v5977_v31  ;;  %v5478_v17 = vadd.f32 %v5446_v62, %v5378_v2  ;;  %v5479_v47 = vadd.f32 %v5447_v56, %v5379_v4  ;;  %v5746_v36 = vmul.f32 %v12659_v43, %v12109_v40 }
 0x7c9   : > { %v5747_v63 = vmul.f32 %v12666_v29, %v12109_v40  ;;  %v6115_v27 = vadd.f32 %v12712_v23, %v6076_v24  ;;  %v5846_v35 = vmul.f32 %v12095_v30, %v12691_v16  ;;  %v5847_v22 = vmul.f32 %v12095_v30, %v12693_v49 }
 0x7ca   : > { %v6116_v14 = vadd.f32 %v12712_v23, %v6077_v57  ;;  %v5578_v38 = vadd.f32 %v5546_v37, %v5478_v17  ;;  %v5579_v3 = vadd.f32 %v5547_v54, %v5479_v47  ;;  %v5946_v61 = vmul.f32 %v12104_v53, %v12699_v58 }
 0x7cb   : > { %v5947_v21 = vmul.f32 %v12104_v53, %v12701_v45  ;;  %v6147_v1 = vmax.f32 %v6115_v27, 0.0  ;;  %v6046_v18 = vmul.f32 %v12619_v44, %v12707_v32  ;;  %v5280_v25 = vmul.f32 %v12635_v55, %v12072_v42 }
 0x7cc   : > { %v6148_v59 = vmax.f32 %v6116_v14, 0.0  ;;  %v5678_v0 = vadd.f32 %v5646_v46, %v5578_v38  ;;  %v5679_v33 = vadd.f32 %v5647_v48, %v5579_v3  ;;  %v5281_v11 = vmul.f32 %v12637_v12, %v12072_v42  ;;  %v12745_v46 = vld [vmem:[#allocation3 + $0x140] sm:$0xff] }
 0x7cd   : > { %v5348_v34 = vmul.f32 %v12647_v51, %v12075_v26  ;;  %v6179_v15 = vmin.f32 %v6147_v1, 6.0  ;;  %v5349_v5 = vmul.f32 %v12654_v13, %v12075_v26  ;;  %v5448_v31 = vmul.f32 %v12659_v43, %v12080_v20  ;;  %v12743_v43 = vld [vmem:[#allocation3 + $0x138] sm:$0xff] }
 0x7ce   : > { %v6180_v62 = vmin.f32 %v6148_v59, 6.0  ;;  %v5778_v28 = vadd.f32 %v5746_v36, %v5678_v0  ;;  %v5779_v56 = vadd.f32 %v5747_v63, %v5679_v33  ;;  %v6047_v55 = vmul.f32 %v12619_v44, %v6011_v60  ;;  %v12747_v48 = vld [vmem:[#allocation3 + $0x139] sm:$0xff]  ;;  %v12756_v63 = vld [vmem:[#allocation3 + $0x141] sm:$0xff] }
 0x7cf   : > { %v5380_v2 = vadd.f32 %v5348_v34, %v5280_v25  ;;  %v5381_v37 = vadd.f32 %v5349_v5, %v5281_v11  ;;  %v5449_v12 = vmul.f32 %v12666_v29, %v12080_v20  ;;  %v5548_v51 = vmul.f32 %v12691_v16, %v12098_v7  ;;  %v12759_v38 = vld [vmem:[#allocation3 + $0x13a] sm:$0xff] }
 0x7d0   : > { %v6202_v4 = vpack.c.bf16 %v6180_v62, %v6179_v15  ;;  %v5878_v54 = vadd.f32 %v5846_v35, %v5778_v28  ;;  %v5879_v24 = vadd.f32 %v5847_v22, %v5779_v56  ;;  %v5549_v13 = vmul.f32 %v12693_v49, %v12098_v7 }
 0x7d1   : > { %v5480_v57 = vadd.f32 %v5448_v31, %v5380_v2  ;;  %v5481_v17 = vadd.f32 %v5449_v12, %v5381_v37  ;;  %v5648_v29 = vmul.f32 %v12699_v58, %v12101_v52  ;;  %v5649_v47 = vmul.f32 %v12701_v45, %v12101_v52  ;;  %v6013_v12 = vld [vmem:[#allocation3 + $0x142] sm:$0xff] }
 0x7d2   : > { %9023 = vmatmul.mubr.msk.bf16.gmra.mxu1 %vm5187_vm15, %v6202_v4  ;;  %v5748_v36 = vmul.f32 %v12707_v32, %v12109_v40  ;;  %v5978_v27 = vadd.f32 %v5946_v61, %v5878_v54  ;;  %v5979_v14 = vadd.f32 %v5947_v21, %v5879_v24  ;;  %v5749_v22 = vmul.f32 %v6011_v60, %v12109_v40 }
 0x7d3   : > { %v5580_v35 = vadd.f32 %v5548_v51, %v5480_v57  ;;  %v5581_v3 = vadd.f32 %v5549_v13, %v5481_v17  ;;  %v5848_v1 = vmul.f32 %v12095_v30, %v12743_v43  ;;  %v5849_v59 = vmul.f32 %v12095_v30, %v12745_v46 }
 0x7d4   : > { %v5948_v25 = vmul.f32 %v12104_v53, %v12747_v48  ;;  %v6078_v0 = vadd.f32 %v6046_v18, %v5978_v27  ;;  %v6079_v33 = vadd.f32 %v6047_v55, %v5979_v14  ;;  %v5949_v61 = vmul.f32 %v12104_v53, %v12756_v63  ;;  %v12791_v27 = vld [vmem:[#allocation3 + $0x150] sm:$0xff] }
 0x7d5   : > { %v5680_v11 = vadd.f32 %v5648_v29, %v5580_v35  ;;  %v5681_v21 = vadd.f32 %v5649_v47, %v5581_v3  ;;  %v6048_v34 = vmul.f32 %v12619_v44, %v12759_v38  ;;  %v5282_v15 = vmul.f32 %v12691_v16, %v12072_v42 }
 0x7d6   : > { %v5283_v62 = vmul.f32 %v12693_v49, %v12072_v42  ;;  %v6117_v5 = vadd.f32 %v12712_v23, %v6078_v0  ;;  %v6118_v31 = vadd.f32 %v12712_v23, %v6079_v33  ;;  %v5350_v28 = vmul.f32 %v12699_v58, %v12075_v26 }
 0x7d7   : > { %v5780_v18 = vadd.f32 %v5748_v36, %v5680_v11  ;;  %v5781_v56 = vadd.f32 %v5749_v22, %v5681_v21  ;;  %v5351_v55 = vmul.f32 %v12701_v45, %v12075_v26  ;;  %v5450_v2 = vmul.f32 %v12707_v32, %v12080_v20  ;;  %v12801_v11 = vld [vmem:[#allocation3 + $0x159] sm:$0xff] }
 0x7d8   : > { %v5451_v16 = vmul.f32 %v6011_v60, %v12080_v20  ;;  %v6149_v4 = vmax.f32 %v6117_v5, 0.0  ;;  %v6150_v37 = vmax.f32 %v6118_v31, 0.0  ;;  %v5382_v51 = vadd.f32 %v5350_v28, %v5282_v15  ;;  %v6014_v28 = vld [vmem:[#allocation3 + $0x152] sm:$0xff] }
 0x7d9   : > { %v5880_v49 = vadd.f32 %v5848_v1, %v5780_v18  ;;  %v5881_v54 = vadd.f32 %v5849_v59, %v5781_v56  ;;  %v5383_v24 = vadd.f32 %v5351_v55, %v5283_v62  ;;  %v5550_v57 = vmul.f32 %v12743_v43, %v12098_v7  ;;  %v12795_v1 = vld [vmem:[#allocation3 + $0x158] sm:$0xff] }
 0x7da   : > { %v5551_v58 = vmul.f32 %v12745_v46, %v12098_v7  ;;  %v6181_v13 = vmin.f32 %v6149_v4, 6.0  ;;  %v6182_v45 = vmin.f32 %v6150_v37, 6.0  ;;  %v5482_v29 = vadd.f32 %v5450_v2, %v5382_v51  ;;  %v12797_v59 = vld [vmem:[#allocation3 + $0x151] sm:$0xff] }
 0x7db   : > { %v5980_v17 = vadd.f32 %v5948_v25, %v5880_v49  ;;  %v5981_v32 = vadd.f32 %v5949_v61, %v5881_v54  ;;  %v6049_v60 = vmul.f32 %v12619_v44, %v6013_v12  ;;  %v5483_v47 = vadd.f32 %v5451_v16, %v5383_v24  ;;  %v6015_v49 = vld [vmem:[#allocation3 + $0x15a] sm:$0xff] }
 0x7dc   : > { %v5650_v36 = vmul.f32 %v12747_v48, %v12101_v52  ;;  %v6203_v14 = vpack.c.bf16 %v6182_v45, %v6181_v13  ;;  %v5582_v22 = vadd.f32 %v5550_v57, %v5482_v29  ;;  %v5750_v3 = vmul.f32 %v12759_v38, %v12109_v40 }
 0x7dd   : > { %v6080_v35 = vadd.f32 %v6048_v34, %v5980_v17  ;;  %v6081_v25 = vadd.f32 %v6049_v60, %v5981_v32  ;;  %v5583_v0 = vadd.f32 %v5551_v58, %v5483_v47  ;;  %v5651_v33 = vmul.f32 %v12756_v63, %v12101_v52 }
 0x7de   : > { %9026 = vmatprep.mubr.msk.bf16.mxu1 %vm5187_vm15, %v6203_v14  ;;  %v5682_v21 = vadd.f32 %v5650_v36, %v5582_v22  ;;  %v5751_v34 = vmul.f32 %v6013_v12, %v12109_v40  ;;  %v5850_v15 = vmul.f32 %v12095_v30, %v12791_v27  ;;  %v5851_v31 = vmul.f32 %v12095_v30, %v12795_v1 }
 0x7df   : > { %v6119_v61 = vadd.f32 %v12712_v23, %v6080_v35  ;;  %v6120_v62 = vadd.f32 %v12712_v23, %v6081_v25  ;;  %v5683_v5 = vadd.f32 %v5651_v33, %v5583_v0  ;;  %v5950_v18 = vmul.f32 %v12104_v53, %v12797_v59  ;;  %v12836_v0 = vld [vmem:[#allocation3 + $0x170] sm:$0xff] }
 0x7e0   : > { %v5782_v55 = vadd.f32 %v5750_v3, %v5682_v21  ;;  %v5951_v2 = vmul.f32 %v12104_v53, %v12801_v11  ;;  %v5284_v16 = vmul.f32 %v12743_v43, %v12072_v42  ;;  %v5285_v51 = vmul.f32 %v12745_v46, %v12072_v42  ;;  %v12838_v33 = vld [vmem:[#allocation3 + $0x169] sm:$0xff] }
 0x7e1   : > { %v6151_v56 = vmax.f32 %v6119_v61, 0.0  ;;  %v6152_v4 = vmax.f32 %v6120_v62, 0.0  ;;  %v5783_v37 = vadd.f32 %v5751_v34, %v5683_v5  ;;  %v5352_v54 = vmul.f32 %v12747_v48, %v12075_v26 }
 0x7e2   : > { %v5882_v24 = vadd.f32 %v5850_v15, %v5782_v55  ;;  %v6050_v57 = vmul.f32 %v12619_v44, %v6014_v28  ;;  %v5353_v58 = vmul.f32 %v12756_v63, %v12075_v26  ;;  %v5452_v13 = vmul.f32 %v12759_v38, %v12080_v20  ;;  %v12830_v63 = vld [vmem:[#allocation3 + $0x168] sm:$0xff]  ;;  %v12844_v15 = vld [vmem:[#allocation3 + $0x171] sm:$0xff] }
 0x7e3   : > { %v6183_v45 = vmin.f32 %v6151_v56, 6.0  ;;  %v6184_v43 = vmin.f32 %v6152_v4, 6.0  ;;  %v5883_v17 = vadd.f32 %v5851_v31, %v5783_v37  ;;  %v5384_v29 = vadd.f32 %v5352_v54, %v5284_v16 }
 0x7e4   : > { %v5982_v32 = vadd.f32 %v5950_v18, %v5882_v24  ;;  %v6051_v60 = vmul.f32 %v12619_v44, %v6015_v49  ;;  %v5385_v46 = vadd.f32 %v5353_v58, %v5285_v51  ;;  %v5453_v47 = vmul.f32 %v6013_v12, %v12080_v20 }
 0x7e5   : > { %v6204_v48 = vpack.c.bf16 %v6184_v43, %v6183_v45  ;;  %v5983_v36 = vadd.f32 %v5951_v2, %v5883_v17  ;;  %v5484_v14 = vadd.f32 %v5452_v13, %v5384_v29  ;;  %v5552_v35 = vmul.f32 %v12791_v27, %v12098_v7  ;;  %v6016_v17 = vld [vmem:[#allocation3 + $0x16a] sm:$0xff] }
 0x7e6   : > { %v6082_v22 = vadd.f32 %v6050_v57, %v5982_v32  ;;  %v5485_v38 = vadd.f32 %v5453_v47, %v5385_v46  ;;  %v5553_v3 = vmul.f32 %v12795_v1, %v12098_v7  ;;  %v5652_v25 = vmul.f32 %v12797_v59, %v12101_v52  ;;  %v6017_v47 = vld [vmem:[#allocation3 + $0x172] sm:$0xff] }
 0x7e7   : > { %9027 = vmatmul.mubr.msk.bf16.gmra.mxu1 %vm5187_vm15, %v6204_v48  ;;  %v6083_v12 = vadd.f32 %v6051_v60, %v5983_v36  ;;  %v5584_v61 = vadd.f32 %v5552_v35, %v5484_v14  ;;  %v5653_v21 = vmul.f32 %v12801_v11, %v12101_v52  ;;  %v5752_v34 = vmul.f32 %v6014_v28, %v12109_v40 }
 0x7e8   : > { %v6121_v62 = vadd.f32 %v12712_v23, %v6082_v22  ;;  %v5585_v5 = vadd.f32 %v5553_v3, %v5485_v38  ;;  %v5753_v31 = vmul.f32 %v6015_v49, %v12109_v40  ;;  %v5852_v18 = vmul.f32 %v12095_v30, %v12830_v63 }
 0x7e9   : > { %v6122_v56 = vadd.f32 %v12712_v23, %v6083_v12  ;;  %v5684_v55 = vadd.f32 %v5652_v25, %v5584_v61  ;;  %v5853_v2 = vmul.f32 %v12095_v30, %v12836_v0  ;;  %v5952_v16 = vmul.f32 %v12104_v53, %v12838_v33  ;;  %v5819_v61 = vld [vmem:[#allocation3 + $0x188] sm:$0xff] }
 0x7ea   : > { %v6153_v4 = vmax.f32 %v6121_v62, 0.0  ;;  %v5685_v37 = vadd.f32 %v5653_v21, %v5585_v5  ;;  %v5953_v51 = vmul.f32 %v12104_v53, %v12844_v15  ;;  %v5286_v54 = vmul.f32 %v12791_v27, %v12072_v42  ;;  %v5918_v21 = vld [vmem:[#allocation3 + $0x181] sm:$0xff] }
 0x7eb   : > { %v6154_v24 = vmax.f32 %v6122_v56, 0.0  ;;  %v5784_v57 = vadd.f32 %v5752_v34, %v5684_v55  ;;  %v5287_v58 = vmul.f32 %v12795_v1, %v12072_v42  ;;  %v5354_v13 = vmul.f32 %v12797_v59, %v12075_v26 }
 0x7ec   : > { %v6185_v45 = vmin.f32 %v6153_v4, 6.0  ;;  %v5785_v43 = vadd.f32 %v5753_v31, %v5685_v37  ;;  %v5355_v29 = vmul.f32 %v12801_v11, %v12075_v26  ;;  %v5454_v32 = vmul.f32 %v6014_v28, %v12080_v20  ;;  %v5818_v28 = vld [vmem:[#allocation3 + $0x180] sm:$0xff] }
 0x7ed   : > { %v6186_v60 = vmin.f32 %v6154_v24, 6.0  ;;  %v5884_v46 = vadd.f32 %v5852_v18, %v5784_v57  ;;  %v5386_v27 = vadd.f32 %v5354_v13, %v5286_v54  ;;  %v5455_v48 = vmul.f32 %v6015_v49, %v12080_v20  ;;  %v5919_v18 = vld [vmem:[#allocation3 + $0x189] sm:$0xff] }
 0x7ee   : > { %v5885_v36 = vadd.f32 %v5853_v2, %v5785_v43  ;;  %v5387_v14 = vadd.f32 %v5355_v29, %v5287_v58  ;;  %v5554_v1 = vmul.f32 %v12830_v63, %v12098_v7  ;;  %v5555_v59 = vmul.f32 %v12836_v0, %v12098_v7  ;;  %v6018_v13 = vld [vmem:[#allocation3 + $0x182] sm:$0xff] }
 0x7ef   : > { %v6205_v35 = vpack.c.bf16 %v6186_v60, %v6185_v45  ;;  %v5984_v22 = vadd.f32 %v5952_v16, %v5884_v46  ;;  %v6052_v11 = vmul.f32 %v12619_v44, %v6016_v17  ;;  %v5486_v38 = vadd.f32 %v5454_v32, %v5386_v27 }
 0x7f0   : > { %v5985_v3 = vadd.f32 %v5953_v51, %v5885_v36  ;;  %v6053_v25 = vmul.f32 %v12619_v44, %v6017_v47  ;;  %v5487_v12 = vadd.f32 %v5455_v48, %v5387_v14  ;;  %v5654_v49 = vmul.f32 %v12838_v33, %v12101_v52  ;;  %v6019_v48 = vld [vmem:[#allocation3 + $0x18a] sm:$0xff] }
 0x7f1   : > { %9030 = vmatprep.mubr.msk.bf16.mxu1 %vm5187_vm15, %v6205_v35  ;;  %v6084_v34 = vadd.f32 %v6052_v11, %v5984_v22  ;;  %v5586_v62 = vadd.f32 %v5554_v1, %v5486_v38  ;;  %v5655_v5 = vmul.f32 %v12844_v15, %v12101_v52  ;;  %v5754_v31 = vmul.f32 %v6016_v17, %v12109_v40 }
 0x7f2   : > { %v6085_v56 = vadd.f32 %v6053_v25, %v5985_v3  ;;  %v5587_v55 = vadd.f32 %v5555_v59, %v5487_v12  ;;  %v5755_v2 = vmul.f32 %v6017_v47, %v12109_v40  ;;  %v5854_v16 = vmul.f32 %v12095_v30, %v5818_v28 }
 0x7f3   : > { %v6123_v4 = vadd.f32 %v12712_v23, %v6084_v34  ;;  %v5686_v37 = vadd.f32 %v5654_v49, %v5586_v62  ;;  %v5855_v51 = vmul.f32 %v12095_v30, %v5819_v61  ;;  %v5954_v54 = vmul.f32 %v12104_v53, %v5918_v21  ;;  %v5820_v49 = vld [vmem:[#allocation3 + $0x198] sm:$0xff] }
 0x7f4   : > { %v6124_v24 = vadd.f32 %v12712_v23, %v6085_v56  ;;  %v5687_v57 = vadd.f32 %v5655_v5, %v5587_v55  ;;  %v5955_v58 = vmul.f32 %v12104_v53, %v5919_v18  ;;  %v5288_v45 = vmul.f32 %v12830_v63, %v12072_v42  ;;  %v5920_v55 = vld [vmem:[#allocation3 + $0x199] sm:$0xff] }
 0x7f5   : > { %v6155_v43 = vmax.f32 %v6123_v4, 0.0  ;;  %v5786_v29 = vadd.f32 %v5754_v31, %v5686_v37  ;;  %v5289_v32 = vmul.f32 %v12836_v0, %v12072_v42  ;;  %v5356_v60 = vmul.f32 %v12838_v33, %v12075_v26  ;;  %v5821_v31 = vld [vmem:[#allocation3 + $0x1a0] sm:$0xff] }
 0x7f6   : > { %v6156_v46 = vmax.f32 %v6124_v24, 0.0  ;;  %v5787_v27 = vadd.f32 %v5755_v2, %v5687_v57  ;;  %v5357_v36 = vmul.f32 %v12844_v15, %v12075_v26  ;;  %v5456_v14 = vmul.f32 %v6016_v17, %v12080_v20 }
 0x7f7   : > { %v6187_v1 = vmin.f32 %v6155_v43, 6.0  ;;  %v5886_v59 = vadd.f32 %v5854_v16, %v5786_v29  ;;  %v6054_v63 = vmul.f32 %v12619_v44, %v6018_v13  ;;  %v5388_v35 = vadd.f32 %v5356_v60, %v5288_v45 }
 0x7f8   : > { %v6188_v22 = vmin.f32 %v6156_v46, 6.0  ;;  %v5887_v11 = vadd.f32 %v5855_v51, %v5787_v27  ;;  %v5389_v38 = vadd.f32 %v5357_v36, %v5289_v32  ;;  %v5457_v42 = vmul.f32 %v6017_v47, %v12080_v20 }
 0x7f9   : > { %v5986_v0 = vadd.f32 %v5954_v54, %v5886_v59  ;;  %v6055_v33 = vmul.f32 %v12619_v44, %v6019_v48  ;;  %v5488_v3 = vadd.f32 %v5456_v14, %v5388_v35  ;;  %v5556_v25 = vmul.f32 %v5818_v28, %v12098_v7  ;;  %v6020_v54 = vld [vmem:[#allocation3 + $0x19a] sm:$0xff] }
 0x7fa   : > { %v6206_v12 = vpack.c.bf16 %v6188_v22, %v6187_v1  ;;  %v5987_v26 = vadd.f32 %v5955_v58, %v5887_v11  ;;  %v5489_v15 = vadd.f32 %v5457_v42, %v5389_v38  ;;  %v5557_v17 = vmul.f32 %v5819_v61, %v12098_v7  ;;  %v5921_v61 = vld [vmem:[#allocation3 + $0x1a1] sm:$0xff]  ;;  %v12920_v42 = vld [vmem:[%s13968_s18] ss:$0 sm:$0xff] }
 0x7fb   : > { %v6086_v34 = vadd.f32 %v6054_v63, %v5986_v0  ;;  %v5588_v62 = vadd.f32 %v5556_v25, %v5488_v3  ;;  %v5656_v5 = vmul.f32 %v5918_v21, %v12101_v52  ;;  %v5657_v56 = vmul.f32 %v5919_v18, %v12101_v52  ;;  %v6021_v18 = vld [vmem:[#allocation3 + $0x1a2] sm:$0xff] }
 0x7fc   : > { %9031 = vmatmul.mubr.msk.bf16.gmra.mxu1 %vm5187_vm15, %v6206_v12  ;;  %v6087_v20 = vadd.f32 %v6055_v33, %v5987_v26  ;;  %v5589_v47 = vadd.f32 %v5557_v17, %v5489_v15  ;;  %v5756_v16 = vmul.f32 %v6018_v13, %v12109_v40  ;;  %v5856_v7 = vmul.f32 %v12095_v30, %v5820_v49  ;;  %v6484_v12 = vpop.permute.xlu1 %6483 }
 0x7fd   : > { %v6125_v28 = vadd.f32 %v12712_v23, %v6086_v34  ;;  %v5688_v2 = vadd.f32 %v5656_v5, %v5588_v62  ;;  %v5757_v21 = vmul.f32 %v6019_v48, %v12109_v40  ;;  %v5857_v51 = vmul.f32 %v12095_v30, %v5821_v31 }
 0x7fe   : > { %v6126_v4 = vadd.f32 %v12712_v23, %v6087_v20  ;;  %v5689_v37 = vadd.f32 %v5657_v56, %v5589_v47  ;;  %v5956_v52 = vmul.f32 %v12104_v53, %v5920_v55  ;;  %v5957_v13 = vmul.f32 %v12104_v53, %v5921_v61 }
 0x7ff   : > { %v6157_v24 = vmax.f32 %v6125_v28, 0.0  ;;  %v5788_v57 = vadd.f32 %v5756_v16, %v5688_v2  ;;  %v6056_v29 = vmul.f32 %v12619_v44, %v6020_v54  ;;  %v6057_v40 = vmul.f32 %v12619_v44, %v6021_v18  ;;  %v6482_v44 = vpop.permute.xlu0 %6481 }
 0x800   : > { %v6158_v58 = vmax.f32 %v6126_v4, 0.0  ;;  %v5789_v45 = vadd.f32 %v5757_v21, %v5689_v37  ;;  %v6488_v5 = vpop.permute.xlu1 %6487 }
 0x801   : > { %v5888_v43 = vadd.f32 %v5856_v7, %v5788_v57  ;;  %v6189_v32 = vmin.f32 %v6157_v24, 6.0 }
 0x802   : > { %v6190_v60 = vmin.f32 %v6158_v58, 6.0  ;;  %v5889_v46 = vadd.f32 %v5857_v51, %v5789_v45 }
 0x803   : > { %v5988_v27 = vadd.f32 %v5956_v52, %v5888_v43  ;;  %v6486_v17 = vpop.permute.xlu0 %6485  ;;  %v9183_v52 = vld [vmem:[%s13969_s19] sm:$0xff]  }
 0x804   : > { %v6207_v30 = vpack.c.bf16 %v6190_v60, %v6189_v32  ;;  %v5989_v48 = vadd.f32 %v5957_v13, %v5889_v46  ;;  %v6492_v7 = vpop.permute.xlu1 %6491  ;;  %9038 = vmatprep.subr.bf16.mxu0 %v9183_v52 }
 0x805   : > { %v6088_v36 = vadd.f32 %v6056_v29, %v5988_v27  ;;  %9039 = vmatpush3.bf16.msra.mxu0 %v9183_v52 }
 0x806   : > { %9034 = vmatprep.mubr.msk.bf16.mxu1 %vm5187_vm15, %v6207_v30  ;;  %v6089_v14 = vadd.f32 %v6057_v40, %v5989_v48 }
 0x807   : > { %v6127_v1 = vadd.f32 %v12712_v23, %v6088_v36  ;;  %v6490_v47 = vpop.permute.xlu0 %6489 }
 0x808   : > { %v6128_v59 = vadd.f32 %v12712_v23, %v6089_v14  ;;  %v6496_v24 = vpop.permute.xlu1 %6495 }
 0x809   : > { %v6159_v53 = vmax.f32 %v6127_v1, 0.0 }
 0x80a   : > { %v6160_v63 = vmax.f32 %v6128_v59, 0.0 }
 0x80b   : > { %v6191_v35 = vmin.f32 %v6159_v53, 6.0  ;;  %v6494_v37 = vpop.permute.xlu0 %6493 }
 0x80c   : > { %v6192_v22 = vmin.f32 %v6160_v63, 6.0  ;;  %v6500_v60 = vpop.permute.xlu1 %6499 }
 0x80e   : > { %v6208_v11 = vpack.c.bf16 %v6192_v22, %v6191_v35 }
 0x80f   : > { %v6498_v58 = vpop.permute.xlu0 %6497 }
 0x810   : > { %9035 = vmatmul.mubr.msk.bf16.gmra.mxu1 %vm5187_vm15, %v6208_v11  ;;  %v6504_v14 = vpop.permute.xlu1 %6503 }
 0x813   : > { %v6502_v27 = vpop.permute.xlu0 %6501 }
 0x814   : > { %v6508_v53 = vpop.permute.xlu1 %6507 }
 0x817   : > { %v6506_v59 = vpop.permute.xlu0 %6505 }
 0x818   : > { %v6512_v22 = vpop.permute.xlu1 %6511 }
 0x81b   : > { %v6510_v63 = vpop.permute.xlu0 %6509 }
 0x833   : > { %v9008_v38 = vpop.f32.mrf.mxu1 }
 0x834   : > { %v6331_v23 = vadd.f32 %v9008_v38, %v12920_v42 }
 0x835   : > { %v6322_v0 = vpop.f32.mrf.mxu1 }
 0x836   : > { %v6323_v33 = vadd.f32 %v12920_v42, %v6322_v0  ;;  %v6579_v49 = vadd.f32 %v6486_v17, %v6331_v23 }
 0x837   : > { %v9009_v3 = vpop.f32.mrf.mxu1 }
 0x838   : > { %v6577_v25 = vadd.f32 %v6482_v44, %v6323_v33  ;;  %v6334_v34 = vadd.f32 %v9009_v3, %v12920_v42  ;;  %v6514_v44 = vpop.permute.xlu0 %6513 }
 0x839   : > { %v6325_v26 = vpop.f32.mrf.mxu1 }
 0x83a   : > { %v6326_v15 = vadd.f32 %v12920_v42, %v6325_v26  ;;  %6641 = vrot.lane.b32.xlu0 %v6577_v25, %s13992_s3  ;;  %v6580_v31 = vadd.f32 %v6488_v5, %v6334_v34  ;;  %v6516_v25 = vpop.permute.xlu1 %6515 }
 0x83c   : > { %v6578_v62 = vadd.f32 %v6484_v12, %v6326_v15 }
 0x83e   : > { %6643 = vrot.lane.b32.xlu1 %v6578_v62, %s13992_s3  ;;  %6645 = vrot.lane.b32.xlu0 %v6579_v49, %s13992_s3  ;;  %v6518_v49 = vpop.permute.xlu0 %6517  ;;  %v6520_v34 = vpop.permute.xlu1 %6519 }
 0x842   : > { %6647 = vrot.lane.b32.xlu1 %v6580_v31, %s13992_s3  ;;  %v6522_v5 = vpop.permute.xlu0 %6521  ;;  %v6524_v31 = vpop.permute.xlu1 %6523 }
 0x84b   : > { %v9012_v20 = vpop.f32.mrf.mxu1 }
 0x84c   : > { %v6347_v2 = vadd.f32 %v9012_v20, %v12920_v42  ;;  %v6526_v20 = vpop.permute.xlu0 %6525 }
 0x84d   : > { %v6338_v56 = vpop.f32.mrf.mxu1 }
 0x84e   : > { %v6339_v55 = vadd.f32 %v12920_v42, %v6338_v56  ;;  %v6583_v21 = vadd.f32 %v6494_v37, %v6347_v2  ;;  %v6528_v56 = vpop.permute.xlu1 %6527 }
 0x84f   : > { %v9013_v28 = vpop.f32.mrf.mxu1 }
 0x850   : > { %v6581_v16 = vadd.f32 %v6490_v47, %v6339_v55  ;;  %v6350_v51 = vadd.f32 %v9013_v28, %v12920_v42  ;;  %v6530_v2 = vpop.permute.xlu0 %6529 }
 0x851   : > { %v6341_v61 = vpop.f32.mrf.mxu1 }
 0x852   : > { %v6342_v4 = vadd.f32 %v12920_v42, %v6341_v61  ;;  %6649 = vrot.lane.b32.xlu0 %v6581_v16, %s13992_s3  ;;  %v6584_v57 = vadd.f32 %v6496_v24, %v6350_v51  ;;  %v6532_v37 = vpop.permute.xlu1 %6531 }
 0x854   : > { %v6582_v54 = vadd.f32 %v6492_v7, %v6342_v4 }
 0x856   : > { %6651 = vrot.lane.b32.xlu1 %v6582_v54, %s13992_s3  ;;  %6653 = vrot.lane.b32.xlu0 %v6583_v21, %s13992_s3  ;;  %v6536_v52 = vpop.permute.xlu1 %6535 }
 0x85a   : > { %6655 = vrot.lane.b32.xlu1 %v6584_v57, %s13992_s3  ;;  %v6534_v57 = vpop.permute.xlu0 %6533 }
 0x863   : > { %v9016_v18 = vpop.f32.mrf.mxu1 }
 0x864   : > { %v6363_v29 = vadd.f32 %v9016_v18, %v12920_v42 }
 0x865   : > { %v6354_v45 = vpop.f32.mrf.mxu1 }
 0x866   : > { %v6355_v13 = vadd.f32 %v12920_v42, %v6354_v45  ;;  %v6587_v30 = vadd.f32 %v6502_v27, %v6363_v29  ;;  %v12967_v45 = vpop.permute.xlu1 %6539 }
 0x867   : > { %v9017_v43 = vpop.f32.mrf.mxu1 }
 0x868   : > { %v6585_v32 = vadd.f32 %v6498_v58, %v6355_v13  ;;  %v6366_v48 = vadd.f32 %v9017_v43, %v12920_v42  ;;  %v12965_v58 = vpop.permute.xlu0 %6537 }
 0x869   : > { %v6357_v46 = vpop.f32.mrf.mxu1 }
 0x86a   : > { %v6358_v40 = vadd.f32 %v12920_v42, %v6357_v46  ;;  %6657 = vrot.lane.b32.xlu0 %v6585_v32, %s13992_s3  ;;  %v6588_v1 = vadd.f32 %v6504_v14, %v6366_v48  ;;  %v12971_v32 = vpop.permute.xlu1 %6543 }
 0x86c   : > { %v6586_v36 = vadd.f32 %v6500_v60, %v6358_v40  ;;  %v12969_v13 = vpop.permute.xlu0 %6541 }
 0x86e   : > { %6659 = vrot.lane.b32.xlu1 %v6586_v36, %s13992_s3  ;;  %6661 = vrot.lane.b32.xlu0 %v6587_v30, %s13992_s3 }
 0x872   : > { %6663 = vrot.lane.b32.xlu1 %v6588_v1, %s13992_s3 }
 0x87a   : > { %v9020_v35 = vpop.f32.mrf.mxu1 }
 0x87b   : > { %v6379_v33 = vadd.f32 %v9020_v35, %v12920_v42 }
 0x87c   : > { %v6370_v11 = vpop.f32.mrf.mxu1 }
 0x87d   : > { %v6371_v38 = vadd.f32 %v12920_v42, %v6370_v11  ;;  %v6591_v26 = vadd.f32 %v6510_v63, %v6379_v33 }
 0x87e   : > { %v9021_v0 = vpop.f32.mrf.mxu1 }
 0x87f   : > { %v6589_v3 = vadd.f32 %v6506_v59, %v6371_v38  ;;  %v6382_v15 = vadd.f32 %v9021_v0, %v12920_v42 }
 0x880   : > { %v6373_v23 = vpop.f32.mrf.mxu1 }
 0x881   : > { %v6374_v12 = vadd.f32 %v12920_v42, %v6373_v23  ;;  %6665 = vrot.lane.b32.xlu0 %v6589_v3, %s13992_s3  ;;  %v6592_v62 = vadd.f32 %v6512_v22, %v6382_v15 }
 0x883   : > { %v6590_v17 = vadd.f32 %v6508_v53, %v6374_v12 }
 0x885   : > { %6667 = vrot.lane.b32.xlu1 %v6590_v17, %s13992_s3  ;;  %6669 = vrot.lane.b32.xlu0 %v6591_v26, %s13992_s3 }
 0x889   : > { %6671 = vrot.lane.b32.xlu1 %v6592_v62, %s13992_s3 }
 0x892   : > { %v9024_v47 = vpop.f32.mrf.mxu1 }
 0x893   : > { %v6395_v7 = vadd.f32 %v9024_v47, %v12920_v42 }
 0x894   : > { %v6386_v55 = vpop.f32.mrf.mxu1 }
 0x895   : > { %v6387_v28 = vadd.f32 %v12920_v42, %v6386_v55  ;;  %v6595_v51 = vadd.f32 %v6518_v49, %v6395_v7 }
 0x896   : > { %v9025_v16 = vpop.f32.mrf.mxu1 }
 0x897   : > { %v6593_v61 = vadd.f32 %v6514_v44, %v6387_v28  ;;  %v6398_v54 = vadd.f32 %v9025_v16, %v12920_v42 }
 0x898   : > { %v6389_v4 = vpop.f32.mrf.mxu1 }
 0x899   : > { %v6390_v21 = vadd.f32 %v12920_v42, %v6389_v4  ;;  %6673 = vrot.lane.b32.xlu0 %v6593_v61, %s13992_s3  ;;  %v6596_v18 = vadd.f32 %v6520_v34, %v6398_v54 }
 0x89b   : > { %v6594_v24 = vadd.f32 %v6516_v25, %v6390_v21 }
 0x89d   : > { %6675 = vrot.lane.b32.xlu1 %v6594_v24, %s13992_s3  ;;  %6677 = vrot.lane.b32.xlu0 %v6595_v51, %s13992_s3 }
 0x8a1   : > { %6679 = vrot.lane.b32.xlu1 %v6596_v18, %s13992_s3 }
 0x8a7   : > { %v9028_v43 = vpop.f32.mrf.mxu1 }
 0x8a8   : > { %v6411_v27 = vadd.f32 %v9028_v43, %v12920_v42 }
 0x8a9   : > { %v6402_v29 = vpop.f32.mrf.mxu1 }
 0x8aa   : > { %v6403_v60 = vadd.f32 %v12920_v42, %v6402_v29  ;;  %v6599_v59 = vadd.f32 %v6526_v20, %v6411_v27  ;;  %v9185_v27 = vld [vmem:[%s13971_s21 + $0x20] sm:$0xff]  }
 0x8ab   : > { %v9029_v46 = vpop.f32.mrf.mxu1 }
 0x8ac   : > { %v6642_v40 = vpop.permute.xlu0 %6641  ;;  %v6597_v30 = vadd.f32 %v6522_v5, %v6403_v60  ;;  %v6414_v53 = vadd.f32 %v9029_v46, %v12920_v42 }
 0x8ad   : > { %6738 = vst.msk [vmem:[#allocation2] sm:$0xff] %vm6737_vm1, %v6642_v40  ;;  %v6405_v48 = vpop.f32.mrf.mxu1 }
 0x8ae   : > { %v6406_v36 = vadd.f32 %v12920_v42, %v6405_v48  ;;  %6681 = vrot.lane.b32.xlu0 %v6597_v30, %s13992_s3  ;;  %v6600_v22 = vadd.f32 %v6528_v56, %v6414_v53 }
 0x8b0   : > { %v6644_v14 = vpop.permute.xlu1 %6643  ;;  %v6646_v1 = vpop.permute.xlu0 %6645  ;;  %v6598_v63 = vadd.f32 %v6524_v31, %v6406_v36 }
 0x8b1   : > { %6739 = vst.msk [vmem:[#allocation2 + $0x8] sm:$0xff] %vm6737_vm1, %v6644_v14  ;;  %6740 = vst.msk [vmem:[#allocation2 + $0x10] sm:$0xff] %vm6737_vm1, %v6646_v1 }
 0x8b2   : > { %6683 = vrot.lane.b32.xlu1 %v6598_v63, %s13992_s3  ;;  %6685 = vrot.lane.b32.xlu0 %v6599_v59, %s13992_s3 }
 0x8b4   : > { %v6648_v35 = vpop.permute.xlu1 %6647  ;;  %v6770_v11 = vld [vmem:[#allocation2] sm:$0xff] }
 0x8b5   : > { %6741 = vst.msk [vmem:[#allocation2 + $0x18] sm:$0xff] %vm6737_vm1, %v6648_v35 }
 0x8b6   : > { %6687 = vrot.lane.b32.xlu1 %v6600_v22, %s13992_s3 }
 0x8b8   : > { %v6771_v38 = vld [vmem:[#allocation2 + $0x8] sm:$0xff]  ;;  %v6772_v0 = vld [vmem:[#allocation2 + $0x10] sm:$0xff] }
 0x8b9   : > { %v6802_v44 = vpack.c.bf16 %v6771_v38, %v6770_v11 }
 0x8bb   : > { %9040 = vmatprep.mubr.msk.bf16.mxu0 %vm862_vm0, %v6802_v44 }
 0x8bc   : > { %v6773_v33 = vld [vmem:[#allocation2 + $0x18] sm:$0xff]  ;;  %v9032_v3 = vpop.f32.mrf.mxu1 }
 0x8bd   : > { %v6803_v23 = vpack.c.bf16 %v6773_v33, %v6772_v0  ;;  %v6427_v15 = vadd.f32 %v9032_v3, %v12920_v42 }
 0x8be   : > { %v6418_v25 = vpop.f32.mrf.mxu1 }
 0x8bf   : > { %9041 = vmatmul.mubr.msk.bf16.vlgmr.msra.gmra.mxu0 %vm862_vm0, %v6803_v23  ;;  %v6419_v12 = vadd.f32 %v12920_v42, %v6418_v25  ;;  %v6603_v5 = vadd.f32 %v6534_v57, %v6427_v15  ;;  %v9186_v23 = vld [vmem:[%s13971_s21 + $0x18] sm:$0xff]  }
 0x8c0   : > { %v9033_v26 = vpop.f32.mrf.mxu1 }
 0x8c1   : > { %v6601_v17 = vadd.f32 %v6530_v2, %v6419_v12  ;;  %v6430_v31 = vadd.f32 %v9033_v26, %v12920_v42 }
 0x8c2   : > { %v6421_v49 = vpop.f32.mrf.mxu1 }
 0x8c3   : > { %v6422_v34 = vadd.f32 %v12920_v42, %v6421_v49  ;;  %6689 = vrot.lane.b32.xlu0 %v6601_v17, %s13992_s3  ;;  %v6604_v55 = vadd.f32 %v6536_v52, %v6430_v31 }
 0x8c4   : > { %v6650_v62 = vpop.permute.xlu0 %6649 }
 0x8c5   : > { %v6602_v20 = vadd.f32 %v6532_v37, %v6422_v34  ;;  %6742 = vst.msk [vmem:[#allocation2 + $0x20] sm:$0xff] %vm6737_vm1, %v6650_v62 }
 0x8c7   : > { %6691 = vrot.lane.b32.xlu1 %v6602_v20, %s13992_s3  ;;  %6693 = vrot.lane.b32.xlu0 %v6603_v5, %s13992_s3 }
 0x8c8   : > { %v6652_v47 = vpop.permute.xlu1 %6651  ;;  %v6654_v56 = vpop.permute.xlu0 %6653 }
 0x8c9   : > { %6743 = vst.msk [vmem:[#allocation2 + $0x28] sm:$0xff] %vm6737_vm1, %v6652_v47  ;;  %6744 = vst.msk [vmem:[#allocation2 + $0x30] sm:$0xff] %vm6737_vm1, %v6654_v56 }
 0x8cb   : > { %6695 = vrot.lane.b32.xlu1 %v6604_v55, %s13992_s3  ;;  %v9187_v55 = vld [vmem:[%s13971_s21 + $0x10] sm:$0xff]  }
 0x8cc   : > { %v6656_v28 = vpop.permute.xlu1 %6655  ;;  %v6774_v16 = vld [vmem:[#allocation2 + $0x20] sm:$0xff] }
 0x8cd   : > { %6745 = vst.msk [vmem:[#allocation2 + $0x38] sm:$0xff] %vm6737_vm1, %v6656_v28 }
 0x8d0   : > { %v9036_v2 = vpop.f32.mrf.mxu1  ;;  %v6775_v7 = vld [vmem:[#allocation2 + $0x28] sm:$0xff]  ;;  %v6776_v51 = vld [vmem:[#allocation2 + $0x30] sm:$0xff] }
 0x8d1   : > { %v6804_v61 = vpack.c.bf16 %v6775_v7, %v6774_v16  ;;  %v6443_v24 = vadd.f32 %v9036_v2, %v12920_v42 }
 0x8d2   : > { %v6434_v4 = vpop.f32.mrf.mxu1 }
 0x8d3   : > { %v6435_v37 = vadd.f32 %v12920_v42, %v6434_v4  ;;  %9044 = vmatprep.mubr.msk.bf16.mxu0 %vm862_vm0, %v6804_v61  ;;  %v6607_v29 = vadd.f32 %v12969_v13, %v6443_v24 }
 0x8d4   : > { %v9037_v21 = vpop.f32.mrf.mxu1  ;;  %v6777_v54 = vld [vmem:[#allocation2 + $0x38] sm:$0xff] }
 0x8d5   : > { %v6605_v57 = vadd.f32 %v12965_v58, %v6435_v37  ;;  %v6805_v52 = vpack.c.bf16 %v6777_v54, %v6776_v51  ;;  %v6446_v60 = vadd.f32 %v9037_v21, %v12920_v42  ;;  %v9184_v58 = vld [vmem:[%s13971_s21 + $0x28] sm:$0xff]  }
 0x8d6   : > { %v6437_v18 = vpop.f32.mrf.mxu1  ;;  %9072 = vmatprep.subr.bf16.mxu1 %v9184_v58 }
 0x8d7   : > { %v6438_v43 = vadd.f32 %v12920_v42, %v6437_v18  ;;  %6697 = vrot.lane.b32.xlu0 %v6605_v57, %s13992_s3  ;;  %9045 = vmatmul.mubr.msk.bf16.gmra.mxu0 %vm862_vm0, %v6805_v52  ;;  %v6608_v13 = vadd.f32 %v12971_v32, %v6446_v60 }
 0x8d8   : > { %9073 = vmatpush3.bf16.msra.mxu1 %v9184_v58 }
 0x8d9   : > { %v6606_v46 = vadd.f32 %v12967_v45, %v6438_v43  ;;  %9074 = vmatprep.subr.bf16.mxu1 %v9185_v27 }
 0x8db   : > { %6699 = vrot.lane.b32.xlu1 %v6606_v46, %s13992_s3  ;;  %6701 = vrot.lane.b32.xlu0 %v6607_v29, %s13992_s3 }
 0x8dc   : > { %v6658_v40 = vpop.permute.xlu0 %6657  ;;  %9075 = vmatpush3.bf16.msra.mxu1 %v9185_v27 }
 0x8dd   : > { %6746 = vst.msk [vmem:[#allocation2 + $0x40] sm:$0xff] %vm6737_vm1, %v6658_v40  ;;  %9076 = vmatprep.subr.bf16.mxu1 %v9186_v23  ;;  %v9188_v40 = vld [vmem:[%s13971_s21 + $0x8] sm:$0xff]  }
 0x8df   : > { %6703 = vrot.lane.b32.xlu1 %v6608_v13, %s13992_s3 }
 0x8e0   : > { %v6660_v42 = vpop.permute.xlu1 %6659  ;;  %v6662_v45 = vpop.permute.xlu0 %6661  ;;  %9077 = vmatpush3.bf16.msra.mxu1 %v9186_v23 }
 0x8e1   : > { %6747 = vst.msk [vmem:[#allocation2 + $0x48] sm:$0xff] %vm6737_vm1, %v6660_v42  ;;  %6748 = vst.msk [vmem:[#allocation2 + $0x50] sm:$0xff] %vm6737_vm1, %v6662_v45  ;;  %9078 = vmatprep.subr.bf16.mxu1 %v9187_v55 }
 0x8e4   : > { %v6664_v30 = vpop.permute.xlu1 %6663  ;;  %v6778_v48 = vld [vmem:[#allocation2 + $0x40] sm:$0xff]  ;;  %9079 = vmatpush3.bf16.msra.mxu1 %v9187_v55 }
 0x8e5   : > { %6749 = vst.msk [vmem:[#allocation2 + $0x58] sm:$0xff] %vm6737_vm1, %v6664_v30  ;;  %9080 = vmatprep.subr.bf16.mxu1 %v9188_v40 }
 0x8e8   : > { %v6779_v36 = vld [vmem:[#allocation2 + $0x48] sm:$0xff]  ;;  %v6780_v32 = vld [vmem:[#allocation2 + $0x50] sm:$0xff]  ;;  %9081 = vmatpush3.bf16.msra.mxu1 %v9188_v40 }
 0x8e9   : > { %v6806_v14 = vpack.c.bf16 %v6779_v36, %v6778_v48 }
 0x8eb   : > { %9048 = vmatprep.mubr.msk.bf16.mxu0 %vm862_vm0, %v6806_v14 }
 0x8ec   : > { %v6781_v1 = vld [vmem:[#allocation2 + $0x58] sm:$0xff] }
 0x8ed   : > { %v6807_v59 = vpack.c.bf16 %v6781_v1, %v6780_v32  ;;  %v9189_v32 = vld [vmem:[%s13971_s21] sm:$0xff]  }
 0x8ee   : > { %9082 = vmatprep.subr.bf16.mxu1 %v9189_v32  ;;  %v13070_v1 = vld [vmem:[%s13972_s22] ss:$0 sm:$0xff] }
 0x8ef   : > { %9049 = vmatmul.mubr.msk.bf16.gmra.mxu0 %vm862_vm0, %v6807_v59  ;;  %9083 = vmatpush3.bf16.msra.mxu1 %v9189_v32  ;;  %v7138_v59 = vld [vmem:[%s13970_s20] sm:$0xff] }
 0x8f3   : > { %v6666_v53 = vpop.permute.xlu0 %6665 }
 0x8f4   : > { %6750 = vst.msk [vmem:[#allocation2 + $0x60] sm:$0xff] %vm6737_vm1, %v6666_v53 }
 0x8f7   : > { %v6668_v63 = vpop.permute.xlu1 %6667  ;;  %v6670_v35 = vpop.permute.xlu0 %6669 }
 0x8f8   : > { %6751 = vst.msk [vmem:[#allocation2 + $0x68] sm:$0xff] %vm6737_vm1, %v6668_v63  ;;  %6752 = vst.msk [vmem:[#allocation2 + $0x70] sm:$0xff] %vm6737_vm1, %v6670_v35 }
 0x8fb   : > { %v6672_v22 = vpop.permute.xlu1 %6671  ;;  %v6782_v11 = vld [vmem:[#allocation2 + $0x60] sm:$0xff] }
 0x8fc   : > { %6753 = vst.msk [vmem:[#allocation2 + $0x78] sm:$0xff] %vm6737_vm1, %v6672_v22  ;;  %v13077_v22 = vrot.slane %v7138_v59, %v9794_v39 }
 0x8ff   : > { %v6783_v38 = vld [vmem:[#allocation2 + $0x68] sm:$0xff]  ;;  %v6784_v0 = vld [vmem:[#allocation2 + $0x70] sm:$0xff] }
 0x900   : > { %v6808_v44 = vpack.c.bf16 %v6783_v38, %v6782_v11  ;;  %v13080_v11 = vrot.slane %v7138_v59, %v9801_v41 }
 0x902   : > { %9052 = vmatprep.mubr.msk.bf16.mxu0 %vm862_vm0, %v6808_v44 }
 0x903   : > { %v6785_v33 = vld [vmem:[#allocation2 + $0x78] sm:$0xff] }
 0x904   : > { %v6809_v3 = vpack.c.bf16 %v6785_v33, %v6784_v0  ;;  %v7140_v0 = vld [vmem:[#allocation3] sm:$0xff] }
 0x905   : > { %v7208_v33 = vld [vmem:[#allocation3 + $0x1] sm:$0xff] }
 0x906   : > { %9053 = vmatmul.mubr.msk.bf16.gmra.mxu0 %vm862_vm0, %v6809_v3 }
 0x90b   : > { %v6674_v25 = vpop.permute.xlu0 %6673 }
 0x90c   : > { %6754 = vst.msk [vmem:[#allocation2 + $0x80] sm:$0xff] %vm6737_vm1, %v6674_v25 }
 0x90f   : > { %v6676_v12 = vpop.permute.xlu1 %6675  ;;  %v6678_v26 = vpop.permute.xlu0 %6677 }
 0x910   : > { %6755 = vst.msk [vmem:[#allocation2 + $0x88] sm:$0xff] %vm6737_vm1, %v6676_v12  ;;  %6756 = vst.msk [vmem:[#allocation2 + $0x90] sm:$0xff] %vm6737_vm1, %v6678_v26 }
 0x913   : > { %v6680_v15 = vpop.permute.xlu1 %6679  ;;  %v6786_v17 = vld [vmem:[#allocation2 + $0x80] sm:$0xff] }
 0x914   : > { %6757 = vst.msk [vmem:[#allocation2 + $0x98] sm:$0xff] %vm6737_vm1, %v6680_v15  ;;  %v7176_v15 = vmul.f32 %v13077_v22, %v7140_v0 }
 0x917   : > { %v6787_v49 = vld [vmem:[#allocation2 + $0x88] sm:$0xff]  ;;  %v6788_v62 = vld [vmem:[#allocation2 + $0x90] sm:$0xff] }
 0x918   : > { %v6810_v34 = vpack.c.bf16 %v6787_v49, %v6786_v17  ;;  %v7244_v17 = vmul.f32 %v13080_v11, %v7208_v33 }
 0x91a   : > { %9056 = vmatprep.mubr.msk.bf16.mxu0 %vm862_vm0, %v6810_v34  ;;  %v13089_v34 = vrot.slane %v7138_v59, %v9817_v50 }
 0x91b   : > { %v6789_v5 = vld [vmem:[#allocation2 + $0x98] sm:$0xff] }
 0x91c   : > { %v6811_v31 = vpack.c.bf16 %v6789_v5, %v6788_v62  ;;  %v7141_v62 = vld [vmem:[#allocation3 + $0x8] sm:$0xff] }
 0x91d   : > { %v7209_v5 = vld [vmem:[#allocation3 + $0x9] sm:$0xff] }
 0x91e   : > { %9057 = vmatmul.mubr.msk.bf16.gmra.mxu0 %vm862_vm0, %v6811_v31  ;;  %v7308_v31 = vld [vmem:[#allocation3 + $0x2] sm:$0xff] }
 0x920   : > { %v6682_v20 = vpop.permute.xlu0 %6681 }
 0x921   : > { %6758 = vst.msk [vmem:[#allocation2 + $0xa0] sm:$0xff] %vm6737_vm1, %v6682_v20 }
 0x924   : > { %v6684_v47 = vpop.permute.xlu1 %6683  ;;  %v6686_v56 = vpop.permute.xlu0 %6685 }
 0x925   : > { %6759 = vst.msk [vmem:[#allocation2 + $0xa8] sm:$0xff] %vm6737_vm1, %v6684_v47  ;;  %6760 = vst.msk [vmem:[#allocation2 + $0xb0] sm:$0xff] %vm6737_vm1, %v6686_v56  ;;  %v7276_v56 = vadd.f32 %v7244_v17, %v7176_v15 }
 0x928   : > { %v6688_v28 = vpop.permute.xlu1 %6687  ;;  %v6790_v2 = vld [vmem:[#allocation2 + $0xa0] sm:$0xff] }
 0x929   : > { %6761 = vst.msk [vmem:[#allocation2 + $0xb8] sm:$0xff] %vm6737_vm1, %v6688_v28  ;;  %v7177_v28 = vmul.f32 %v13077_v22, %v7141_v62 }
 0x92c   : > { %v6791_v16 = vld [vmem:[#allocation2 + $0xa8] sm:$0xff]  ;;  %v6792_v61 = vld [vmem:[#allocation2 + $0xb0] sm:$0xff] }
 0x92d   : > { %v6812_v7 = vpack.c.bf16 %v6791_v16, %v6790_v2  ;;  %v7245_v2 = vmul.f32 %v13080_v11, %v7209_v5  ;;  %v7344_v16 = vmul.f32 %v13089_v34, %v7308_v31 }
 0x92f   : > { %9060 = vmatprep.mubr.msk.bf16.mxu0 %vm862_vm0, %v6812_v7  ;;  %v7309_v7 = vld [vmem:[#allocation3 + $0xa] sm:$0xff]  ;;  %v7277_v50 = vadd.f32 %v7245_v2, %v7177_v28  ;;  %v13145_v28 = vld [vmem:[%s13973_s23] ss:$0 sm:$0xff] }
 0x930   : > { %v6793_v4 = vld [vmem:[#allocation2 + $0xb8] sm:$0xff] }
 0x931   : > { %v6813_v37 = vpack.c.bf16 %v6793_v4, %v6792_v61  ;;  %v7345_v61 = vmul.f32 %v13089_v34, %v7309_v7  ;;  %v7376_v4 = vadd.f32 %v7344_v16, %v7276_v56 }
 0x933   : > { %9061 = vmatmul.mubr.msk.bf16.gmra.mxu0 %vm862_vm0, %v6813_v37  ;;  %v13099_v37 = vrot.slane %v7138_v59, %v9833_v8 }
 0x935   : > { %v6690_v21 = vpop.permute.xlu0 %6689 }
 0x936   : > { %6762 = vst.msk [vmem:[#allocation2 + $0xc0] sm:$0xff] %vm6737_vm1, %v6690_v21 }
 0x939   : > { %v6692_v51 = vpop.permute.xlu1 %6691  ;;  %v6694_v54 = vpop.permute.xlu0 %6693 }
 0x93a   : > { %6763 = vst.msk [vmem:[#allocation2 + $0xc8] sm:$0xff] %vm6737_vm1, %v6692_v51  ;;  %6764 = vst.msk [vmem:[#allocation2 + $0xd0] sm:$0xff] %vm6737_vm1, %v6694_v54 }
 0x93d   : > { %v6696_v24 = vpop.permute.xlu1 %6695  ;;  %v6794_v57 = vld [vmem:[#allocation2 + $0xc0] sm:$0xff] }
 0x93e   : > { %6765 = vst.msk [vmem:[#allocation2 + $0xd8] sm:$0xff] %vm6737_vm1, %v6696_v24  ;;  %v13103_v24 = vrot.slane %v7138_v59, %v9835_v9 }
 0x941   : > { %v6795_v52 = vld [vmem:[#allocation2 + $0xc8] sm:$0xff]  ;;  %v6796_v43 = vld [vmem:[#allocation2 + $0xd0] sm:$0xff] }
 0x942   : > { %v6814_v18 = vpack.c.bf16 %v6795_v52, %v6794_v57  ;;  %v13106_v57 = vrot.slane %v7138_v59, %v9831_v6  ;;  %v7377_v52 = vadd.f32 %v7345_v61, %v7277_v50 }
 0x944   : > { %9064 = vmatprep.mubr.msk.bf16.mxu0 %vm862_vm0, %v6814_v18 }
 0x945   : > { %v6797_v29 = vld [vmem:[#allocation2 + $0xd8] sm:$0xff] }
 0x946   : > { %v6815_v60 = vpack.c.bf16 %v6797_v29, %v6796_v43  ;;  %v13110_v29 = vrot.slane %v7138_v59, %v9843_v19 }
 0x948   : > { %9065 = vmatmul.mubr.msk.bf16.gmra.mxu0 %vm862_vm0, %v6815_v60 }
 0x949   : > { %v6698_v46 = vpop.permute.xlu0 %6697 }
 0x94a   : > { %6766 = vst.msk [vmem:[#allocation2 + $0xe0] sm:$0xff] %vm6737_vm1, %v6698_v46 }
 0x94d   : > { %v6700_v58 = vpop.permute.xlu1 %6699  ;;  %v6702_v27 = vpop.permute.xlu0 %6701 }
 0x94e   : > { %6767 = vst.msk [vmem:[#allocation2 + $0xe8] sm:$0xff] %vm6737_vm1, %v6700_v58  ;;  %6768 = vst.msk [vmem:[#allocation2 + $0xf0] sm:$0xff] %vm6737_vm1, %v6702_v27  ;;  %v13115_v58 = vrot.slane %v7138_v59, %v9837_v10 }
 0x951   : > { %v6704_v13 = vpop.permute.xlu1 %6703  ;;  %v6798_v42 = vld [vmem:[#allocation2 + $0xe0] sm:$0xff] }
 0x952   : > { %6769 = vst.msk [vmem:[#allocation2 + $0xf8] sm:$0xff] %vm6737_vm1, %v6704_v13 }
 0x955   : > { %v6799_v45 = vld [vmem:[#allocation2 + $0xe8] sm:$0xff]  ;;  %v6800_v48 = vld [vmem:[#allocation2 + $0xf0] sm:$0xff] }
 0x956   : > { %v6816_v30 = vpack.c.bf16 %v6799_v45, %v6798_v42 }
 0x958   : > { %9068 = vmatprep.mubr.msk.bf16.mxu0 %vm862_vm0, %v6816_v30 }
 0x959   : > { %v6801_v36 = vld [vmem:[#allocation2 + $0xf8] sm:$0xff] }
 0x95a   : > { %v6817_v14 = vpack.c.bf16 %v6801_v36, %v6800_v48 }
 0x95c   : > { %9069 = vmatmul.mubr.msk.bf16.gmra.mxu0 %vm862_vm0, %v6817_v14  ;;  %vm8391_vm0 = vcmask 261120  }
 0x97f   : > { %v9042_v53 = vpop.f32.mrf.mxu0 }
 0x980   : > { %v6924_v63 = vadd.f32 %v9042_v53, %v13070_v1 }
 0x981   : > { %v6915_v35 = vpop.f32.mrf.mxu0 }
 0x982   : > { %v7044_v38 = vmax.f32 %v6924_v63, 0.0  ;;  %v6916_v44 = vadd.f32 %v13070_v1, %v6915_v35  ;;  %v13130_v63 = vld [vmem:[%s13970_s20 + $0x8] ss:$0 sm:$0xff] }
 0x983   : > { %v9043_v3 = vpop.f32.mrf.mxu0 }
 0x984   : > { %v7076_v23 = vmin.f32 %v7044_v38, 6.0  ;;  %v7042_v25 = vmax.f32 %v6916_v44, 0.0  ;;  %v6927_v12 = vadd.f32 %v9043_v3, %v13070_v1 }
 0x985   : > { %v6918_v26 = vpop.f32.mrf.mxu0 }
 0x986   : > { %7108 = vst.msk [vmem:[#allocation3 + $0x31] sm:$0xff] %vm784_vm3, %v7076_v23  ;;  %v7074_v39 = vmin.f32 %v7042_v25, 6.0  ;;  %v7045_v41 = vmax.f32 %v6927_v12, 0.0  ;;  %v6919_v49 = vadd.f32 %v13070_v1, %v6918_v26 }
 0x988   : > { %7106 = vst.msk [vmem:[#allocation3 + $0x19] sm:$0xff] %vm784_vm3, %v7074_v39  ;;  %v7077_v20 = vmin.f32 %v7045_v41, 6.0  ;;  %v7043_v47 = vmax.f32 %v6919_v49, 0.0 }
 0x98a   : > { %7109 = vst.msk [vmem:[#allocation3 + $0x39] sm:$0xff] %vm784_vm3, %v7077_v20  ;;  %v7075_v55 = vmin.f32 %v7043_v47, 6.0 }
 0x98c   : > { %7107 = vst.msk [vmem:[#allocation3 + $0x21] sm:$0xff] %vm784_vm3, %v7075_v55 }
 0x98d   : > { %v13112_v60 = vld [vmem:[#allocation3 + $0x30] sm:$0xff] }
 0x98e   : > { %v7808_v42 = vld [vmem:[#allocation3 + $0x31] sm:$0xff]  ;;  %v7744_v30 = vmul.f32 %v13106_v57, %v13112_v60  ;;  %v7446_v41 = vmul.f32 %v13112_v60, %v13099_v37 }
 0x98f   : > { %v7408_v21 = vld [vmem:[#allocation3 + $0x18] sm:$0xff]  ;;  %v7844_v35 = vmul.f32 %v13115_v58, %v7808_v42 }
 0x990   : > { %v7508_v51 = vld [vmem:[#allocation3 + $0x19] sm:$0xff]  ;;  %v7444_v54 = vmul.f32 %v13099_v37, %v7408_v21  ;;  %v7178_v9 = vmul.f32 %v7408_v21, %v13077_v22 }
 0x991   : > { %v7544_v43 = vmul.f32 %v13103_v24, %v7508_v51  ;;  %v7246_v45 = vmul.f32 %v7508_v51, %v13080_v11  ;;  %v7709_v59 = vld [vmem:[#allocation3 + $0x38] sm:$0xff] }
 0x992   : > { %v7476_v18 = vadd.f32 %v7444_v54, %v7376_v4  ;;  %v7908_v38 = vld [vmem:[#allocation3 + $0x32] sm:$0xff]  ;;  %v7745_v15 = vmul.f32 %v13106_v57, %v7709_v59  ;;  %v7909_v17 = vld [vmem:[#allocation3 + $0x3a] sm:$0xff]  ;;  %v7447_v4 = vmul.f32 %v7709_v59, %v13099_v37 }
 0x993   : > { %v7409_v8 = vld [vmem:[#allocation3 + $0x20] sm:$0xff]  ;;  %v7278_v12 = vadd.f32 %v7246_v45, %v7178_v9  ;;  %v7944_v31 = vmul.f32 %v13130_v63, %v7908_v38  ;;  %v7945_v50 = vmul.f32 %v13130_v63, %v7909_v17 }
 0x994   : > { %v7509_v46 = vld [vmem:[#allocation3 + $0x21] sm:$0xff]  ;;  %v7445_v6 = vmul.f32 %v13099_v37, %v7409_v8  ;;  %v7576_v27 = vadd.f32 %v7544_v43, %v7476_v18  ;;  %v7179_v48 = vmul.f32 %v7409_v8, %v13077_v22  ;;  %v7809_v25 = vld [vmem:[#allocation3 + $0x39] sm:$0xff] }
 0x995   : > { %v7608_v40 = vld [vmem:[#allocation3 + $0x1a] sm:$0xff]  ;;  %v7609_v19 = vld [vmem:[#allocation3 + $0x22] sm:$0xff]  ;;  %v7247_v36 = vmul.f32 %v7509_v46, %v13080_v11  ;;  %v7545_v14 = vmul.f32 %v13103_v24, %v7509_v46  ;;  %v7845_v55 = vmul.f32 %v13115_v58, %v7809_v25 }
 0x996   : > { %v7644_v13 = vmul.f32 %v13110_v29, %v7608_v40  ;;  %v7477_v10 = vadd.f32 %v7445_v6, %v7377_v52  ;;  %v7346_v53 = vmul.f32 %v7608_v40, %v13089_v34  ;;  %v7645_v3 = vmul.f32 %v13110_v29, %v7609_v19 }
 0x997   : > { %v7279_v44 = vadd.f32 %v7247_v36, %v7179_v48  ;;  %v9046_v0 = vpop.f32.mrf.mxu0  ;;  %v7347_v39 = vmul.f32 %v7609_v19, %v13089_v34  ;;  %v7181_v52 = vmul.f32 %v7709_v59, %v13077_v22  ;;  %v7249_v40 = vmul.f32 %v7809_v25, %v13080_v11 }
 0x998   : > { %v7676_v32 = vadd.f32 %v7644_v13, %v7576_v27  ;;  %v7577_v33 = vadd.f32 %v7545_v14, %v7477_v10  ;;  %v6940_v26 = vadd.f32 %v9046_v0, %v13070_v1  ;;  %v7378_v20 = vadd.f32 %v7346_v53, %v7278_v12 }
 0x999   : > { %v6931_v49 = vpop.f32.mrf.mxu0  ;;  %v7379_v2 = vadd.f32 %v7347_v39, %v7279_v44  ;;  %v7180_v19 = vmul.f32 %v13112_v60, %v13077_v22  ;;  %v7546_v10 = vmul.f32 %v7808_v42, %v13103_v24  ;;  %v7547_v14 = vmul.f32 %v7809_v25, %v13103_v24 }
 0x99a   : > { %v7776_v23 = vadd.f32 %v7744_v30, %v7676_v32  ;;  %v7677_v62 = vadd.f32 %v7645_v3, %v7577_v33  ;;  %v7048_v47 = vmax.f32 %v6940_v26, 0.0  ;;  %v6932_v56 = vadd.f32 %v13070_v1, %v6931_v49 }
 0x99b   : > { %v9047_v16 = vpop.f32.mrf.mxu0  ;;  %v7478_v46 = vadd.f32 %v7446_v41, %v7378_v20  ;;  %v7479_v13 = vadd.f32 %v7447_v4, %v7379_v2  ;;  %v7248_v30 = vmul.f32 %v7808_v42, %v13080_v11  ;;  %v7348_v53 = vmul.f32 %v7908_v38, %v13089_v34 }
 0x99c   : > { %v7876_v5 = vadd.f32 %v7844_v35, %v7776_v23  ;;  %v7777_v7 = vadd.f32 %v7745_v15, %v7677_v62  ;;  %v7080_v21 = vmin.f32 %v7048_v47, 6.0  ;;  %v7046_v51 = vmax.f32 %v6932_v56, 0.0 }
 0x99d   : > { %v6943_v54 = vadd.f32 %v9047_v16, %v13070_v1  ;;  %v6934_v18 = vpop.f32.mrf.mxu0  ;;  %v7578_v44 = vadd.f32 %v7546_v10, %v7478_v46  ;;  %v7579_v60 = vadd.f32 %v7547_v14, %v7479_v13  ;;  %v7281_v0 = vadd.f32 %v7249_v40, %v7181_v52 }
 0x99e   : > { %v7976_v61 = vadd.f32 %v7944_v31, %v7876_v5  ;;  %v7877_v43 = vadd.f32 %v7845_v55, %v7777_v7  ;;  %7112 = vst.msk [vmem:[#allocation3 + $0x61] sm:$0xff] %vm784_vm3, %v7080_v21  ;;  %v7078_v9 = vmin.f32 %v7046_v51, 6.0  ;;  %v6935_v27 = vadd.f32 %v13070_v1, %v6934_v18 }
 0x99f   : > { %v7049_v6 = vmax.f32 %v6943_v54, 0.0  ;;  %v7280_v3 = vadd.f32 %v7248_v30, %v7180_v19  ;;  %v7646_v23 = vmul.f32 %v7908_v38, %v13110_v29  ;;  %v7647_v42 = vmul.f32 %v7909_v17, %v13110_v29 }
 0x9a0   : > { %v8015_v8 = vadd.f32 %v13145_v28, %v7976_v61  ;;  %v7977_v45 = vadd.f32 %v7945_v50, %v7877_v43  ;;  %7110 = vst.msk [vmem:[#allocation3 + $0x49] sm:$0xff] %vm784_vm3, %v7078_v9  ;;  %v7047_v36 = vmax.f32 %v6935_v27, 0.0  ;;  %v7349_v25 = vmul.f32 %v7909_v17, %v13089_v34 }
 0x9a1   : > { %v7081_v48 = vmin.f32 %v7049_v6, 6.0  ;;  %v7380_v15 = vadd.f32 %v7348_v53, %v7280_v3  ;;  %v7678_v49 = vadd.f32 %v7646_v23, %v7578_v44  ;;  %v7679_v62 = vadd.f32 %v7647_v42, %v7579_v60 }
 0x9a2   : > { %v8016_v32 = vadd.f32 %v13145_v28, %v7977_v45  ;;  %v8047_v59 = vmax.f32 %v8015_v8, 0.0  ;;  %v7079_v35 = vmin.f32 %v7047_v36, 6.0  ;;  %v7381_v5 = vadd.f32 %v7349_v25, %v7281_v0 }
 0x9a3   : > { %7113 = vst.msk [vmem:[#allocation3 + $0x69] sm:$0xff] %vm784_vm3, %v7081_v48 }
 0x9a4   : > { %v8048_v33 = vmax.f32 %v8016_v32, 0.0  ;;  %7111 = vst.msk [vmem:[#allocation3 + $0x51] sm:$0xff] %vm784_vm3, %v7079_v35  ;;  %v8079_v12 = vmin.f32 %v8047_v59, 6.0 }
 0x9a5   : > { %v7712_v39 = vld [vmem:[#allocation3 + $0x60] sm:$0xff] }
 0x9a6   : > { %v8080_v26 = vmin.f32 %v8048_v33, 6.0  ;;  %v7812_v41 = vld [vmem:[#allocation3 + $0x61] sm:$0xff]  ;;  %v7748_v31 = vmul.f32 %v13106_v57, %v7712_v39  ;;  %v13173_v38 = vmul.f32 %v7712_v39, %v13099_v37  ;;  %v13181_v7 = vmul.f32 %v7712_v39, %v13077_v22 }
 0x9a7   : > { %v7710_v47 = vld [vmem:[#allocation3 + $0x48] sm:$0xff]  ;;  %v13170_v55 = vmul.f32 %v13115_v58, %v7812_v41  ;;  %v13176_v17 = vmul.f32 %v7812_v41, %v13103_v24  ;;  %v13184_v50 = vmul.f32 %v7812_v41, %v13080_v11 }
 0x9a8   : > { %v8111_v20 = vpack.c.bf16 %v8080_v26, %v8079_v12  ;;  %v7810_v56 = vld [vmem:[#allocation3 + $0x49] sm:$0xff]  ;;  %v7746_v2 = vmul.f32 %v13106_v57, %v7710_v47  ;;  %v7448_v16 = vmul.f32 %v7710_v47, %v13099_v37  ;;  %v7182_v52 = vmul.f32 %v7710_v47, %v13077_v22 }
 0x9a9   : > { %v7846_v61 = vmul.f32 %v13115_v58, %v7810_v56  ;;  %v7548_v4 = vmul.f32 %v7810_v56, %v13103_v24  ;;  %v7250_v18 = vmul.f32 %v7810_v56, %v13080_v11 }
 0x9aa   : > { %9084 = vmatprep.mubr.msk.bf16.mxu1 %vm784_vm3, %v8111_v20  ;;  %v13189_v21 = vld [vmem:[#allocation3 + $0x68] sm:$0xff]  ;;  %v7778_v43 = vadd.f32 %v7746_v2, %v7678_v49  ;;  %v7480_v8 = vadd.f32 %v7448_v16, %v7380_v15 }
 0x9ab   : > { %v13191_v51 = vld [vmem:[#allocation3 + $0x69] sm:$0xff]  ;;  %v7749_v46 = vmul.f32 %v13106_v57, %v13189_v21  ;;  %v7811_v27 = vld [vmem:[#allocation3 + $0x51] sm:$0xff]  ;;  %v7282_v30 = vadd.f32 %v7250_v18, %v7182_v52  ;;  %v7451_v48 = vmul.f32 %v13189_v21, %v13099_v37 }
 0x9ac   : > { %v13193_v54 = vld [vmem:[#allocation3 + $0x62] sm:$0xff]  ;;  %v7849_v40 = vmul.f32 %v13115_v58, %v13191_v51  ;;  %v13201_v9 = vld [vmem:[#allocation3 + $0x6a] sm:$0xff]  ;;  %v7847_v10 = vmul.f32 %v13115_v58, %v7811_v27  ;;  %v7878_v14 = vadd.f32 %v7846_v61, %v7778_v43  ;;  %v7911_v32 = vld [vmem:[#allocation3 + $0x52] sm:$0xff]  ;;  %v7549_v44 = vmul.f32 %v7811_v27, %v13103_v24 }
 0x9ad   : > { %v7711_v6 = vld [vmem:[#allocation3 + $0x50] sm:$0xff]  ;;  %v7948_v45 = vmul.f32 %v13130_v63, %v13193_v54  ;;  %v13207_v19 = vmul.f32 %v13130_v63, %v13201_v9  ;;  %v7947_v53 = vmul.f32 %v13130_v63, %v7911_v32  ;;  %v7580_v60 = vadd.f32 %v7548_v4, %v7480_v8 }
 0x9ae   : > { %v7910_v13 = vld [vmem:[#allocation3 + $0x4a] sm:$0xff]  ;;  %v7747_v36 = vmul.f32 %v13106_v57, %v7711_v6  ;;  %v7449_v35 = vmul.f32 %v7711_v6, %v13099_v37  ;;  %v7649_v42 = vmul.f32 %v7911_v32, %v13110_v29  ;;  %v7183_v26 = vmul.f32 %v7711_v6, %v13077_v22 }
 0x9af   : > { %v7946_v59 = vmul.f32 %v13130_v63, %v7910_v13  ;;  %v9050_v0 = vpop.f32.mrf.mxu0  ;;  %v7648_v23 = vmul.f32 %v7910_v13, %v13110_v29  ;;  %v7251_v15 = vmul.f32 %v7811_v27, %v13080_v11  ;;  %v7350_v47 = vmul.f32 %v7910_v13, %v13089_v34 }
 0x9b0   : > { %v7779_v33 = vadd.f32 %v7747_v36, %v7679_v62  ;;  %v6956_v25 = vadd.f32 %v9050_v0, %v13070_v1  ;;  %v7481_v12 = vadd.f32 %v7449_v35, %v7381_v5  ;;  %v7351_v18 = vmul.f32 %v7911_v32, %v13089_v34 }
 0x9b1   : > { %v7978_v3 = vadd.f32 %v7946_v59, %v7878_v14  ;;  %v6947_v39 = vpop.f32.mrf.mxu0  ;;  %v7680_v20 = vadd.f32 %v7648_v23, %v7580_v60  ;;  %v7283_v16 = vadd.f32 %v7251_v15, %v7183_v26  ;;  %v7382_v59 = vadd.f32 %v7350_v47, %v7282_v30 }
 0x9b2   : > { %v7879_v41 = vadd.f32 %v7847_v10, %v7779_v33  ;;  %v7052_v62 = vmax.f32 %v6956_v25, 0.0  ;;  %v6948_v56 = vadd.f32 %v13070_v1, %v6947_v39  ;;  %v7581_v2 = vadd.f32 %v7549_v44, %v7481_v12 }
 0x9b3   : > { %v8017_v49 = vadd.f32 %v13145_v28, %v7978_v3  ;;  %v9051_v61 = vpop.f32.mrf.mxu0  ;;  %v7780_v5 = vadd.f32 %v7748_v31, %v7680_v20  ;;  %v7383_v0 = vadd.f32 %v7351_v18, %v7283_v16  ;;  %v7482_v33 = vadd.f32 %v13173_v38, %v7382_v59 }
 0x9b4   : > { %v7979_v4 = vadd.f32 %v7947_v53, %v7879_v41  ;;  %v7084_v43 = vmin.f32 %v7052_v62, 6.0  ;;  %v7050_v8 = vmax.f32 %v6948_v56, 0.0  ;;  %v6959_v6 = vadd.f32 %v9051_v61, %v13070_v1 }
 0x9b5   : > { %v8049_v52 = vmax.f32 %v8017_v49, 0.0  ;;  %v7681_v27 = vadd.f32 %v7649_v42, %v7581_v2  ;;  %v6950_v36 = vpop.f32.mrf.mxu0  ;;  %v7880_v14 = vadd.f32 %v13170_v55, %v7780_v5  ;;  %v7551_v55 = vmul.f32 %v13191_v51, %v13103_v24 }
 0x9b6   : > { %v8018_v10 = vadd.f32 %v13145_v28, %v7979_v4  ;;  %7116 = vst.msk [vmem:[#allocation3 + $0x91] sm:$0xff] %vm784_vm3, %v7084_v43  ;;  %v7082_v35 = vmin.f32 %v7050_v8, 6.0  ;;  %v7053_v53 = vmax.f32 %v6959_v6, 0.0  ;;  %v6951_v31 = vadd.f32 %v13070_v1, %v6950_v36 }
 0x9b7   : > { %v8081_v13 = vmin.f32 %v8049_v52, 6.0  ;;  %v7781_v44 = vadd.f32 %v7749_v46, %v7681_v27  ;;  %v7980_v60 = vadd.f32 %v7948_v45, %v7880_v14  ;;  %v7483_v12 = vadd.f32 %v7451_v48, %v7383_v0 }
 0x9b8   : > { %v8050_v32 = vmax.f32 %v8018_v10, 0.0  ;;  %7114 = vst.msk [vmem:[#allocation3 + $0x79] sm:$0xff] %vm784_vm3, %v7082_v35  ;;  %v7085_v3 = vmin.f32 %v7053_v53, 6.0  ;;  %v7051_v23 = vmax.f32 %v6951_v31, 0.0  ;;  %v7582_v26 = vadd.f32 %v13176_v17, %v7482_v33 }
 0x9b9   : > { %v7881_v42 = vadd.f32 %v7849_v40, %v7781_v44  ;;  %v8019_v25 = vadd.f32 %v13145_v28, %v7980_v60  ;;  %v7650_v38 = vmul.f32 %v13193_v54, %v13110_v29  ;;  %v7651_v40 = vmul.f32 %v13201_v9, %v13110_v29 }
 0x9ba   : > { %v8082_v30 = vmin.f32 %v8050_v32, 6.0  ;;  %7117 = vst.msk [vmem:[#allocation3 + $0x99] sm:$0xff] %vm784_vm3, %v7085_v3  ;;  %v7083_v46 = vmin.f32 %v7051_v23, 6.0  ;;  %v7583_v41 = vadd.f32 %v7551_v55, %v7483_v12  ;;  %v7185_v49 = vmul.f32 %v13189_v21, %v13077_v22 }
 0x9bb   : > { %v7981_v45 = vadd.f32 %v13207_v19, %v7881_v42  ;;  %v8051_v39 = vmax.f32 %v8019_v25, 0.0  ;;  %v7253_v48 = vmul.f32 %v13191_v51, %v13080_v11  ;;  %v7284_v19 = vadd.f32 %v13184_v50, %v13181_v7 }
 0x9bc   : > { %v8112_v15 = vpack.c.bf16 %v8082_v30, %v8081_v13  ;;  %7115 = vst.msk [vmem:[#allocation3 + $0x81] sm:$0xff] %vm784_vm3, %v7083_v46  ;;  %v7352_v20 = vmul.f32 %v13193_v54, %v13089_v34  ;;  %v7682_v62 = vadd.f32 %v7650_v38, %v7582_v26  ;;  %v7683_v56 = vadd.f32 %v7651_v40, %v7583_v41 }
 0x9bd   : > { %v8020_v17 = vadd.f32 %v13145_v28, %v7981_v45  ;;  %v8083_v47 = vmin.f32 %v8051_v39, 6.0  ;;  %v7353_v21 = vmul.f32 %v13201_v9, %v13089_v34  ;;  %v7716_v2 = vld [vmem:[#allocation3 + $0x90] sm:$0xff]  ;;  %v7285_v4 = vadd.f32 %v7253_v48, %v7185_v49 }
 0x9be   : > { %9085 = vmatmul.mubr.msk.bf16.vlgmr.msra.gmra.mxu1 %vm784_vm3, %v8112_v15  ;;  %v13256_v16 = vld [vmem:[#allocation3 + $0x91] sm:$0xff]  ;;  %v7384_v51 = vadd.f32 %v7352_v20, %v7284_v19  ;;  %v7752_v52 = vmul.f32 %v13106_v57, %v7716_v2  ;;  %v13264_v5 = vmul.f32 %v7716_v2, %v13099_v37  ;;  %v13271_v18 = vmul.f32 %v7716_v2, %v13077_v22 }
 0x9bf   : > { %v8052_v61 = vmax.f32 %v8020_v17, 0.0  ;;  %v7714_v7 = vld [vmem:[#allocation3 + $0x78] sm:$0xff]  ;;  %v13261_v54 = vmul.f32 %v13115_v58, %v13256_v16  ;;  %v13268_v9 = vmul.f32 %v13256_v16, %v13103_v24  ;;  %v7385_v27 = vadd.f32 %v7353_v21, %v7285_v4 }
 0x9c0   : > { %v7814_v50 = vld [vmem:[#allocation3 + $0x79] sm:$0xff]  ;;  %v7750_v8 = vmul.f32 %v13106_v57, %v7714_v7  ;;  %v7452_v36 = vmul.f32 %v7714_v7, %v13099_v37  ;;  %v7186_v35 = vmul.f32 %v7714_v7, %v13077_v22 }
 0x9c1   : > { %v8084_v43 = vmin.f32 %v8052_v61, 6.0  ;;  %v7850_v6 = vmul.f32 %v13115_v58, %v7814_v50  ;;  %v7552_v10 = vmul.f32 %v7814_v50, %v13103_v24  ;;  %v13277_v13 = vld [vmem:[#allocation3 + $0x98] sm:$0xff]  ;;  %v7254_v53 = vmul.f32 %v7814_v50, %v13080_v11 }
 0x9c2   : > { %v13279_v14 = vld [vmem:[#allocation3 + $0x99] sm:$0xff]  ;;  %v7782_v44 = vadd.f32 %v7750_v8, %v7682_v62  ;;  %v7753_v32 = vmul.f32 %v13106_v57, %v13277_v13  ;;  %v7484_v42 = vadd.f32 %v7452_v36, %v7384_v51 }
 0x9c3   : > { %v13281_v59 = vld [vmem:[#allocation3 + $0x92] sm:$0xff]  ;;  %v8113_v31 = vpack.c.bf16 %v8084_v43, %v8083_v47  ;;  %v13289_v60 = vmul.f32 %v13115_v58, %v13279_v14  ;;  %v13291_v0 = vld [vmem:[#allocation3 + $0x9a] sm:$0xff]  ;;  %v7286_v25 = vadd.f32 %v7254_v53, %v7186_v35  ;;  %v7915_v45 = vld [vmem:[#allocation3 + $0x82] sm:$0xff] }
 0x9c4   : > { %v7715_v33 = vld [vmem:[#allocation3 + $0x80] sm:$0xff]  ;;  %v7952_v55 = vmul.f32 %v13130_v63, %v13281_v59  ;;  %v13297_v30 = vmul.f32 %v13130_v63, %v13291_v0  ;;  %v7882_v46 = vadd.f32 %v7850_v6, %v7782_v44  ;;  %v7951_v40 = vmul.f32 %v13130_v63, %v7915_v45 }
 0x9c5   : > { %v7815_v3 = vld [vmem:[#allocation3 + $0x81] sm:$0xff]  ;;  %9088 = vmatprep.mubr.msk.bf16.mxu1 %vm784_vm3, %v8113_v31  ;;  %v7751_v12 = vmul.f32 %v13106_v57, %v7715_v33  ;;  %v7453_v15 = vmul.f32 %v7715_v33, %v13099_v37  ;;  %v7584_v41 = vadd.f32 %v7552_v10, %v7484_v42  ;;  %v7653_v20 = vmul.f32 %v7915_v45, %v13110_v29 }
 0x9c6   : > { %v7914_v23 = vld [vmem:[#allocation3 + $0x7a] sm:$0xff]  ;;  %v7851_v26 = vmul.f32 %v13115_v58, %v7815_v3  ;;  %v7553_v39 = vmul.f32 %v7815_v3, %v13103_v24  ;;  %v9054_v49 = vpop.f32.mrf.mxu0  ;;  %v7187_v21 = vmul.f32 %v7715_v33, %v13077_v22  ;;  %v7255_v2 = vmul.f32 %v7815_v3, %v13080_v11 }
 0x9c7   : > { %v7950_v38 = vmul.f32 %v13130_v63, %v7914_v23  ;;  %v7783_v17 = vadd.f32 %v7751_v12, %v7683_v56  ;;  %v7652_v19 = vmul.f32 %v7914_v23, %v13110_v29  ;;  %v6972_v47 = vadd.f32 %v9054_v49, %v13070_v1 }
 0x9c8   : > { %v7485_v62 = vadd.f32 %v7453_v15, %v7385_v27  ;;  %v6963_v61 = vpop.f32.mrf.mxu0  ;;  %v7354_v50 = vmul.f32 %v7914_v23, %v13089_v34  ;;  %v7287_v6 = vadd.f32 %v7255_v2, %v7187_v21  ;;  %v7355_v53 = vmul.f32 %v7915_v45, %v13089_v34 }
 0x9c9   : > { %v7982_v48 = vadd.f32 %v7950_v38, %v7882_v46  ;;  %v7883_v4 = vadd.f32 %v7851_v26, %v7783_v17  ;;  %v7684_v7 = vadd.f32 %v7652_v19, %v7584_v41  ;;  %v7056_v56 = vmax.f32 %v6972_v47, 0.0 }
 0x9ca   : > { %v6964_v43 = vadd.f32 %v13070_v1, %v6963_v61  ;;  %v7585_v8 = vadd.f32 %v7553_v39, %v7485_v62  ;;  %v9055_v36 = vpop.f32.mrf.mxu0  ;;  %v7386_v46 = vadd.f32 %v7354_v50, %v7286_v25  ;;  %v7387_v41 = vadd.f32 %v7355_v53, %v7287_v6 }
 0x9cb   : > { %v8021_v51 = vadd.f32 %v13145_v28, %v7982_v48  ;;  %v7983_v10 = vadd.f32 %v7951_v40, %v7883_v4  ;;  %v7784_v27 = vadd.f32 %v7752_v52, %v7684_v7  ;;  %v7088_v31 = vmin.f32 %v7056_v56, 6.0 }
 0x9cc   : > { %v7054_v44 = vmax.f32 %v6964_v43, 0.0  ;;  %v6975_v33 = vadd.f32 %v9055_v36, %v13070_v1  ;;  %v7685_v3 = vadd.f32 %v7653_v20, %v7585_v8  ;;  %v6966_v42 = vpop.f32.mrf.mxu0  ;;  %v7455_v49 = vmul.f32 %v13277_v13, %v13099_v37 }
 0x9cd   : > { %v8053_v35 = vmax.f32 %v8021_v51, 0.0  ;;  %v8022_v12 = vadd.f32 %v13145_v28, %v7983_v10  ;;  %v7884_v26 = vadd.f32 %v13261_v54, %v7784_v27  ;;  %7120 = vst.msk [vmem:[#allocation3 + $0xc1] sm:$0xff] %vm784_vm3, %v7088_v31  ;;  %v6967_v52 = vadd.f32 %v13070_v1, %v6966_v42 }
 0x9ce   : > { %v7086_v38 = vmin.f32 %v7054_v44, 6.0  ;;  %v7057_v40 = vmax.f32 %v6975_v33, 0.0  ;;  %v7785_v15 = vadd.f32 %v7753_v32, %v7685_v3  ;;  %v7486_v25 = vadd.f32 %v13264_v5, %v7386_v46 }
 0x9cf   : > { %v8085_v23 = vmin.f32 %v8053_v35, 6.0  ;;  %v8054_v45 = vmax.f32 %v8022_v12, 0.0  ;;  %v7984_v39 = vadd.f32 %v7952_v55, %v7884_v26  ;;  %v7055_v48 = vmax.f32 %v6967_v52, 0.0 }
 0x9d0   : > { %7118 = vst.msk [vmem:[#allocation3 + $0xa9] sm:$0xff] %vm784_vm3, %v7086_v38  ;;  %v7089_v17 = vmin.f32 %v7057_v40, 6.0  ;;  %v7885_v54 = vadd.f32 %v13289_v60, %v7785_v15  ;;  %v7487_v47 = vadd.f32 %v7455_v49, %v7387_v41  ;;  %v7555_v32 = vmul.f32 %v13279_v14, %v13103_v24 }
 0x9d1   : > { %v8086_v19 = vmin.f32 %v8054_v45, 6.0  ;;  %v8023_v20 = vadd.f32 %v13145_v28, %v7984_v39  ;;  %v7087_v55 = vmin.f32 %v7055_v48, 6.0  ;;  %v7586_v21 = vadd.f32 %v13268_v9, %v7486_v25 }
 0x9d2   : > { %7121 = vst.msk [vmem:[#allocation3 + $0xc9] sm:$0xff] %vm784_vm3, %v7089_v17  ;;  %v7985_v62 = vadd.f32 %v13297_v30, %v7885_v54  ;;  %v7654_v2 = vmul.f32 %v13281_v59, %v13110_v29  ;;  %v7587_v5 = vadd.f32 %v7555_v32, %v7487_v47  ;;  %v7655_v4 = vmul.f32 %v13291_v0, %v13110_v29 }
 0x9d3   : > { %v8114_v60 = vpack.c.bf16 %v8086_v19, %v8085_v23  ;;  %v8055_v61 = vmax.f32 %v8023_v20, 0.0  ;;  %7119 = vst.msk [vmem:[#allocation3 + $0xb1] sm:$0xff] %vm784_vm3, %v7087_v55  ;;  %v7189_v50 = vmul.f32 %v13277_v13, %v13077_v22  ;;  %v7256_v9 = vmul.f32 %v13256_v16, %v13080_v11 }
 0x9d4   : > { %v8024_v51 = vadd.f32 %v13145_v28, %v7985_v62  ;;  %v7686_v7 = vadd.f32 %v7654_v2, %v7586_v21  ;;  %v7687_v56 = vadd.f32 %v7655_v4, %v7587_v5  ;;  %v7257_v43 = vmul.f32 %v13279_v14, %v13080_v11  ;;  %v13346_v6 = vld [vmem:[#allocation3 + $0xc0] sm:$0xff] }
 0x9d5   : > { %9089 = vmatmul.mubr.msk.bf16.gmra.mxu1 %vm784_vm3, %v8114_v60  ;;  %v8087_v30 = vmin.f32 %v8055_v61, 6.0  ;;  %v7356_v8 = vmul.f32 %v13281_v59, %v13089_v34  ;;  %v13348_v36 = vld [vmem:[#allocation3 + $0xc1] sm:$0xff]  ;;  %v7288_v13 = vadd.f32 %v7256_v9, %v13271_v18  ;;  %v7357_v16 = vmul.f32 %v13291_v0, %v13089_v34 }
 0x9d6   : > { %v8056_v10 = vmax.f32 %v8024_v51, 0.0  ;;  %v13355_v35 = vmul.f32 %v13106_v57, %v13346_v6  ;;  %v7289_v14 = vadd.f32 %v7257_v43, %v7189_v50  ;;  %v13359_v59 = vmul.f32 %v13115_v58, %v13348_v36 }
 0x9d7   : > { %v7718_v27 = vld [vmem:[#allocation3 + $0xa8] sm:$0xff]  ;;  %v13363_v31 = vmul.f32 %v13346_v6, %v13099_v37  ;;  %v13367_v18 = vmul.f32 %v13348_v36, %v13103_v24  ;;  %v7388_v3 = vadd.f32 %v7356_v8, %v7288_v13 }
 0x9d8   : > { %v7818_v53 = vld [vmem:[#allocation3 + $0xa9] sm:$0xff]  ;;  %v8088_v0 = vmin.f32 %v8056_v10, 6.0  ;;  %v7754_v44 = vmul.f32 %v13106_v57, %v7718_v27  ;;  %v7389_v42 = vadd.f32 %v7357_v16, %v7289_v14  ;;  %v7456_v12 = vmul.f32 %v7718_v27, %v13099_v37 }
 0x9d9   : > { %v7854_v33 = vmul.f32 %v13115_v58, %v7818_v53  ;;  %v7556_v23 = vmul.f32 %v7818_v53, %v13103_v24  ;;  %v13373_v26 = vld [vmem:[#allocation3 + $0xc8] sm:$0xff]  ;;  %v7190_v40 = vmul.f32 %v7718_v27, %v13077_v22  ;;  %v7258_v20 = vmul.f32 %v7818_v53, %v13080_v11 }
 0x9da   : > { %v13375_v46 = vld [vmem:[#allocation3 + $0xc9] sm:$0xff]  ;;  %v8115_v52 = vpack.c.bf16 %v8088_v0, %v8087_v30  ;;  %v7786_v15 = vadd.f32 %v7754_v44, %v7686_v7  ;;  %v7757_v45 = vmul.f32 %v13106_v57, %v13373_v26  ;;  %v7819_v17 = vld [vmem:[#allocation3 + $0xb1] sm:$0xff]  ;;  %v7488_v54 = vadd.f32 %v7456_v12, %v7388_v3 }
 0x9db   : > { %v13377_v38 = vld [vmem:[#allocation3 + $0xc2] sm:$0xff]  ;;  %v7857_v39 = vmul.f32 %v13115_v58, %v13375_v46  ;;  %v13384_v41 = vld [vmem:[#allocation3 + $0xca] sm:$0xff]  ;;  %v7855_v32 = vmul.f32 %v13115_v58, %v7819_v17  ;;  %v7919_v62 = vld [vmem:[#allocation3 + $0xb2] sm:$0xff]  ;;  %v7557_v61 = vmul.f32 %v7819_v17, %v13103_v24  ;;  %v7259_v8 = vmul.f32 %v7819_v17, %v13080_v11 }
 0x9dc   : > { %v7719_v49 = vld [vmem:[#allocation3 + $0xb0] sm:$0xff]  ;;  %v7956_v25 = vmul.f32 %v13130_v63, %v13377_v38  ;;  %v7957_v19 = vmul.f32 %v13130_v63, %v13384_v41  ;;  %9092 = vmatprep.mubr.msk.bf16.mxu1 %vm784_vm3, %v8115_v52  ;;  %v7886_v55 = vadd.f32 %v7854_v33, %v7786_v15  ;;  %v7955_v2 = vmul.f32 %v13130_v63, %v7919_v62 }
 0x9dd   : > { %v7918_v48 = vld [vmem:[#allocation3 + $0xaa] sm:$0xff]  ;;  %v7755_v47 = vmul.f32 %v13106_v57, %v7719_v49  ;;  %v7457_v60 = vmul.f32 %v7719_v49, %v13099_v37  ;;  %v7588_v5 = vadd.f32 %v7556_v23, %v7488_v54  ;;  %v7657_v50 = vmul.f32 %v7919_v62, %v13110_v29 }
 0x9de   : > { %v7954_v21 = vmul.f32 %v13130_v63, %v7918_v48  ;;  %v7656_v7 = vmul.f32 %v7918_v48, %v13110_v29  ;;  %v9058_v9 = vpop.f32.mrf.mxu0  ;;  %v7191_v43 = vmul.f32 %v7719_v49, %v13077_v22  ;;  %v7290_v10 = vadd.f32 %v7258_v20, %v7190_v40 }
 0x9df   : > { %v7787_v4 = vadd.f32 %v7755_v47, %v7687_v56  ;;  %v7489_v30 = vadd.f32 %v7457_v60, %v7389_v42  ;;  %v6988_v13 = vadd.f32 %v9058_v9, %v13070_v1  ;;  %v7358_v44 = vmul.f32 %v7918_v48, %v13089_v34 }
 0x9e0   : > { %v7986_v51 = vadd.f32 %v7954_v21, %v7886_v55  ;;  %v7688_v53 = vadd.f32 %v7656_v7, %v7588_v5  ;;  %v6979_v14 = vpop.f32.mrf.mxu0  ;;  %v7291_v0 = vadd.f32 %v7259_v8, %v7191_v43  ;;  %v7359_v33 = vmul.f32 %v7919_v62, %v13089_v34 }
 0x9e1   : > { %v7887_v16 = vadd.f32 %v7855_v32, %v7787_v4  ;;  %v7589_v56 = vadd.f32 %v7557_v61, %v7489_v30  ;;  %v7060_v3 = vmax.f32 %v6988_v13, 0.0  ;;  %v6980_v42 = vadd.f32 %v13070_v1, %v6979_v14 }
 0x9e2   : > { %v8025_v27 = vadd.f32 %v13145_v28, %v7986_v51  ;;  %v9059_v52 = vpop.f32.mrf.mxu0  ;;  %v7788_v15 = vadd.f32 %v13355_v35, %v7688_v53  ;;  %v7390_v49 = vadd.f32 %v7358_v44, %v7290_v10  ;;  %v7391_v17 = vadd.f32 %v7359_v33, %v7291_v0 }
 0x9e3   : > { %v7987_v12 = vadd.f32 %v7955_v2, %v7887_v16  ;;  %v7689_v40 = vadd.f32 %v7657_v50, %v7589_v56  ;;  %v7092_v54 = vmin.f32 %v7060_v3, 6.0  ;;  %v7058_v20 = vmax.f32 %v6980_v42, 0.0 }
 0x9e4   : > { %v8057_v23 = vmax.f32 %v8025_v27, 0.0  ;;  %v6991_v47 = vadd.f32 %v9059_v52, %v13070_v1  ;;  %v6982_v48 = vpop.f32.mrf.mxu0  ;;  %v7888_v21 = vadd.f32 %v13359_v59, %v7788_v15  ;;  %v7459_v2 = vmul.f32 %v13373_v26, %v13099_v37 }
 0x9e5   : > { %v8026_v32 = vadd.f32 %v13145_v28, %v7987_v12  ;;  %v7789_v62 = vadd.f32 %v7757_v45, %v7689_v40  ;;  %7124 = vst.msk [vmem:[#allocation3 + $0xf1] sm:$0xff] %vm784_vm3, %v7092_v54  ;;  %v7090_v60 = vmin.f32 %v7058_v20, 6.0  ;;  %v6983_v61 = vadd.f32 %v13070_v1, %v6982_v48 }
 0x9e6   : > { %v8089_v55 = vmin.f32 %v8057_v23, 6.0  ;;  %v7061_v35 = vmax.f32 %v6991_v47, 0.0  ;;  %v7988_v51 = vadd.f32 %v7956_v25, %v7888_v21  ;;  %v7490_v7 = vadd.f32 %v13363_v31, %v7390_v49 }
 0x9e7   : > { %v8058_v5 = vmax.f32 %v8026_v32, 0.0  ;;  %v7889_v4 = vadd.f32 %v7857_v39, %v7789_v62  ;;  %v7491_v50 = vadd.f32 %v7459_v2, %v7391_v17  ;;  %7122 = vst.msk [vmem:[#allocation3 + $0xd9] sm:$0xff] %vm784_vm3, %v7090_v60  ;;  %v7059_v9 = vmax.f32 %v6983_v61, 0.0 }
 0x9e8   : > { %v7093_v45 = vmin.f32 %v7061_v35, 6.0  ;;  %v7559_v30 = vmul.f32 %v13375_v46, %v13103_v24  ;;  %v8027_v8 = vadd.f32 %v13145_v28, %v7988_v51  ;;  %v7590_v10 = vadd.f32 %v13367_v18, %v7490_v7 }
 0x9e9   : > { %v8090_v59 = vmin.f32 %v8058_v5, 6.0  ;;  %v7989_v43 = vadd.f32 %v7957_v19, %v7889_v4  ;;  %v7658_v1 = vmul.f32 %v13377_v38, %v13110_v29  ;;  %v7091_v31 = vmin.f32 %v7059_v9, 6.0 }
 0x9ea   : > { %7125 = vst.msk [vmem:[#allocation3 + $0xf9] sm:$0xff] %vm784_vm3, %v7093_v45  ;;  %v7591_v25 = vadd.f32 %v7559_v30, %v7491_v50  ;;  %v7659_v13 = vmul.f32 %v13384_v41, %v13110_v29  ;;  %v8059_v27 = vmax.f32 %v8027_v8, 0.0  ;;  %v7192_v19 = vmul.f32 %v13346_v6, %v13077_v22 }
 0x9eb   : > { %v8116_v39 = vpack.c.bf16 %v8090_v59, %v8089_v55  ;;  %v8028_v16 = vadd.f32 %v13145_v28, %v7989_v43  ;;  %v7690_v53 = vadd.f32 %v7658_v1, %v7590_v10  ;;  %7123 = vst.msk [vmem:[#allocation3 + $0xe1] sm:$0xff] %vm784_vm3, %v7091_v31  ;;  %v7193_v14 = vmul.f32 %v13373_v26, %v13077_v22 }
 0x9ec   : > { %v7691_v18 = vadd.f32 %v7659_v13, %v7591_v25  ;;  %v7260_v56 = vmul.f32 %v13348_v36, %v13080_v11  ;;  %v7261_v0 = vmul.f32 %v13375_v46, %v13080_v11  ;;  %v8091_v33 = vmin.f32 %v8059_v27, 6.0  ;;  %v7724_v42 = vld [vmem:[#allocation3 + $0xf0] sm:$0xff] }
 0x9ed   : > { %9093 = vmatmul.mubr.msk.bf16.gmra.mxu1 %vm784_vm3, %v8116_v39  ;;  %v8060_v44 = vmax.f32 %v8028_v16, 0.0  ;;  %v7360_v3 = vmul.f32 %v13377_v38, %v13089_v34  ;;  %v7361_v6 = vmul.f32 %v13384_v41, %v13089_v34  ;;  %v13441_v12 = vld [vmem:[#allocation3 + $0xf1] sm:$0xff]  ;;  %v13444_v26 = vmul.f32 %v13106_v57, %v7724_v42 }
 0x9ee   : > { %v7292_v23 = vadd.f32 %v7260_v56, %v7192_v19  ;;  %v7293_v52 = vadd.f32 %v7261_v0, %v7193_v14  ;;  %v13448_v36 = vmul.f32 %v13115_v58, %v13441_v12  ;;  %v7722_v40 = vld [vmem:[#allocation3 + $0xd8] sm:$0xff]  ;;  %v13451_v38 = vmul.f32 %v7724_v42, %v13099_v37  ;;  %v13500_v19 = vld [vmem:[%s13972_s22] ss:$0 sm:$0xff] }
 0x9ef   : > { %v8092_v46 = vmin.f32 %v8060_v44, 6.0  ;;  %v7822_v15 = vld [vmem:[#allocation3 + $0xd9] sm:$0xff]  ;;  %v13455_v41 = vmul.f32 %v13441_v12, %v13103_v24  ;;  %v13458_v49 = vmul.f32 %v7724_v42, %v13077_v22  ;;  %v7758_v17 = vmul.f32 %v13106_v57, %v7722_v40 }
 0x9f0   : > { %v7858_v54 = vmul.f32 %v13115_v58, %v7822_v15  ;;  %v7392_v20 = vadd.f32 %v7360_v3, %v7292_v23  ;;  %v7393_v47 = vadd.f32 %v7361_v6, %v7293_v52  ;;  %v7460_v48 = vmul.f32 %v7722_v40, %v13099_v37 }
 0x9f1   : > { %v8117_v32 = vpack.c.bf16 %v8092_v46, %v8091_v33  ;;  %v7560_v55 = vmul.f32 %v7822_v15, %v13103_v24  ;;  %v13464_v62 = vld [vmem:[#allocation3 + $0xf8] sm:$0xff]  ;;  %v7194_v60 = vmul.f32 %v7722_v40, %v13077_v22  ;;  %v7790_v35 = vadd.f32 %v7758_v17, %v7690_v53 }
 0x9f2   : > { %v13466_v21 = vld [vmem:[#allocation3 + $0xf9] sm:$0xff]  ;;  %v7761_v61 = vmul.f32 %v13106_v57, %v13464_v62  ;;  %v7823_v50 = vld [vmem:[#allocation3 + $0xe1] sm:$0xff]  ;;  %v7492_v9 = vadd.f32 %v7460_v48, %v7392_v20  ;;  %v7262_v30 = vmul.f32 %v7822_v15, %v13080_v11  ;;  %v13489_v43 = vmul.f32 %v13464_v62, %v13099_v37 }
 0x9f3   : > { %v13468_v2 = vld [vmem:[#allocation3 + $0xf2] sm:$0xff]  ;;  %v13475_v5 = vmul.f32 %v13115_v58, %v13466_v21  ;;  %v13477_v4 = vld [vmem:[#allocation3 + $0xfa] sm:$0xff]  ;;  %9096 = vmatprep.mubr.msk.bf16.mxu1 %vm784_vm3, %v8117_v32  ;;  %v7859_v10 = vmul.f32 %v13115_v58, %v7823_v50  ;;  %v7890_v1 = vadd.f32 %v7858_v54, %v7790_v35  ;;  %v7923_v31 = vld [vmem:[#allocation3 + $0xe2] sm:$0xff]  ;;  %v9062_v25 = vpop.f32.mrf.mxu0  ;;  %v7561_v27 = vmul.f32 %v7823_v50, %v13103_v24 }
 0x9f4   : > { %v7960_v51 = vmul.f32 %v13130_v63, %v13468_v2  ;;  %v7723_v7 = vld [vmem:[#allocation3 + $0xe0] sm:$0xff]  ;;  %v13484_v59 = vmul.f32 %v13130_v63, %v13477_v4  ;;  %v7959_v13 = vmul.f32 %v13130_v63, %v7923_v31  ;;  %v7592_v53 = vadd.f32 %v7560_v55, %v7492_v9 }
 0x9f5   : > { %v7922_v45 = vld [vmem:[#allocation3 + $0xda] sm:$0xff]  ;;  %v7759_v8 = vmul.f32 %v13106_v57, %v7723_v7  ;;  %v7461_v16 = vmul.f32 %v7723_v7, %v13099_v37  ;;  %v7004_v14 = vadd.f32 %v13500_v19, %v9062_v25  ;;  %v6995_v33 = vpop.f32.mrf.mxu0  ;;  %v7195_v6 = vmul.f32 %v7723_v7, %v13077_v22 }
 0x9f6   : > { %v7958_v39 = vmul.f32 %v13130_v63, %v7922_v45  ;;  %v7660_v44 = vmul.f32 %v7922_v45, %v13110_v29  ;;  %v7661_v63 = vmul.f32 %v7923_v31, %v13110_v29  ;;  %v7263_v42 = vmul.f32 %v7823_v50, %v13080_v11 }
 0x9f7   : > { %v7791_v56 = vadd.f32 %v7759_v8, %v7691_v18  ;;  %v7493_v3 = vadd.f32 %v7461_v16, %v7393_v47  ;;  %v7064_v23 = vmax.f32 %v7004_v14, 0.0  ;;  %v6996_v52 = vadd.f32 %v13500_v19, %v6995_v33  ;;  %v9063_v15 = vpop.f32.mrf.mxu0 }
 0x9f8   : > { %v7990_v0 = vadd.f32 %v7958_v39, %v7890_v1  ;;  %v7692_v18 = vadd.f32 %v7660_v44, %v7592_v53  ;;  %v7294_v54 = vadd.f32 %v7262_v30, %v7194_v60  ;;  %v7295_v20 = vadd.f32 %v7263_v42, %v7195_v6 }
 0x9f9   : > { %v7891_v46 = vadd.f32 %v7859_v10, %v7791_v56  ;;  %v7593_v17 = vadd.f32 %v7561_v27, %v7493_v3  ;;  %v7096_v32 = vmin.f32 %v7064_v23, 6.0  ;;  %v7062_v48 = vmax.f32 %v6996_v52, 0.0  ;;  %v6998_v35 = vpop.f32.mrf.mxu0 }
 0x9fa   : > { %v8029_v40 = vadd.f32 %v13145_v28, %v7990_v0  ;;  %v7007_v47 = vadd.f32 %v13500_v19, %v9063_v15  ;;  %v7792_v50 = vadd.f32 %v13444_v26, %v7692_v18  ;;  %v7362_v8 = vmul.f32 %v7922_v45, %v13089_v34 }
 0x9fb   : > { %v7991_v55 = vadd.f32 %v7959_v13, %v7891_v46  ;;  %v7693_v9 = vadd.f32 %v7661_v63, %v7593_v17  ;;  %7128 = vst.msk [vmem:[#allocation3 + $0x121] sm:$0xff] %vm784_vm3, %v7096_v32  ;;  %v7094_v10 = vmin.f32 %v7062_v48, 6.0  ;;  %v6999_v39 = vadd.f32 %v13500_v19, %v6998_v35 }
 0x9fc   : > { %v8061_v7 = vmax.f32 %v8029_v40, 0.0  ;;  %v7065_v1 = vmax.f32 %v7007_v47, 0.0  ;;  %v7892_v16 = vadd.f32 %v13448_v36, %v7792_v50  ;;  %v7363_v13 = vmul.f32 %v7923_v31, %v13089_v34 }
 0x9fd   : > { %v8030_v60 = vadd.f32 %v13145_v28, %v7991_v55  ;;  %v7793_v25 = vadd.f32 %v7761_v61, %v7693_v9  ;;  %7126 = vst.msk [vmem:[#allocation3 + $0x109] sm:$0xff] %vm784_vm3, %v7094_v10  ;;  %v7063_v26 = vmax.f32 %v6999_v39, 0.0  ;;  %v7394_v45 = vadd.f32 %v7362_v8, %v7294_v54 }
 0x9fe   : > { %v8093_v30 = vmin.f32 %v8061_v7, 6.0  ;;  %v7097_v27 = vmin.f32 %v7065_v1, 6.0  ;;  %v7992_v56 = vadd.f32 %v7960_v51, %v7892_v16  ;;  %v7395_v0 = vadd.f32 %v7363_v13, %v7295_v20 }
 0x9ff   : > { %v8062_v53 = vmax.f32 %v8030_v60, 0.0  ;;  %v7893_v14 = vadd.f32 %v13475_v5, %v7793_v25  ;;  %v7563_v44 = vmul.f32 %v13466_v21, %v13103_v24  ;;  %v7095_v61 = vmin.f32 %v7063_v26, 6.0 }
 0xa00   : > { %7129 = vst.msk [vmem:[#allocation3 + $0x129] sm:$0xff] %vm784_vm3, %v7097_v27  ;;  %v7494_v36 = vadd.f32 %v13451_v38, %v7394_v45  ;;  %v7662_v31 = vmul.f32 %v13468_v2, %v13110_v29  ;;  %v8031_v63 = vadd.f32 %v13145_v28, %v7992_v56  ;;  %v7495_v5 = vadd.f32 %v13489_v43, %v7395_v0 }
 0xa01   : > { %v8094_v33 = vmin.f32 %v8062_v53, 6.0  ;;  %v7993_v3 = vadd.f32 %v13484_v59, %v7893_v14  ;;  %v7663_v51 = vmul.f32 %v13477_v4, %v13110_v29  ;;  %7127 = vst.msk [vmem:[#allocation3 + $0x111] sm:$0xff] %vm784_vm3, %v7095_v61  ;;  %v7197_v38 = vmul.f32 %v13464_v62, %v13077_v22  ;;  %v13576_v53 = vld [vmem:[%s13970_s20 + $0x8] ss:$0 sm:$0xff] }
 0xa02   : > { %v7594_v42 = vadd.f32 %v13455_v41, %v7494_v36  ;;  %v7264_v23 = vmul.f32 %v13441_v12, %v13080_v11  ;;  %v8063_v52 = vmax.f32 %v8031_v63, 0.0  ;;  %v7595_v46 = vadd.f32 %v7563_v44, %v7495_v5  ;;  %v13545_v17 = vld [vmem:[#allocation3 + $0x120] sm:$0xff] }
 0xa03   : > { %v8118_v6 = vpack.c.bf16 %v8094_v33, %v8093_v30  ;;  %v8032_v59 = vadd.f32 %v13145_v28, %v7993_v3  ;;  %v7265_v43 = vmul.f32 %v13466_v21, %v13080_v11  ;;  %v7364_v41 = vmul.f32 %v13468_v2, %v13089_v34  ;;  %v13549_v32 = vld [vmem:[#allocation3 + $0x121] sm:$0xff] }
 0xa04   : > { %v7694_v40 = vadd.f32 %v7662_v31, %v7594_v42  ;;  %v7296_v15 = vadd.f32 %v7264_v23, %v13458_v49  ;;  %v7365_v62 = vmul.f32 %v13477_v4, %v13089_v34  ;;  %v8095_v28 = vmin.f32 %v8063_v52, 6.0  ;;  %v7726_v54 = vld [vmem:[#allocation3 + $0x108] sm:$0xff] }
 0xa05   : > { %9097 = vmatmul.mubr.msk.bf16.gmra.mxu1 %vm784_vm3, %v8118_v6  ;;  %v8064_v12 = vmax.f32 %v8032_v59, 0.0  ;;  %v7695_v18 = vadd.f32 %v7663_v51, %v7595_v46  ;;  %v13547_v20 = vld [vmem:[#allocation3 + $0x109] sm:$0xff]  ;;  %v7297_v21 = vadd.f32 %v7265_v43, %v7197_v38  ;;  %v7762_v48 = vmul.f32 %v13106_v57, %v7726_v54 }
 0xa06   : > { %v7862_v49 = vmul.f32 %v13115_v58, %v13547_v20  ;;  %v7396_v2 = vadd.f32 %v7364_v41, %v7296_v15  ;;  %v7464_v47 = vmul.f32 %v7726_v54, %v13099_v37  ;;  %v7564_v35 = vmul.f32 %v13547_v20, %v13103_v24  ;;  %v13598_v41 = vld [vmem:[%s13973_s23] ss:$0 sm:$0xff] }
 0xa07   : > { %v8096_v4 = vmin.f32 %v8064_v12, 6.0  ;;  %v7397_v55 = vadd.f32 %v7365_v62, %v7297_v21  ;;  %v13557_v7 = vld [vmem:[#allocation3 + $0x128] sm:$0xff]  ;;  %v7764_v9 = vmul.f32 %v13106_v57, %v13545_v17  ;;  %v7794_v10 = vadd.f32 %v7762_v48, %v7694_v40 }
 0xa08   : > { %v13561_v50 = vld [vmem:[#allocation3 + $0x129] sm:$0xff]  ;;  %v7496_v1 = vadd.f32 %v7464_v47, %v7396_v2  ;;  %v7765_v39 = vmul.f32 %v13106_v57, %v13557_v7  ;;  %v7864_v60 = vmul.f32 %v13115_v58, %v13549_v32  ;;  %v7827_v13 = vld [vmem:[#allocation3 + $0x111] sm:$0xff]  ;;  %v9066_v56 = vpop.f32.mrf.mxu0 }
 0xa09   : > { %v13563_v8 = vld [vmem:[#allocation3 + $0x122] sm:$0xff]  ;;  %v13569_v30 = vld [vmem:[#allocation3 + $0x12a] sm:$0xff]  ;;  %v8119_v25 = vpack.c.bf16 %v8096_v4, %v8095_v28  ;;  %v7865_v26 = vmul.f32 %v13115_v58, %v13561_v50  ;;  %v7863_v44 = vmul.f32 %v13115_v58, %v7827_v13  ;;  %v7894_v61 = vadd.f32 %v7862_v49, %v7794_v10  ;;  %v7927_v33 = vld [vmem:[#allocation3 + $0x112] sm:$0xff] }
 0xa0a   : > { %v7727_v16 = vld [vmem:[#allocation3 + $0x110] sm:$0xff]  ;;  %v7964_v45 = vmul.f32 %v13576_v53, %v13563_v8  ;;  %v13582_v14 = vmul.f32 %v13576_v53, %v13569_v30  ;;  %v7020_v31 = vadd.f32 %v13500_v19, %v9066_v56  ;;  %v7963_v3 = vmul.f32 %v13576_v53, %v7927_v33  ;;  %v7011_v51 = vpop.f32.mrf.mxu0 }
 0xa0b   : > { %v7926_v27 = vld [vmem:[#allocation3 + $0x10a] sm:$0xff]  ;;  %v7763_v0 = vmul.f32 %v13106_v57, %v7727_v16  ;;  %9100 = vmatprep.mubr.msk.bf16.mxu1 %vm784_vm3, %v8119_v25  ;;  %v7465_v63 = vmul.f32 %v7727_v16, %v13099_v37  ;;  %v7565_v5 = vmul.f32 %v7827_v13, %v13103_v24  ;;  %v7596_v38 = vadd.f32 %v7564_v35, %v7496_v1 }
 0xa0c   : > { %v7962_v36 = vmul.f32 %v13576_v53, %v7926_v27  ;;  %v7664_v23 = vmul.f32 %v7926_v27, %v13110_v29  ;;  %v7068_v59 = vmax.f32 %v7020_v31, 0.0  ;;  %v7012_v52 = vadd.f32 %v13500_v19, %v7011_v51  ;;  %v9067_v40 = vpop.f32.mrf.mxu0 }
 0xa0d   : > { %v7795_v6 = vadd.f32 %v7763_v0, %v7695_v18  ;;  %v7497_v46 = vadd.f32 %v7465_v63, %v7397_v55  ;;  %v7665_v43 = vmul.f32 %v7927_v33, %v13110_v29  ;;  %v7198_v28 = vmul.f32 %v7726_v54, %v13077_v22 }
 0xa0e   : > { %v7994_v42 = vadd.f32 %v7962_v36, %v7894_v61  ;;  %v7696_v12 = vadd.f32 %v7664_v23, %v7596_v38  ;;  %v7100_v18 = vmin.f32 %v7068_v59, 6.0  ;;  %v7066_v21 = vmax.f32 %v7012_v52, 0.0  ;;  %v7014_v2 = vpop.f32.mrf.mxu0 }
 0xa0f   : > { %v7895_v15 = vadd.f32 %v7863_v44, %v7795_v6  ;;  %v7023_v48 = vadd.f32 %v13500_v19, %v9067_v40  ;;  %v7597_v49 = vadd.f32 %v7565_v5, %v7497_v46  ;;  %v7199_v35 = vmul.f32 %v7727_v16, %v13077_v22 }
 0xa10   : > { %v8033_v62 = vadd.f32 %v13598_v41, %v7994_v42  ;;  %v7796_v55 = vadd.f32 %v7764_v9, %v7696_v12  ;;  %7132 = vst.msk [vmem:[#allocation3 + $0x151] sm:$0xff] %vm784_vm3, %v7100_v18  ;;  %v7098_v10 = vmin.f32 %v7066_v21, 6.0  ;;  %v7015_v25 = vadd.f32 %v13500_v19, %v7014_v2 }
 0xa11   : > { %v7995_v47 = vadd.f32 %v7963_v3, %v7895_v15  ;;  %v7069_v1 = vmax.f32 %v7023_v48, 0.0  ;;  %v7697_v56 = vadd.f32 %v7665_v43, %v7597_v49  ;;  %v7266_v61 = vmul.f32 %v13547_v20, %v13080_v11 }
 0xa12   : > { %v8065_v4 = vmax.f32 %v8033_v62, 0.0  ;;  %v7896_v44 = vadd.f32 %v7864_v60, %v7796_v55  ;;  %7130 = vst.msk [vmem:[#allocation3 + $0x139] sm:$0xff] %vm784_vm3, %v7098_v10  ;;  %v7067_v9 = vmax.f32 %v7015_v25, 0.0  ;;  %v7267_v16 = vmul.f32 %v7827_v13, %v13080_v11 }
 0xa13   : > { %v8034_v54 = vadd.f32 %v13598_v41, %v7995_v47  ;;  %v7101_v36 = vmin.f32 %v7069_v1, 6.0  ;;  %v7797_v31 = vadd.f32 %v7765_v39, %v7697_v56  ;;  %v7298_v5 = vadd.f32 %v7266_v61, %v7198_v28 }
 0xa14   : > { %v8097_v0 = vmin.f32 %v8065_v4, 6.0  ;;  %v7996_v63 = vadd.f32 %v7964_v45, %v7896_v44  ;;  %v7366_v51 = vmul.f32 %v7926_v27, %v13089_v34  ;;  %v7099_v6 = vmin.f32 %v7067_v9, 6.0 }
 0xa15   : > { %v8066_v3 = vmax.f32 %v8034_v54, 0.0  ;;  %7133 = vst.msk [vmem:[#allocation3 + $0x159] sm:$0xff] %vm784_vm3, %v7101_v36  ;;  %v7897_v42 = vadd.f32 %v7865_v26, %v7797_v31  ;;  %v7299_v60 = vadd.f32 %v7267_v16, %v7199_v35  ;;  %v7367_v38 = vmul.f32 %v7927_v33, %v13089_v34 }
 0xa16   : > { %v8035_v23 = vadd.f32 %v13598_v41, %v7996_v63  ;;  %v7398_v59 = vadd.f32 %v7366_v51, %v7298_v5  ;;  %v7466_v39 = vmul.f32 %v13545_v17, %v13099_v37  ;;  %7131 = vst.msk [vmem:[#allocation3 + $0x141] sm:$0xff] %vm784_vm3, %v7099_v6  ;;  %v7467_v27 = vmul.f32 %v13557_v7, %v13099_v37 }
 0xa17   : > { %v8098_v20 = vmin.f32 %v8066_v3, 6.0  ;;  %v7997_v13 = vadd.f32 %v13582_v14, %v7897_v42  ;;  %v7399_v45 = vadd.f32 %v7367_v38, %v7299_v60  ;;  %v7566_v26 = vmul.f32 %v13549_v32, %v13103_v24 }
 0xa18   : > { %v8067_v33 = vmax.f32 %v8035_v23, 0.0  ;;  %v7498_v46 = vadd.f32 %v7466_v39, %v7398_v59  ;;  %v7567_v43 = vmul.f32 %v13561_v50, %v13103_v24  ;;  %v7666_v62 = vmul.f32 %v13563_v8, %v13110_v29 }
 0xa19   : > { %v8120_v52 = vpack.c.bf16 %v8098_v20, %v8097_v0  ;;  %v8036_v40 = vadd.f32 %v13598_v41, %v7997_v13  ;;  %v7499_v15 = vadd.f32 %v7467_v27, %v7399_v45  ;;  %v7667_v14 = vmul.f32 %v13569_v30, %v13110_v29  ;;  %v13631_v18 = vld [vmem:[#allocation3 + $0x138] sm:$0xff] }
 0xa1a   : > { %v8099_v12 = vmin.f32 %v8067_v33, 6.0  ;;  %v7598_v28 = vadd.f32 %v7566_v26, %v7498_v46  ;;  %v13633_v21 = vld [vmem:[#allocation3 + $0x139] sm:$0xff]  ;;  %v7200_v48 = vmul.f32 %v13545_v17, %v13077_v22  ;;  %v7201_v49 = vmul.f32 %v13557_v7, %v13077_v22 }
 0xa1b   : > { %9101 = vmatmul.mubr.msk.bf16.gmra.mxu1 %vm784_vm3, %v8120_v52  ;;  %v8068_v2 = vmax.f32 %v8036_v40, 0.0  ;;  %v7599_v47 = vadd.f32 %v7567_v43, %v7499_v15  ;;  %v7766_v4 = vmul.f32 %v13106_v57, %v13631_v18  ;;  %v7866_v55 = vmul.f32 %v13115_v58, %v13633_v21 }
 0xa1c   : > { %v7698_v35 = vadd.f32 %v7666_v62, %v7598_v28  ;;  %v7268_v10 = vmul.f32 %v13549_v32, %v13080_v11  ;;  %v7269_v1 = vmul.f32 %v13561_v50, %v13080_v11  ;;  %v7368_v17 = vmul.f32 %v13563_v8, %v13089_v34  ;;  %v9070_v0 = vpop.f32.mrf.mxu0  ;;  %v7732_v28 = vld [vmem:[#allocation3 + $0x150] sm:$0xff] }
 0xa1d   : > { %v8100_v25 = vmin.f32 %v8068_v2, 6.0  ;;  %v7699_v7 = vadd.f32 %v7667_v14, %v7599_v47  ;;  %v7369_v56 = vmul.f32 %v13569_v30, %v13089_v34  ;;  %v7468_v54 = vmul.f32 %v13631_v18, %v13099_v37  ;;  %v13653_v44 = vld [vmem:[#allocation3 + $0x140] sm:$0xff] }
 0xa1e   : > { %v7798_v61 = vadd.f32 %v7766_v4, %v7698_v35  ;;  %v13655_v36 = vld [vmem:[#allocation3 + $0x141] sm:$0xff]  ;;  %v7300_v50 = vadd.f32 %v7268_v10, %v7200_v48  ;;  %v7301_v9 = vadd.f32 %v7269_v1, %v7201_v49  ;;  %v7568_v8 = vmul.f32 %v13633_v21, %v13103_v24  ;;  %v7027_v5 = vpop.f32.mrf.mxu0  ;;  %v13684_v4 = vld [vmem:[#allocation3 + $0x158] sm:$0xff] }
 0xa1f   : > { %v13657_v32 = vld [vmem:[#allocation3 + $0x13a] sm:$0xff]  ;;  %v7036_v31 = vadd.f32 %v13500_v19, %v9070_v0  ;;  %v8121_v16 = vpack.c.bf16 %v8100_v25, %v8099_v12  ;;  %v7767_v30 = vmul.f32 %v13106_v57, %v13653_v44  ;;  %v7867_v3 = vmul.f32 %v13115_v58, %v13655_v36  ;;  %v13666_v63 = vld [vmem:[#allocation3 + $0x142] sm:$0xff] }
 0xa20   : > { %v7898_v51 = vadd.f32 %v7866_v55, %v7798_v61  ;;  %v7966_v6 = vmul.f32 %v13576_v53, %v13657_v32  ;;  %v7967_v42 = vmul.f32 %v13576_v53, %v13666_v63  ;;  %v7400_v60 = vadd.f32 %v7368_v17, %v7300_v50  ;;  %v9071_v39 = vpop.f32.mrf.mxu0  ;;  %v7832_v17 = vld [vmem:[#allocation3 + $0x151] sm:$0xff]  ;;  %v13691_v0 = vld [vmem:[#allocation3 + $0x159] sm:$0xff] }
 0xa21   : > { %v7072_v38 = vmax.f32 %v7036_v31, 0.0  ;;  %v7028_v20 = vadd.f32 %v13500_v19, %v7027_v5  ;;  %9104 = vmatprep.mubr.msk.bf16.mxu1 %vm784_vm3, %v8121_v16  ;;  %v7799_v23 = vadd.f32 %v7767_v30, %v7699_v7  ;;  %v7401_v59 = vadd.f32 %v7369_v56, %v7301_v9 }
 0xa22   : > { %v7998_v13 = vadd.f32 %v7966_v6, %v7898_v51  ;;  %v7469_v45 = vmul.f32 %v13653_v44, %v13099_v37  ;;  %v7500_v27 = vadd.f32 %v7468_v54, %v7400_v60  ;;  %v7569_v26 = vmul.f32 %v13655_v36, %v13103_v24  ;;  %v7030_v40 = vpop.f32.mrf.mxu0 }
 0xa23   : > { %v7104_v52 = vmin.f32 %v7072_v38, 6.0  ;;  %v7070_v33 = vmax.f32 %v7028_v20, 0.0  ;;  %v7039_v46 = vadd.f32 %v13500_v19, %v9071_v39  ;;  %v7899_v43 = vadd.f32 %v7867_v3, %v7799_v23  ;;  %v7933_v3 = vld [vmem:[#allocation3 + $0x15a] sm:$0xff] }
 0xa24   : > { %v8037_v15 = vadd.f32 %v13598_v41, %v7998_v13  ;;  %v7501_v62 = vadd.f32 %v7469_v45, %v7401_v59  ;;  %v7600_v14 = vadd.f32 %v7568_v8, %v7500_v27  ;;  %v7668_v12 = vmul.f32 %v13657_v32, %v13110_v29 }
 0xa25   : > { %7136 = vst.msk [vmem:[#allocation3 + $0x181] sm:$0xff] %vm784_vm3, %v7104_v52  ;;  %v7102_v48 = vmin.f32 %v7070_v33, 6.0  ;;  %v7073_v49 = vmax.f32 %v7039_v46, 0.0  ;;  %v7031_v2 = vadd.f32 %v13500_v19, %v7030_v40  ;;  %v7999_v47 = vadd.f32 %v7967_v42, %v7899_v43  ;;  %v13693_v19 = vld [vmem:[#allocation3 + $0x152] sm:$0xff] }
 0xa26   : > { %v8069_v55 = vmax.f32 %v8037_v15, 0.0  ;;  %v7601_v35 = vadd.f32 %v7569_v26, %v7501_v62  ;;  %v7669_v10 = vmul.f32 %v13666_v63, %v13110_v29  ;;  %v7700_v1 = vadd.f32 %v7668_v12, %v7600_v14 }
 0xa27   : > { %7134 = vst.msk [vmem:[#allocation3 + $0x169] sm:$0xff] %vm784_vm3, %v7102_v48  ;;  %v7105_v25 = vmin.f32 %v7073_v49, 6.0  ;;  %v7071_v7 = vmax.f32 %v7031_v2, 0.0  ;;  %v8038_v56 = vadd.f32 %v13598_v41, %v7999_v47  ;;  %v7768_v54 = vmul.f32 %v13106_v57, %v7732_v28 }
 0xa28   : > { %v8101_v61 = vmin.f32 %v8069_v55, 6.0  ;;  %v7701_v50 = vadd.f32 %v7669_v10, %v7601_v35  ;;  %v7769_v9 = vmul.f32 %v13106_v57, %v13684_v4  ;;  %v7868_v30 = vmul.f32 %v13115_v58, %v7832_v17 }
 0xa29   : > { %7137 = vst.msk [vmem:[#allocation3 + $0x189] sm:$0xff] %vm784_vm3, %v7105_v25  ;;  %v7103_v8 = vmin.f32 %v7071_v7, 6.0  ;;  %v8070_v31 = vmax.f32 %v8038_v56, 0.0  ;;  %v7800_v16 = vadd.f32 %v7768_v54, %v7700_v1  ;;  %v7869_v51 = vmul.f32 %v13115_v58, %v13691_v0 }
 0xa2a   : > { %v7801_v5 = vadd.f32 %v7769_v9, %v7701_v50  ;;  %v7968_v6 = vmul.f32 %v13576_v53, %v13693_v19  ;;  %v7202_v42 = vmul.f32 %v13631_v18, %v13077_v22  ;;  %v7203_v20 = vmul.f32 %v13653_v44, %v13077_v22 }
 0xa2b   : > { %7135 = vst.msk [vmem:[#allocation3 + $0x171] sm:$0xff] %vm784_vm3, %v7103_v8  ;;  %v8102_v60 = vmin.f32 %v8070_v31, 6.0  ;;  %v7900_v38 = vadd.f32 %v7868_v30, %v7800_v16  ;;  %v7270_v23 = vmul.f32 %v13633_v21, %v13080_v11  ;;  %v7969_v39 = vmul.f32 %v13576_v53, %v7933_v3 }
 0xa2c   : > { %v7901_v59 = vadd.f32 %v7869_v51, %v7801_v5  ;;  %v7271_v13 = vmul.f32 %v13655_v36, %v13080_v11  ;;  %v7370_v45 = vmul.f32 %v13657_v32, %v13089_v34  ;;  %v7371_v44 = vmul.f32 %v13666_v63, %v13089_v34 }
 0xa2d   : > { %v8122_v18 = vpack.c.bf16 %v8102_v60, %v8101_v61  ;;  %v8000_v27 = vadd.f32 %v7968_v6, %v7900_v38  ;;  %v7302_v26 = vadd.f32 %v7270_v23, %v7202_v42  ;;  %v7470_v46 = vmul.f32 %v7732_v28, %v13099_v37 }
 0xa2e   : > { %v8001_v52 = vadd.f32 %v7969_v39, %v7901_v59  ;;  %v7303_v33 = vadd.f32 %v7271_v13, %v7203_v20  ;;  %v7471_v36 = vmul.f32 %v13684_v4, %v13099_v37  ;;  %v7570_v32 = vmul.f32 %v7832_v17, %v13103_v24  ;;  %v13723_v40 = vld [vmem:[#allocation3 + $0x168] sm:$0xff]  ;;  %v7736_v13 = vld [vmem:[#allocation3 + $0x180] sm:$0xff] }
 0xa2f   : > { %9105 = vmatmul.mubr.msk.bf16.gmra.mxu1 %vm784_vm3, %v8122_v18  ;;  %v8039_v21 = vadd.f32 %v13598_v41, %v8000_v27  ;;  %v7402_v43 = vadd.f32 %v7370_v45, %v7302_v26  ;;  %v7571_v63 = vmul.f32 %v13691_v0, %v13103_v24  ;;  %v7670_v14 = vmul.f32 %v13693_v19, %v13110_v29  ;;  %v13730_v12 = vld [vmem:[#allocation3 + $0x169] sm:$0xff] }
 0xa30   : > { %v8040_v15 = vadd.f32 %v13598_v41, %v8001_v52  ;;  %v7403_v62 = vadd.f32 %v7371_v44, %v7303_v33  ;;  %v7671_v2 = vmul.f32 %v7933_v3, %v13110_v29  ;;  %v7204_v47 = vmul.f32 %v7732_v28, %v13077_v22  ;;  %v7836_v44 = vld [vmem:[#allocation3 + $0x181] sm:$0xff] }
 0xa31   : > { %v8071_v48 = vmax.f32 %v8039_v21, 0.0  ;;  %v7502_v49 = vadd.f32 %v7470_v46, %v7402_v43  ;;  %v7770_v1 = vmul.f32 %v13106_v57, %v13723_v40  ;;  %v7272_v7 = vmul.f32 %v7832_v17, %v13080_v11  ;;  %v7837_v46 = vld [vmem:[#allocation3 + $0x189] sm:$0xff] }
 0xa32   : > { %v8072_v55 = vmax.f32 %v8040_v15, 0.0  ;;  %v7503_v35 = vadd.f32 %v7471_v36, %v7403_v62  ;;  %v7735_v10 = vld [vmem:[#allocation3 + $0x170] sm:$0xff]  ;;  %v7870_v61 = vmul.f32 %v13115_v58, %v13730_v12  ;;  %v7205_v50 = vmul.f32 %v13684_v4, %v13077_v22 }
 0xa33   : > { %v7835_v25 = vld [vmem:[#allocation3 + $0x171] sm:$0xff]  ;;  %v8103_v56 = vmin.f32 %v8071_v48, 6.0  ;;  %v7602_v54 = vadd.f32 %v7570_v32, %v7502_v49  ;;  %v7771_v28 = vmul.f32 %v13106_v57, %v7735_v10  ;;  %v7273_v17 = vmul.f32 %v13691_v0, %v13080_v11 }
 0xa34   : > { %v8104_v9 = vmin.f32 %v8072_v55, 6.0  ;;  %v7603_v8 = vadd.f32 %v7571_v63, %v7503_v35  ;;  %v7871_v31 = vmul.f32 %v13115_v58, %v7835_v25  ;;  %v7934_v30 = vld [vmem:[#allocation3 + $0x16a] sm:$0xff]  ;;  %v7935_v5 = vld [vmem:[#allocation3 + $0x172] sm:$0xff]  ;;  %v7304_v51 = vadd.f32 %v7272_v7, %v7204_v47  ;;  %v7936_v47 = vld [vmem:[#allocation3 + $0x182] sm:$0xff] }
 0xa35   : > { %v7702_v16 = vadd.f32 %v7670_v14, %v7602_v54  ;;  %v7372_v6 = vmul.f32 %v13693_v19, %v13089_v34  ;;  %v7373_v4 = vmul.f32 %v7933_v3, %v13089_v34  ;;  %v7472_v38 = vmul.f32 %v13723_v40, %v13099_v37  ;;  %v7737_v3 = vld [vmem:[#allocation3 + $0x188] sm:$0xff] }
 0xa36   : > { %v8123_v42 = vpack.c.bf16 %v8104_v9, %v8103_v56  ;;  %v7703_v60 = vadd.f32 %v7671_v2, %v7603_v8  ;;  %v7305_v23 = vadd.f32 %v7273_v17, %v7205_v50  ;;  %v7473_v39 = vmul.f32 %v7735_v10, %v13099_v37  ;;  %v7937_v17 = vld [vmem:[#allocation3 + $0x18a] sm:$0xff] }
 0xa37   : > { %v7802_v20 = vadd.f32 %v7770_v1, %v7702_v16  ;;  %v7404_v59 = vadd.f32 %v7372_v6, %v7304_v51  ;;  %v7970_v45 = vmul.f32 %v13576_v53, %v7934_v30  ;;  %v7971_v19 = vmul.f32 %v13576_v53, %v7935_v5 }
 0xa38   : > { %9108 = vmatprep.mubr.msk.bf16.mxu1 %vm784_vm3, %v8123_v42  ;;  %v7803_v0 = vadd.f32 %v7771_v28, %v7703_v60  ;;  %v7572_v18 = vmul.f32 %v13730_v12, %v13103_v24  ;;  %v7405_v26 = vadd.f32 %v7373_v4, %v7305_v23  ;;  %v7672_v33 = vmul.f32 %v7934_v30, %v13110_v29 }
 0xa39   : > { %v7902_v27 = vadd.f32 %v7870_v61, %v7802_v20  ;;  %v7504_v52 = vadd.f32 %v7472_v38, %v7404_v59  ;;  %v7573_v43 = vmul.f32 %v7835_v25, %v13103_v24  ;;  %v7673_v36 = vmul.f32 %v7935_v5, %v13110_v29 }
 0xa3a   : > { %v7903_v21 = vadd.f32 %v7871_v31, %v7803_v0  ;;  %v7772_v32 = vmul.f32 %v13106_v57, %v7736_v13  ;;  %v7505_v62 = vadd.f32 %v7473_v39, %v7405_v26  ;;  %v7773_v14 = vmul.f32 %v13106_v57, %v7737_v3  ;;  %v7738_v39 = vld [vmem:[#allocation3 + $0x198] sm:$0xff]  ;;  %v7739_v0 = vld [vmem:[#allocation3 + $0x1a0] sm:$0xff] }
 0xa3b   : > { %v8002_v15 = vadd.f32 %v7970_v45, %v7902_v27  ;;  %v7604_v63 = vadd.f32 %v7572_v18, %v7504_v52  ;;  %v7872_v49 = vmul.f32 %v13115_v58, %v7836_v44  ;;  %v7873_v2 = vmul.f32 %v13115_v58, %v7837_v46  ;;  %v7839_v26 = vld [vmem:[#allocation3 + $0x1a1] sm:$0xff] }
 0xa3c   : > { %v8003_v48 = vadd.f32 %v7971_v19, %v7903_v21  ;;  %v7206_v55 = vmul.f32 %v13723_v40, %v13077_v22  ;;  %v7605_v1 = vadd.f32 %v7573_v43, %v7505_v62  ;;  %v7207_v56 = vmul.f32 %v7735_v10, %v13077_v22 }
 0xa3d   : > { %v8041_v35 = vadd.f32 %v13598_v41, %v8002_v15  ;;  %v7704_v7 = vadd.f32 %v7672_v33, %v7604_v63  ;;  %v7274_v61 = vmul.f32 %v13730_v12, %v13080_v11  ;;  %v7275_v50 = vmul.f32 %v7835_v25, %v13080_v11 }
 0xa3e   : > { %v8042_v54 = vadd.f32 %v13598_v41, %v8003_v48  ;;  %v7374_v9 = vmul.f32 %v7934_v30, %v13089_v34  ;;  %v7705_v28 = vadd.f32 %v7673_v36, %v7605_v1  ;;  %v7972_v40 = vmul.f32 %v13576_v53, %v7936_v47  ;;  %v7939_v36 = vld [vmem:[#allocation3 + $0x1a2] sm:$0xff] }
 0xa3f   : > { %v8073_v8 = vmax.f32 %v8041_v35, 0.0  ;;  %v7804_v31 = vadd.f32 %v7772_v32, %v7704_v7  ;;  %v7306_v51 = vadd.f32 %v7274_v61, %v7206_v55  ;;  %v7307_v6 = vadd.f32 %v7275_v50, %v7207_v56 }
 0xa40   : > { %v8074_v16 = vmax.f32 %v8042_v54, 0.0  ;;  %v7375_v22 = vmul.f32 %v7935_v5, %v13089_v34  ;;  %v7805_v42 = vadd.f32 %v7773_v14, %v7705_v28  ;;  %v7474_v12 = vmul.f32 %v7736_v13, %v13099_v37 }
 0xa41   : > { %v8105_v10 = vmin.f32 %v8073_v8, 6.0  ;;  %v7904_v60 = vadd.f32 %v7872_v49, %v7804_v31  ;;  %v7406_v11 = vadd.f32 %v7374_v9, %v7306_v51  ;;  %v7475_v30 = vmul.f32 %v7737_v3, %v13099_v37  ;;  %v7838_v3 = vld [vmem:[#allocation3 + $0x199] sm:$0xff] }
 0xa42   : > { %v8106_v4 = vmin.f32 %v8074_v16, 6.0  ;;  %v7407_v25 = vadd.f32 %v7375_v22, %v7307_v6  ;;  %v7905_v38 = vadd.f32 %v7873_v2, %v7805_v42  ;;  %v7973_v20 = vmul.f32 %v13576_v53, %v7937_v17 }
 0xa43   : > { %v8004_v23 = vadd.f32 %v7972_v40, %v7904_v60  ;;  %v7574_v59 = vmul.f32 %v7836_v44, %v13103_v24  ;;  %v7506_v34 = vadd.f32 %v7474_v12, %v7406_v11  ;;  %v7575_v19 = vmul.f32 %v7837_v46, %v13103_v24  ;;  %v7938_v46 = vld [vmem:[#allocation3 + $0x19a] sm:$0xff] }
 0xa44   : > { %v8124_v45 = vpack.c.bf16 %v8106_v4, %v8105_v10  ;;  %v7507_v5 = vadd.f32 %v7475_v30, %v7407_v25  ;;  %v8005_v18 = vadd.f32 %v7973_v20, %v7905_v38  ;;  %v7674_v27 = vmul.f32 %v7936_v47, %v13110_v29 }
 0xa45   : > { %v8043_v13 = vadd.f32 %v13598_v41, %v8004_v23  ;;  %v7675_v37 = vmul.f32 %v7937_v17, %v13110_v29  ;;  %v7606_v52 = vadd.f32 %v7574_v59, %v7506_v34  ;;  %v7774_v44 = vmul.f32 %v13106_v57, %v7738_v39 }
 0xa46   : > { %9109 = vmatmul.mubr.msk.bf16.gmra.mxu1 %vm784_vm3, %v8124_v45  ;;  %v7607_v33 = vadd.f32 %v7575_v19, %v7507_v5  ;;  %v7775_v21 = vmul.f32 %v13106_v57, %v7739_v0  ;;  %v8044_v43 = vadd.f32 %v13598_v41, %v8005_v18  ;;  %v7874_v62 = vmul.f32 %v13115_v58, %v7838_v3 }
 0xa47   : > { %v8075_v24 = vmax.f32 %v8043_v13, 0.0  ;;  %v7706_v32 = vadd.f32 %v7674_v27, %v7606_v52  ;;  %v7875_v29 = vmul.f32 %v13115_v58, %v7839_v26  ;;  %v7974_v49 = vmul.f32 %v13576_v53, %v7938_v46 }
 0xa48   : > { %v7707_v15 = vadd.f32 %v7675_v37, %v7607_v33  ;;  %v8076_v63 = vmax.f32 %v8044_v43, 0.0  ;;  %v7975_v2 = vmul.f32 %v13576_v53, %v7939_v36  ;;  %v13797_v53 = vld [vmem:[%s14037_s24] ss:$0 sm:$0xff]  ;;  %s14040_s24 = sld [smem:[#allocation30_spill]] }
 0xa49   : > { %v7806_v14 = vadd.f32 %v7774_v44, %v7706_v32  ;;  %v8107_v47 = vmin.f32 %v8075_v24, 6.0 }
 0xa4a   : > { %v7807_v48 = vadd.f32 %v7775_v21, %v7707_v15  ;;  %v8108_v57 = vmin.f32 %v8076_v63, 6.0 }
 0xa4b   : > { %v7906_v55 = vadd.f32 %v7874_v62, %v7806_v14 }
 0xa4c   : > { %v7907_v35 = vadd.f32 %v7875_v29, %v7807_v48  ;;  %v8125_v1 = vpack.c.bf16 %v8108_v57, %v8107_v47 }
 0xa4d   : > { %v8006_v7 = vadd.f32 %v7974_v49, %v7906_v55 }
 0xa4e   : > { %v8007_v56 = vadd.f32 %v7975_v2, %v7907_v35  ;;  %9112 = vmatprep.mubr.msk.bf16.mxu1 %vm784_vm3, %v8125_v1  ;;  %s13899_s3 = scalar_lea.hbm %s14040_s24, %s8683_s28  ;;  %s9233_s28 = sshll.u32 %s9305_s29, 4  ;;  %s9234_s28 = int_to_ptr.vmem [resolvable:$false] %s9233_s28 }
 0xa4f   : > { %v8045_v54 = vadd.f32 %v13598_v41, %v8006_v7  ;;  %s9235_s1 = scalar_lea.vmem %s9234_s28, 8192  ;;  %p9236_p5 = scmp.lt.s32.totalorder %s13904_s9, %s9234_s28 }
 0xa50   : > { %v8046_v58 = vadd.f32 %v13598_v41, %v8007_v56  ;;  %p9237_p7 = scmp.lt.s32.totalorder %s9235_s1, %s9229_s0 }
 0xa51   : > { %v8077_v61 = vmax.f32 %v8045_v54, 0.0 }
 0xa52   : > { %v8078_v50 = vmax.f32 %v8046_v58, 0.0  ;;  %p9238_p8 = por %p9237_p7, %p9236_p5 }
 0xa53   : > { %v8109_v9 = vmin.f32 %v8077_v61, 6.0 }
 0xa54   : > { %v8110_v8 = vmin.f32 %v8078_v50, 6.0  ;;  %p9239_p10 = pnand %p9238_p8, %p9232_p4 }
 0xa56   : > { %v8126_v28 = vpack.c.bf16 %v8110_v8, %v8109_v9 }
 0xa58   : > { %9113 = vmatmul.mubr.msk.bf16.gmra.mxu1 %vm784_vm3, %v8126_v28 }
 0xa7e   : > { %v9086_v31 = vpop.f32.mrf.mxu1 }
 0xa7f   : > { %v8273_v40 = vadd.f32 %v9086_v31, %v13797_v53 }
 0xa80   : > { %v8264_v16 = vpop.f32.mrf.mxu1 }
 0xa81   : > { %8394 = vst.msk [vmem:[%s13802_s6 + $0x10] sm:$0xff] %vm8391_vm0, %v8273_v40  ;;  %v8265_v41 = vadd.f32 %v13797_v53, %v8264_v16 }
 0xa82   : > { %v9087_v17 = vpop.f32.mrf.mxu1 }
 0xa83   : > { %8392 = vst.msk [vmem:[%s13802_s6] sm:$0xff] %vm8391_vm0, %v8265_v41  ;;  %v8276_v51 = vadd.f32 %v9087_v17, %v13797_v53 }
 0xa84   : > { %v8267_v6 = vpop.f32.mrf.mxu1 }
 0xa85   : > { %8395 = vst.msk [vmem:[%s13802_s6 + $0x18] sm:$0xff] %vm8391_vm0, %v8276_v51  ;;  %v8268_v22 = vadd.f32 %v13797_v53, %v8267_v6 }
 0xa87   : > { %8393 = vst.msk [vmem:[%s13802_s6 + $0x8] sm:$0xff] %vm8391_vm0, %v8268_v22 }
 0xa95   : > { %v9090_v10 = vpop.f32.mrf.mxu1 }
 0xa96   : > { %v8289_v42 = vadd.f32 %v9090_v10, %v13797_v53 }
 0xa97   : > { %v8280_v60 = vpop.f32.mrf.mxu1 }
 0xa98   : > { %8398 = vst.msk [vmem:[%s13802_s6 + $0x30] sm:$0xff] %vm8391_vm0, %v8289_v42  ;;  %v8281_v12 = vadd.f32 %v13797_v53, %v8280_v60 }
 0xa99   : > { %v9091_v4 = vpop.f32.mrf.mxu1 }
 0xa9a   : > { %8396 = vst.msk [vmem:[%s13802_s6 + $0x20] sm:$0xff] %vm8391_vm0, %v8281_v12  ;;  %v8292_v11 = vadd.f32 %v9091_v4, %v13797_v53 }
 0xa9b   : > { %v8283_v25 = vpop.f32.mrf.mxu1 }
 0xa9c   : > { %8399 = vst.msk [vmem:[%s13802_s6 + $0x38] sm:$0xff] %vm8391_vm0, %v8292_v11  ;;  %v8284_v30 = vadd.f32 %v13797_v53, %v8283_v25 }
 0xa9e   : > { %8397 = vst.msk [vmem:[%s13802_s6 + $0x28] sm:$0xff] %vm8391_vm0, %v8284_v30 }
 0xaad   : > { %v9094_v38 = vpop.f32.mrf.mxu1 }
 0xaae   : > { %v8305_v20 = vadd.f32 %v9094_v38, %v13797_v53 }
 0xaaf   : > { %v8296_v23 = vpop.f32.mrf.mxu1 }
 0xab0   : > { %8402 = vst.msk [vmem:[%s13802_s6 + $0x50] sm:$0xff] %vm8391_vm0, %v8305_v20  ;;  %v8297_v59 = vadd.f32 %v13797_v53, %v8296_v23 }
 0xab1   : > { %v9095_v39 = vpop.f32.mrf.mxu1 }
 0xab2   : > { %8400 = vst.msk [vmem:[%s13802_s6 + $0x40] sm:$0xff] %vm8391_vm0, %v8297_v59  ;;  %v8308_v0 = vadd.f32 %v9095_v39, %v13797_v53 }
 0xab3   : > { %v8299_v45 = vpop.f32.mrf.mxu1 }
 0xab4   : > { %8403 = vst.msk [vmem:[%s13802_s6 + $0x58] sm:$0xff] %vm8391_vm0, %v8308_v0  ;;  %v8300_v34 = vadd.f32 %v13797_v53, %v8299_v45 }
 0xab6   : > { %8401 = vst.msk [vmem:[%s13802_s6 + $0x48] sm:$0xff] %vm8391_vm0, %v8300_v34 }
 0xac5   : > { %v9098_v5 = vpop.f32.mrf.mxu1 }
 0xac6   : > { %v8321_v19 = vadd.f32 %v9098_v5, %v13797_v53 }
 0xac7   : > { %v8312_v18 = vpop.f32.mrf.mxu1 }
 0xac8   : > { %8406 = vst.msk [vmem:[%s13802_s6 + $0x70] sm:$0xff] %vm8391_vm0, %v8321_v19  ;;  %v8313_v13 = vadd.f32 %v13797_v53, %v8312_v18 }
 0xac9   : > { %v9099_v27 = vpop.f32.mrf.mxu1 }
 0xaca   : > { %8404 = vst.msk [vmem:[%s13802_s6 + $0x60] sm:$0xff] %vm8391_vm0, %v8313_v13  ;;  %v8324_v37 = vadd.f32 %v9099_v27, %v13797_v53 }
 0xacb   : > { %v8315_v3 = vpop.f32.mrf.mxu1 }
 0xacc   : > { %8407 = vst.msk [vmem:[%s13802_s6 + $0x78] sm:$0xff] %vm8391_vm0, %v8324_v37  ;;  %v8316_v26 = vadd.f32 %v13797_v53, %v8315_v3 }
 0xace   : > { %8405 = vst.msk [vmem:[%s13802_s6 + $0x68] sm:$0xff] %vm8391_vm0, %v8316_v26 }
 0xadb   : > { %v9102_v52 = vpop.f32.mrf.mxu1 }
 0xadc   : > { %v8337_v33 = vadd.f32 %v9102_v52, %v13797_v53 }
 0xadd   : > { %v8328_v44 = vpop.f32.mrf.mxu1 }
 0xade   : > { %8410 = vst.msk [vmem:[%s13802_s6 + $0x90] sm:$0xff] %vm8391_vm0, %v8337_v33  ;;  %v8329_v21 = vadd.f32 %v13797_v53, %v8328_v44 }
 0xadf   : > { %v9103_v43 = vpop.f32.mrf.mxu1 }
 0xae0   : > { %8408 = vst.msk [vmem:[%s13802_s6 + $0x80] sm:$0xff] %vm8391_vm0, %v8329_v21  ;;  %v8340_v24 = vadd.f32 %v9103_v43, %v13797_v53 }
 0xae1   : > { %v8331_v46 = vpop.f32.mrf.mxu1 }
 0xae2   : > { %8411 = vst.msk [vmem:[%s13802_s6 + $0x98] sm:$0xff] %vm8391_vm0, %v8340_v24  ;;  %v8332_v36 = vadd.f32 %v13797_v53, %v8331_v46 }
 0xae4   : > { %8409 = vst.msk [vmem:[%s13802_s6 + $0x88] sm:$0xff] %vm8391_vm0, %v8332_v36 }
 0xaef   : > { %v9106_v32 = vpop.f32.mrf.mxu1 }
 0xaf0   : > { %v8353_v15 = vadd.f32 %v9106_v32, %v13797_v53 }
 0xaf1   : > { %v8344_v62 = vpop.f32.mrf.mxu1 }
 0xaf2   : > { %8414 = vst.msk [vmem:[%s13802_s6 + $0xb0] sm:$0xff] %vm8391_vm0, %v8353_v15  ;;  %v8345_v29 = vadd.f32 %v13797_v53, %v8344_v62 }
 0xaf3   : > { %v9107_v63 = vpop.f32.mrf.mxu1 }
 0xaf4   : > { %8412 = vst.msk [vmem:[%s13802_s6 + $0xa0] sm:$0xff] %vm8391_vm0, %v8345_v29  ;;  %v8356_v14 = vadd.f32 %v9107_v63, %v13797_v53 }
 0xaf5   : > { %v8347_v48 = vpop.f32.mrf.mxu1 }
 0xaf6   : > { %8415 = vst.msk [vmem:[%s13802_s6 + $0xb8] sm:$0xff] %vm8391_vm0, %v8356_v14  ;;  %v8348_v49 = vadd.f32 %v13797_v53, %v8347_v48 }
 0xaf8   : > { %8413 = vst.msk [vmem:[%s13802_s6 + $0xa8] sm:$0xff] %vm8391_vm0, %v8348_v49 }
 0xb06   : > { %v9110_v2 = vpop.f32.mrf.mxu1 }
 0xb07   : > { %v8369_v47 = vadd.f32 %v9110_v2, %v13797_v53 }
 0xb08   : > { %v8360_v57 = vpop.f32.mrf.mxu1 }
 0xb09   : > { %8418 = vst.msk [vmem:[%s13802_s6 + $0xd0] sm:$0xff] %vm8391_vm0, %v8369_v47  ;;  %v8361_v55 = vadd.f32 %v13797_v53, %v8360_v57 }
 0xb0a   : > { %v9111_v35 = vpop.f32.mrf.mxu1 }
 0xb0b   : > { %8416 = vst.msk [vmem:[%s13802_s6 + $0xc0] sm:$0xff] %vm8391_vm0, %v8361_v55  ;;  %v8372_v1 = vadd.f32 %v9111_v35, %v13797_v53 }
 0xb0c   : > { %v8363_v7 = vpop.f32.mrf.mxu1 }
 0xb0d   : > { %8419 = vst.msk [vmem:[%s13802_s6 + $0xd8] sm:$0xff] %vm8391_vm0, %v8372_v1  ;;  %v8364_v56 = vadd.f32 %v13797_v53, %v8363_v7 }
 0xb0f   : > { %8417 = vst.msk [vmem:[%s13802_s6 + $0xc8] sm:$0xff] %vm8391_vm0, %v8364_v56 }
 0xb18   : > { %v9114_v54 = vpop.f32.mrf.mxu1 }
 0xb19   : > { %v8385_v58 = vadd.f32 %v9114_v54, %v13797_v53 }
 0xb1a   : > { %v8376_v61 = vpop.f32.mrf.mxu1 }
 0xb1b   : > { %8422 = vst.msk [vmem:[%s13802_s6 + $0xf0] sm:$0xff] %vm8391_vm0, %v8385_v58  ;;  %v8377_v50 = vadd.f32 %v13797_v53, %v8376_v61 }
 0xb1c   : > { %v9115_v9 = vpop.f32.mrf.mxu1 }
 0xb1d   : > { %8420 = vst.msk [vmem:[%s13802_s6 + $0xe0] sm:$0xff] %vm8391_vm0, %v8377_v50  ;;  %v8388_v8 = vadd.f32 %v9115_v9, %v13797_v53 }
 0xb1e   : > { %v8379_v28 = vpop.f32.mrf.mxu1 }
 0xb1f   : > { %8423 = vst.msk [vmem:[%s13802_s6 + $0xf8] sm:$0xff] %vm8391_vm0, %v8388_v8  ;;  %v8380_v31 = vadd.f32 %v13797_v53, %v8379_v28 }
 0xb21   : > { %8421 = vst.msk [vmem:[%s13802_s6 + $0xe8] sm:$0xff] %vm8391_vm0, %v8380_v31 }
 0xb22   : > { %9242 = shalt.err (!%p9239_p10)
}
 0xb23   : > { %s9243_s6 = scalar_lea.hbm %s13899_s3, 4096  ;;  %s9247_s29 = scalar_lea.hbm %s14040_s24, 8192 }
 0xb24   : > { %p9244_p0 = scmp.ne.s32.totalorder %s13899_s3, %s9243_s6  ;;  %p9248_p1 = scmp.lt.s32.totalorder %s13899_s3, %s14040_s24 }
 0xb25   : > { %p9249_p3 = scmp.lt.s32.totalorder %s9247_s29, %s9243_s6 }
 0xb26   : > { %p9245_p2 = pnand %p9244_p0, %p14041_p12 }
 0xb27   : > { %p9250_p6 = por %p9249_p3, %p9248_p1 }
 0xb28   : > { %p9246_p9 = pneg %p9245_p2 }
 0xb2a   : > { %p9251_p11 = pnand %p9250_p6, %p9246_p9 }
 0xb2c   : > { %9254 = shalt.err (!%p9251_p11)
}
 0xb2d   : > { %s9306_s0 = smov 128   ;;  %s14042_s28 = smov 8  }
 0xb2e   : > { %s14043_s1 = scalar_lea.sflag [#allocation6], %s9534_s27 }
 0xb2f   : > { %9123 = dma.vmem_to_hbm [thread:$0]  (%p14041_p12), %s13904_s9, 4096, %s13899_s3, %s14043_s1, %s9306_s0, %s9306_s0, %s14042_s28  }
 0xb30 PF: > { %s14044_s5 = sld [smem:[#allocation10_spill]]  ;;  %p14047_p4 = scmp.ge.s32.totalorder %s9293_s30, 2 }
 0xb31   : > { %s14045_s4 = sld [smem:[#allocation16_spill]] }
 0xb36   : > { %s8453_s11 = sand.u32 1, %s14044_s5  }
 0xb37   : > { %p14046_p13 = scmp.ne.s32.totalorder %s14045_s4, 0  ;;  %s8454_s10 = scalar_lea.sflag [#allocation6], %s8453_s11 }
 0xb39   : > { %p9130_p5 = pnand %p14047_p4, %p14046_p13 }
 0xb3b   : > { %p9131_p7 = pneg %p9130_p5 }
 0xb3d   : > { %9276 = dma.done.wait (%p9131_p7), %s8454_s10, 4096  }
 0xb3e   : > { %9278 = vsyncadd (%p9131_p7), %s8454_s10, 4294963200  ;;  %s14048_s30 = sld [smem:[#allocation13_spill]]  ;;  %s14051_s29 = smov %s9285_s2 }
 0xb3f   : > { %s14049_s8 = sld [smem:[#allocation11_spill]] }
 0xb40   : > { %s14050_s6 = sld [smem:[#allocation14_spill]] }
 0xb44   : > { %p38_p8 = scmp.ge.s32.totalorder %s14048_s30, 4  }
 0xb45   : > { %s14052_s2 = smov %s14049_s8 }
 0xb46   :  { %40 = sbr.rel (!%p38_p8) target bundleno = 20 (0x14), region = 168 }
 0xb4b   :  { %8459 = vsyncpa [#allocation5], 1 }
 0xb4c   :  { %8461 = vsyncpa [#allocation5 + $0x1], 1 }
 0xb4d   :  { %8462 = vsyncpa [#allocation6], 1 }
 0xb4e   :  { %8464 = vsyncpa [#allocation6 + $0x1], 1 }

</bundles_post_ra>
